<compile_context>
chip_gen: v7x
topology: tpu7x:2x2x1
jax: 0.10.0
libtpu: 0.0.40
codegen_flags: <defaults>
</compile_context>

<pallas_src>
import functools

import jax
import jax.numpy as jnp
from jax import lax
from jax.experimental import pallas as pl
from jax.experimental.pallas import tpu as pltpu

_EPS = 1e-5                      # PyTorch BatchNorm2d default eps
_LANE = 128                      # pad matmul N-dim / output slab to the TPU lane width
# Scoped VMEM budget: per-step usage here is a few MiB; 48 MiB is < physical VMEM on all
# generations (v5e/v6e: 128 MiB, v7x: 64 MiB).
_VMEM_LIMIT = 48 * 1024 * 1024

# NAS_BENCH_201 op order: ['nor_conv_1x1', 'nor_conv_3x3', 'avg_pool_3x3', 'skip', 'none']
_OP_CONV1, _OP_CONV3, _OP_POOL, _OP_SKIP, _OP_NONE = range(5)


def _round_up(v, m):
    return ((v + m - 1) // m) * m


def _edge_keys(max_nodes):
    keys = sorted(f"{i}<-{j}" for i in range(1, max_nodes) for j in range(i))
    return keys, {k: idx for idx, k in enumerate(keys)}


def _pick_nb(N, H, W, C, E):
    """Images per grid step: as large as a ~8 MiB/step VMEM budget allows, dividing N,
    and keeping >=2 grid steps when N>=2 (v7x megacore)."""
    Ep = _round_up(E * C, _LANE)
    per_img = 4 * (H * W * (19 * C + 2 * Ep + 2 * C) + (H + 2) * (W + 2) * C)
    budget = 8 * 1024 * 1024
    cap = max(1, budget // max(per_img, 1))
    if N >= 2:
        cap = min(cap, N // 2)
    nb = 1
    for d in range(1, N + 1):
        if d <= cap and N % d == 0:
            nb = d
    return nb


# ----------------------------- Pallas kernels ------------------------------ #

def _edge_stats_kernel(x_ref, w_ref, stat_ref, pad_ref, slab_ref, *, NB, H, W, C):
    """Pass 1: ReLU -> in-kernel zero-halo pad -> (M, 9C) patch slab in VMEM -> ONE
    K=9C matmul against the stacked {3x3,1x1} weights of all outgoing edges -> per-block
    per-channel sum / sum-of-squares for train-mode BN."""
    M = NB * H * W
    pad_ref[...] = jnp.zeros_like(pad_ref)
    pad_ref[:, 1:H + 1, 1:W + 1, :] = jnp.maximum(x_ref[...], 0.0)     # ReLU once
    for t in range(9):                                                 # static unroll
        dy, dx = t // 3, t % 3
        slab_ref[:, t * C:(t + 1) * C] = (
            pad_ref[:, dy:dy + H, dx:dx + W, :].reshape(M, C))
    y = jnp.dot(slab_ref[...], w_ref[...], preferred_element_type=jnp.float32)
    stat_ref[0:1, :] = jnp.sum(y, axis=0, keepdims=True)
    stat_ref[1:2, :] = jnp.sum(y * y, axis=0, keepdims=True)


def _edge_apply_kernel(x_ref, w_ref, t_ref, invc_ref, o_ref, pad_ref, slab_ref,
                       *, NB, H, W, C):
    """Pass 2: all E mixed edges of one source node in a single K=19C matmul.
    Slab columns: [0,9C) relu taps (convs), [9C,10C) raw center (skip),
    [10C,19C) raw taps * 1/valid-count (avg-pool).  BN scale, BN shift and the
    architecture weights are pre-folded into w_ref / t_ref, so the epilogue is one
    bias add and one lane-dense HBM store."""
    M = NB * H * W
    pad_ref[...] = jnp.zeros_like(pad_ref)
    pad_ref[:, 1:H + 1, 1:W + 1, :] = x_ref[...]                       # raw, zero halo
    invc = invc_ref[...]                                               # (M, 1)
    for t in range(9):                                                 # static unroll
        dy, dx = t // 3, t % 3
        v = pad_ref[:, dy:dy + H, dx:dx + W, :].reshape(M, C)          # raw tap
        slab_ref[:, t * C:(t + 1) * C] = jnp.maximum(v, 0.0)           # conv path (ReLU)
        slab_ref[:, (10 + t) * C:(11 + t) * C] = v * invc              # avg-pool path
        if t == 4:
            slab_ref[:, 9 * C:10 * C] = v                              # skip path
    out = jnp.dot(slab_ref[...], w_ref[...], preferred_element_type=jnp.float32)
    o_ref[...] = out + t_ref[...]                                      # folded BN shift


# ------------------------------ pallas_call glue ---------------------------- #

def _stats_call(xj, wstat, NB, H, W, C):
    N = xj.shape[0]
    nblk = N // NB
    Ns = wstat.shape[-1]
    M = NB * H * W
    kern = functools.partial(_edge_stats_kernel, NB=NB, H=H, W=W, C=C)
    return pl.pallas_call(
        kern,
        grid=(nblk,),
        in_specs=[
            pl.BlockSpec((NB, H, W, C), lambda n: (n, 0, 0, 0)),
            pl.BlockSpec((9 * C, Ns), lambda n: (0, 0)),
        ],
        out_specs=pl.BlockSpec((None, 2, Ns), lambda n: (n, 0, 0)),
        out_shape=jax.ShapeDtypeStruct((nblk, 2, Ns), jnp.float32),
        scratch_shapes=[
            pltpu.VMEM((NB, H + 2, W + 2, C), jnp.float32),
            pltpu.VMEM((M, 9 * C), jnp.float32),
        ],
        compiler_params=pltpu.CompilerParams(
            dimension_semantics=("parallel",),
            vmem_limit_bytes=_VMEM_LIMIT),
        cost_estimate=pl.CostEstimate(
            flops=2 * N * H * W * 9 * C * Ns,
            transcendentals=0,
            bytes_accessed=4 * (xj.size + wstat.size + nblk * 2 * Ns)),
    )(xj, wstat)


def _apply_call(xj, wmix, tmix, invc_nb, NB, H, W, C):
    # TODO(synk): on v6e/v7x, cast xj/wmix to bf16 here (keep f32 accumulate) to halve
    #             DMA bytes; kept f32 for exact parity with the f32 reference.
    N = xj.shape[0]
    nblk = N // NB
    Ep = wmix.shape[-1]
    M = NB * H * W
    kern = functools.partial(_edge_apply_kernel, NB=NB, H=H, W=W, C=C)
    return pl.pallas_call(
        kern,
        grid=(nblk,),
        in_specs=[
            pl.BlockSpec((NB, H, W, C), lambda n: (n, 0, 0, 0)),
            pl.BlockSpec((19 * C, Ep), lambda n: (0, 0)),
            pl.BlockSpec((1, Ep), lambda n: (0, 0)),
            pl.BlockSpec((M, 1), lambda n: (0, 0)),
        ],
        out_specs=pl.BlockSpec((M, Ep), lambda n: (n, 0)),
        out_shape=jax.ShapeDtypeStruct((N * H * W, Ep), jnp.float32),
        scratch_shapes=[
            pltpu.VMEM((NB, H + 2, W + 2, C), jnp.float32),
            pltpu.VMEM((M, 19 * C), jnp.float32),
        ],
        compiler_params=pltpu.CompilerParams(
            dimension_semantics=("parallel",),
            vmem_limit_bytes=_VMEM_LIMIT),
        cost_estimate=pl.CostEstimate(
            flops=2 * N * H * W * 19 * C * Ep,
            transcendentals=0,
            bytes_accessed=4 * (xj.size + wmix.size + invc_nb.size + N * H * W * Ep)),
    )(xj, wmix, tmix, invc_nb)


# ------------------------------- cell forward ------------------------------- #

def nas201_search_cell_forward(x_nchw, params, arch_weights, *, max_nodes=4):
    """NAS201SearchCell.forward ('nas-bench-201' search space, stride=1, C_in==C_out).
    Input/output layout: NCHW.  arch_weights: (num_edges, 5) in NAS_BENCH_201 op order."""
    x = jnp.transpose(x_nchw, (0, 2, 3, 1)).astype(jnp.float32)    # NCHW -> NHWC (once)
    N, H, W, C = x.shape
    HW = H * W
    NB = _pick_nb(N, H, W, C, max_nodes - 1)

    # AvgPool2d(3, stride=1, padding=1, count_include_pad=False) reciprocal valid counts.
    ch = jnp.minimum(jnp.arange(H) + 2, H) - jnp.maximum(jnp.arange(H) - 1, 0)
    cw = jnp.minimum(jnp.arange(W) + 2, W) - jnp.maximum(jnp.arange(W) - 1, 0)
    inv_cnt = (1.0 / (ch[:, None] * cw[None, :]).astype(jnp.float32)).reshape(HW, 1)
    inv_cnt_nb = jnp.tile(inv_cnt, (NB, 1))                        # (NB*HW, 1)

    _, edge2index = _edge_keys(max_nodes)
    eye = jnp.eye(C, dtype=jnp.float32)

    nodes = [None] * max_nodes
    nodes[0] = x
    for j in range(max_nodes - 1):          # source node j is complete at this point
        xj = nodes[j]
        targets = list(range(j + 1, max_nodes))
        E = len(targets)

        # ---- pass 1: one stats kernel for ALL outgoing edges of node j --------------
        # stacked columns: edge k -> [2kC, 2kC+C) its 3x3 conv, [2kC+C, 2kC+2C) its 1x1.
        Ns = _round_up(2 * C * E, _LANE)
        w3f, w1f = [], []
        wstat = jnp.zeros((9 * C, Ns), jnp.float32)
        for k, i in enumerate(targets):
            p = params[f"{i}<-{j}"]
            w3 = jnp.transpose(p["w3"], (2, 3, 1, 0)).reshape(9 * C, C)   # OIHW->(9C,Cout)
            w1 = jnp.transpose(p["w1"], (2, 3, 1, 0)).reshape(C, C)
            w3f.append(w3)
            w1f.append(w1)
            wstat = wstat.at[:, 2 * k * C:2 * k * C + C].set(w3)
            wstat = wstat.at[4 * C:5 * C, 2 * k * C + C:2 * k * C + 2 * C].set(w1)
        stats = _stats_call(xj, wstat, NB, H, W, C)              # (nblk, 2, Ns) partials
        tot = jnp.sum(stats, axis=0)
        cnt = float(N * HW)
        m = tot[0] / cnt
        # NOTE: E[y^2]-E[y]^2 in f32 is cancellation-prone for |mean| >> std; fine here.
        v = jnp.maximum(tot[1] / cnt - m * m, 0.0)               # biased var (train BN)
        r = lax.rsqrt(v + _EPS)
        sc, sh = r, -m * r                                       # BN(y)=y*sc+sh (no affine)

        # ---- pass 2: ONE fused kernel for all E mixed edges out of node j ------------
        Ep = _round_up(E * C, _LANE)
        wmix = jnp.zeros((19 * C, Ep), jnp.float32)
        tmix = jnp.zeros((1, Ep), jnp.float32)
        for k, i in enumerate(targets):
            key = f"{i}<-{j}"
            p = params[key]
            a = arch_weights[edge2index[key]]
            c0 = 2 * k * C
            s3, t3 = sc[c0:c0 + C], sh[c0:c0 + C]
            s1, t1 = sc[c0 + C:c0 + 2 * C], sh[c0 + C:c0 + 2 * C]
            if "g3" in p:                                        # affine=True folding
                s3, t3 = s3 * p["g3"], t3 * p["g3"] + p["b3"]
                s1, t1 = s1 * p["g1"], t1 * p["g1"] + p["b1"]
            col = k * C
            wmix = wmix.at[0:9 * C, col:col + C].set(
                (a[_OP_CONV3] * s3)[None, :] * w3f[k])
            wmix = wmix.at[4 * C:5 * C, col:col + C].add(
                (a[_OP_CONV1] * s1)[None, :] * w1f[k])
            wmix = wmix.at[9 * C:10 * C, col:col + C].set(a[_OP_SKIP] * eye)
            wmix = wmix.at[10 * C:19 * C, col:col + C].set(
                jnp.tile(a[_OP_POOL] * eye, (9, 1)))
            tmix = tmix.at[0, col:col + C].set(
                a[_OP_CONV3] * t3 + a[_OP_CONV1] * t1)
            # ('none' op contributes a[4]*0 and is dropped.)

        slab = _apply_call(xj, wmix, tmix, inv_cnt_nb, NB, H, W, C)   # (N*HW, Ep)
        slab = slab.reshape(N, H, W, Ep)
        for k, i in enumerate(targets):
            contrib = slab[:, :, :, k * C:(k + 1) * C]
            nodes[i] = contrib if nodes[i] is None else nodes[i] + contrib

    return jnp.transpose(nodes[max_nodes - 1], (0, 3, 1, 2))     # NHWC -> NCHW


# ---------------------------- params / pure-JAX ref -------------------------- #

def init_params(key, C, max_nodes=4, affine=False):
    params = {}
    keys, _ = _edge_keys(max_nodes)
    for idx, k in enumerate(keys):
        k1, k3 = jax.random.split(jax.random.fold_in(key, idx))
        p = {
            "w1": 0.3 * jax.random.normal(k1, (C, C, 1, 1), jnp.float32),
            "w3": 0.1 * jax.random.normal(k3, (C, C, 3, 3), jnp.float32),
        }
        if affine:
            g = jax.random.split(jax.random.fold_in(key, 1000 + idx), 4)
            p.update({
                "g1": 1.0 + 0.1 * jax.random.normal(g[0], (C,), jnp.float32),
                "b1": 0.1 * jax.random.normal(g[1], (C,), jnp.float32),
                "g3": 1.0 + 0.1 * jax.random.normal(g[2], (C,), jnp.float32),
                "b3": 0.1 * jax.random.normal(g[3], (C,), jnp.float32),
            })
        params[k] = p
    return params


def _ref_bn_train(y, gamma=None, beta=None, eps=_EPS):
    mean = jnp.mean(y, axis=(0, 2, 3), keepdims=True)
    var = jnp.mean(jnp.square(y - mean), axis=(0, 2, 3), keepdims=True)
    out = (y - mean) * lax.rsqrt(var + eps)
    if gamma is not None:
        out = out * gamma.reshape(1, -1, 1, 1) + beta.reshape(1, -1, 1, 1)
    return out


def _ref_relu_conv_bn(x, w, padding, gamma=None, beta=None):
    y = jnp.maximum(x, 0.0)
    y = lax.conv_general_dilated(y, w, (1, 1), [(padding, padding)] * 2,
                                 dimension_numbers=("NCHW", "OIHW", "NCHW"))
    return _ref_bn_train(y, gamma, beta)


def _ref_avgpool3x3(x):
    pads = [(0, 0), (0, 0), (1, 1), (1, 1)]
    s = lax.reduce_window(x, 0.0, lax.add, (1, 1, 3, 3), (1, 1, 1, 1), pads)
    c = lax.reduce_window(jnp.ones_like(x), 0.0, lax.add, (1, 1, 3, 3), (1, 1, 1, 1), pads)
    return s / c


def ref_cell_forward(x, params, arch_weights, max_nodes=4):
    _, edge2index = _edge_keys(max_nodes)
    nodes = [x]
    for i in range(1, max_nodes):
        inter = []
        for j in range(i):
            key = f"{i}<-{j}"
            p = params[key]
            a = arch_weights[edge2index[key]]
            out = (a[_OP_CONV1] * _ref_relu_conv_bn(nodes[j], p["w1"], 0,
                                                    p.get("g1"), p.get("b1"))
                   + a[_OP_CONV3] * _ref_relu_conv_bn(nodes[j], p["w3"], 1,
                                                      p.get("g3"), p.get("b3"))
                   + a[_OP_POOL] * _ref_avgpool3x3(nodes[j])
                   + a[_OP_SKIP] * nodes[j])                 # 'none' contributes 0
            inter.append(out)
        nodes.append(sum(inter))
    return nodes[-1]


# ------------------------------------ main ----------------------------------- #

if __name__ == "__main__":
    key = jax.random.PRNGKey(0)
    max_nodes = 4
    num_edges = max_nodes * (max_nodes - 1) // 2            # 6

    fwd = jax.jit(nas201_search_cell_forward, static_argnames=("max_nodes",))

    for cfg_i, (N, C, H, W) in enumerate([(2, 16, 16, 16), (1, 8, 8, 8)]):
        kx, kp, kw = jax.random.split(jax.random.fold_in(key, cfg_i), 3)
        x = jax.random.normal(kx, (N, C, H, W), jnp.float32)
        params = init_params(kp, C, max_nodes)
        arch_w = jax.nn.softmax(0.5 * jax.random.normal(kw, (num_edges, 5)), axis=-1)

        out = fwd(x, params, arch_w, max_nodes=max_nodes)
        out = jax.block_until_ready(out)

        ref = ref_cell_forward(x, params, arch_w, max_nodes)
        assert out.shape == ref.shape, (out.shape, ref.shape)
        err = float(jnp.max(jnp.abs(out - ref)))
        assert jnp.allclose(out, ref, atol=1e-2, rtol=1e-2), (
            f"mismatch for cfg={(N, C, H, W)}: max abs err {err}")

    print("KERNEL_OK")
</pallas_src>

<mosaic_0001>
module attributes {stable_mosaic.version = 11 : i64} {
  func.func @_edge_stats_kernel(%arg0: i32, %arg1: memref<1x16x16x16xf32, #tpu.memory_space<vmem>>, %arg2: memref<144x128xf32, #tpu.memory_space<vmem>>, %arg3: memref<1x2x128xf32, #tpu.memory_space<vmem>>, %arg4: memref<1x18x18x16xf32, #tpu.memory_space<vmem>>, %arg5: memref<256x144xf32, #tpu.memory_space<vmem>>) attributes {dimension_semantics = [#tpu.dimension_semantics<parallel>], iteration_bounds = array<i64: 2>, scalar_prefetch = 0 : i64, scratch_operands = 2 : i64, tpu.core_type = #tpu.core_type<tc>, window_params = [{transform_indices = @transform_0, window_bounds = array<i64: 1, 16, 16, 16>}, {pipeline_mode = #tpu.pipeline_mode<synchronous>, transform_indices = @transform_1, window_bounds = array<i64: 144, 128>}, {transform_indices = @transform_2, window_bounds = array<i64: 1, 2, 128>}]} {
    %cst = arith.constant 0.000000e+00 : f32
    %0 = vector.broadcast %cst : f32 to vector<1x18x18x16xf32>
    %c0 = arith.constant 0 : index
    %c0_0 = arith.constant 0 : index
    %c0_1 = arith.constant 0 : index
    %c0_2 = arith.constant 0 : index
    %1 = vector.load %arg4[%c0, %c0_0, %c0_1, %c0_2] : memref<1x18x18x16xf32, #tpu.memory_space<vmem>>, vector<1x18x18x16xf32>
    tpu.vector_store %arg4[%c0, %c0_0, %c0_1, %c0_2], %0 {strides = array<i32>} : memref<1x18x18x16xf32, #tpu.memory_space<vmem>>, vector<1x18x18x16xf32>,
    %c0_3 = arith.constant 0 : index
    %c0_4 = arith.constant 0 : index
    %c0_5 = arith.constant 0 : index
    %c0_6 = arith.constant 0 : index
    %2 = vector.load %arg1[%c0_3, %c0_4, %c0_5, %c0_6] : memref<1x16x16x16xf32, #tpu.memory_space<vmem>>, vector<1x16x16x16xf32>
    %cst_7 = arith.constant 0.000000e+00 : f32
    %3 = vector.broadcast %cst_7 : f32 to vector<1x16x16x16xf32>
    %4 = arith.maximumf %2, %3 : vector<1x16x16x16xf32>
    %c0_8 = arith.constant 0 : index
    %c1 = arith.constant 1 : index
    %c1_9 = arith.constant 1 : index
    %c0_10 = arith.constant 0 : index
    %5 = vector.load %arg4[%c0_8, %c1, %c1_9, %c0_10] : memref<1x18x18x16xf32, #tpu.memory_space<vmem>>, vector<1x16x16x16xf32>
    tpu.vector_store %arg4[%c0_8, %c1, %c1_9, %c0_10], %4 {strides = array<i32>} : memref<1x18x18x16xf32, #tpu.memory_space<vmem>>, vector<1x16x16x16xf32>,
    %c0_11 = arith.constant 0 : index
    %c0_12 = arith.constant 0 : index
    %c0_13 = arith.constant 0 : index
    %c0_14 = arith.constant 0 : index
    %6 = vector.load %arg4[%c0_11, %c0_12, %c0_13, %c0_14] : memref<1x18x18x16xf32, #tpu.memory_space<vmem>>, vector<1x16x16x16xf32>
    %7 = vector.shape_cast %6 : vector<1x16x16x16xf32> to vector<256x16xf32>
    %c0_15 = arith.constant 0 : index
    %c0_16 = arith.constant 0 : index
    %8 = vector.load %arg5[%c0_15, %c0_16] : memref<256x144xf32, #tpu.memory_space<vmem>>, vector<256x16xf32>
    tpu.vector_store %arg5[%c0_15, %c0_16], %7 {strides = array<i32>} : memref<256x144xf32, #tpu.memory_space<vmem>>, vector<256x16xf32>,
    %c0_17 = arith.constant 0 : index
    %c0_18 = arith.constant 0 : index
    %c1_19 = arith.constant 1 : index
    %c0_20 = arith.constant 0 : index
    %9 = vector.load %arg4[%c0_17, %c0_18, %c1_19, %c0_20] : memref<1x18x18x16xf32, #tpu.memory_space<vmem>>, vector<1x16x16x16xf32>
    %10 = vector.shape_cast %9 : vector<1x16x16x16xf32> to vector<256x16xf32>
    %c0_21 = arith.constant 0 : index
    %c16 = arith.constant 16 : index
    %11 = vector.load %arg5[%c0_21, %c16] : memref<256x144xf32, #tpu.memory_space<vmem>>, vector<256x16xf32>
    tpu.vector_store %arg5[%c0_21, %c16], %10 {strides = array<i32>} : memref<256x144xf32, #tpu.memory_space<vmem>>, vector<256x16xf32>,
    %c0_22 = arith.constant 0 : index
    %c0_23 = arith.constant 0 : index
    %c2 = arith.constant 2 : index
    %c0_24 = arith.constant 0 : index
    %12 = vector.load %arg4[%c0_22, %c0_23, %c2, %c0_24] : memref<1x18x18x16xf32, #tpu.memory_space<vmem>>, vector<1x16x16x16xf32>
    %13 = vector.shape_cast %12 : vector<1x16x16x16xf32> to vector<256x16xf32>
    %c0_25 = arith.constant 0 : index
    %c32 = arith.constant 32 : index
    %14 = vector.load %arg5[%c0_25, %c32] : memref<256x144xf32, #tpu.memory_space<vmem>>, vector<256x16xf32>
    tpu.vector_store %arg5[%c0_25, %c32], %13 {strides = array<i32>} : memref<256x144xf32, #tpu.memory_space<vmem>>, vector<256x16xf32>,
    %c0_26 = arith.constant 0 : index
    %c1_27 = arith.constant 1 : index
    %c0_28 = arith.constant 0 : index
    %c0_29 = arith.constant 0 : index
    %15 = vector.load %arg4[%c0_26, %c1_27, %c0_28, %c0_29] : memref<1x18x18x16xf32, #tpu.memory_space<vmem>>, vector<1x16x16x16xf32>
    %16 = vector.shape_cast %15 : vector<1x16x16x16xf32> to vector<256x16xf32>
    %c0_30 = arith.constant 0 : index
    %c48 = arith.constant 48 : index
    %17 = vector.load %arg5[%c0_30, %c48] : memref<256x144xf32, #tpu.memory_space<vmem>>, vector<256x16xf32>
    tpu.vector_store %arg5[%c0_30, %c48], %16 {strides = array<i32>} : memref<256x144xf32, #tpu.memory_space<vmem>>, vector<256x16xf32>,
    %c0_31 = arith.constant 0 : index
    %c1_32 = arith.constant 1 : index
    %c1_33 = arith.constant 1 : index
    %c0_34 = arith.constant 0 : index
    %18 = vector.load %arg4[%c0_31, %c1_32, %c1_33, %c0_34] : memref<1x18x18x16xf32, #tpu.memory_space<vmem>>, vector<1x16x16x16xf32>
    %19 = vector.shape_cast %18 : vector<1x16x16x16xf32> to vector<256x16xf32>
    %c0_35 = arith.constant 0 : index
    %c64 = arith.constant 64 : index
    %20 = vector.load %arg5[%c0_35, %c64] : memref<256x144xf32, #tpu.memory_space<vmem>>, vector<256x16xf32>
    tpu.vector_store %arg5[%c0_35, %c64], %19 {strides = array<i32>} : memref<256x144xf32, #tpu.memory_space<vmem>>, vector<256x16xf32>,
    %c0_36 = arith.constant 0 : index
    %c1_37 = arith.constant 1 : index
    %c2_38 = arith.constant 2 : index
    %c0_39 = arith.constant 0 : index
    %21 = vector.load %arg4[%c0_36, %c1_37, %c2_38, %c0_39] : memref<1x18x18x16xf32, #tpu.memory_space<vmem>>, vector<1x16x16x16xf32>
    %22 = vector.shape_cast %21 : vector<1x16x16x16xf32> to vector<256x16xf32>
    %c0_40 = arith.constant 0 : index
    %c80 = arith.constant 80 : index
    %23 = vector.load %arg5[%c0_40, %c80] : memref<256x144xf32, #tpu.memory_space<vmem>>, vector<256x16xf32>
    tpu.vector_store %arg5[%c0_40, %c80], %22 {strides = array<i32>} : memref<256x144xf32, #tpu.memory_space<vmem>>, vector<256x16xf32>,
    %c0_41 = arith.constant 0 : index
    %c2_42 = arith.constant 2 : index
    %c0_43 = arith.constant 0 : index
    %c0_44 = arith.constant 0 : index
    %24 = vector.load %arg4[%c0_41, %c2_42, %c0_43, %c0_44] : memref<1x18x18x16xf32, #tpu.memory_space<vmem>>, vector<1x16x16x16xf32>
    %25 = vector.shape_cast %24 : vector<1x16x16x16xf32> to vector<256x16xf32>
    %c0_45 = arith.constant 0 : index
    %c96 = arith.constant 96 : index
    %26 = vector.load %arg5[%c0_45, %c96] : memref<256x144xf32, #tpu.memory_space<vmem>>, vector<256x16xf32>
    tpu.vector_store %arg5[%c0_45, %c96], %25 {strides = array<i32>} : memref<256x144xf32, #tpu.memory_space<vmem>>, vector<256x16xf32>,
    %c0_46 = arith.constant 0 : index
    %c2_47 = arith.constant 2 : index
    %c1_48 = arith.constant 1 : index
    %c0_49 = arith.constant 0 : index
    %27 = vector.load %arg4[%c0_46, %c2_47, %c1_48, %c0_49] : memref<1x18x18x16xf32, #tpu.memory_space<vmem>>, vector<1x16x16x16xf32>
    %28 = vector.shape_cast %27 : vector<1x16x16x16xf32> to vector<256x16xf32>
    %c0_50 = arith.constant 0 : index
    %c112 = arith.constant 112 : index
    %29 = vector.load %arg5[%c0_50, %c112] : memref<256x144xf32, #tpu.memory_space<vmem>>, vector<256x16xf32>
    tpu.vector_store %arg5[%c0_50, %c112], %28 {strides = array<i32>} : memref<256x144xf32, #tpu.memory_space<vmem>>, vector<256x16xf32>,
    %c0_51 = arith.constant 0 : index
    %c2_52 = arith.constant 2 : index
    %c2_53 = arith.constant 2 : index
    %c0_54 = arith.constant 0 : index
    %30 = vector.load %arg4[%c0_51, %c2_52, %c2_53, %c0_54] : memref<1x18x18x16xf32, #tpu.memory_space<vmem>>, vector<1x16x16x16xf32>
    %31 = vector.shape_cast %30 : vector<1x16x16x16xf32> to vector<256x16xf32>
    %c0_55 = arith.constant 0 : index
    %c128 = arith.constant 128 : index
    %32 = vector.load %arg5[%c0_55, %c128] : memref<256x144xf32, #tpu.memory_space<vmem>>, vector<256x16xf32>
    tpu.vector_store %arg5[%c0_55, %c128], %31 {strides = array<i32>} : memref<256x144xf32, #tpu.memory_space<vmem>>, vector<256x16xf32>,
    %c0_56 = arith.constant 0 : index
    %c0_57 = arith.constant 0 : index
    %33 = vector.load %arg5[%c0_56, %c0_57] : memref<256x144xf32, #tpu.memory_space<vmem>>, vector<256x144xf32>
    %c0_58 = arith.constant 0 : index
    %c0_59 = arith.constant 0 : index
    %34 = vector.load %arg2[%c0_58, %c0_59] : memref<144x128xf32, #tpu.memory_space<vmem>>, vector<144x128xf32>
    %cst_60 = arith.constant dense<0.000000e+00> : vector<256x128xf32>
    %35 = tpu.matmul %33, %34, %cst_60 {dimension_numbers = #tpu.dot_dimension_numbers<[1], [0], [0], [1], [0, 0, 1, 1], [], []>} : vector<256x144xf32>, vector<144x128xf32>, vector<256x128xf32> -> vector<256x128xf32>
    %cst_61 = arith.constant dense<0.000000e+00> : vector<128xf32>
    %36 = vector.multi_reduction <add>, %35, %cst_61 [0] : vector<256x128xf32> to vector<128xf32>
    %37 = vector.shape_cast %36 : vector<128xf32> to vector<1x128xf32>
    %c0_62 = arith.constant 0 : index
    %c0_63 = arith.constant 0 : index
    %c0_64 = arith.constant 0 : index
    %38 = vector.load %arg3[%c0_62, %c0_63, %c0_64] : memref<1x2x128xf32, #tpu.memory_space<vmem>>, vector<1x1x128xf32>
    %39 = vector.shape_cast %38 : vector<1x1x128xf32> to vector<1x128xf32>
    %40 = vector.shape_cast %37 : vector<1x128xf32> to vector<1x1x128xf32>
    tpu.vector_store %arg3[%c0_62, %c0_63, %c0_64], %40 {strides = array<i32>} : memref<1x2x128xf32, #tpu.memory_space<vmem>>, vector<1x1x128xf32>,
    %41 = arith.mulf %35, %35 : vector<256x128xf32>
    %cst_65 = arith.constant dense<0.000000e+00> : vector<128xf32>
    %42 = vector.multi_reduction <add>, %41, %cst_65 [0] : vector<256x128xf32> to vector<128xf32>
    %43 = vector.shape_cast %42 : vector<128xf32> to vector<1x128xf32>
    %c0_66 = arith.constant 0 : index
    %c1_67 = arith.constant 1 : index
    %c0_68 = arith.constant 0 : index
    %44 = vector.load %arg3[%c0_66, %c1_67, %c0_68] : memref<1x2x128xf32, #tpu.memory_space<vmem>>, vector<1x1x128xf32>
    %45 = vector.shape_cast %44 : vector<1x1x128xf32> to vector<1x128xf32>
    %46 = vector.shape_cast %43 : vector<1x128xf32> to vector<1x1x128xf32>
    tpu.vector_store %arg3[%c0_66, %c1_67, %c0_68], %46 {strides = array<i32>} : memref<1x2x128xf32, #tpu.memory_space<vmem>>, vector<1x1x128xf32>,
    return
  }
  func.func @transform_0(%arg0: i32) -> (i32, i32, i32, i32) {
    %c0_i32 = arith.constant 0 : i32
    %c0_i32_0 = arith.constant 0 : i32
    %c0_i32_1 = arith.constant 0 : i32
    %c0_i32_2 = arith.constant 0 : i32
    return %arg0, %c0_i32, %c0_i32_0, %c0_i32_1 : i32, i32, i32, i32
  }
  func.func @transform_1(%arg0: i32) -> (i32, i32) {
    %c0_i32 = arith.constant 0 : i32
    %c0_i32_0 = arith.constant 0 : i32
    %c0_i32_1 = arith.constant 0 : i32
    return %c0_i32, %c0_i32_0 : i32, i32
  }
  func.func @transform_2(%arg0: i32) -> (i32, i32, i32) {
    %c0_i32 = arith.constant 0 : i32
    %c0_i32_0 = arith.constant 0 : i32
    %c0_i32_1 = arith.constant 0 : i32
    return %arg0, %c0_i32, %c0_i32_0 : i32, i32, i32
  }
}

module attributes {stable_mosaic.version = 11 : i64} {
  func.func @_edge_apply_kernel(%arg0: i32, %arg1: memref<1x16x16x16xf32, #tpu.memory_space<vmem>>, %arg2: memref<304x128xf32, #tpu.memory_space<vmem>>, %arg3: memref<1x128xf32, #tpu.memory_space<vmem>>, %arg4: memref<256x1xf32, #tpu.memory_space<vmem>>, %arg5: memref<256x128xf32, #tpu.memory_space<vmem>>, %arg6: memref<1x18x18x16xf32, #tpu.memory_space<vmem>>, %arg7: memref<256x304xf32, #tpu.memory_space<vmem>>) attributes {dimension_semantics = [#tpu.dimension_semantics<parallel>], iteration_bounds = array<i64: 2>, scalar_prefetch = 0 : i64, scratch_operands = 2 : i64, tpu.core_type = #tpu.core_type<tc>, window_params = [{transform_indices = @transform_0, window_bounds = array<i64: 1, 16, 16, 16>}, {pipeline_mode = #tpu.pipeline_mode<synchronous>, transform_indices = @transform_1, window_bounds = array<i64: 304, 128>}, {pipeline_mode = #tpu.pipeline_mode<synchronous>, transform_indices = @transform_2, window_bounds = array<i64: 1, 128>}, {pipeline_mode = #tpu.pipeline_mode<synchronous>, transform_indices = @transform_3, window_bounds = array<i64: 256, 1>}, {transform_indices = @transform_4, window_bounds = array<i64: 256, 128>}]} {
    %cst = arith.constant 0.000000e+00 : f32
    %0 = vector.broadcast %cst : f32 to vector<1x18x18x16xf32>
    %c0 = arith.constant 0 : index
    %c0_0 = arith.constant 0 : index
    %c0_1 = arith.constant 0 : index
    %c0_2 = arith.constant 0 : index
    %1 = vector.load %arg6[%c0, %c0_0, %c0_1, %c0_2] : memref<1x18x18x16xf32, #tpu.memory_space<vmem>>, vector<1x18x18x16xf32>
    tpu.vector_store %arg6[%c0, %c0_0, %c0_1, %c0_2], %0 {strides = array<i32>} : memref<1x18x18x16xf32, #tpu.memory_space<vmem>>, vector<1x18x18x16xf32>,
    %c0_3 = arith.constant 0 : index
    %c0_4 = arith.constant 0 : index
    %c0_5 = arith.constant 0 : index
    %c0_6 = arith.constant 0 : index
    %2 = vector.load %arg1[%c0_3, %c0_4, %c0_5, %c0_6] : memref<1x16x16x16xf32, #tpu.memory_space<vmem>>, vector<1x16x16x16xf32>
    %c0_7 = arith.constant 0 : index
    %c1 = arith.constant 1 : index
    %c1_8 = arith.constant 1 : index
    %c0_9 = arith.constant 0 : index
    %3 = vector.load %arg6[%c0_7, %c1, %c1_8, %c0_9] : memref<1x18x18x16xf32, #tpu.memory_space<vmem>>, vector<1x16x16x16xf32>
    tpu.vector_store %arg6[%c0_7, %c1, %c1_8, %c0_9], %2 {strides = array<i32>} : memref<1x18x18x16xf32, #tpu.memory_space<vmem>>, vector<1x16x16x16xf32>,
    %c0_10 = arith.constant 0 : index
    %c0_11 = arith.constant 0 : index
    %4 = vector.load %arg4[%c0_10, %c0_11] : memref<256x1xf32, #tpu.memory_space<vmem>>, vector<256x1xf32>
    %c0_12 = arith.constant 0 : index
    %c0_13 = arith.constant 0 : index
    %c0_14 = arith.constant 0 : index
    %c0_15 = arith.constant 0 : index
    %5 = vector.load %arg6[%c0_12, %c0_13, %c0_14, %c0_15] : memref<1x18x18x16xf32, #tpu.memory_space<vmem>>, vector<1x16x16x16xf32>
    %6 = vector.shape_cast %5 : vector<1x16x16x16xf32> to vector<256x16xf32>
    %cst_16 = arith.constant 0.000000e+00 : f32
    %7 = vector.broadcast %cst_16 : f32 to vector<256x16xf32>
    %8 = arith.maximumf %6, %7 : vector<256x16xf32>
    %c0_17 = arith.constant 0 : index
    %c0_18 = arith.constant 0 : index
    %9 = vector.load %arg7[%c0_17, %c0_18] : memref<256x304xf32, #tpu.memory_space<vmem>>, vector<256x16xf32>
    tpu.vector_store %arg7[%c0_17, %c0_18], %8 {strides = array<i32>} : memref<256x304xf32, #tpu.memory_space<vmem>>, vector<256x16xf32>,
    %10 = vector.broadcast %4 : vector<256x1xf32> to vector<256x16xf32>
    %11 = arith.mulf %6, %10 : vector<256x16xf32>
    %c0_19 = arith.constant 0 : index
    %c160 = arith.constant 160 : index
    %12 = vector.load %arg7[%c0_19, %c160] : memref<256x304xf32, #tpu.memory_space<vmem>>, vector<256x16xf32>
    tpu.vector_store %arg7[%c0_19, %c160], %11 {strides = array<i32>} : memref<256x304xf32, #tpu.memory_space<vmem>>, vector<256x16xf32>,
    %c0_20 = arith.constant 0 : index
    %c0_21 = arith.constant 0 : index
    %c1_22 = arith.constant 1 : index
    %c0_23 = arith.constant 0 : index
    %13 = vector.load %arg6[%c0_20, %c0_21, %c1_22, %c0_23] : memref<1x18x18x16xf32, #tpu.memory_space<vmem>>, vector<1x16x16x16xf32>
    %14 = vector.shape_cast %13 : vector<1x16x16x16xf32> to vector<256x16xf32>
    %cst_24 = arith.constant 0.000000e+00 : f32
    %15 = vector.broadcast %cst_24 : f32 to vector<256x16xf32>
    %16 = arith.maximumf %14, %15 : vector<256x16xf32>
    %c0_25 = arith.constant 0 : index
    %c16 = arith.constant 16 : index
    %17 = vector.load %arg7[%c0_25, %c16] : memref<256x304xf32, #tpu.memory_space<vmem>>, vector<256x16xf32>
    tpu.vector_store %arg7[%c0_25, %c16], %16 {strides = array<i32>} : memref<256x304xf32, #tpu.memory_space<vmem>>, vector<256x16xf32>,
    %18 = vector.broadcast %4 : vector<256x1xf32> to vector<256x16xf32>
    %19 = arith.mulf %14, %18 : vector<256x16xf32>
    %c0_26 = arith.constant 0 : index
    %c176 = arith.constant 176 : index
    %20 = vector.load %arg7[%c0_26, %c176] : memref<256x304xf32, #tpu.memory_space<vmem>>, vector<256x16xf32>
    tpu.vector_store %arg7[%c0_26, %c176], %19 {strides = array<i32>} : memref<256x304xf32, #tpu.memory_space<vmem>>, vector<256x16xf32>,
    %c0_27 = arith.constant 0 : index
    %c0_28 = arith.constant 0 : index
    %c2 = arith.constant 2 : index
    %c0_29 = arith.constant 0 : index
    %21 = vector.load %arg6[%c0_27, %c0_28, %c2, %c0_29] : memref<1x18x18x16xf32, #tpu.memory_space<vmem>>, vector<1x16x16x16xf32>
    %22 = vector.shape_cast %21 : vector<1x16x16x16xf32> to vector<256x16xf32>
    %cst_30 = arith.constant 0.000000e+00 : f32
    %23 = vector.broadcast %cst_30 : f32 to vector<256x16xf32>
    %24 = arith.maximumf %22, %23 : vector<256x16xf32>
    %c0_31 = arith.constant 0 : index
    %c32 = arith.constant 32 : index
    %25 = vector.load %arg7[%c0_31, %c32] : memref<256x304xf32, #tpu.memory_space<vmem>>, vector<256x16xf32>
    tpu.vector_store %arg7[%c0_31, %c32], %24 {strides = array<i32>} : memref<256x304xf32, #tpu.memory_space<vmem>>, vector<256x16xf32>,
    %26 = vector.broadcast %4 : vector<256x1xf32> to vector<256x16xf32>
    %27 = arith.mulf %22, %26 : vector<256x16xf32>
    %c0_32 = arith.constant 0 : index
    %c192 = arith.constant 192 : index
    %28 = vector.load %arg7[%c0_32, %c192] : memref<256x304xf32, #tpu.memory_space<vmem>>, vector<256x16xf32>
    tpu.vector_store %arg7[%c0_32, %c192], %27 {strides = array<i32>} : memref<256x304xf32, #tpu.memory_space<vmem>>, vector<256x16xf32>,
    %c0_33 = arith.constant 0 : index
    %c1_34 = arith.constant 1 : index
    %c0_35 = arith.constant 0 : index
    %c0_36 = arith.constant 0 : index
    %29 = vector.load %arg6[%c0_33, %c1_34, %c0_35, %c0_36] : memref<1x18x18x16xf32, #tpu.memory_space<vmem>>, vector<1x16x16x16xf32>
    %30 = vector.shape_cast %29 : vector<1x16x16x16xf32> to vector<256x16xf32>
    %cst_37 = arith.constant 0.000000e+00 : f32
    %31 = vector.broadcast %cst_37 : f32 to vector<256x16xf32>
    %32 = arith.maximumf %30, %31 : vector<256x16xf32>
    %c0_38 = arith.constant 0 : index
    %c48 = arith.constant 48 : index
    %33 = vector.load %arg7[%c0_38, %c48] : memref<256x304xf32, #tpu.memory_space<vmem>>, vector<256x16xf32>
    tpu.vector_store %arg7[%c0_38, %c48], %32 {strides = array<i32>} : memref<256x304xf32, #tpu.memory_space<vmem>>, vector<256x16xf32>,
    %34 = vector.broadcast %4 : vector<256x1xf32> to vector<256x16xf32>
    %35 = arith.mulf %30, %34 : vector<256x16xf32>
    %c0_39 = arith.constant 0 : index
    %c208 = arith.constant 208 : index
    %36 = vector.load %arg7[%c0_39, %c208] : memref<256x304xf32, #tpu.memory_space<vmem>>, vector<256x16xf32>
    tpu.vector_store %arg7[%c0_39, %c208], %35 {strides = array<i32>} : memref<256x304xf32, #tpu.memory_space<vmem>>, vector<256x16xf32>,
    %c0_40 = arith.constant 0 : index
    %c1_41 = arith.constant 1 : index
    %c1_42 = arith.constant 1 : index
    %c0_43 = arith.constant 0 : index
    %37 = vector.load %arg6[%c0_40, %c1_41, %c1_42, %c0_43] : memref<1x18x18x16xf32, #tpu.memory_space<vmem>>, vector<1x16x16x16xf32>
    %38 = vector.shape_cast %37 : vector<1x16x16x16xf32> to vector<256x16xf32>
    %cst_44 = arith.constant 0.000000e+00 : f32
    %39 = vector.broadcast %cst_44 : f32 to vector<256x16xf32>
    %40 = arith.maximumf %38, %39 : vector<256x16xf32>
    %c0_45 = arith.constant 0 : index
    %c64 = arith.constant 64 : index
    %41 = vector.load %arg7[%c0_45, %c64] : memref<256x304xf32, #tpu.memory_space<vmem>>, vector<256x16xf32>
    tpu.vector_store %arg7[%c0_45, %c64], %40 {strides = array<i32>} : memref<256x304xf32, #tpu.memory_space<vmem>>, vector<256x16xf32>,
    %42 = vector.broadcast %4 : vector<256x1xf32> to vector<256x16xf32>
    %43 = arith.mulf %38, %42 : vector<256x16xf32>
    %c0_46 = arith.constant 0 : index
    %c224 = arith.constant 224 : index
    %44 = vector.load %arg7[%c0_46, %c224] : memref<256x304xf32, #tpu.memory_space<vmem>>, vector<256x16xf32>
    tpu.vector_store %arg7[%c0_46, %c224], %43 {strides = array<i32>} : memref<256x304xf32, #tpu.memory_space<vmem>>, vector<256x16xf32>,
    %c0_47 = arith.constant 0 : index
    %c144 = arith.constant 144 : index
    %45 = vector.load %arg7[%c0_47, %c144] : memref<256x304xf32, #tpu.memory_space<vmem>>, vector<256x16xf32>
    tpu.vector_store %arg7[%c0_47, %c144], %38 {strides = array<i32>} : memref<256x304xf32, #tpu.memory_space<vmem>>, vector<256x16xf32>,
    %c0_48 = arith.constant 0 : index
    %c1_49 = arith.constant 1 : index
    %c2_50 = arith.constant 2 : index
    %c0_51 = arith.constant 0 : index
    %46 = vector.load %arg6[%c0_48, %c1_49, %c2_50, %c0_51] : memref<1x18x18x16xf32, #tpu.memory_space<vmem>>, vector<1x16x16x16xf32>
    %47 = vector.shape_cast %46 : vector<1x16x16x16xf32> to vector<256x16xf32>
    %cst_52 = arith.constant 0.000000e+00 : f32
    %48 = vector.broadcast %cst_52 : f32 to vector<256x16xf32>
    %49 = arith.maximumf %47, %48 : vector<256x16xf32>
    %c0_53 = arith.constant 0 : index
    %c80 = arith.constant 80 : index
    %50 = vector.load %arg7[%c0_53, %c80] : memref<256x304xf32, #tpu.memory_space<vmem>>, vector<256x16xf32>
    tpu.vector_store %arg7[%c0_53, %c80], %49 {strides = array<i32>} : memref<256x304xf32, #tpu.memory_space<vmem>>, vector<256x16xf32>,
    %51 = vector.broadcast %4 : vector<256x1xf32> to vector<256x16xf32>
    %52 = arith.mulf %47, %51 : vector<256x16xf32>
    %c0_54 = arith.constant 0 : index
    %c240 = arith.constant 240 : index
    %53 = vector.load %arg7[%c0_54, %c240] : memref<256x304xf32, #tpu.memory_space<vmem>>, vector<256x16xf32>
    tpu.vector_store %arg7[%c0_54, %c240], %52 {strides = array<i32>} : memref<256x304xf32, #tpu.memory_space<vmem>>, vector<256x16xf32>,
    %c0_55 = arith.constant 0 : index
    %c2_56 = arith.constant 2 : index
    %c0_57 = arith.constant 0 : index
    %c0_58 = arith.constant 0 : index
    %54 = vector.load %arg6[%c0_55, %c2_56, %c0_57, %c0_58] : memref<1x18x18x16xf32, #tpu.memory_space<vmem>>, vector<1x16x16x16xf32>
    %55 = vector.shape_cast %54 : vector<1x16x16x16xf32> to vector<256x16xf32>
    %cst_59 = arith.constant 0.000000e+00 : f32
    %56 = vector.broadcast %cst_59 : f32 to vector<256x16xf32>
    %57 = arith.maximumf %55, %56 : vector<256x16xf32>
    %c0_60 = arith.constant 0 : index
    %c96 = arith.constant 96 : index
    %58 = vector.load %arg7[%c0_60, %c96] : memref<256x304xf32, #tpu.memory_space<vmem>>, vector<256x16xf32>
    tpu.vector_store %arg7[%c0_60, %c96], %57 {strides = array<i32>} : memref<256x304xf32, #tpu.memory_space<vmem>>, vector<256x16xf32>,
    %59 = vector.broadcast %4 : vector<256x1xf32> to vector<256x16xf32>
    %60 = arith.mulf %55, %59 : vector<256x16xf32>
    %c0_61 = arith.constant 0 : index
    %c256 = arith.constant 256 : index
    %61 = vector.load %arg7[%c0_61, %c256] : memref<256x304xf32, #tpu.memory_space<vmem>>, vector<256x16xf32>
    tpu.vector_store %arg7[%c0_61, %c256], %60 {strides = array<i32>} : memref<256x304xf32, #tpu.memory_space<vmem>>, vector<256x16xf32>,
    %c0_62 = arith.constant 0 : index
    %c2_63 = arith.constant 2 : index
    %c1_64 = arith.constant 1 : index
    %c0_65 = arith.constant 0 : index
    %62 = vector.load %arg6[%c0_62, %c2_63, %c1_64, %c0_65] : memref<1x18x18x16xf32, #tpu.memory_space<vmem>>, vector<1x16x16x16xf32>
    %63 = vector.shape_cast %62 : vector<1x16x16x16xf32> to vector<256x16xf32>
    %cst_66 = arith.constant 0.000000e+00 : f32
    %64 = vector.broadcast %cst_66 : f32 to vector<256x16xf32>
    %65 = arith.maximumf %63, %64 : vector<256x16xf32>
    %c0_67 = arith.constant 0 : index
    %c112 = arith.constant 112 : index
    %66 = vector.load %arg7[%c0_67, %c112] : memref<256x304xf32, #tpu.memory_space<vmem>>, vector<256x16xf32>
    tpu.vector_store %arg7[%c0_67, %c112], %65 {strides = array<i32>} : memref<256x304xf32, #tpu.memory_space<vmem>>, vector<256x16xf32>,
    %67 = vector.broadcast %4 : vector<256x1xf32> to vector<256x16xf32>
    %68 = arith.mulf %63, %67 : vector<256x16xf32>
    %c0_68 = arith.constant 0 : index
    %c272 = arith.constant 272 : index
    %69 = vector.load %arg7[%c0_68, %c272] : memref<256x304xf32, #tpu.memory_space<vmem>>, vector<256x16xf32>
    tpu.vector_store %arg7[%c0_68, %c272], %68 {strides = array<i32>} : memref<256x304xf32, #tpu.memory_space<vmem>>, vector<256x16xf32>,
    %c0_69 = arith.constant 0 : index
    %c2_70 = arith.constant 2 : index
    %c2_71 = arith.constant 2 : index
    %c0_72 = arith.constant 0 : index
    %70 = vector.load %arg6[%c0_69, %c2_70, %c2_71, %c0_72] : memref<1x18x18x16xf32, #tpu.memory_space<vmem>>, vector<1x16x16x16xf32>
    %71 = vector.shape_cast %70 : vector<1x16x16x16xf32> to vector<256x16xf32>
    %cst_73 = arith.constant 0.000000e+00 : f32
    %72 = vector.broadcast %cst_73 : f32 to vector<256x16xf32>
    %73 = arith.maximumf %71, %72 : vector<256x16xf32>
    %c0_74 = arith.constant 0 : index
    %c128 = arith.constant 128 : index
    %74 = vector.load %arg7[%c0_74, %c128] : memref<256x304xf32, #tpu.memory_space<vmem>>, vector<256x16xf32>
    tpu.vector_store %arg7[%c0_74, %c128], %73 {strides = array<i32>} : memref<256x304xf32, #tpu.memory_space<vmem>>, vector<256x16xf32>,
    %75 = vector.broadcast %4 : vector<256x1xf32> to vector<256x16xf32>
    %76 = arith.mulf %71, %75 : vector<256x16xf32>
    %c0_75 = arith.constant 0 : index
    %c288 = arith.constant 288 : index
    %77 = vector.load %arg7[%c0_75, %c288] : memref<256x304xf32, #tpu.memory_space<vmem>>, vector<256x16xf32>
    tpu.vector_store %arg7[%c0_75, %c288], %76 {strides = array<i32>} : memref<256x304xf32, #tpu.memory_space<vmem>>, vector<256x16xf32>,
    %c0_76 = arith.constant 0 : index
    %c0_77 = arith.constant 0 : index
    %78 = vector.load %arg7[%c0_76, %c0_77] : memref<256x304xf32, #tpu.memory_space<vmem>>, vector<256x304xf32>
    %c0_78 = arith.constant 0 : index
    %c0_79 = arith.constant 0 : index
    %79 = vector.load %arg2[%c0_78, %c0_79] : memref<304x128xf32, #tpu.memory_space<vmem>>, vector<304x128xf32>
    %cst_80 = arith.constant dense<0.000000e+00> : vector<256x128xf32>
    %80 = tpu.matmul %78, %79, %cst_80 {dimension_numbers = #tpu.dot_dimension_numbers<[1], [0], [0], [1], [0, 0, 1, 1], [], []>} : vector<256x304xf32>, vector<304x128xf32>, vector<256x128xf32> -> vector<256x128xf32>
    %c0_81 = arith.constant 0 : index
    %c0_82 = arith.constant 0 : index
    %81 = vector.load %arg3[%c0_81, %c0_82] : memref<1x128xf32, #tpu.memory_space<vmem>>, vector<1x128xf32>
    %82 = vector.broadcast %81 : vector<1x128xf32> to vector<256x128xf32>
    %83 = arith.addf %80, %82 : vector<256x128xf32>
    %c0_83 = arith.constant 0 : index
    %c0_84 = arith.constant 0 : index
    %84 = vector.load %arg5[%c0_83, %c0_84] : memref<256x128xf32, #tpu.memory_space<vmem>>, vector<256x128xf32>
    tpu.vector_store %arg5[%c0_83, %c0_84], %83 {strides = array<i32>} : memref<256x128xf32, #tpu.memory_space<vmem>>, vector<256x128xf32>,
    return
  }
  func.func @transform_0(%arg0: i32) -> (i32, i32, i32, i32) {
    %c0_i32 = arith.constant 0 : i32
    %c0_i32_0 = arith.constant 0 : i32
    %c0_i32_1 = arith.constant 0 : i32
    %c0_i32_2 = arith.constant 0 : i32
    return %arg0, %c0_i32, %c0_i32_0, %c0_i32_1 : i32, i32, i32, i32
  }
  func.func @transform_1(%arg0: i32) -> (i32, i32) {
    %c0_i32 = arith.constant 0 : i32
    %c0_i32_0 = arith.constant 0 : i32
    %c0_i32_1 = arith.constant 0 : i32
    return %c0_i32, %c0_i32_0 : i32, i32
  }
  func.func @transform_2(%arg0: i32) -> (i32, i32) {
    %c0_i32 = arith.constant 0 : i32
    %c0_i32_0 = arith.constant 0 : i32
    %c0_i32_1 = arith.constant 0 : i32
    return %c0_i32, %c0_i32_0 : i32, i32
  }
  func.func @transform_3(%arg0: i32) -> (i32, i32) {
    %c0_i32 = arith.constant 0 : i32
    %c0_i32_0 = arith.constant 0 : i32
    %c0_i32_1 = arith.constant 0 : i32
    return %c0_i32, %c0_i32_0 : i32, i32
  }
  func.func @transform_4(%arg0: i32) -> (i32, i32) {
    %c0_i32 = arith.constant 0 : i32
    %c0_i32_0 = arith.constant 0 : i32
    return %arg0, %c0_i32 : i32, i32
  }
}

</mosaic_0001>

<bundles_post_ra>
// kernel: nas201_search_cell_forward.6
= control target key start
LH: loop header
LB: loop body
LE: loop exit
PB: predicated region body
PF: predicated region fallthrough
CT: control target
= control target key end

     0   :  { %s2476_s9 = smov 0   ;;  %s3656_s0 = inlined_call_operand.vmem [shape: f32[2,16,16,16], index: 0, kind: input, shape index: {}]   ;;  %s3657_s1 = inlined_call_operand.vmem [shape: f32[144,128], index: 1, kind: input, shape index: {}]   ;;  %s3658_s2 = inlined_call_operand.vmem [shape: f32[2,2,128], index: 2, kind: output, shape index: {}]  }
   0x1 LB: > { %s2339_s10 = sadd.s32 4294967295, %s2450_s9   ;;  %p2343_p0 = scmp.ge.s32.totalorder %s2450_s9, 1  ;;  %s2450_s9 = sphi %s2476_s9, %s12_s9  }
   0x2   : > { %p112_p1 = scmp.lt.s32.totalorder %s2450_s9, 3 }
   0x4   : > { %p113_p2 = pnand %p2343_p0, %p112_p1 }
   0x5   : > { %vm142_vm0 = vcmask (!%p113_p2), 130048   ;;  %vm145_vm1 = vcmask (!%p113_p2), 123904   ;;  %p2486_p3 = scmp.lt.s32.totalorder (!%p113_p2), %s2339_s10, 1  ;;  %v2452_v0 = vmov (!%p113_p2), 0.0   ;;  %s2453_s16 = smov (!%p113_p2), 16   ;;  %vm519_vm2 = vcmask (!%p113_p2), 261248  }
   0x6   : > { %116 = sbr.rel (%p113_p2) target bundleno = 838 (0x346), region = 28  ;;  %143 = vst.msk [vmem:[#allocation2] sm:$0xff] (!%p113_p2), %vm142_vm0, %v2452_v0  ;;  %144 = vst.msk [vmem:[#allocation2 + $0x8] sm:$0xff] (!%p113_p2), %vm142_vm0, %v2452_v0  ;;  %s2455_s21 = smov (!%p113_p2), 48   ;;  %vm712_vm3 = vcmask (!%p113_p2), 392448   ;;  %vm905_vm4 = vcmask (!%p113_p2), 523648  }
   0x7   : > { %147 = vst.msk [vmem:[#allocation2 + $0x18] sm:$0xff] (!%p113_p2), %vm142_vm0, %v2452_v0  ;;  %148 = vst.msk [vmem:[#allocation2 + $0x20] sm:$0xff] (!%p113_p2), %vm142_vm0, %v2452_v0  ;;  %s2456_s26 = smov (!%p113_p2), 80   ;;  %s2457_s27 = smov (!%p113_p2), 32   ;;  %vm1098_vm5 = vcmask (!%p113_p2), 654848   ;;  %vm1291_vm6 = vcmask (!%p113_p2), 786048  }
   0x8   : > { %150 = vst.msk [vmem:[#allocation2 + $0x30] sm:$0xff] (!%p113_p2), %vm142_vm0, %v2452_v0  ;;  %151 = vst.msk [vmem:[#allocation2 + $0x38] sm:$0xff] (!%p113_p2), %vm142_vm0, %v2452_v0  ;;  %s2458_s4 = smov (!%p113_p2), 96   ;;  %s2459_s5 = smov (!%p113_p2), 64   ;;  %vm1485_vm7 = vcmask (!%p113_p2), 917248   ;;  %vm1678_vm8 = vcmask (!%p113_p2), 1048448  }
   0x9   : > { %153 = vst.msk [vmem:[#allocation2 + $0x48] sm:$0xff] (!%p113_p2), %vm142_vm0, %v2452_v0  ;;  %154 = vst.msk [vmem:[#allocation2 + $0x50] sm:$0xff] (!%p113_p2), %vm142_vm0, %v2452_v0  ;;  %s2460_s6 = smov (!%p113_p2), 112  }
   0xa   : > { %156 = vst.msk [vmem:[#allocation2 + $0x60] sm:$0xff] (!%p113_p2), %vm142_vm0, %v2452_v0  ;;  %157 = vst.msk [vmem:[#allocation2 + $0x68] sm:$0xff] (!%p113_p2), %vm142_vm0, %v2452_v0 }
   0xb   : > { %159 = vst.msk [vmem:[#allocation2 + $0x78] sm:$0xff] (!%p113_p2), %vm142_vm0, %v2452_v0  ;;  %160 = vst.msk [vmem:[#allocation2 + $0x80] sm:$0xff] (!%p113_p2), %vm142_vm0, %v2452_v0 }
   0xc   : > { %162 = vst.msk [vmem:[#allocation2 + $0x90] sm:$0xff] (!%p113_p2), %vm142_vm0, %v2452_v0  ;;  %163 = vst.msk [vmem:[#allocation2 + $0x98] sm:$0xff] (!%p113_p2), %vm142_vm0, %v2452_v0 }
   0xd   : > { %165 = vst.msk [vmem:[#allocation2 + $0xa8] sm:$0xff] %vm142_vm0, %v2452_v0  ;;  %166 = vst.msk [vmem:[#allocation2 + $0xb0] sm:$0xff] %vm142_vm0, %v2452_v0  ;;  %s3661_s10 = smov (!%p2486_p3, %s2339_s10), 1  ;;  %v359_v10 = vld [vmem:[#allocation2 + $0x1] sm:$0xff] }
   0xe   : > { %168 = vst.msk [vmem:[#allocation2 + $0xc0] sm:$0xff] %vm142_vm0, %v2452_v0  ;;  %169 = vst.msk [vmem:[#allocation2 + $0xc8] sm:$0xff] %vm142_vm0, %v2452_v0  ;;  %s2381_s12 = sshll.u32 %s3661_s10, 8  ;;  %423 = vrot.lane.b32.xlu0 %v359_v10, %s2453_s16 }
   0xf   : > { %171 = vst.msk [vmem:[#allocation2 + $0xd8] sm:$0xff] %vm142_vm0, %v2452_v0  ;;  %172 = vst.msk [vmem:[#allocation2 + $0xe0] sm:$0xff] %vm142_vm0, %v2452_v0  ;;  %s2554_s15 = scalar_lea.vmem %s3656_s0, %s2381_s12 }
  0x10   : > { %174 = vst.msk [vmem:[#allocation2 + $0xf0] sm:$0xff] %vm142_vm0, %v2452_v0  ;;  %175 = vst.msk [vmem:[#allocation2 + $0xf8] sm:$0xff] %vm142_vm0, %v2452_v0  ;;  %v200_v1 = vld [vmem:[%s2554_s15 + $0x10] sm:$0xff]  ;;  %v198_v2 = vld [vmem:[%s2554_s15] sm:$0xff] }
  0x11   : > { %177 = vst.msk [vmem:[#allocation2 + $0x108] sm:$0xff] %vm142_vm0, %v2452_v0  ;;  %178 = vst.msk [vmem:[#allocation2 + $0x110] sm:$0xff] %vm142_vm0, %v2452_v0  ;;  %v202_v3 = vld [vmem:[%s2554_s15 + $0x20] sm:$0xff]  ;;  %v232_v4 = vmax.f32 %v200_v1, 0.0  ;;  %v230_v5 = vmax.f32 %v198_v2, 0.0  ;;  %v199_v7 = vld [vmem:[%s2554_s15 + $0x8] sm:$0xff] }
  0x12   : > { %180 = vst.msk [vmem:[#allocation2 + $0x120] sm:$0xff] %vm142_vm0, %v2452_v0  ;;  %181 = vst.msk [vmem:[#allocation2 + $0x128] sm:$0xff] %vm142_vm0, %v2452_v0  ;;  %v234_v6 = vmax.f32 %v202_v3, 0.0  ;;  %v204_v8 = vld [vmem:[%s2554_s15 + $0x30] sm:$0xff]  ;;  %v201_v9 = vld [vmem:[%s2554_s15 + $0x18] sm:$0xff]  ;;  %v231_v12 = vmax.f32 %v199_v7, 0.0 }
  0x13   : > { %183 = vst.msk [vmem:[#allocation2 + $0x138] sm:$0xff] %vm142_vm0, %v2452_v0  ;;  %184 = vst.msk [vmem:[#allocation2 + $0x140] sm:$0xff] %vm142_vm0, %v2452_v0  ;;  %v236_v13 = vmax.f32 %v204_v8, 0.0  ;;  %v233_v14 = vmax.f32 %v201_v9, 0.0  ;;  %v206_v15 = vld [vmem:[%s2554_s15 + $0x40] sm:$0xff]  ;;  %v203_v17 = vld [vmem:[%s2554_s15 + $0x28] sm:$0xff] }
  0x14   : > { %186 = vst.msk [vmem:[#allocation2 + $0x150] sm:$0xff] %vm142_vm0, %v2452_v0  ;;  %187 = vst.msk [vmem:[#allocation2 + $0x158] sm:$0xff] %vm142_vm0, %v2452_v0  ;;  %v238_v16 = vmax.f32 %v206_v15, 0.0  ;;  %v208_v18 = vld [vmem:[%s2554_s15 + $0x50] sm:$0xff]  ;;  %v205_v19 = vld [vmem:[%s2554_s15 + $0x38] sm:$0xff]  ;;  %v235_v20 = vmax.f32 %v203_v17, 0.0 }
  0x15   : > { %189 = vst.msk [vmem:[#allocation2 + $0x168] sm:$0xff] %vm142_vm0, %v2452_v0  ;;  %190 = vst.msk [vmem:[#allocation2 + $0x170] sm:$0xff] %vm142_vm0, %v2452_v0  ;;  %v240_v21 = vmax.f32 %v208_v18, 0.0  ;;  %v237_v22 = vmax.f32 %v205_v19, 0.0  ;;  %v210_v23 = vld [vmem:[%s2554_s15 + $0x60] sm:$0xff]  ;;  %v207_v24 = vld [vmem:[%s2554_s15 + $0x48] sm:$0xff] }
  0x16   : > { %192 = vst.msk [vmem:[#allocation2 + $0x180] sm:$0xff] %vm142_vm0, %v2452_v0  ;;  %193 = vst.msk [vmem:[#allocation2 + $0x188] sm:$0xff] %vm142_vm0, %v2452_v0  ;;  %v212_v25 = vld [vmem:[%s2554_s15 + $0x70] sm:$0xff]  ;;  %v242_v26 = vmax.f32 %v210_v23, 0.0  ;;  %v239_v27 = vmax.f32 %v207_v24, 0.0  ;;  %v209_v29 = vld [vmem:[%s2554_s15 + $0x58] sm:$0xff] }
  0x17   : > { %195 = vst.msk [vmem:[#allocation2 + $0x198] sm:$0xff] %vm142_vm0, %v2452_v0  ;;  %196 = vst.msk [vmem:[#allocation2 + $0x1a0] sm:$0xff] %vm142_vm0, %v2452_v0  ;;  %v244_v28 = vmax.f32 %v212_v25, 0.0  ;;  %v214_v30 = vld [vmem:[%s2554_s15 + $0x80] sm:$0xff]  ;;  %v211_v31 = vld [vmem:[%s2554_s15 + $0x68] sm:$0xff]  ;;  %v241_v32 = vmax.f32 %v209_v29, 0.0 }
  0x18   : > { %146 = vst.msk [vmem:[#allocation2 + $0x10] sm:$0x3] %vm145_vm1, %v2452_v0  ;;  %149 = vst.msk [vmem:[#allocation2 + $0x28] sm:$0x3] %vm145_vm1, %v2452_v0  ;;  %v246_v33 = vmax.f32 %v214_v30, 0.0  ;;  %v243_v34 = vmax.f32 %v211_v31, 0.0 }
  0x19   : > { %152 = vst.msk [vmem:[#allocation2 + $0x40] sm:$0x3] %vm145_vm1, %v2452_v0  ;;  %155 = vst.msk [vmem:[#allocation2 + $0x58] sm:$0x3] %vm145_vm1, %v2452_v0  ;;  %v216_v35 = vld [vmem:[%s2554_s15 + $0x90] sm:$0xff]  ;;  %v213_v36 = vld [vmem:[%s2554_s15 + $0x78] sm:$0xff] }
  0x1a   : > { %158 = vst.msk [vmem:[#allocation2 + $0x70] sm:$0x3] %vm145_vm1, %v2452_v0  ;;  %161 = vst.msk [vmem:[#allocation2 + $0x88] sm:$0x3] %vm145_vm1, %v2452_v0  ;;  %v218_v37 = vld [vmem:[%s2554_s15 + $0xa0] sm:$0xff]  ;;  %v248_v38 = vmax.f32 %v216_v35, 0.0 }
  0x1b   : > { %164 = vst.msk [vmem:[#allocation2 + $0xa0] sm:$0x3] %vm145_vm1, %v2452_v0  ;;  %167 = vst.msk [vmem:[#allocation2 + $0xb8] sm:$0x3] %vm145_vm1, %v2452_v0  ;;  %v245_v39 = vmax.f32 %v213_v36, 0.0  ;;  %v250_v40 = vmax.f32 %v218_v37, 0.0 }
  0x1c   : > { %170 = vst.msk [vmem:[#allocation2 + $0xd0] sm:$0x3] %vm145_vm1, %v2452_v0  ;;  %173 = vst.msk [vmem:[#allocation2 + $0xe8] sm:$0x3] %vm145_vm1, %v2452_v0  ;;  %v215_v41 = vld [vmem:[%s2554_s15 + $0x88] sm:$0xff]  ;;  %v220_v42 = vld [vmem:[%s2554_s15 + $0xb0] sm:$0xff] }
  0x1d   : > { %176 = vst.msk [vmem:[#allocation2 + $0x100] sm:$0x3] %vm145_vm1, %v2452_v0  ;;  %179 = vst.msk [vmem:[#allocation2 + $0x118] sm:$0x3] %vm145_vm1, %v2452_v0  ;;  %v217_v43 = vld [vmem:[%s2554_s15 + $0x98] sm:$0xff]  ;;  %v247_v44 = vmax.f32 %v215_v41, 0.0 }
  0x1e   : > { %182 = vst.msk [vmem:[#allocation2 + $0x130] sm:$0x3] %vm145_vm1, %v2452_v0  ;;  %185 = vst.msk [vmem:[#allocation2 + $0x148] sm:$0x3] %vm145_vm1, %v2452_v0  ;;  %v252_v45 = vmax.f32 %v220_v42, 0.0  ;;  %v249_v46 = vmax.f32 %v217_v43, 0.0 }
  0x1f   : > { %188 = vst.msk [vmem:[#allocation2 + $0x160] sm:$0x3] %vm145_vm1, %v2452_v0  ;;  %191 = vst.msk [vmem:[#allocation2 + $0x178] sm:$0x3] %vm145_vm1, %v2452_v0  ;;  %v360_v11 = vld [vmem:[#allocation2 + $0x9] sm:$0xff]  ;;  %v222_v47 = vld [vmem:[%s2554_s15 + $0xc0] sm:$0xff] }
  0x20   : > { %194 = vst.msk [vmem:[#allocation2 + $0x190] sm:$0x3] %vm145_vm1, %v2452_v0  ;;  %197 = vst.msk [vmem:[#allocation2 + $0x1a8] sm:$0x3] %vm145_vm1, %v2452_v0  ;;  %425 = vrot.lane.b32.xlu0 %v360_v11, %s2453_s16  ;;  %v219_v48 = vld [vmem:[%s2554_s15 + $0xa8] sm:$0xff]  ;;  %v224_v49 = vld [vmem:[%s2554_s15 + $0xd0] sm:$0xff] }
  0x21   : > { %265 = vst.msk [vmem:[#allocation2 + $0x31] sm:$0xff] %vm142_vm0, %v232_v4  ;;  %263 = vst.msk [vmem:[#allocation2 + $0x19] sm:$0xff] %vm142_vm0, %v230_v5  ;;  %v254_v50 = vmax.f32 %v222_v47, 0.0  ;;  %v251_v51 = vmax.f32 %v219_v48, 0.0  ;;  %v256_v52 = vmax.f32 %v224_v49, 0.0  ;;  %v221_v53 = vld [vmem:[%s2554_s15 + $0xb8] sm:$0xff] }
  0x22   : > { %267 = vst.msk [vmem:[#allocation2 + $0x49] sm:$0xff] %vm142_vm0, %v234_v6  ;;  %264 = vst.msk [vmem:[#allocation2 + $0x21] sm:$0xff] %vm142_vm0, %v231_v12  ;;  %v223_v54 = vld [vmem:[%s2554_s15 + $0xc8] sm:$0xff]  ;;  %v253_v57 = vmax.f32 %v221_v53, 0.0  ;;  %v295_v12 = vld [vmem:[#allocation2] sm:$0xff] }
  0x23   : > { %269 = vst.msk [vmem:[#allocation2 + $0x61] sm:$0xff] %vm142_vm0, %v236_v13  ;;  %266 = vst.msk [vmem:[#allocation2 + $0x39] sm:$0xff] %vm142_vm0, %v233_v14  ;;  %v255_v58 = vmax.f32 %v223_v54, 0.0  ;;  %v296_v14 = vld [vmem:[#allocation2 + $0x8] sm:$0xff]  ;;  %v1841_v47 = vld [vmem:[%s3657_s1 + $0x10] sm:$0xff] }
  0x24   : > { %271 = vst.msk [vmem:[#allocation2 + $0x79] sm:$0xff] %vm142_vm0, %v238_v16  ;;  %268 = vst.msk [vmem:[#allocation2 + $0x51] sm:$0xff] %vm142_vm0, %v235_v20  ;;  %v1842_v48 = vld [vmem:[%s3657_s1 + $0x18] sm:$0xff] }
  0x25   : > { %273 = vst.msk [vmem:[#allocation2 + $0x91] sm:$0xff] %vm142_vm0, %v240_v21  ;;  %270 = vst.msk [vmem:[#allocation2 + $0x69] sm:$0xff] %vm142_vm0, %v237_v22  ;;  %v2386_v49 = vpack.c.bf16 %v1842_v48, %v1841_v47  ;;  %v1847_v47 = vld [vmem:[%s3657_s1 + $0x40] sm:$0xff]  ;;  %v1848_v48 = vld [vmem:[%s3657_s1 + $0x48] sm:$0xff] }
  0x26   : > { %275 = vst.msk [vmem:[#allocation2 + $0xa9] sm:$0xff] %vm142_vm0, %v242_v26  ;;  %272 = vst.msk [vmem:[#allocation2 + $0x81] sm:$0xff] %vm142_vm0, %v239_v27 }
  0x27   : > { %277 = vst.msk [vmem:[#allocation2 + $0xc1] sm:$0xff] %vm142_vm0, %v244_v28  ;;  %274 = vst.msk [vmem:[#allocation2 + $0x99] sm:$0xff] %vm142_vm0, %v241_v32 }
  0x28   : > { %279 = vst.msk [vmem:[#allocation2 + $0xd9] sm:$0xff] %vm142_vm0, %v246_v33  ;;  %276 = vst.msk [vmem:[#allocation2 + $0xb1] sm:$0xff] %vm142_vm0, %v243_v34  ;;  %v2604_v55 = vld [vmem:[#allocation2 + $0x31] sm:$0xff]  ;;  %v2606_v56 = vld [vmem:[#allocation2 + $0x19] sm:$0xff] }
  0x29   : > { %281 = vst.msk [vmem:[#allocation2 + $0xf1] sm:$0xff] %vm142_vm0, %v248_v38  ;;  %278 = vst.msk [vmem:[#allocation2 + $0xc9] sm:$0xff] %vm142_vm0, %v245_v39  ;;  %431 = vrot.lane.b32.xlu0 %v2604_v55, %s2453_s16  ;;  %427 = vrot.lane.b32.xlu1 %v2606_v56, %s2453_s16  ;;  %v2618_v59 = vld [vmem:[#allocation2 + $0x49] sm:$0xff]  ;;  %v2620_v60 = vld [vmem:[#allocation2 + $0x21] sm:$0xff] }
  0x2a   : > { %283 = vst.msk [vmem:[#allocation2 + $0x109] sm:$0xff] %vm142_vm0, %v250_v40  ;;  %280 = vst.msk [vmem:[#allocation2 + $0xe1] sm:$0xff] %vm142_vm0, %v247_v44  ;;  %v2623_v61 = vld [vmem:[#allocation2 + $0x18] sm:$0xff]  ;;  %v2632_v62 = vld [vmem:[#allocation2 + $0x61] sm:$0xff] }
  0x2b   : > { %285 = vst.msk [vmem:[#allocation2 + $0x121] sm:$0xff] %vm142_vm0, %v252_v45  ;;  %282 = vst.msk [vmem:[#allocation2 + $0xf9] sm:$0xff] %vm142_vm0, %v249_v46  ;;  %v2634_v63 = vld [vmem:[#allocation2 + $0x39] sm:$0xff]  ;;  %v2640_v0 = vld [vmem:[#allocation2 + $0x30] sm:$0xff]  ;;  %v2454_v45 = vmov 0.0|0.0  }
  0x2c   : > { %287 = vst.msk [vmem:[#allocation2 + $0x139] sm:$0xff] %vm142_vm0, %v254_v50  ;;  %284 = vst.msk [vmem:[#allocation2 + $0x111] sm:$0xff] %vm142_vm0, %v251_v51  ;;  %v2642_v1 = vld [vmem:[#allocation2 + $0x79] sm:$0xff]  ;;  %v2644_v2 = vld [vmem:[#allocation2 + $0x51] sm:$0xff]  ;;  %2382 = vmatprep.subr.bf16.mxu0 %v2454_v45  ;;  %2409 = vmatprep.subr.bf16.mxu1 %v2454_v45 }
  0x2d   : > { %289 = vst.msk [vmem:[#allocation2 + $0x151] sm:$0xff] %vm142_vm0, %v256_v52  ;;  %286 = vst.msk [vmem:[#allocation2 + $0x129] sm:$0xff] %vm142_vm0, %v253_v57  ;;  %435 = vrot.lane.b32.xlu0 %v2618_v59, %s2453_s16  ;;  %429 = vrot.lane.b32.xlu1 %v2620_v60, %s2453_s16  ;;  %v2646_v3 = vld [vmem:[#allocation2 + $0x20] sm:$0xff]  ;;  %v2650_v4 = vld [vmem:[#allocation2 + $0x38] sm:$0xff] }
  0x2e   : > { %288 = vst.msk [vmem:[#allocation2 + $0x141] sm:$0xff] %vm142_vm0, %v255_v58  ;;  %329 = vst.msk [vmem:[#allocation3 + $0x20] sm:$0xff] %vm142_vm0, %v2623_v61  ;;  %v2652_v5 = vld [vmem:[#allocation2 + $0x32] sm:$0xff]  ;;  %v2654_v6 = vld [vmem:[#allocation2 + $0x48] sm:$0xff] }
  0x2f   : > { %331 = vst.msk [vmem:[#allocation3 + $0x40] sm:$0xff] %vm142_vm0, %v2640_v0  ;;  %330 = vst.msk [vmem:[#allocation3 + $0x30] sm:$0xff] %vm142_vm0, %v2646_v3  ;;  %v2658_v7 = vld [vmem:[#allocation2 + $0x91] sm:$0xff]  ;;  %v2660_v8 = vld [vmem:[#allocation2 + $0x69] sm:$0xff] }
  0x30   : > { %v2662_v9 = vld [vmem:[#allocation2 + $0x3a] sm:$0xff]  ;;  %v2664_v10 = vld [vmem:[#allocation2 + $0x50] sm:$0xff]  ;;  %333 = vst.msk [vmem:[#allocation3 + $0x60] sm:$0xff] %vm142_vm0, %v2654_v6  ;;  %332 = vst.msk [vmem:[#allocation3 + $0x50] sm:$0xff] %vm142_vm0, %v2650_v4 }
  0x31   : > { %439 = vrot.lane.b32.xlu0 %v2632_v62, %s2453_s16  ;;  %433 = vrot.lane.b32.xlu1 %v2634_v63, %s2453_s16  ;;  %v2666_v11 = vld [vmem:[#allocation2 + $0x4a] sm:$0xff]  ;;  %1743 = vst.msk [vmem:[#allocation3 + $0x8] sm:$0xff] %vm142_vm0, %v2652_v5  ;;  %v2678_v13 = vld [vmem:[#allocation2 + $0x60] sm:$0xff]  ;;  %334 = vst.msk [vmem:[#allocation3 + $0x70] sm:$0xff] %vm142_vm0, %v2664_v10 }
  0x32   : > { %1744 = vst.msk [vmem:[#allocation3 + $0x18] sm:$0xff] %vm142_vm0, %v2662_v9  ;;  %1745 = vst.msk [vmem:[#allocation3 + $0x28] sm:$0xff] %vm142_vm0, %v2666_v11  ;;  %v2688_v15 = vld [vmem:[#allocation2 + $0x52] sm:$0xff]  ;;  %v2690_v16 = vld [vmem:[#allocation2 + $0x68] sm:$0xff] }
  0x33   : > { %327 = vst.msk [vmem:[#allocation3] sm:$0xff] %vm142_vm0, %v295_v12  ;;  %328 = vst.msk [vmem:[#allocation3 + $0x10] sm:$0xff] %vm142_vm0, %v296_v14  ;;  %v2694_v17 = vld [vmem:[#allocation2 + $0x78] sm:$0xff]  ;;  %v2698_v18 = vld [vmem:[#allocation2 + $0x62] sm:$0xff] }
  0x34   : > { %335 = vst.msk [vmem:[#allocation3 + $0x80] sm:$0xff] %vm142_vm0, %v2678_v13  ;;  %337 = vst.msk [vmem:[#allocation3 + $0xa0] sm:$0xff] %vm142_vm0, %v2694_v17  ;;  %v2700_v19 = vld [vmem:[#allocation2 + $0x90] sm:$0xff]  ;;  %v2704_v20 = vld [vmem:[#allocation2 + $0xa8] sm:$0xff] }
  0x35   : > { %443 = vrot.lane.b32.xlu0 %v2642_v1, %s2453_s16  ;;  %437 = vrot.lane.b32.xlu1 %v2644_v2, %s2453_s16  ;;  %336 = vst.msk [vmem:[#allocation3 + $0x90] sm:$0xff] %vm142_vm0, %v2690_v16  ;;  %1746 = vst.msk [vmem:[#allocation3 + $0x38] sm:$0xff] %vm142_vm0, %v2688_v15  ;;  %v373_v21 = vld [vmem:[#allocation2 + $0xa9] sm:$0xff]  ;;  %v2712_v22 = vld [vmem:[#allocation2 + $0x80] sm:$0xff] }
  0x36   : > { %339 = vst.msk [vmem:[#allocation3 + $0xc0] sm:$0xff] %vm142_vm0, %v2700_v19  ;;  %341 = vst.msk [vmem:[#allocation3 + $0xe0] sm:$0xff] %vm142_vm0, %v2704_v20  ;;  %v2714_v23 = vld [vmem:[#allocation2 + $0xc0] sm:$0xff]  ;;  %v2716_v24 = vld [vmem:[#allocation2 + $0x98] sm:$0xff] }
  0x37   : > { %1747 = vst.msk [vmem:[#allocation3 + $0x48] sm:$0xff] %vm142_vm0, %v2698_v18  ;;  %338 = vst.msk [vmem:[#allocation3 + $0xb0] sm:$0xff] %vm142_vm0, %v2712_v22  ;;  %v2730_v25 = vld [vmem:[#allocation2 + $0x6a] sm:$0xff]  ;;  %v2732_v26 = vld [vmem:[#allocation2 + $0xd8] sm:$0xff] }
  0x38   : > { %343 = vst.msk [vmem:[#allocation3 + $0x100] sm:$0xff] %vm142_vm0, %v2714_v23  ;;  %340 = vst.msk [vmem:[#allocation3 + $0xd0] sm:$0xff] %vm142_vm0, %v2716_v24  ;;  %v2734_v27 = vld [vmem:[#allocation2 + $0xb0] sm:$0xff]  ;;  %v2736_v28 = vld [vmem:[#allocation2 + $0x81] sm:$0xff] }
  0x39   : > { %447 = vrot.lane.b32.xlu0 %v2658_v7, %s2453_s16  ;;  %441 = vrot.lane.b32.xlu1 %v2660_v8, %s2453_s16  ;;  %345 = vst.msk [vmem:[#allocation3 + $0x120] sm:$0xff] %vm142_vm0, %v2732_v26  ;;  %342 = vst.msk [vmem:[#allocation3 + $0xf0] sm:$0xff] %vm142_vm0, %v2734_v27  ;;  %v2742_v29 = vld [vmem:[#allocation2 + $0xf0] sm:$0xff]  ;;  %v2744_v30 = vld [vmem:[#allocation2 + $0xc8] sm:$0xff] }
  0x3a   : > { %1748 = vst.msk [vmem:[#allocation3 + $0x58] sm:$0xff] %vm142_vm0, %v2730_v25  ;;  %347 = vst.msk [vmem:[#allocation3 + $0x140] sm:$0xff] %vm142_vm0, %v2742_v29  ;;  %v2755_v31 = vld [vmem:[#allocation2 + $0x108] sm:$0xff]  ;;  %v2757_v33 = vld [vmem:[#allocation2 + $0x99] sm:$0xff] }
  0x3b   : > { %344 = vst.msk [vmem:[#allocation3 + $0x110] sm:$0xff] %vm142_vm0, %v2744_v30  ;;  %v375_v32 = vld [vmem:[#allocation2 + $0xc1] sm:$0xff]  ;;  %349 = vst.msk [vmem:[#allocation3 + $0x160] sm:$0xff] %vm142_vm0, %v2755_v31  ;;  %v2770_v36 = vld [vmem:[#allocation2 + $0xd9] sm:$0xff] }
  0x3c   : > { %v2761_v34 = vld [vmem:[#allocation2 + $0xe0] sm:$0xff]  ;;  %v374_v37 = vld [vmem:[#allocation2 + $0xb1] sm:$0xff]  ;;  %v1840_v40 = vld [vmem:[%s3657_s1 + $0x8] sm:$0xff] }
  0x3d   : > { %451 = vrot.lane.b32.xlu0 %v373_v21, %s2453_s16  ;;  %445 = vrot.lane.b32.xlu1 %v2736_v28, %s2453_s16  ;;  %346 = vst.msk [vmem:[#allocation3 + $0x130] sm:$0xff] %vm142_vm0, %v2761_v34  ;;  %v2768_v35 = vld [vmem:[#allocation2 + $0x120] sm:$0xff]  ;;  %v2774_v38 = vld [vmem:[#allocation2 + $0xf8] sm:$0xff]  ;;  %v376_v44 = vld [vmem:[#allocation2 + $0xc9] sm:$0xff] }
  0x3e   : > { %351 = vst.msk [vmem:[#allocation3 + $0x180] sm:$0xff] %vm142_vm0, %v2768_v35  ;;  %348 = vst.msk [vmem:[#allocation3 + $0x150] sm:$0xff] %vm142_vm0, %v2774_v38  ;;  %v1839_v39 = vld [vmem:[%s3657_s1] sm:$0xff]  ;;  %v2787_v42 = vld [vmem:[#allocation2 + $0x138] sm:$0xff] }
  0x3f   : > { %v2383_v41 = vpack.c.bf16 %v1840_v40, %v1839_v39  ;;  %v2789_v43 = vld [vmem:[#allocation2 + $0xf1] sm:$0xff]  ;;  %353 = vst.msk [vmem:[#allocation3 + $0x1a0] sm:$0xff] %vm142_vm0, %v2787_v42  ;;  %v2812_v51 = vld [vmem:[#allocation2 + $0x109] sm:$0xff]  ;;  %v2814_v52 = vld [vmem:[#allocation2 + $0xe1] sm:$0xff] }
  0x40   : > { %v2794_v46 = vld [vmem:[#allocation2 + $0x110] sm:$0xff]  ;;  %v2818_v53 = vld [vmem:[#allocation2 + $0x128] sm:$0xff]  ;;  %v2822_v54 = vld [vmem:[#allocation2 + $0x7a] sm:$0xff] }
  0x41   : > { %455 = vrot.lane.b32.xlu0 %v375_v32, %s2453_s16  ;;  %449 = vrot.lane.b32.xlu1 %v2757_v33, %s2453_s16  ;;  %350 = vst.msk [vmem:[#allocation3 + $0x170] sm:$0xff] %vm142_vm0, %v2794_v46  ;;  %v2810_v50 = vld [vmem:[#allocation2 + $0x150] sm:$0xff]  ;;  %352 = vst.msk [vmem:[#allocation3 + $0x190] sm:$0xff] %vm142_vm0, %v2818_v53  ;;  %v1843_v57 = vld [vmem:[%s3657_s1 + $0x20] sm:$0xff] }
  0x42   : > { %2384 = vmatpush1.bf16.msra.mxu0 %v2383_v41  ;;  %2418 = vmatpush1.bf16.msra.mxu1 %v2383_v41  ;;  %355 = vst.msk [vmem:[#allocation3 + $0x1c0] sm:$0xff] %vm142_vm0, %v2810_v50  ;;  %v1844_v58 = vld [vmem:[%s3657_s1 + $0x28] sm:$0xff]  ;;  %1749 = vst.msk [vmem:[#allocation3 + $0x68] sm:$0xff] %vm142_vm0, %v2822_v54  ;;  %v2838_v14 = vld [vmem:[#allocation2 + $0xf9] sm:$0xff] }
  0x43   : > { %2385 = vmatprep.subr.bf16.mxu0 %v2454_v45  ;;  %2410 = vmatprep.subr.bf16.mxu1 %v2454_v45  ;;  %v383_v12 = vld [vmem:[#allocation2 + $0x121] sm:$0xff]  ;;  %v2389_v21 = vpack.c.bf16 %v1844_v58, %v1843_v57  ;;  %v1846_v39 = vld [vmem:[%s3657_s1 + $0x38] sm:$0xff]  ;;  %v384_v58 = vld [vmem:[#allocation2 + $0x129] sm:$0xff] }
  0x44   : > { %v2840_v32 = vld [vmem:[#allocation2 + $0x140] sm:$0xff]  ;;  %v387_v57 = vld [vmem:[#allocation2 + $0x151] sm:$0xff] }
  0x45   : > { %459 = vrot.lane.b32.xlu0 %v2770_v36, %s2453_s16  ;;  %453 = vrot.lane.b32.xlu1 %v374_v37, %s2453_s16  ;;  %354 = vst.msk [vmem:[#allocation3 + $0x1b0] sm:$0xff] %vm142_vm0, %v2840_v32  ;;  %v1845_v37 = vld [vmem:[%s3657_s1 + $0x30] sm:$0xff]  ;;  %v385_v41 = vld [vmem:[#allocation2 + $0x139] sm:$0xff] }
  0x46   : > { %2387 = vmatpush1.bf16.msra.mxu0 %v2386_v49  ;;  %2419 = vmatpush1.bf16.msra.mxu1 %v2386_v49  ;;  %v2392_v40 = vpack.c.bf16 %v1846_v39, %v1845_v37  ;;  %v2395_v49 = vpack.c.bf16 %v1848_v48, %v1847_v47  ;;  %v386_v39 = vld [vmem:[#allocation2 + $0x141] sm:$0xff] }
  0x47   : > { %2388 = vmatprep.subr.bf16.mxu0 %v2454_v45  ;;  %2411 = vmatprep.subr.bf16.mxu1 %v2454_v45  ;;  %v1131_v48 = vld [vmem:[#allocation2 + $0x1a] sm:$0xff] }
  0x49   : > { %463 = vrot.lane.b32.xlu0 %v2789_v43, %s2453_s16  ;;  %457 = vrot.lane.b32.xlu1 %v376_v44, %s2453_s16  ;;  %v2853_v44 = vld [vmem:[#allocation2 + $0x111] sm:$0xff] }
  0x4a   : > { %2390 = vmatpush1.bf16.msra.mxu0 %v2389_v21  ;;  %2420 = vmatpush1.bf16.msra.mxu1 %v2389_v21  ;;  %v1850_v21 = vld [vmem:[%s3657_s1 + $0x58] sm:$0xff] }
  0x4b   : > { %2391 = vmatprep.subr.bf16.mxu0 %v2454_v45  ;;  %2412 = vmatprep.subr.bf16.mxu1 %v2454_v45 }
  0x4d   : > { %467 = vrot.lane.b32.xlu0 %v2812_v51, %s2453_s16  ;;  %461 = vrot.lane.b32.xlu1 %v2814_v52, %s2453_s16 }
  0x4e   : > { %2393 = vmatpush1.bf16.msra.mxu0 %v2392_v40  ;;  %2421 = vmatpush1.bf16.msra.mxu1 %v2392_v40  ;;  %v1851_v40 = vld [vmem:[%s3657_s1 + $0x60] sm:$0xff] }
  0x4f   : > { %2394 = vmatprep.subr.bf16.mxu0 %v2454_v45  ;;  %2413 = vmatprep.subr.bf16.mxu1 %v2454_v45 }
  0x51   : > { %471 = vrot.lane.b32.xlu0 %v383_v12, %s2453_s16  ;;  %465 = vrot.lane.b32.xlu1 %v2838_v14, %s2453_s16  ;;  %v1849_v12 = vld [vmem:[%s3657_s1 + $0x50] sm:$0xff] }
  0x52   : > { %2396 = vmatpush1.bf16.msra.mxu0 %v2395_v49  ;;  %2422 = vmatpush1.bf16.msra.mxu1 %v2395_v49  ;;  %v2398_v37 = vpack.c.bf16 %v1850_v21, %v1849_v12  ;;  %v552_v49 = vld [vmem:[#allocation2 + $0x2] sm:$0xff] }
  0x53   : > { %2397 = vmatprep.subr.bf16.mxu0 %v2454_v45  ;;  %2414 = vmatprep.subr.bf16.mxu1 %v2454_v45  ;;  %v2899_v12 = vld [vmem:[#allocation2 + $0x82] sm:$0xff] }
  0x54   : > { %v1855_v21 = vld [vmem:[%s3657_s1 + $0x80] sm:$0xff]  ;;  %1750 = vst.msk [vmem:[#allocation3 + $0x78] sm:$0xff] %vm142_vm0, %v2899_v12 }
  0x55   : > { %475 = vrot.lane.b32.xlu0 %v385_v41, %s2453_s16  ;;  %469 = vrot.lane.b32.xlu1 %v2853_v44, %s2453_s16  ;;  %v1852_v41 = vld [vmem:[%s3657_s1 + $0x68] sm:$0xff] }
  0x56   : > { %2399 = vmatpush1.bf16.msra.mxu0 %v2398_v37  ;;  %2423 = vmatpush1.bf16.msra.mxu1 %v2398_v37  ;;  %v2401_v47 = vpack.c.bf16 %v1852_v41, %v1851_v40  ;;  %v1856_v37 = vld [vmem:[%s3657_s1 + $0x88] sm:$0xff]  ;;  %v1776_v41 = vld [vmem:[#allocation3 + $0x8] sm:$0xff] }
  0x57   : > { %2400 = vmatprep.subr.bf16.mxu0 %v2454_v45  ;;  %2415 = vmatprep.subr.bf16.mxu1 %v2454_v45  ;;  %v553_v40 = vld [vmem:[#allocation2 + $0xa] sm:$0xff] }
  0x58   : > { %2347 = vmatprep.mubr.msk.f32.mxu0 %vm142_vm0, %v1776_v41 }
  0x59   : > { %479 = vrot.lane.b32.xlu0 %v387_v57, %s2453_s16  ;;  %473 = vrot.lane.b32.xlu1 %v384_v58, %s2453_s16  ;;  %v1853_v57 = vld [vmem:[%s3657_s1 + $0x70] sm:$0xff]  ;;  %v1854_v58 = vld [vmem:[%s3657_s1 + $0x78] sm:$0xff] }
  0x5a   : > { %2402 = vmatpush1.bf16.msra.mxu0 %v2401_v47  ;;  %2424 = vmatpush1.bf16.msra.mxu1 %v2401_v47  ;;  %v1132_v47 = vld [vmem:[#allocation2 + $0x22] sm:$0xff] }
  0x5b   : > { %2403 = vmatprep.subr.bf16.mxu0 %v2454_v45  ;;  %2416 = vmatprep.subr.bf16.mxu1 %v2454_v45 }
  0x5d   : > { %809 = vrot.lane.b32.xlu0 %v2623_v61, %s2455_s21  ;;  %477 = vrot.lane.b32.xlu1 %v386_v39, %s2453_s16  ;;  %v2404_v61 = vpack.c.bf16 %v1854_v58, %v1853_v57  ;;  %v2407_v39 = vpack.c.bf16 %v1856_v37, %v1855_v21 }
  0x5f   : > { %2405 = vmatpush1.bf16.msra.mxu0 %v2404_v61  ;;  %2425 = vmatpush1.bf16.msra.mxu1 %v2404_v61 }
  0x60   : > { %2406 = vmatprep.subr.bf16.mxu0 %v2454_v45  ;;  %2417 = vmatprep.subr.bf16.mxu1 %v2454_v45 }
  0x61   : > { %1195 = vrot.lane.b32.xlu0 %v1131_v48, %s2456_s26  ;;  %616 = vrot.lane.b32.xlu1 %v552_v49, %s2457_s27  ;;  %v3002_v49 = vld [vmem:[#allocation2 + $0x10a] sm:$0xff] }
  0x62   : > { %1761 = vst.msk [vmem:[#allocation3 + $0x128] sm:$0xff] %vm142_vm0, %v3002_v49 }
  0x63   : > { %2408 = vmatpush1.bf16.msra.mxu0 %v2407_v39  ;;  %2426 = vmatpush1.bf16.msra.mxu1 %v2407_v39 }
  0x65   : > { %1389 = vrot.lane.b32.xlu0 %v2640_v0, %s2458_s4  ;;  %1002 = vrot.lane.b32.xlu1 %v2606_v56, %s2459_s5  ;;  %v2929_v56 = vld [vmem:[#allocation2 + $0xf2] sm:$0xff] }
  0x66   : > { %1759 = vst.msk [vmem:[#allocation3 + $0x108] sm:$0xff] %vm142_vm0, %v2929_v56 }
  0x69   : > { %1582 = vrot.lane.b32.xlu0 %v2604_v55, %s2460_s6  ;;  %618 = vrot.lane.b32.xlu1 %v553_v40, %s2457_s27 }
  0x6d   : > { %1197 = vrot.lane.b32.xlu0 %v1132_v47, %s2456_s26  ;;  %811 = vrot.lane.b32.xlu1 %v2646_v3, %s2455_s21  ;;  %v2937_v3 = vld [vmem:[#allocation2 + $0x92] sm:$0xff] }
  0x6e   : > { %1751 = vst.msk [vmem:[#allocation3 + $0x88] sm:$0xff] %vm142_vm0, %v2937_v3 }
  0x71   : > { %1391 = vrot.lane.b32.xlu0 %v2650_v4, %s2458_s4  ;;  %1004 = vrot.lane.b32.xlu1 %v2620_v60, %s2459_s5 }
  0x75   : > { %1584 = vrot.lane.b32.xlu0 %v2634_v63, %s2460_s6  ;;  %620 = vrot.lane.b32.xlu1 %v1131_v48, %s2457_s27 }
  0x79   : > { %1199 = vrot.lane.b32.xlu0 %v2652_v5, %s2456_s26  ;;  %813 = vrot.lane.b32.xlu1 %v2640_v0, %s2455_s21 }
  0x7d   : > { %1393 = vrot.lane.b32.xlu0 %v2654_v6, %s2458_s4  ;;  %1006 = vrot.lane.b32.xlu1 %v2604_v55, %s2459_s5  ;;  %v2960_v55 = vld [vmem:[#allocation2 + $0xfa] sm:$0xff] }
  0x7e   : > { %1760 = vst.msk [vmem:[#allocation3 + $0x118] sm:$0xff] %vm142_vm0, %v2960_v55 }
  0x80   : > { %v424_v60 = vpop.permute.xlu0 %423 }
  0x81   : > { %1586 = vrot.lane.b32.xlu0 %v2618_v59, %s2460_s6  ;;  %622 = vrot.lane.b32.xlu1 %v1132_v47, %s2457_s27  ;;  %520 = vst.msk [vmem:[#allocation3] sm:$0xff] %vm519_vm2, %v424_v60  ;;  %v3048_v47 = vld [vmem:[#allocation2 + $0x112] sm:$0xff]  ;;  %v1147_v60 = vld [vmem:[#allocation2 + $0xda] sm:$0xff] }
  0x82   : > { %1762 = vst.msk [vmem:[#allocation3 + $0x138] sm:$0xff] %vm142_vm0, %v3048_v47 }
  0x85   : > { %1201 = vrot.lane.b32.xlu0 %v2662_v9, %s2456_s26  ;;  %815 = vrot.lane.b32.xlu1 %v2650_v4, %s2455_s21 }
  0x89   : > { %1395 = vrot.lane.b32.xlu0 %v2664_v10, %s2458_s4  ;;  %1008 = vrot.lane.b32.xlu1 %v2634_v63, %s2459_s5  ;;  %v2969_v63 = vld [vmem:[#allocation2 + $0x9a] sm:$0xff] }
  0x8a   : > { %1752 = vst.msk [vmem:[#allocation3 + $0x98] sm:$0xff] %vm142_vm0, %v2969_v63 }
  0x8d   : > { %1588 = vrot.lane.b32.xlu0 %v2644_v2, %s2460_s6  ;;  %624 = vrot.lane.b32.xlu1 %v2652_v5, %s2457_s27 }
  0x91   : > { %1203 = vrot.lane.b32.xlu0 %v2666_v11, %s2456_s26  ;;  %817 = vrot.lane.b32.xlu1 %v2654_v6, %s2455_s21 }
  0x92   : > { %v426_v0 = vpop.permute.xlu0 %425 }
  0x93   : > { %521 = vst.msk [vmem:[#allocation3 + $0x10] sm:$0xff] %vm519_vm2, %v426_v0 }
  0x95   : > { %1397 = vrot.lane.b32.xlu0 %v2678_v13, %s2458_s4  ;;  %1010 = vrot.lane.b32.xlu1 %v2618_v59, %s2459_s5 }
  0x99   : > { %1590 = vrot.lane.b32.xlu0 %v2632_v62, %s2460_s6  ;;  %626 = vrot.lane.b32.xlu1 %v2662_v9, %s2457_s27 }
  0x9b   : > { %v432_v4 = vpop.permute.xlu0 %431  ;;  %v428_v5 = vpop.permute.xlu1 %427 }
  0x9c   : > { %524 = vst.msk [vmem:[#allocation3 + $0x40] sm:$0xff] %vm519_vm2, %v432_v4  ;;  %522 = vst.msk [vmem:[#allocation3 + $0x20] sm:$0xff] %vm519_vm2, %v428_v5 }
  0x9d   : > { %1205 = vrot.lane.b32.xlu0 %v2688_v15, %s2456_s26  ;;  %819 = vrot.lane.b32.xlu1 %v2664_v10, %s2455_s21 }
  0x9f   : > { %v436_v59 = vpop.permute.xlu0 %435  ;;  %v430_v6 = vpop.permute.xlu1 %429 }
  0xa0   : > { %526 = vst.msk [vmem:[#allocation3 + $0x60] sm:$0xff] %vm519_vm2, %v436_v59  ;;  %523 = vst.msk [vmem:[#allocation3 + $0x30] sm:$0xff] %vm519_vm2, %v430_v6 }
  0xa1   : > { %1399 = vrot.lane.b32.xlu0 %v2690_v16, %s2458_s4  ;;  %1012 = vrot.lane.b32.xlu1 %v2644_v2, %s2459_s5 }
  0xa3   : > { %v440_v9 = vpop.permute.xlu0 %439  ;;  %v434_v45 = vpop.permute.xlu1 %433 }
  0xa4   : > { %528 = vst.msk [vmem:[#allocation3 + $0x80] sm:$0xff] %vm519_vm2, %v440_v9  ;;  %525 = vst.msk [vmem:[#allocation3 + $0x50] sm:$0xff] %vm519_vm2, %v434_v45 }
  0xa5   : > { %1592 = vrot.lane.b32.xlu0 %v2660_v8, %s2460_s6  ;;  %628 = vrot.lane.b32.xlu1 %v2666_v11, %s2457_s27  ;;  %v3012_v11 = vld [vmem:[#allocation2 + $0xaa] sm:$0xff] }
  0xa6   : > { %1753 = vst.msk [vmem:[#allocation3 + $0xa8] sm:$0xff] %vm142_vm0, %v3012_v11 }
  0xa7   : > { %v444_v10 = vpop.permute.xlu0 %443  ;;  %v438_v48 = vpop.permute.xlu1 %437 }
  0xa8   : > { %530 = vst.msk [vmem:[#allocation3 + $0xa0] sm:$0xff] %vm519_vm2, %v444_v10  ;;  %527 = vst.msk [vmem:[#allocation3 + $0x70] sm:$0xff] %vm519_vm2, %v438_v48 }
  0xa9   : > { %1207 = vrot.lane.b32.xlu0 %v2698_v18, %s2456_s26  ;;  %821 = vrot.lane.b32.xlu1 %v2678_v13, %s2455_s21 }
  0xab   : > { %v448_v2 = vpop.permute.xlu0 %447  ;;  %v442_v57 = vpop.permute.xlu1 %441 }
  0xac   : > { %532 = vst.msk [vmem:[#allocation3 + $0xc0] sm:$0xff] %vm519_vm2, %v448_v2  ;;  %529 = vst.msk [vmem:[#allocation3 + $0x90] sm:$0xff] %vm519_vm2, %v442_v57  ;;  %v3091_v2 = vld [vmem:[#allocation2 + $0x122] sm:$0xff] }
  0xad   : > { %1401 = vrot.lane.b32.xlu0 %v2694_v17, %s2458_s4  ;;  %1014 = vrot.lane.b32.xlu1 %v2632_v62, %s2459_s5  ;;  %v3032_v62 = vld [vmem:[#allocation2 + $0xc2] sm:$0xff]  ;;  %1763 = vst.msk [vmem:[#allocation3 + $0x148] sm:$0xff] %vm142_vm0, %v3091_v2 }
  0xaf   : > { %v452_v13 = vpop.permute.xlu0 %451  ;;  %v446_v58 = vpop.permute.xlu1 %445 }
  0xb0   : > { %534 = vst.msk [vmem:[#allocation3 + $0xe0] sm:$0xff] %vm519_vm2, %v452_v13  ;;  %531 = vst.msk [vmem:[#allocation3 + $0xb0] sm:$0xff] %vm519_vm2, %v446_v58 }
  0xb1   : > { %1594 = vrot.lane.b32.xlu0 %v2642_v1, %s2460_s6  ;;  %630 = vrot.lane.b32.xlu1 %v2688_v15, %s2457_s27 }
  0xb3   : > { %v456_v61 = vpop.permute.xlu0 %455  ;;  %v450_v21 = vpop.permute.xlu1 %449 }
  0xb4   : > { %536 = vst.msk [vmem:[#allocation3 + $0x100] sm:$0xff] %vm519_vm2, %v456_v61  ;;  %533 = vst.msk [vmem:[#allocation3 + $0xd0] sm:$0xff] %vm519_vm2, %v450_v21 }
  0xb5   : > { %1209 = vrot.lane.b32.xlu0 %v2730_v25, %s2456_s26  ;;  %823 = vrot.lane.b32.xlu1 %v2690_v16, %s2455_s21 }
  0xb7   : > { %v460_v37 = vpop.permute.xlu0 %459  ;;  %v454_v39 = vpop.permute.xlu1 %453 }
  0xb8   : > { %538 = vst.msk [vmem:[#allocation3 + $0x120] sm:$0xff] %vm519_vm2, %v460_v37  ;;  %535 = vst.msk [vmem:[#allocation3 + $0xf0] sm:$0xff] %vm519_vm2, %v454_v39  ;;  %v1778_v39 = vld [vmem:[#allocation3 + $0x18] sm:$0xff] }
  0xb9   : > { %648 = vrot.lane.b32.xlu0 %v3032_v62, %s2457_s27  ;;  %1016 = vrot.lane.b32.xlu1 %v2660_v8, %s2459_s5 }
  0xbb   : > { %v464_v15 = vpop.permute.xlu0 %463  ;;  %v458_v40 = vpop.permute.xlu1 %457 }
  0xbc   : > { %540 = vst.msk [vmem:[#allocation3 + $0x140] sm:$0xff] %vm519_vm2, %v464_v15  ;;  %537 = vst.msk [vmem:[#allocation3 + $0x110] sm:$0xff] %vm519_vm2, %v458_v40 }
  0xbd   : > { %825 = vrot.lane.b32.xlu0 %v2694_v17, %s2455_s21  ;;  %632 = vrot.lane.b32.xlu1 %v2698_v18, %s2457_s27  ;;  %v3062_v18 = vld [vmem:[#allocation2 + $0xb2] sm:$0xff] }
  0xbe   : > { %1754 = vst.msk [vmem:[#allocation3 + $0xb8] sm:$0xff] %vm142_vm0, %v3062_v18 }
  0xbf   : > { %v468_v16 = vpop.permute.xlu0 %467  ;;  %v462_v41 = vpop.permute.xlu1 %461 }
  0xc0   : > { %542 = vst.msk [vmem:[#allocation3 + $0x160] sm:$0xff] %vm519_vm2, %v468_v16  ;;  %539 = vst.msk [vmem:[#allocation3 + $0x130] sm:$0xff] %vm519_vm2, %v462_v41 }
  0xc1   : > { %1596 = vrot.lane.b32.xlu0 %v2736_v28, %s2460_s6  ;;  %1403 = vrot.lane.b32.xlu1 %v2712_v22, %s2458_s4 }
  0xc3   : > { %v472_v8 = vpop.permute.xlu0 %471  ;;  %v466_v17 = vpop.permute.xlu1 %465 }
  0xc4   : > { %544 = vst.msk [vmem:[#allocation3 + $0x180] sm:$0xff] %vm519_vm2, %v472_v8  ;;  %541 = vst.msk [vmem:[#allocation3 + $0x150] sm:$0xff] %vm519_vm2, %v466_v17  ;;  %v1780_v17 = vld [vmem:[#allocation3 + $0x28] sm:$0xff] }
  0xc5   : > { %1034 = vrot.lane.b32.xlu0 %v2770_v36, %s2459_s5  ;;  %841 = vrot.lane.b32.xlu1 %v2732_v26, %s2455_s21  ;;  %v3071_v36 = vld [vmem:[#allocation2 + $0xca] sm:$0xff] }
  0xc7   : > { %v476_v0 = vpop.permute.xlu0 %475  ;;  %v470_v4 = vpop.permute.xlu1 %469 }
  0xc8   : > { %546 = vst.msk [vmem:[#allocation3 + $0x1a0] sm:$0xff] %vm519_vm2, %v476_v0  ;;  %543 = vst.msk [vmem:[#allocation3 + $0x170] sm:$0xff] %vm519_vm2, %v470_v4 }
  0xc9   : > { %1227 = vrot.lane.b32.xlu0 %v1147_v60, %s2456_s26  ;;  %1018 = vrot.lane.b32.xlu1 %v2642_v1, %s2459_s5 }
  0xcb   : > { %v480_v5 = vpop.permute.xlu0 %479  ;;  %v474_v59 = vpop.permute.xlu1 %473 }
  0xcc   : > { %548 = vst.msk [vmem:[#allocation3 + $0x1c0] sm:$0xff] %vm519_vm2, %v480_v5  ;;  %545 = vst.msk [vmem:[#allocation3 + $0x190] sm:$0xff] %vm519_vm2, %v474_v59 }
  0xcd   : > { %650 = vrot.lane.b32.xlu0 %v3071_v36, %s2457_s27  ;;  %1211 = vrot.lane.b32.xlu1 %v2822_v54, %s2456_s26 }
  0xcf   : > { %v810_v6 = vpop.permute.xlu0 %809  ;;  %v478_v9 = vpop.permute.xlu1 %477 }
  0xd0   : > { %547 = vst.msk [vmem:[#allocation3 + $0x1b0] sm:$0xff] %vm519_vm2, %v478_v9  ;;  %v3162_v9 = vld [vmem:[#allocation2 + $0x13a] sm:$0xff] }
  0xd1   : > { %1421 = vrot.lane.b32.xlu0 %v2742_v29, %s2458_s4  ;;  %634 = vrot.lane.b32.xlu1 %v2730_v25, %s2457_s27  ;;  %v1808_v25 = vld [vmem:[#allocation3 + $0x108] sm:$0xff]  ;;  %1765 = vst.msk [vmem:[#allocation3 + $0x168] sm:$0xff] %vm142_vm0, %v3162_v9 }
  0xd2   : > { %2363 = vmatprep.mubr.msk.f32.mxu1 %vm142_vm0, %v1808_v25 }
  0xd3   : > { %v1196_v1 = vpop.permute.xlu0 %1195  ;;  %v617_v45 = vpop.permute.xlu1 %616 }
  0xd4   : > { %713 = vst.msk [vmem:[#allocation3] sm:$0xff] %vm712_vm3, %v617_v45 }
  0xd5   : > { %843 = vrot.lane.b32.xlu0 %v2761_v34, %s2455_s21  ;;  %1405 = vrot.lane.b32.xlu1 %v2700_v19, %s2458_s4  ;;  %906 = vst.msk [vmem:[#allocation3] sm:$0xff] %vm905_vm4, %v810_v6  ;;  %v1782_v6 = vld [vmem:[#allocation3 + $0x38] sm:$0xff] }
  0xd7   : > { %v1390_v10 = vpop.permute.xlu0 %1389  ;;  %v1003_v48 = vpop.permute.xlu1 %1002 }
  0xd8   : > { %1099 = vst.msk [vmem:[#allocation3] sm:$0xff] %vm1098_vm5, %v1003_v48 }
  0xd9   : > { %1292 = vst.msk [vmem:[#allocation3] sm:$0xff] %vm1291_vm6, %v1196_v1  ;;  %1614 = vrot.lane.b32.xlu0 %v2789_v43, %s2460_s6  ;;  %827 = vrot.lane.b32.xlu1 %v2712_v22, %s2455_s21  ;;  %v1148_v22 = vld [vmem:[#allocation2 + $0xe2] sm:$0xff] }
  0xda   : > { %1486 = vst.msk [vmem:[#allocation3] sm:$0xff] %vm1485_vm7, %v1390_v10 }
  0xdb   : > { %v1583_v34 = vpop.permute.xlu0 %1582  ;;  %v619_v57 = vpop.permute.xlu1 %618 }
  0xdc   : > { %1679 = vst.msk [vmem:[#allocation3] sm:$0xff] %vm1678_vm8, %v1583_v34  ;;  %v1784_v34 = vld [vmem:[#allocation3 + $0x48] sm:$0xff] }
  0xdd   : > { %714 = vst.msk [vmem:[#allocation3 + $0x10] sm:$0xff] %vm712_vm3, %v619_v57  ;;  %1036 = vrot.lane.b32.xlu0 %v2814_v52, %s2459_s5  ;;  %1598 = vrot.lane.b32.xlu1 %v2658_v7, %s2460_s6  ;;  %v225_v57 = vld [vmem:[%s2554_s15 + $0xd8] sm:$0xff] }
  0xdf   : > { %v1198_v13 = vpop.permute.xlu0 %1197  ;;  %v812_v58 = vpop.permute.xlu1 %811 }
  0xe0   : > { %907 = vst.msk [vmem:[#allocation3 + $0x10] sm:$0xff] %vm905_vm4, %v812_v58  ;;  %v3189_v58 = vld [vmem:[#allocation2 + $0x142] sm:$0xff] }
  0xe1   : > { %1229 = vrot.lane.b32.xlu0 %v1148_v22, %s2456_s26  ;;  %1020 = vrot.lane.b32.xlu1 %v2736_v28, %s2459_s5  ;;  %1766 = vst.msk [vmem:[#allocation3 + $0x178] sm:$0xff] %vm142_vm0, %v3189_v58 }
  0xe3   : > { %v1392_v61 = vpop.permute.xlu0 %1391  ;;  %v1005_v21 = vpop.permute.xlu1 %1004  ;;  %v1775_v37 = vld [vmem:[#allocation3] sm:$0xff] }
  0xe4   : > { %1100 = vst.msk [vmem:[#allocation3 + $0x10] sm:$0xff] %vm1098_vm5, %v1005_v21  ;;  %2018 = vmatmul.mubr.f32.vlgmr.msra.gmra.mrb[0].mxu0 %v1775_v37 }
  0xe5   : > { %1293 = vst.msk [vmem:[#allocation3 + $0x10] sm:$0xff] %vm1291_vm6, %v1198_v13  ;;  %652 = vrot.lane.b32.xlu0 %v1147_v60, %s2457_s27  ;;  %1213 = vrot.lane.b32.xlu1 %v2899_v12, %s2456_s26  ;;  %v3131_v60 = vld [vmem:[#allocation2 + $0x12a] sm:$0xff] }
  0xe6   : > { %1487 = vst.msk [vmem:[#allocation3 + $0x10] sm:$0xff] %vm1485_vm7, %v1392_v61  ;;  %2348 = vmatprep.mubr.msk.f32.mxu0 %vm142_vm0, %v1778_v39  ;;  %v1786_v39 = vld [vmem:[#allocation3 + $0x58] sm:$0xff] }
  0xe7   : > { %v1585_v52 = vpop.permute.xlu0 %1584  ;;  %v621_v28 = vpop.permute.xlu1 %620  ;;  %1764 = vst.msk [vmem:[#allocation3 + $0x158] sm:$0xff] %vm142_vm0, %v3131_v60 }
  0xe8   : > { %1680 = vst.msk [vmem:[#allocation3 + $0x10] sm:$0xff] %vm1678_vm8, %v1585_v52  ;;  %v226_v52 = vld [vmem:[%s2554_s15 + $0xe0] sm:$0xff] }
  0xe9   : > { %715 = vst.msk [vmem:[#allocation3 + $0x20] sm:$0xff] %vm712_vm3, %v621_v28  ;;  %1423 = vrot.lane.b32.xlu0 %v2774_v38, %s2458_s4  ;;  %636 = vrot.lane.b32.xlu1 %v2822_v54, %s2457_s27  ;;  %v258_v28 = vmax.f32 %v226_v52, 0.0 }
  0xeb   : > { %v1200_v15 = vpop.permute.xlu0 %1199  ;;  %v814_v40 = vpop.permute.xlu1 %813  ;;  %291 = vst.msk [vmem:[#allocation2 + $0x169] sm:$0xff] %vm142_vm0, %v258_v28 }
  0xec   : > { %908 = vst.msk [vmem:[#allocation3 + $0x20] sm:$0xff] %vm905_vm4, %v814_v40 }
  0xed   : > { %845 = vrot.lane.b32.xlu0 %v2742_v29, %s2455_s21  ;;  %1407 = vrot.lane.b32.xlu1 %v2716_v24, %s2458_s4 }
  0xef   : > { %v1394_v16 = vpop.permute.xlu0 %1393  ;;  %v1007_v41 = vpop.permute.xlu1 %1006  ;;  %v1777_v8 = vld [vmem:[#allocation3 + $0x10] sm:$0xff] }
  0xf0   : > { %1101 = vst.msk [vmem:[#allocation3 + $0x20] sm:$0xff] %vm1098_vm5, %v1007_v41  ;;  %2023 = vmatmul.mubr.f32.gmra.mrb[2].mxu0 %v1777_v8 }
  0xf1   : > { %1294 = vst.msk [vmem:[#allocation3 + $0x20] sm:$0xff] %vm1291_vm6, %v1200_v15  ;;  %1616 = vrot.lane.b32.xlu0 %v2838_v14, %s2460_s6  ;;  %829 = vrot.lane.b32.xlu1 %v2700_v19, %s2455_s21 }
  0xf2   : > { %1488 = vst.msk [vmem:[#allocation3 + $0x20] sm:$0xff] %vm1485_vm7, %v1394_v16  ;;  %2349 = vmatprep.mubr.msk.f32.mxu0 %vm142_vm0, %v1780_v17  ;;  %v3231_v41 = vld [vmem:[#allocation2 + $0x168] sm:$0xff] }
  0xf3   : > { %v1587_v29 = vpop.permute.xlu0 %1586  ;;  %v623_v54 = vpop.permute.xlu1 %622  ;;  %357 = vst.msk [vmem:[#allocation3 + $0x1e0] sm:$0xff] %vm142_vm0, %v3231_v41 }
  0xf4   : > { %1681 = vst.msk [vmem:[#allocation3 + $0x20] sm:$0xff] %vm1678_vm8, %v1587_v29  ;;  %v1788_v29 = vld [vmem:[#allocation3 + $0x68] sm:$0xff] }
  0xf5   : > { %716 = vst.msk [vmem:[#allocation3 + $0x30] sm:$0xff] %vm712_vm3, %v623_v54  ;;  %1038 = vrot.lane.b32.xlu0 %v2789_v43, %s2459_s5  ;;  %1600 = vrot.lane.b32.xlu1 %v2757_v33, %s2460_s6  ;;  %v227_v54 = vld [vmem:[%s2554_s15 + $0xe8] sm:$0xff] }
  0xf7   : > { %v1202_v19 = vpop.permute.xlu0 %1201  ;;  %v816_v0 = vpop.permute.xlu1 %815 }
  0xf8   : > { %909 = vst.msk [vmem:[#allocation3 + $0x30] sm:$0xff] %vm905_vm4, %v816_v0  ;;  %v3243_v0 = vld [vmem:[#allocation2 + $0xb1] sm:$0xff] }
  0xf9   : > { %1231 = vrot.lane.b32.xlu0 %v2929_v56, %s2456_s26  ;;  %1022 = vrot.lane.b32.xlu1 %v2658_v7, %s2459_s5 }
  0xfb   : > { %v1396_v4 = vpop.permute.xlu0 %1395  ;;  %v1009_v5 = vpop.permute.xlu1 %1008  ;;  %v1779_v59 = vld [vmem:[#allocation3 + $0x20] sm:$0xff] }
  0xfc   : > { %1102 = vst.msk [vmem:[#allocation3 + $0x30] sm:$0xff] %vm1098_vm5, %v1009_v5  ;;  %2028 = vmatmul.mubr.f32.gmra.mrb[4].mxu0 %v1779_v59 }
  0xfd   : > { %1295 = vst.msk [vmem:[#allocation3 + $0x30] sm:$0xff] %vm1291_vm6, %v1202_v19  ;;  %654 = vrot.lane.b32.xlu0 %v1148_v22, %s2457_s27  ;;  %1215 = vrot.lane.b32.xlu1 %v2937_v3, %s2456_s26  ;;  %v259_v19 = vmax.f32 %v227_v54, 0.0 }
  0xfe   : > { %1489 = vst.msk [vmem:[#allocation3 + $0x30] sm:$0xff] %vm1485_vm7, %v1396_v4  ;;  %2350 = vmatprep.mubr.msk.f32.mxu0 %vm142_vm0, %v1782_v6 }
  0xff   : > { %v1589_v43 = vpop.permute.xlu0 %1588  ;;  %v625_v7 = vpop.permute.xlu1 %624  ;;  %292 = vst.msk [vmem:[#allocation2 + $0x171] sm:$0xff] %vm142_vm0, %v259_v19 }
 0x100   : > { %1682 = vst.msk [vmem:[#allocation3 + $0x30] sm:$0xff] %vm1678_vm8, %v1589_v43 }
 0x101   : > { %717 = vst.msk [vmem:[#allocation3 + $0x40] sm:$0xff] %vm712_vm3, %v625_v7  ;;  %1425 = vrot.lane.b32.xlu0 %v2755_v31, %s2458_s4  ;;  %638 = vrot.lane.b32.xlu1 %v2899_v12, %s2457_s27  ;;  %v257_v12 = vmax.f32 %v225_v57, 0.0  ;;  %v228_v57 = vld [vmem:[%s2554_s15 + $0xf0] sm:$0xff] }
 0x103   : > { %v1204_v1 = vpop.permute.xlu0 %1203  ;;  %v818_v45 = vpop.permute.xlu1 %817  ;;  %290 = vst.msk [vmem:[#allocation2 + $0x159] sm:$0xff] %vm142_vm0, %v257_v12  ;;  %v260_v12 = vmax.f32 %v228_v57, 0.0  ;;  %v1532_v57 = vld [vmem:[#allocation2 + $0xd9] sm:$0xff] }
 0x104   : > { %910 = vst.msk [vmem:[#allocation3 + $0x40] sm:$0xff] %vm905_vm4, %v818_v45  ;;  %v1790_v45 = vld [vmem:[#allocation3 + $0x78] sm:$0xff] }
 0x105   : > { %847 = vrot.lane.b32.xlu0 %v2774_v38, %s2455_s21  ;;  %1409 = vrot.lane.b32.xlu1 %v2704_v20, %s2458_s4  ;;  %v3183_v38 = vld [vmem:[#allocation2 + $0xa9] sm:$0xff]  ;;  %293 = vst.msk [vmem:[#allocation2 + $0x181] sm:$0xff] %vm142_vm0, %v260_v12 }
 0x106   : > { %v3261_v6 = vld [vmem:[#allocation2 + $0x170] sm:$0xff] }
 0x107   : > { %v1398_v10 = vpop.permute.xlu0 %1397  ;;  %v1011_v48 = vpop.permute.xlu1 %1010  ;;  %v1781_v25 = vld [vmem:[#allocation3 + $0x30] sm:$0xff]  ;;  %358 = vst.msk [vmem:[#allocation3 + $0x1f0] sm:$0xff] %vm142_vm0, %v3261_v6 }
 0x108   : > { %1103 = vst.msk [vmem:[#allocation3 + $0x40] sm:$0xff] %vm1098_vm5, %v1011_v48  ;;  %2033 = vmatmul.mubr.f32.gmra.mrb[6].mxu0 %v1781_v25  ;;  %v1723_v25 = vld [vmem:[#allocation2 + $0xc2] sm:$0xff] }
 0x109   : > { %1296 = vst.msk [vmem:[#allocation3 + $0x40] sm:$0xff] %vm1291_vm6, %v1204_v1  ;;  %1618 = vrot.lane.b32.xlu0 %v2812_v51, %s2460_s6  ;;  %831 = vrot.lane.b32.xlu1 %v2716_v24, %s2455_s21 }
 0x10a   : > { %1490 = vst.msk [vmem:[#allocation3 + $0x40] sm:$0xff] %vm1485_vm7, %v1398_v10  ;;  %2351 = vmatprep.mubr.msk.f32.mxu0 %vm142_vm0, %v1784_v34  ;;  %v3202_v61 = vld [vmem:[#allocation2 + $0x158] sm:$0xff] }
 0x10b   : > { %v1591_v22 = vpop.permute.xlu0 %1590  ;;  %v627_v13 = vpop.permute.xlu1 %626  ;;  %356 = vst.msk [vmem:[#allocation3 + $0x1d0] sm:$0xff] %vm142_vm0, %v3202_v61  ;;  %v3218_v40 = vld [vmem:[#allocation2 + $0x152] sm:$0xff]  ;;  %v3249_v59 = vld [vmem:[#allocation2 + $0x15a] sm:$0xff]  ;;  %1755 = vst.msk [vmem:[#allocation3 + $0xc8] sm:$0xff] %vm142_vm0, %v1723_v25 }
 0x10c   : > { %1683 = vst.msk [vmem:[#allocation3 + $0x40] sm:$0xff] %vm1678_vm8, %v1591_v22 }
 0x10d   : > { %718 = vst.msk [vmem:[#allocation3 + $0x50] sm:$0xff] %vm712_vm3, %v627_v13  ;;  %1040 = vrot.lane.b32.xlu0 %v2838_v14, %s2459_s5  ;;  %1602 = vrot.lane.b32.xlu1 %v3183_v38, %s2460_s6  ;;  %v959_v13 = vld [vmem:[#allocation2 + $0x111] sm:$0xff] }
 0x10e   : > { %1767 = vst.msk [vmem:[#allocation3 + $0x188] sm:$0xff] %vm142_vm0, %v3218_v40  ;;  %1768 = vst.msk [vmem:[#allocation3 + $0x198] sm:$0xff] %vm142_vm0, %v3249_v59 }
 0x10f   : > { %v1206_v24 = vpop.permute.xlu0 %1205  ;;  %v820_v51 = vpop.permute.xlu1 %819 }
 0x110   : > { %911 = vst.msk [vmem:[#allocation3 + $0x50] sm:$0xff] %vm905_vm4, %v820_v51 }
 0x111   : > { %1233 = vrot.lane.b32.xlu0 %v2960_v55, %s2456_s26  ;;  %1024 = vrot.lane.b32.xlu1 %v2757_v33, %s2459_s5 }
 0x113   : > { %v1400_v14 = vpop.permute.xlu0 %1399  ;;  %v1013_v21 = vpop.permute.xlu1 %1012  ;;  %v1783_v37 = vld [vmem:[#allocation3 + $0x40] sm:$0xff] }
 0x114   : > { %1104 = vst.msk [vmem:[#allocation3 + $0x50] sm:$0xff] %vm1098_vm5, %v1013_v21  ;;  %2038 = vmatmul.mubr.f32.gmra.mrb[8].mxu0 %v1783_v37  ;;  %v229_v21 = vld [vmem:[%s2554_s15 + $0xf8] sm:$0xff]  ;;  %s2346_s15 = sshll.u32 %s3661_s10, 1 }
 0x115   : > { %1297 = vst.msk [vmem:[#allocation3 + $0x50] sm:$0xff] %vm1291_vm6, %v1206_v24  ;;  %656 = vrot.lane.b32.xlu0 %v2929_v56, %s2457_s27  ;;  %1217 = vrot.lane.b32.xlu1 %v2969_v63, %s2456_s26  ;;  %v3298_v24 = vld [vmem:[#allocation2 + $0xc1] sm:$0xff]  ;;  %v261_v52 = vmax.f32 %v229_v21, 0.0  ;;  %s141_s8 = scalar_lea.vmem %s3658_s2, %s2346_s15 }
 0x116   : > { %1491 = vst.msk [vmem:[#allocation3 + $0x50] sm:$0xff] %vm1485_vm7, %v1400_v14  ;;  %2352 = vmatprep.mubr.msk.f32.mxu0 %vm142_vm0, %v1786_v39  ;;  %v1792_v39 = vld [vmem:[#allocation3 + $0x88] sm:$0xff]  ;;  %v1726_v21 = vld [vmem:[#allocation2 + $0xe2] sm:$0xff] }
 0x117   : > { %v1593_v33 = vpop.permute.xlu0 %1592  ;;  %v629_v15 = vpop.permute.xlu1 %628  ;;  %294 = vst.msk [vmem:[#allocation2 + $0x189] sm:$0xff] %vm142_vm0, %v261_v52  ;;  %1758 = vst.msk [vmem:[#allocation3 + $0xf8] sm:$0xff] %vm142_vm0, %v1726_v21  ;;  %v1541_v52 = vld [vmem:[#allocation2 + $0x141] sm:$0xff] }
 0x118   : > { %1684 = vst.msk [vmem:[#allocation3 + $0x50] sm:$0xff] %vm1678_vm8, %v1593_v33  ;;  %v3312_v33 = vld [vmem:[#allocation2 + $0x172] sm:$0xff] }
 0x119   : > { %719 = vst.msk [vmem:[#allocation3 + $0x60] sm:$0xff] %vm712_vm3, %v629_v15  ;;  %1427 = vrot.lane.b32.xlu0 %v2794_v46, %s2458_s4  ;;  %640 = vrot.lane.b32.xlu1 %v2937_v3, %s2457_s27 }
 0x11a   : > { %1770 = vst.msk [vmem:[#allocation3 + $0x1b8] sm:$0xff] %vm142_vm0, %v3312_v33 }
 0x11b   : > { %v1208_v56 = vpop.permute.xlu0 %1207  ;;  %v822_v16 = vpop.permute.xlu1 %821 }
 0x11c   : > { %912 = vst.msk [vmem:[#allocation3 + $0x60] sm:$0xff] %vm905_vm4, %v822_v16 }
 0x11d   : > { %849 = vrot.lane.b32.xlu0 %v2755_v31, %s2455_s21  ;;  %1411 = vrot.lane.b32.xlu1 %v2734_v27, %s2458_s4  ;;  %v958_v31 = vld [vmem:[#allocation2 + $0x109] sm:$0xff] }
 0x11e   : > { %v3380_v25 = vld [vmem:[#allocation2 + $0x18a] sm:$0xff] }
 0x11f   : > { %v1402_v8 = vpop.permute.xlu0 %1401  ;;  %v1015_v3 = vpop.permute.xlu1 %1014  ;;  %v1785_v17 = vld [vmem:[#allocation3 + $0x50] sm:$0xff]  ;;  %1772 = vst.msk [vmem:[#allocation3 + $0x1d8] sm:$0xff] %vm142_vm0, %v3380_v25 }
 0x120   : > { %1105 = vst.msk [vmem:[#allocation3 + $0x60] sm:$0xff] %vm1098_vm5, %v1015_v3  ;;  %2043 = vmatmul.mubr.f32.gmra.mrb[10].mxu0 %v1785_v17  ;;  %v1724_v3 = vld [vmem:[#allocation2 + $0xca] sm:$0xff] }
 0x121   : > { %1298 = vst.msk [vmem:[#allocation3 + $0x60] sm:$0xff] %vm1291_vm6, %v1208_v56  ;;  %1620 = vrot.lane.b32.xlu0 %v2853_v44, %s2460_s6  ;;  %833 = vrot.lane.b32.xlu1 %v2704_v20, %s2455_s21 }
 0x122   : > { %1492 = vst.msk [vmem:[#allocation3 + $0x60] sm:$0xff] %vm1485_vm7, %v1402_v8  ;;  %2353 = vmatprep.mubr.msk.f32.mxu0 %vm142_vm0, %v1788_v29  ;;  %v3339_v29 = vld [vmem:[#allocation2 + $0x129] sm:$0xff] }
 0x123   : > { %v1595_v4 = vpop.permute.xlu0 %1594  ;;  %v631_v5 = vpop.permute.xlu1 %630  ;;  %1756 = vst.msk [vmem:[#allocation3 + $0xd8] sm:$0xff] %vm142_vm0, %v1724_v3 }
 0x124   : > { %1685 = vst.msk [vmem:[#allocation3 + $0x60] sm:$0xff] %vm1678_vm8, %v1595_v4  ;;  %v1810_v4 = vld [vmem:[#allocation3 + $0x118] sm:$0xff] }
 0x125   : > { %720 = vst.msk [vmem:[#allocation3 + $0x70] sm:$0xff] %vm712_vm3, %v631_v5  ;;  %1042 = vrot.lane.b32.xlu0 %v958_v31, %s2459_s5  ;;  %1604 = vrot.lane.b32.xlu1 %v3243_v0, %s2460_s6  ;;  %v3355_v5 = vld [vmem:[#allocation2 + $0x182] sm:$0xff] }
 0x126   : > { %1771 = vst.msk [vmem:[#allocation3 + $0x1c8] sm:$0xff] %vm142_vm0, %v3355_v5 }
 0x127   : > { %v1210_v20 = vpop.permute.xlu0 %1209  ;;  %v824_v44 = vpop.permute.xlu1 %823 }
 0x128   : > { %913 = vst.msk [vmem:[#allocation3 + $0x70] sm:$0xff] %vm905_vm4, %v824_v44 }
 0x129   : > { %1235 = vrot.lane.b32.xlu0 %v3002_v49, %s2456_s26  ;;  %1026 = vrot.lane.b32.xlu1 %v3183_v38, %s2459_s5  ;;  %v3287_v38 = vld [vmem:[#allocation2 + $0x121] sm:$0xff] }
 0x12b   : > { %v649_v43 = vpop.permute.xlu0 %648  ;;  %v1017_v7 = vpop.permute.xlu1 %1016  ;;  %v1787_v1 = vld [vmem:[#allocation3 + $0x60] sm:$0xff] }
 0x12c   : > { %729 = vst.msk [vmem:[#allocation3 + $0x100] sm:$0xff] %vm712_vm3, %v649_v43  ;;  %2048 = vmatmul.mubr.f32.gmra.mrb[12].mxu0 %v1787_v1  ;;  %v1794_v43 = vld [vmem:[#allocation3 + $0x98] sm:$0xff] }
 0x12d   : > { %1106 = vst.msk [vmem:[#allocation3 + $0x70] sm:$0xff] %vm1098_vm5, %v1017_v7  ;;  %658 = vrot.lane.b32.xlu0 %v2960_v55, %s2457_s27  ;;  %1219 = vrot.lane.b32.xlu1 %v3012_v11, %s2456_s26 }
 0x12e   : > { %1299 = vst.msk [vmem:[#allocation3 + $0x70] sm:$0xff] %vm1291_vm6, %v1210_v20  ;;  %2354 = vmatprep.mubr.msk.f32.mxu0 %vm142_vm0, %v1790_v45 }
 0x12f   : > { %v826_v10 = vpop.permute.xlu0 %825  ;;  %v633_v48 = vpop.permute.xlu1 %632 }
 0x130   : > { %721 = vst.msk [vmem:[#allocation3 + $0x80] sm:$0xff] %vm712_vm3, %v633_v48  ;;  %v1725_v48 = vld [vmem:[#allocation2 + $0xda] sm:$0xff] }
 0x131   : > { %914 = vst.msk [vmem:[#allocation3 + $0x80] sm:$0xff] %vm905_vm4, %v826_v10  ;;  %1429 = vrot.lane.b32.xlu0 %v2768_v35, %s2458_s4  ;;  %642 = vrot.lane.b32.xlu1 %v2969_v63, %s2457_s27 }
 0x132   : > { %1757 = vst.msk [vmem:[#allocation3 + $0xe8] sm:$0xff] %vm142_vm0, %v1725_v48 }
 0x133   : > { %v1597_v55 = vpop.permute.xlu0 %1596  ;;  %v1404_v34 = vpop.permute.xlu1 %1403 }
 0x134   : > { %1493 = vst.msk [vmem:[#allocation3 + $0x70] sm:$0xff] %vm1485_vm7, %v1404_v34 }
 0x135   : > { %1686 = vst.msk [vmem:[#allocation3 + $0x70] sm:$0xff] %vm1678_vm8, %v1597_v55  ;;  %851 = vrot.lane.b32.xlu0 %v2794_v46, %s2455_s21  ;;  %1413 = vrot.lane.b32.xlu1 %v2714_v23, %s2458_s4  ;;  %v3296_v46 = vld [vmem:[#allocation2 + $0x16a] sm:$0xff]  ;;  %v3390_v55 = vld [vmem:[#allocation2 + $0x139] sm:$0xff] }
 0x136   : > { %1769 = vst.msk [vmem:[#allocation3 + $0x1a8] sm:$0xff] %vm142_vm0, %v3296_v46 }
 0x137   : > { %v1035_v63 = vpop.permute.xlu0 %1034  ;;  %v842_v22 = vpop.permute.xlu1 %841 }
 0x138   : > { %922 = vst.msk [vmem:[#allocation3 + $0x100] sm:$0xff] %vm905_vm4, %v842_v22 }
 0x139   : > { %1115 = vst.msk [vmem:[#allocation3 + $0x100] sm:$0xff] %vm1098_vm5, %v1035_v63  ;;  %1622 = vrot.lane.b32.xlu0 %v3287_v38, %s2460_s6  ;;  %835 = vrot.lane.b32.xlu1 %v2734_v27, %s2455_s21  ;;  %v1812_v63 = vld [vmem:[#allocation3 + $0x128] sm:$0xff] }
 0x13b   : > { %v1228_v51 = vpop.permute.xlu0 %1227  ;;  %v1019_v14 = vpop.permute.xlu1 %1018 }
 0x13c   : > { %1308 = vst.msk [vmem:[#allocation3 + $0x100] sm:$0xff] %vm1291_vm6, %v1228_v51  ;;  %v1789_v37 = vld [vmem:[#allocation3 + $0x70] sm:$0xff] }
 0x13d   : > { %1107 = vst.msk [vmem:[#allocation3 + $0x80] sm:$0xff] %vm1098_vm5, %v1019_v14  ;;  %1044 = vrot.lane.b32.xlu0 %v959_v13, %s2459_s5  ;;  %1606 = vrot.lane.b32.xlu1 %v3298_v24, %s2460_s6  ;;  %v1796_v13 = vld [vmem:[#allocation3 + $0xa8] sm:$0xff] }
 0x13e   : > { %2053 = vmatmul.mubr.f32.gmra.mrb[14].mxu0 %v1789_v37 }
 0x13f   : > { %v651_v27 = vpop.permute.xlu0 %650  ;;  %v1212_v28 = vpop.permute.xlu1 %1211  ;;  %2355 = vmatprep.mubr.msk.f32.mxu0 %vm142_vm0, %v1792_v39 }
 0x140   : > { %730 = vst.msk [vmem:[#allocation3 + $0x110] sm:$0xff] %vm712_vm3, %v651_v27 }
 0x141   : > { %1300 = vst.msk [vmem:[#allocation3 + $0x80] sm:$0xff] %vm1291_vm6, %v1212_v28  ;;  %1237 = vrot.lane.b32.xlu0 %v3048_v47, %s2456_s26  ;;  %1028 = vrot.lane.b32.xlu1 %v3243_v0, %s2459_s5 }
 0x143   : > { %v1422_v15 = vpop.permute.xlu0 %1421  ;;  %v635_v56 = vpop.permute.xlu1 %634 }
 0x144   : > { %1502 = vst.msk [vmem:[#allocation3 + $0x100] sm:$0xff] %vm1485_vm7, %v1422_v15 }
 0x145   : > { %722 = vst.msk [vmem:[#allocation3 + $0x90] sm:$0xff] %vm712_vm3, %v635_v56  ;;  %660 = vrot.lane.b32.xlu0 %v3002_v49, %s2457_s27  ;;  %1221 = vrot.lane.b32.xlu1 %v3062_v18, %s2456_s26 }
 0x147   : > { %v844_v16 = vpop.permute.xlu0 %843  ;;  %v1406_v8 = vpop.permute.xlu1 %1405 }
 0x148   : > { %923 = vst.msk [vmem:[#allocation3 + $0x110] sm:$0xff] %vm905_vm4, %v844_v16 }
 0x149   : > { %1494 = vst.msk [vmem:[#allocation3 + $0x80] sm:$0xff] %vm1485_vm7, %v1406_v8  ;;  %1431 = vrot.lane.b32.xlu0 %v2818_v53, %s2458_s4  ;;  %644 = vrot.lane.b32.xlu1 %v3012_v11, %s2457_s27  ;;  %v3347_v11 = vld [vmem:[#allocation2 + $0xc9] sm:$0xff] }
 0x14a   : > { %v1814_v8 = vld [vmem:[#allocation3 + $0x138] sm:$0xff] }
 0x14b   : > { %v1615_v17 = vpop.permute.xlu0 %1614  ;;  %v828_v49 = vpop.permute.xlu1 %827 }
 0x14c   : > { %1695 = vst.msk [vmem:[#allocation3 + $0x100] sm:$0xff] %vm1678_vm8, %v1615_v17 }
 0x14d   : > { %915 = vst.msk [vmem:[#allocation3 + $0x90] sm:$0xff] %vm905_vm4, %v828_v49  ;;  %853 = vrot.lane.b32.xlu0 %v2768_v35, %s2455_s21  ;;  %1415 = vrot.lane.b32.xlu1 %v2744_v30, %s2458_s4 }
 0x14f   : > { %v1037_v54 = vpop.permute.xlu0 %1036  ;;  %v1599_v19 = vpop.permute.xlu1 %1598 }
 0x150   : > { %1116 = vst.msk [vmem:[#allocation3 + $0x110] sm:$0xff] %vm1098_vm5, %v1037_v54 }
 0x151   : > { %1687 = vst.msk [vmem:[#allocation3 + $0x80] sm:$0xff] %vm1678_vm8, %v1599_v19  ;;  %1624 = vrot.lane.b32.xlu0 %v3339_v29, %s2460_s6  ;;  %837 = vrot.lane.b32.xlu1 %v2714_v23, %s2455_s21 }
 0x153   : > { %v1230_v35 = vpop.permute.xlu0 %1229  ;;  %v1021_v31 = vpop.permute.xlu1 %1020  ;;  %v1807_v0 = vld [vmem:[#allocation3 + $0x100] sm:$0xff] }
 0x154   : > { %1309 = vst.msk [vmem:[#allocation3 + $0x110] sm:$0xff] %vm1291_vm6, %v1230_v35  ;;  %2098 = vmatmul.mubr.f32.vlgmr.msra.gmra.mrb[0].mxu1 %v1807_v0 }
 0x155   : > { %1108 = vst.msk [vmem:[#allocation3 + $0x90] sm:$0xff] %vm1098_vm5, %v1021_v31  ;;  %1046 = vrot.lane.b32.xlu0 %v3287_v38, %s2459_s5  ;;  %1608 = vrot.lane.b32.xlu1 %v3347_v11, %s2460_s6 }
 0x156   : > { %2364 = vmatprep.mubr.msk.f32.mxu1 %vm142_vm0, %v1810_v4  ;;  %v771_v4 = vld [vmem:[#allocation2 + $0x150] sm:$0xff] }
 0x157   : > { %v653_v23 = vpop.permute.xlu0 %652  ;;  %v1214_v20 = vpop.permute.xlu1 %1213 }
 0x158   : > { %v1791_v44 = vld [vmem:[#allocation3 + $0x80] sm:$0xff]  ;;  %731 = vst.msk [vmem:[#allocation3 + $0x120] sm:$0xff] %vm712_vm3, %v653_v23 }
 0x159   : > { %1301 = vst.msk [vmem:[#allocation3 + $0x90] sm:$0xff] %vm1291_vm6, %v1214_v20  ;;  %2058 = vmatmul.mubr.f32.gmra.mrb[16].mxu0 %v1791_v44  ;;  %1239 = vrot.lane.b32.xlu0 %v3091_v2, %s2456_s26 }
 0x15a   : > { %1030 = vrot.lane.b32.xlu1 %v3298_v24, %s2459_s5  ;;  %2356 = vmatprep.mubr.msk.f32.mxu0 %vm142_vm0, %v1794_v43  ;;  %v1340_v24 = vld [vmem:[#allocation2 + $0xe0] sm:$0xff] }
 0x15b   : > { %v1424_v7 = vpop.permute.xlu0 %1423  ;;  %v637_v1 = vpop.permute.xlu1 %636 }
 0x15c   : > { %1503 = vst.msk [vmem:[#allocation3 + $0x110] sm:$0xff] %vm1485_vm7, %v1424_v7 }
 0x15d   : > { %723 = vst.msk [vmem:[#allocation3 + $0xa0] sm:$0xff] %vm712_vm3, %v637_v1  ;;  %662 = vrot.lane.b32.xlu0 %v3048_v47, %s2457_s27  ;;  %v1816_v1 = vld [vmem:[#allocation3 + $0x148] sm:$0xff] }
 0x15e   : > { %1223 = vrot.lane.b32.xlu1 %v3032_v62, %s2456_s26 }
 0x15f   : > { %v846_v45 = vpop.permute.xlu0 %845  ;;  %v1408_v10 = vpop.permute.xlu1 %1407 }
 0x160   : > { %924 = vst.msk [vmem:[#allocation3 + $0x120] sm:$0xff] %vm905_vm4, %v846_v45 }
 0x161   : > { %1495 = vst.msk [vmem:[#allocation3 + $0x90] sm:$0xff] %vm1485_vm7, %v1408_v10  ;;  %1433 = vrot.lane.b32.xlu0 %v2787_v42, %s2458_s4 }
 0x162   : > { %646 = vrot.lane.b32.xlu1 %v3062_v18, %s2457_s27 }
 0x163   : > { %v1617_v62 = vpop.permute.xlu0 %1616  ;;  %v830_v47 = vpop.permute.xlu1 %829 }
 0x164   : > { %1696 = vst.msk [vmem:[#allocation3 + $0x110] sm:$0xff] %vm1678_vm8, %v1617_v62  ;;  %v1800_v62 = vld [vmem:[#allocation3 + $0xc8] sm:$0xff] }
 0x165   : > { %916 = vst.msk [vmem:[#allocation3 + $0xa0] sm:$0xff] %vm905_vm4, %v830_v47  ;;  %855 = vrot.lane.b32.xlu0 %v2818_v53, %s2455_s21 }
 0x166   : > { %1417 = vrot.lane.b32.xlu1 %v2732_v26, %s2458_s4 }
 0x167   : > { %v1039_v18 = vpop.permute.xlu0 %1038  ;;  %v1601_v34 = vpop.permute.xlu1 %1600 }
 0x168   : > { %1117 = vst.msk [vmem:[#allocation3 + $0x120] sm:$0xff] %vm1098_vm5, %v1039_v18 }
 0x169   : > { %1688 = vst.msk [vmem:[#allocation3 + $0x90] sm:$0xff] %vm1678_vm8, %v1601_v34  ;;  %1626 = vrot.lane.b32.xlu0 %v3390_v55, %s2460_s6 }
 0x16a   : > { %839 = vrot.lane.b32.xlu1 %v2744_v30, %s2455_s21 }
 0x16b   : > { %v1232_v12 = vpop.permute.xlu0 %1231  ;;  %v1023_v53 = vpop.permute.xlu1 %1022  ;;  %v1809_v38 = vld [vmem:[#allocation3 + $0x110] sm:$0xff] }
 0x16c   : > { %1310 = vst.msk [vmem:[#allocation3 + $0x120] sm:$0xff] %vm1291_vm6, %v1232_v12  ;;  %2103 = vmatmul.mubr.f32.gmra.mrb[2].mxu1 %v1809_v38 }
 0x16d   : > { %1109 = vst.msk [vmem:[#allocation3 + $0xa0] sm:$0xff] %vm1098_vm5, %v1023_v53  ;;  %1048 = vrot.lane.b32.xlu0 %v3339_v29, %s2459_s5  ;;  %2365 = vmatprep.mubr.msk.f32.mxu1 %vm142_vm0, %v1812_v63  ;;  %v1798_v29 = vld [vmem:[#allocation3 + $0xb8] sm:$0xff] }
 0x16e   : > { %1610 = vrot.lane.b32.xlu1 %v1532_v57, %s2460_s6 }
 0x16f   : > { %v655_v26 = vpop.permute.xlu0 %654  ;;  %v1216_v22 = vpop.permute.xlu1 %1215 }
 0x170   : > { %v1793_v30 = vld [vmem:[#allocation3 + $0x90] sm:$0xff]  ;;  %732 = vst.msk [vmem:[#allocation3 + $0x130] sm:$0xff] %vm712_vm3, %v655_v26 }
 0x171   : > { %1302 = vst.msk [vmem:[#allocation3 + $0xa0] sm:$0xff] %vm1291_vm6, %v1216_v22  ;;  %2063 = vmatmul.mubr.f32.gmra.mrb[18].mxu0 %v1793_v30  ;;  %1241 = vrot.lane.b32.xlu0 %v3131_v60, %s2456_s26  ;;  %v1818_v22 = vld [vmem:[#allocation3 + $0x158] sm:$0xff] }
 0x172   : > { %1032 = vrot.lane.b32.xlu1 %v3347_v11, %s2459_s5  ;;  %2357 = vmatprep.mubr.msk.f32.mxu0 %vm142_vm0, %v1796_v13  ;;  %v1802_v13 = vld [vmem:[#allocation3 + $0xd8] sm:$0xff] }
 0x173   : > { %v1426_v51 = vpop.permute.xlu0 %1425  ;;  %v639_v14 = vpop.permute.xlu1 %638 }
 0x174   : > { %1504 = vst.msk [vmem:[#allocation3 + $0x120] sm:$0xff] %vm1485_vm7, %v1426_v51  ;;  %v1353_v51 = vld [vmem:[#allocation2 + $0x180] sm:$0xff] }
 0x175   : > { %724 = vst.msk [vmem:[#allocation3 + $0xb0] sm:$0xff] %vm712_vm3, %v639_v14  ;;  %1419 = vrot.lane.b32.xlu0 %v1340_v24, %s2458_s4 }
 0x176   : > { %1225 = vrot.lane.b32.xlu1 %v3071_v36, %s2456_s26  ;;  %v1533_v36 = vld [vmem:[#allocation2 + $0xe1] sm:$0xff] }
 0x177   : > { %v848_v37 = vpop.permute.xlu0 %847  ;;  %v1410_v39 = vpop.permute.xlu1 %1409 }
 0x178   : > { %925 = vst.msk [vmem:[#allocation3 + $0x130] sm:$0xff] %vm905_vm4, %v848_v37  ;;  %v1546_v37 = vld [vmem:[#allocation2 + $0x181] sm:$0xff] }
 0x179   : > { %1496 = vst.msk [vmem:[#allocation3 + $0xa0] sm:$0xff] %vm1485_vm7, %v1410_v39  ;;  %857 = vrot.lane.b32.xlu0 %v2787_v42, %s2455_s21 }
 0x17a   : > { %664 = vrot.lane.b32.xlu1 %v3091_v2, %s2457_s27 }
 0x17b   : > { %v1619_v27 = vpop.permute.xlu0 %1618  ;;  %v832_v28 = vpop.permute.xlu1 %831 }
 0x17c   : > { %1697 = vst.msk [vmem:[#allocation3 + $0x120] sm:$0xff] %vm1678_vm8, %v1619_v27 }
 0x17d   : > { %917 = vst.msk [vmem:[#allocation3 + $0xb0] sm:$0xff] %vm905_vm4, %v832_v28  ;;  %1628 = vrot.lane.b32.xlu0 %v1541_v52, %s2460_s6 }
 0x17e   : > { %1435 = vrot.lane.b32.xlu1 %v2840_v32, %s2458_s4  ;;  %v1542_v32 = vld [vmem:[#allocation2 + $0x151] sm:$0xff] }
 0x17f   : > { %v1041_v15 = vpop.permute.xlu0 %1040  ;;  %v1603_v56 = vpop.permute.xlu1 %1602 }
 0x180   : > { %1118 = vst.msk [vmem:[#allocation3 + $0x130] sm:$0xff] %vm1098_vm5, %v1041_v15 }
 0x181   : > { %1689 = vst.msk [vmem:[#allocation3 + $0xa0] sm:$0xff] %vm1678_vm8, %v1603_v56  ;;  %1243 = vrot.lane.b32.xlu0 %v3162_v9, %s2456_s26 }
 0x182   : > { %1612 = vrot.lane.b32.xlu1 %v1533_v36, %s2460_s6 }
 0x183   : > { %v1234_v42 = vpop.permute.xlu0 %1233  ;;  %v1025_v2 = vpop.permute.xlu1 %1024  ;;  %v1811_v16 = vld [vmem:[#allocation3 + $0x120] sm:$0xff] }
 0x184   : > { %1311 = vst.msk [vmem:[#allocation3 + $0x130] sm:$0xff] %vm1291_vm6, %v1234_v42  ;;  %2108 = vmatmul.mubr.f32.gmra.mrb[4].mxu1 %v1811_v16 }
 0x185   : > { %1110 = vst.msk [vmem:[#allocation3 + $0xb0] sm:$0xff] %vm1098_vm5, %v1025_v2  ;;  %1437 = vrot.lane.b32.xlu0 %v2810_v50, %s2458_s4  ;;  %2366 = vmatprep.mubr.msk.f32.mxu1 %vm142_vm0, %v1814_v8  ;;  %v770_v50 = vld [vmem:[#allocation2 + $0x140] sm:$0xff]  ;;  %v1547_v8 = vld [vmem:[#allocation2 + $0x189] sm:$0xff] }
 0x186   : > { %1050 = vrot.lane.b32.xlu1 %v3390_v55, %s2459_s5 }
 0x187   : > { %v657_v3 = vpop.permute.xlu0 %656  ;;  %v1218_v17 = vpop.permute.xlu1 %1217 }
 0x188   : > { %v1795_v49 = vld [vmem:[#allocation3 + $0xa0] sm:$0xff]  ;;  %733 = vst.msk [vmem:[#allocation3 + $0x140] sm:$0xff] %vm712_vm3, %v657_v3 }
 0x189   : > { %1303 = vst.msk [vmem:[#allocation3 + $0xb0] sm:$0xff] %vm1291_vm6, %v1218_v17  ;;  %2068 = vmatmul.mubr.f32.gmra.mrb[20].mxu0 %v1795_v49  ;;  %1630 = vrot.lane.b32.xlu0 %v1542_v32, %s2460_s6 }
 0x18a   : > { %666 = vrot.lane.b32.xlu1 %v3131_v60, %s2457_s27  ;;  %2358 = vmatprep.mubr.msk.f32.mxu0 %vm142_vm0, %v1798_v29  ;;  %v1543_v60 = vld [vmem:[#allocation2 + $0x159] sm:$0xff] }
 0x18b   : > { %v1428_v54 = vpop.permute.xlu0 %1427  ;;  %v641_v19 = vpop.permute.xlu1 %640  ;;  %v1820_v29 = vld [vmem:[#allocation3 + $0x168] sm:$0xff] }
 0x18c   : > { %1505 = vst.msk [vmem:[#allocation3 + $0x130] sm:$0xff] %vm1485_vm7, %v1428_v54 }
 0x18d   : > { %725 = vst.msk [vmem:[#allocation3 + $0xc0] sm:$0xff] %vm712_vm3, %v641_v19  ;;  %1245 = vrot.lane.b32.xlu0 %v3189_v58, %s2456_s26 }
 0x18e   : > { %859 = vrot.lane.b32.xlu1 %v770_v50, %s2455_s21 }
 0x18f   : > { %v850_v11 = vpop.permute.xlu0 %849  ;;  %v1412_v35 = vpop.permute.xlu1 %1411 }
 0x190   : > { %926 = vst.msk [vmem:[#allocation3 + $0x140] sm:$0xff] %vm905_vm4, %v850_v11  ;;  %v1804_v11 = vld [vmem:[#allocation3 + $0xe8] sm:$0xff] }
 0x191   : > { %1497 = vst.msk [vmem:[#allocation3 + $0xb0] sm:$0xff] %vm1485_vm7, %v1412_v35  ;;  %1439 = vrot.lane.b32.xlu0 %v3202_v61, %s2458_s4 }
 0x192   : > { %1052 = vrot.lane.b32.xlu1 %v1541_v52, %s2459_s5  ;;  %v1354_v52 = vld [vmem:[#allocation2 + $0x188] sm:$0xff] }
 0x193   : > { %v1621_v31 = vpop.permute.xlu0 %1620  ;;  %v834_v0 = vpop.permute.xlu1 %833 }
 0x194   : > { %1698 = vst.msk [vmem:[#allocation3 + $0x130] sm:$0xff] %vm1678_vm8, %v1621_v31 }
 0x195   : > { %918 = vst.msk [vmem:[#allocation3 + $0xc0] sm:$0xff] %vm905_vm4, %v834_v0  ;;  %1632 = vrot.lane.b32.xlu0 %v1543_v60, %s2460_s6 }
 0x196   : > { %668 = vrot.lane.b32.xlu1 %v3162_v9, %s2457_s27  ;;  %v3471_v9 = vld [vmem:[#allocation2 + $0x169] sm:$0xff] }
 0x197   : > { %v1043_v23 = vpop.permute.xlu0 %1042  ;;  %v1605_v20 = vpop.permute.xlu1 %1604 }
 0x198   : > { %1119 = vst.msk [vmem:[#allocation3 + $0x140] sm:$0xff] %vm1098_vm5, %v1043_v23 }
 0x199   : > { %1690 = vst.msk [vmem:[#allocation3 + $0xb0] sm:$0xff] %vm1678_vm8, %v1605_v20  ;;  %1247 = vrot.lane.b32.xlu0 %v3218_v40, %s2456_s26 }
 0x19a   : > { %861 = vrot.lane.b32.xlu1 %v771_v4, %s2455_s21 }
 0x19b   : > { %v1236_v44 = vpop.permute.xlu0 %1235  ;;  %v1027_v43 = vpop.permute.xlu1 %1026  ;;  %v1813_v7 = vld [vmem:[#allocation3 + $0x130] sm:$0xff] }
 0x19c   : > { %1312 = vst.msk [vmem:[#allocation3 + $0x140] sm:$0xff] %vm1291_vm6, %v1236_v44  ;;  %2113 = vmatmul.mubr.f32.gmra.mrb[6].mxu1 %v1813_v7 }
 0x19d   : > { %1111 = vst.msk [vmem:[#allocation3 + $0xc0] sm:$0xff] %vm1098_vm5, %v1027_v43  ;;  %1441 = vrot.lane.b32.xlu0 %v3231_v41, %s2458_s4  ;;  %2367 = vmatprep.mubr.msk.f32.mxu1 %vm142_vm0, %v1816_v1  ;;  %v1355_v43 = vld [vmem:[#allocation2 + $0x198] sm:$0xff]  ;;  %v1742_v1 = vld [vmem:[#allocation2 + $0x1a2] sm:$0xff] }
 0x19e   : > { %1054 = vrot.lane.b32.xlu1 %v1542_v32, %s2459_s5  ;;  %1774 = vst.msk [vmem:[#allocation3 + $0x1f8] sm:$0xff] %vm142_vm0, %v1742_v1 }
 0x19f   : > { %v659_v45 = vpop.permute.xlu0 %658  ;;  %v1220_v10 = vpop.permute.xlu1 %1219 }
 0x1a0   : > { %v1797_v48 = vld [vmem:[#allocation3 + $0xb0] sm:$0xff]  ;;  %734 = vst.msk [vmem:[#allocation3 + $0x150] sm:$0xff] %vm712_vm3, %v659_v45 }
 0x1a1   : > { %1304 = vst.msk [vmem:[#allocation3 + $0xc0] sm:$0xff] %vm1291_vm6, %v1220_v10  ;;  %2073 = vmatmul.mubr.f32.gmra.mrb[22].mxu0 %v1797_v48  ;;  %1634 = vrot.lane.b32.xlu0 %v3471_v9, %s2460_s6 }
 0x1a2   : > { %670 = vrot.lane.b32.xlu1 %v3189_v58, %s2457_s27  ;;  %2359 = vmatprep.mubr.msk.f32.mxu0 %vm142_vm0, %v1800_v62  ;;  %v3492_v58 = vld [vmem:[#allocation2 + $0x171] sm:$0xff] }
 0x1a3   : > { %v1430_v47 = vpop.permute.xlu0 %1429  ;;  %v643_v55 = vpop.permute.xlu1 %642 }
 0x1a4   : > { %1506 = vst.msk [vmem:[#allocation3 + $0x140] sm:$0xff] %vm1485_vm7, %v1430_v47 }
 0x1a5   : > { %726 = vst.msk [vmem:[#allocation3 + $0xd0] sm:$0xff] %vm712_vm3, %v643_v55  ;;  %1249 = vrot.lane.b32.xlu0 %v3249_v59, %s2456_s26 }
 0x1a6   : > { %863 = vrot.lane.b32.xlu1 %v3202_v61, %s2455_s21 }
 0x1a7   : > { %v852_v18 = vpop.permute.xlu0 %851  ;;  %v1414_v34 = vpop.permute.xlu1 %1413 }
 0x1a8   : > { %927 = vst.msk [vmem:[#allocation3 + $0x150] sm:$0xff] %vm905_vm4, %v852_v18 }
 0x1a9   : > { %1498 = vst.msk [vmem:[#allocation3 + $0xc0] sm:$0xff] %vm1485_vm7, %v1414_v34  ;;  %1443 = vrot.lane.b32.xlu0 %v3261_v6, %s2458_s4 }
 0x1aa   : > { %1056 = vrot.lane.b32.xlu1 %v1543_v60, %s2459_s5 }
 0x1ab   : > { %v1623_v57 = vpop.permute.xlu0 %1622  ;;  %v836_v12 = vpop.permute.xlu1 %835 }
 0x1ac   : > { %1699 = vst.msk [vmem:[#allocation3 + $0x140] sm:$0xff] %vm1678_vm8, %v1623_v57  ;;  %v1549_v57 = vld [vmem:[#allocation2 + $0x1a1] sm:$0xff] }
 0x1ad   : > { %919 = vst.msk [vmem:[#allocation3 + $0xd0] sm:$0xff] %vm905_vm4, %v836_v12  ;;  %1636 = vrot.lane.b32.xlu0 %v3492_v58, %s2460_s6  ;;  %v1822_v12 = vld [vmem:[#allocation3 + $0x178] sm:$0xff] }
 0x1ae   : > { %672 = vrot.lane.b32.xlu1 %v3218_v40, %s2457_s27 }
 0x1af   : > { %v1045_v61 = vpop.permute.xlu0 %1044  ;;  %v1607_v53 = vpop.permute.xlu1 %1606 }
 0x1b0   : > { %1120 = vst.msk [vmem:[#allocation3 + $0x150] sm:$0xff] %vm1098_vm5, %v1045_v61 }
 0x1b1   : > { %1691 = vst.msk [vmem:[#allocation3 + $0xc0] sm:$0xff] %vm1678_vm8, %v1607_v53  ;;  %481 = vrot.lane.b32.xlu0 %v1543_v60, %s2453_s16 }
 0x1b2   : > { %865 = vrot.lane.b32.xlu1 %v3231_v41, %s2455_s21 }
 0x1b3   : > { %v1238_v38 = vpop.permute.xlu0 %1237  ;;  %v1029_v63 = vpop.permute.xlu1 %1028  ;;  %v1815_v26 = vld [vmem:[#allocation3 + $0x140] sm:$0xff] }
 0x1b4   : > { %1313 = vst.msk [vmem:[#allocation3 + $0x150] sm:$0xff] %vm1291_vm6, %v1238_v38  ;;  %2118 = vmatmul.mubr.f32.gmra.mrb[8].mxu1 %v1815_v26 }
 0x1b5   : > { %1112 = vst.msk [vmem:[#allocation3 + $0xd0] sm:$0xff] %vm1098_vm5, %v1029_v63  ;;  %674 = vrot.lane.b32.xlu0 %v3249_v59, %s2457_s27  ;;  %2368 = vmatprep.mubr.msk.f32.mxu1 %vm142_vm0, %v1818_v22  ;;  %v1806_v22 = vld [vmem:[#allocation3 + $0xf8] sm:$0xff] }
 0x1b6   : > { %1058 = vrot.lane.b32.xlu1 %v3471_v9, %s2459_s5 }
 0x1b7   : > { %v661_v40 = vpop.permute.xlu0 %660  ;;  %v1222_v30 = vpop.permute.xlu1 %1221 }
 0x1b8   : > { %v1799_v41 = vld [vmem:[#allocation3 + $0xc0] sm:$0xff]  ;;  %735 = vst.msk [vmem:[#allocation3 + $0x160] sm:$0xff] %vm712_vm3, %v661_v40  ;;  %v2019_v24 = vpop.f32.mrb[0].mxu0 }
 0x1b9   : > { %1305 = vst.msk [vmem:[#allocation3 + $0xd0] sm:$0xff] %vm1291_vm6, %v1222_v30  ;;  %2078 = vmatmul.mubr.f32.gmra.mrb[24].mxu0 %v1799_v41  ;;  %867 = vrot.lane.b32.xlu0 %v3261_v6, %s2455_s21  ;;  %v2021_v59 = vpop.f32.mrb[1].mxu0  ;;  %v2216_v36 = vmul.f32 %v2019_v24, %v2019_v24 }
 0x1ba   : > { %1251 = vrot.lane.b32.xlu1 %v3296_v46, %s2456_s26  ;;  %2360 = vmatprep.mubr.msk.f32.mxu0 %vm142_vm0, %v1802_v13 }
 0x1bb   : > { %v1432_v14 = vpop.permute.xlu0 %1431  ;;  %v645_v21 = vpop.permute.xlu1 %644 }
 0x1bc   : > { %1507 = vst.msk [vmem:[#allocation3 + $0x150] sm:$0xff] %vm1485_vm7, %v1432_v14 }
 0x1bd   : > { %727 = vst.msk [vmem:[#allocation3 + $0xe0] sm:$0xff] %vm712_vm3, %v645_v21  ;;  %1060 = vrot.lane.b32.xlu0 %v3492_v58, %s2459_s5 }
 0x1be   : > { %1445 = vrot.lane.b32.xlu1 %v1353_v51, %s2458_s4 }
 0x1bf   : > { %v854_v6 = vpop.permute.xlu0 %853  ;;  %v1416_v39 = vpop.permute.xlu1 %1415 }
 0x1c0   : > { %928 = vst.msk [vmem:[#allocation3 + $0x160] sm:$0xff] %vm905_vm4, %v854_v6 }
 0x1c1   : > { %1499 = vst.msk [vmem:[#allocation3 + $0xd0] sm:$0xff] %vm1485_vm7, %v1416_v39  ;;  %1253 = vrot.lane.b32.xlu0 %v3312_v33, %s2456_s26 }
 0x1c2   : > { %1638 = vrot.lane.b32.xlu1 %v1546_v37, %s2460_s6 }
 0x1c3   : > { %v1625_v27 = vpop.permute.xlu0 %1624  ;;  %v2024_v28 = vpop.f32.mrb[2].mxu0 }
 0x1c4   : > { %1700 = vst.msk [vmem:[#allocation3 + $0x150] sm:$0xff] %vm1678_vm8, %v1625_v27  ;;  %v2178_v15 = vadd.f32 %v2024_v28, %v2019_v24  ;;  %v2217_v56 = vmul.f32 %v2024_v28, %v2024_v28  ;;  %v838_v42 = vpop.permute.xlu1 %837  ;;  %v2026_v2 = vpop.f32.mrb[3].mxu0 }
 0x1c5   : > { %920 = vst.msk [vmem:[#allocation3 + $0xe0] sm:$0xff] %vm905_vm4, %v838_v42  ;;  %1447 = vrot.lane.b32.xlu0 %v1354_v52, %s2458_s4  ;;  %v1824_v42 = vld [vmem:[#allocation3 + $0x188] sm:$0xff] }
 0x1c6   : > { %483 = vrot.lane.b32.xlu1 %v3471_v9, %s2453_s16  ;;  %v2248_v16 = vadd.f32 %v2217_v56, %v2216_v36 }
 0x1c7   : > { %v1047_v32 = vpop.permute.xlu0 %1046 }
 0x1c8   : > { %1121 = vst.msk [vmem:[#allocation3 + $0x160] sm:$0xff] %vm1098_vm5, %v1047_v32  ;;  %v1609_v3 = vpop.permute.xlu1 %1608 }
 0x1c9   : > { %1692 = vst.msk [vmem:[#allocation3 + $0xd0] sm:$0xff] %vm1678_vm8, %v1609_v3  ;;  %1640 = vrot.lane.b32.xlu0 %v1547_v8, %s2460_s6 }
 0x1ca   : > { %676 = vrot.lane.b32.xlu1 %v3296_v46, %s2457_s27  ;;  %v1741_v46 = vld [vmem:[#allocation2 + $0x19a] sm:$0xff] }
 0x1cb   : > { %v1240_v17 = vpop.permute.xlu0 %1239  ;;  %v1817_v49 = vld [vmem:[#allocation3 + $0x150] sm:$0xff]  ;;  %1773 = vst.msk [vmem:[#allocation3 + $0x1e8] sm:$0xff] %vm142_vm0, %v1741_v46 }
 0x1cc   : > { %1314 = vst.msk [vmem:[#allocation3 + $0x160] sm:$0xff] %vm1291_vm6, %v1240_v17  ;;  %v1031_v50 = vpop.permute.xlu1 %1030  ;;  %2123 = vmatmul.mubr.f32.gmra.mrb[10].mxu1 %v1817_v49 }
 0x1cd   : > { %1113 = vst.msk [vmem:[#allocation3 + $0xe0] sm:$0xff] %vm1098_vm5, %v1031_v50  ;;  %485 = vrot.lane.b32.xlu0 %v3492_v58, %s2453_s16  ;;  %2369 = vmatprep.mubr.msk.f32.mxu1 %vm142_vm0, %v1820_v29 }
 0x1ce   : > { %869 = vrot.lane.b32.xlu1 %v1353_v51, %s2455_s21 }
 0x1cf   : > { %v663_v54 = vpop.permute.xlu0 %662  ;;  %v2029_v19 = vpop.f32.mrb[4].mxu0 }
 0x1d0   : > { %736 = vst.msk [vmem:[#allocation3 + $0x170] sm:$0xff] %vm712_vm3, %v663_v54  ;;  %v1224_v35 = vpop.permute.xlu1 %1223  ;;  %v2179_v60 = vadd.f32 %v2178_v15, %v2029_v19  ;;  %v2218_v31 = vmul.f32 %v2029_v19, %v2029_v19  ;;  %v1801_v0 = vld [vmem:[#allocation3 + $0xd0] sm:$0xff]  ;;  %v2031_v4 = vpop.f32.mrb[5].mxu0 }
 0x1d1   : > { %1306 = vst.msk [vmem:[#allocation3 + $0xe0] sm:$0xff] %vm1291_vm6, %v1224_v35  ;;  %2083 = vmatmul.mubr.f32.gmra.mrb[26].mxu0 %v1801_v0  ;;  %678 = vrot.lane.b32.xlu0 %v3312_v33, %s2457_s27  ;;  %v1548_v33 = vld [vmem:[#allocation2 + $0x199] sm:$0xff] }
 0x1d2   : > { %1062 = vrot.lane.b32.xlu1 %v1546_v37, %s2459_s5  ;;  %v2249_v23 = vadd.f32 %v2248_v16, %v2218_v31  ;;  %2361 = vmatprep.mubr.msk.f32.mxu0 %vm142_vm0, %v1804_v11  ;;  %v1826_v11 = vld [vmem:[#allocation3 + $0x198] sm:$0xff] }
 0x1d3   : > { %v1434_v20 = vpop.permute.xlu0 %1433 }
 0x1d4   : > { %1508 = vst.msk [vmem:[#allocation3 + $0x160] sm:$0xff] %vm1485_vm7, %v1434_v20  ;;  %v647_v44 = vpop.permute.xlu1 %646  ;;  %v1828_v20 = vld [vmem:[#allocation3 + $0x1a8] sm:$0xff] }
 0x1d5   : > { %728 = vst.msk [vmem:[#allocation3 + $0xf0] sm:$0xff] %vm712_vm3, %v647_v44  ;;  %871 = vrot.lane.b32.xlu0 %v1354_v52, %s2455_s21 }
 0x1d6   : > { %1255 = vrot.lane.b32.xlu1 %v3355_v5, %s2456_s26  ;;  %v1356_v5 = vld [vmem:[#allocation2 + $0x1a0] sm:$0xff] }
 0x1d7   : > { %v856_v7 = vpop.permute.xlu0 %855 }
 0x1d8   : > { %929 = vst.msk [vmem:[#allocation3 + $0x170] sm:$0xff] %vm905_vm4, %v856_v7  ;;  %v1418_v9 = vpop.permute.xlu1 %1417 }
 0x1d9   : > { %1500 = vst.msk [vmem:[#allocation3 + $0xe0] sm:$0xff] %vm1485_vm7, %v1418_v9  ;;  %1064 = vrot.lane.b32.xlu0 %v1547_v8, %s2459_s5 }
 0x1da   : > { %1449 = vrot.lane.b32.xlu1 %v1355_v43, %s2458_s4 }
 0x1db   : > { %v1627_v45 = vpop.permute.xlu0 %1626  ;;  %v2034_v10 = vpop.f32.mrb[6].mxu0 }
 0x1dc   : > { %1701 = vst.msk [vmem:[#allocation3 + $0x160] sm:$0xff] %vm1678_vm8, %v1627_v45  ;;  %v840_v48 = vpop.permute.xlu1 %839  ;;  %v2180_v62 = vadd.f32 %v2179_v60, %v2034_v10  ;;  %v2219_v47 = vmul.f32 %v2034_v10, %v2034_v10  ;;  %v2036_v55 = vpop.f32.mrb[7].mxu0 }
 0x1dd   : > { %921 = vst.msk [vmem:[#allocation3 + $0xf0] sm:$0xff] %vm905_vm4, %v840_v48  ;;  %1451 = vrot.lane.b32.xlu0 %v1356_v5, %s2458_s4  ;;  %v1830_v55 = vld [vmem:[#allocation3 + $0x1b8] sm:$0xff] }
 0x1de   : > { %1642 = vrot.lane.b32.xlu1 %v1548_v33, %s2460_s6  ;;  %v2250_v18 = vadd.f32 %v2249_v23, %v2219_v47 }
 0x1df   : > { %v1049_v34 = vpop.permute.xlu0 %1048 }
 0x1e0   : > { %1122 = vst.msk [vmem:[#allocation3 + $0x170] sm:$0xff] %vm1098_vm5, %v1049_v34  ;;  %v1611_v58 = vpop.permute.xlu1 %1610 }
 0x1e1   : > { %1693 = vst.msk [vmem:[#allocation3 + $0xe0] sm:$0xff] %vm1678_vm8, %v1611_v58 }
 0x1e2   : > { %1257 = vrot.lane.b32.xlu1 %v3380_v25, %s2456_s26 }
 0x1e3   : > { %v1242_v61 = vpop.permute.xlu0 %1241  ;;  %v1819_v53 = vld [vmem:[#allocation3 + $0x160] sm:$0xff] }
 0x1e4   : > { %1315 = vst.msk [vmem:[#allocation3 + $0x170] sm:$0xff] %vm1291_vm6, %v1242_v61  ;;  %v1033_v38 = vpop.permute.xlu1 %1032  ;;  %2128 = vmatmul.mubr.f32.gmra.mrb[12].mxu1 %v1819_v53 }
 0x1e5   : > { %1114 = vst.msk [vmem:[#allocation3 + $0xf0] sm:$0xff] %vm1098_vm5, %v1033_v38  ;;  %2370 = vmatprep.mubr.msk.f32.mxu1 %vm142_vm0, %v1822_v12  ;;  %v1832_v38 = vld [vmem:[#allocation3 + $0x1c8] sm:$0xff] }
 0x1e6   : > { %1644 = vrot.lane.b32.xlu1 %v1549_v57, %s2460_s6 }
 0x1e7   : > { %v1420_v63 = vpop.permute.xlu0 %1419  ;;  %v2039_v26 = vpop.f32.mrb[8].mxu0 }
 0x1e8   : > { %v1226_v40 = vpop.permute.xlu1 %1225  ;;  %v2181_v30 = vadd.f32 %v2180_v62, %v2039_v26  ;;  %v2220_v25 = vmul.f32 %v2039_v26, %v2039_v26  ;;  %v1803_v41 = vld [vmem:[#allocation3 + $0xe0] sm:$0xff]  ;;  %v2041_v13 = vpop.f32.mrb[9].mxu0 }
 0x1e9   : > { %1307 = vst.msk [vmem:[#allocation3 + $0xf0] sm:$0xff] %vm1291_vm6, %v1226_v40  ;;  %2088 = vmatmul.mubr.f32.gmra.mrb[28].mxu0 %v1803_v41 }
 0x1ea   : > { %1501 = vst.msk [vmem:[#allocation3 + $0xf0] sm:$0xff] %vm1485_vm7, %v1420_v63  ;;  %v2251_v24 = vadd.f32 %v2250_v18, %v2220_v25  ;;  %2362 = vmatprep.mubr.msk.f32.mxu0 %vm142_vm0, %v1806_v22 }
 0x1eb   : > { %v858_v59 = vpop.permute.xlu0 %857 }
 0x1ec   : > { %v665_v51 = vpop.permute.xlu1 %664 }
 0x1ed   : > { %737 = vst.msk [vmem:[#allocation3 + $0x180] sm:$0xff] %vm712_vm3, %v665_v51 }
 0x1ee   : > { %930 = vst.msk [vmem:[#allocation3 + $0x180] sm:$0xff] %vm905_vm4, %v858_v59 }
 0x1ef   : > { %v1629_v14 = vpop.permute.xlu0 %1628 }
 0x1f0   : > { %v1436_v21 = vpop.permute.xlu1 %1435 }
 0x1f1   : > { %1509 = vst.msk [vmem:[#allocation3 + $0x170] sm:$0xff] %vm1485_vm7, %v1436_v21 }
 0x1f2   : > { %1702 = vst.msk [vmem:[#allocation3 + $0x170] sm:$0xff] %vm1678_vm8, %v1629_v14 }
 0x1f3   : > { %v1244_v37 = vpop.permute.xlu0 %1243  ;;  %v2044_v6 = vpop.f32.mrb[10].mxu0 }
 0x1f4   : > { %v1613_v39 = vpop.permute.xlu1 %1612  ;;  %v2182_v52 = vadd.f32 %v2181_v30, %v2044_v6  ;;  %v2221_v27 = vmul.f32 %v2044_v6, %v2044_v6  ;;  %v2046_v28 = vpop.f32.mrb[11].mxu0 }
 0x1f5   : > { %1694 = vst.msk [vmem:[#allocation3 + $0xf0] sm:$0xff] %vm1678_vm8, %v1613_v39 }
 0x1f6   : > { %v2252_v36 = vadd.f32 %v2251_v24, %v2221_v27 }
 0x1f7   : > { %v1438_v15 = vpop.permute.xlu0 %1437 }
 0x1f8   : > { %v1051_v56 = vpop.permute.xlu1 %1050 }
 0x1f9   : > { %1123 = vst.msk [vmem:[#allocation3 + $0x180] sm:$0xff] %vm1098_vm5, %v1051_v56  ;;  %v1821_v2 = vld [vmem:[#allocation3 + $0x170] sm:$0xff] }
 0x1fa   : > { %1316 = vst.msk [vmem:[#allocation3 + $0x180] sm:$0xff] %vm1291_vm6, %v1244_v37  ;;  %2133 = vmatmul.mubr.f32.gmra.mrb[14].mxu1 %v1821_v2 }
 0x1fb   : > { %1510 = vst.msk [vmem:[#allocation3 + $0x180] sm:$0xff] %vm1485_vm7, %v1438_v15  ;;  %v1631_v16 = vpop.permute.xlu0 %1630  ;;  %2371 = vmatprep.mubr.msk.f32.mxu1 %vm142_vm0, %v1824_v42 }
 0x1fc   : > { %1703 = vst.msk [vmem:[#allocation3 + $0x180] sm:$0xff] %vm1678_vm8, %v1631_v16  ;;  %v667_v8 = vpop.permute.xlu1 %666  ;;  %v1805_v32 = vld [vmem:[#allocation3 + $0xf0] sm:$0xff] }
 0x1fd   : > { %738 = vst.msk [vmem:[#allocation3 + $0x190] sm:$0xff] %vm712_vm3, %v667_v8  ;;  %2093 = vmatmul.mubr.f32.gmra.mrb[30].mxu0 %v1805_v32  ;;  %v1836_v32 = vld [vmem:[#allocation3 + $0x1e8] sm:$0xff] }
 0x1ff   : > { %v1246_v3 = vpop.permute.xlu0 %1245  ;;  %v2049_v17 = vpop.f32.mrb[12].mxu0 }
 0x200   : > { %v860_v49 = vpop.permute.xlu1 %859  ;;  %v2183_v29 = vadd.f32 %v2182_v52, %v2049_v17  ;;  %v2222_v50 = vmul.f32 %v2049_v17, %v2049_v17  ;;  %v2051_v54 = vpop.f32.mrb[13].mxu0 }
 0x201   : > { %931 = vst.msk [vmem:[#allocation3 + $0x190] sm:$0xff] %vm905_vm4, %v860_v49 }
 0x202   : > { %v2253_v19 = vadd.f32 %v2252_v36, %v2222_v50  ;;  %v1834_v36 = vld [vmem:[#allocation3 + $0x1d8] sm:$0xff] }
 0x203   : > { %v1440_v46 = vpop.permute.xlu0 %1439  ;;  %v1823_v35 = vld [vmem:[#allocation3 + $0x180] sm:$0xff] }
 0x204   : > { %v1053_v60 = vpop.permute.xlu1 %1052  ;;  %2138 = vmatmul.mubr.f32.gmra.mrb[16].mxu1 %v1823_v35 }
 0x205   : > { %1124 = vst.msk [vmem:[#allocation3 + $0x190] sm:$0xff] %vm1098_vm5, %v1053_v60  ;;  %2372 = vmatprep.mubr.msk.f32.mxu1 %vm142_vm0, %v1826_v11 }
 0x206   : > { %1317 = vst.msk [vmem:[#allocation3 + $0x190] sm:$0xff] %vm1291_vm6, %v1246_v3 }
 0x207   : > { %1511 = vst.msk [vmem:[#allocation3 + $0x190] sm:$0xff] %vm1485_vm7, %v1440_v46  ;;  %v1633_v31 = vpop.permute.xlu0 %1632 }
 0x208   : > { %1704 = vst.msk [vmem:[#allocation3 + $0x190] sm:$0xff] %vm1678_vm8, %v1633_v31  ;;  %v669_v0 = vpop.permute.xlu1 %668 }
 0x209   : > { %739 = vst.msk [vmem:[#allocation3 + $0x1a0] sm:$0xff] %vm712_vm3, %v669_v0 }
 0x20b   : > { %v1248_v4 = vpop.permute.xlu0 %1247 }
 0x20c   : > { %v862_v23 = vpop.permute.xlu1 %861 }
 0x20d   : > { %932 = vst.msk [vmem:[#allocation3 + $0x1a0] sm:$0xff] %vm905_vm4, %v862_v23 }
 0x20f   : > { %v1442_v44 = vpop.permute.xlu0 %1441  ;;  %v1825_v43 = vld [vmem:[#allocation3 + $0x190] sm:$0xff] }
 0x210   : > { %v1055_v7 = vpop.permute.xlu1 %1054  ;;  %2143 = vmatmul.mubr.f32.gmra.mrb[18].mxu1 %v1825_v43 }
 0x211   : > { %1125 = vst.msk [vmem:[#allocation3 + $0x1a0] sm:$0xff] %vm1098_vm5, %v1055_v7  ;;  %v2054_v1 = vpop.f32.mrb[14].mxu0  ;;  %2373 = vmatprep.mubr.msk.f32.mxu1 %vm142_vm0, %v1828_v20 }
 0x212   : > { %1318 = vst.msk [vmem:[#allocation3 + $0x1a0] sm:$0xff] %vm1291_vm6, %v1248_v4  ;;  %v2184_v9 = vadd.f32 %v2183_v29, %v2054_v1  ;;  %v2223_v33 = vmul.f32 %v2054_v1, %v2054_v1  ;;  %v2056_v45 = vpop.f32.mrb[15].mxu0 }
 0x213   : > { %1512 = vst.msk [vmem:[#allocation3 + $0x1a0] sm:$0xff] %vm1485_vm7, %v1442_v44  ;;  %v1635_v10 = vpop.permute.xlu0 %1634  ;;  %v1838_v44 = vld [vmem:[#allocation3 + $0x1f8] sm:$0xff] }
 0x214   : > { %v2254_v5 = vadd.f32 %v2253_v19, %v2223_v33  ;;  %1705 = vst.msk [vmem:[#allocation3 + $0x1a0] sm:$0xff] %vm1678_vm8, %v1635_v10  ;;  %v671_v48 = vpop.permute.xlu1 %670 }
 0x215   : > { %740 = vst.msk [vmem:[#allocation3 + $0x1b0] sm:$0xff] %vm712_vm3, %v671_v48 }
 0x217   : > { %v1250_v62 = vpop.permute.xlu0 %1249 }
 0x218   : > { %v864_v47 = vpop.permute.xlu1 %863 }
 0x219   : > { %933 = vst.msk [vmem:[#allocation3 + $0x1b0] sm:$0xff] %vm905_vm4, %v864_v47 }
 0x21b   : > { %v1444_v18 = vpop.permute.xlu0 %1443  ;;  %v1827_v34 = vld [vmem:[#allocation3 + $0x1a0] sm:$0xff] }
 0x21c   : > { %v1057_v58 = vpop.permute.xlu1 %1056  ;;  %2148 = vmatmul.mubr.f32.gmra.mrb[20].mxu1 %v1827_v34 }
 0x21d   : > { %1126 = vst.msk [vmem:[#allocation3 + $0x1b0] sm:$0xff] %vm1098_vm5, %v1057_v58  ;;  %2374 = vmatprep.mubr.msk.f32.mxu1 %vm142_vm0, %v1830_v55 }
 0x21e   : > { %1319 = vst.msk [vmem:[#allocation3 + $0x1b0] sm:$0xff] %vm1291_vm6, %v1250_v62 }
 0x21f   : > { %1513 = vst.msk [vmem:[#allocation3 + $0x1b0] sm:$0xff] %vm1485_vm7, %v1444_v18  ;;  %v1637_v57 = vpop.permute.xlu0 %1636 }
 0x220   : > { %1706 = vst.msk [vmem:[#allocation3 + $0x1b0] sm:$0xff] %vm1678_vm8, %v1637_v57  ;;  %v673_v12 = vpop.permute.xlu1 %672 }
 0x221   : > { %741 = vst.msk [vmem:[#allocation3 + $0x1c0] sm:$0xff] %vm712_vm3, %v673_v12 }
 0x223   : > { %v482_v61 = vpop.permute.xlu0 %481 }
 0x224   : > { %549 = vst.msk [vmem:[#allocation3 + $0x1d0] sm:$0xff] %vm519_vm2, %v482_v61  ;;  %v866_v53 = vpop.permute.xlu1 %865 }
 0x225   : > { %934 = vst.msk [vmem:[#allocation3 + $0x1c0] sm:$0xff] %vm905_vm4, %v866_v53 }
 0x227   : > { %v675_v63 = vpop.permute.xlu0 %674  ;;  %v1829_v26 = vld [vmem:[#allocation3 + $0x1b0] sm:$0xff]  ;;  %v3611_v22 = vpop.f32.mrb[0].mxu1 }
 0x228   : > { %742 = vst.msk [vmem:[#allocation3 + $0x1d0] sm:$0xff] %vm712_vm3, %v675_v63  ;;  %v1059_v40 = vpop.permute.xlu1 %1058  ;;  %2153 = vmatmul.mubr.f32.gmra.mrb[22].mxu1 %v1829_v26  ;;  %v2101_v30 = vpop.f32.mrb[1].mxu1 }
 0x229   : > { %1127 = vst.msk [vmem:[#allocation3 + $0x1c0] sm:$0xff] %vm1098_vm5, %v1059_v40  ;;  %2375 = vmatprep.mubr.msk.f32.mxu1 %vm142_vm0, %v1832_v38 }
 0x22b   : > { %v868_v25 = vpop.permute.xlu0 %867 }
 0x22c   : > { %v2059_v41 = vpop.f32.mrb[16].mxu0  ;;  %935 = vst.msk [vmem:[#allocation3 + $0x1d0] sm:$0xff] %vm905_vm4, %v868_v25  ;;  %v1252_v13 = vpop.permute.xlu1 %1251 }
 0x22d   : > { %v2185_v24 = vadd.f32 %v2184_v9, %v2059_v41  ;;  %v2224_v59 = vmul.f32 %v2059_v41, %v2059_v41  ;;  %v2061_v51 = vpop.f32.mrb[17].mxu0  ;;  %1320 = vst.msk [vmem:[#allocation3 + $0x1c0] sm:$0xff] %vm1291_vm6, %v1252_v13 }
 0x22f   : > { %v2255_v14 = vadd.f32 %v2254_v5, %v2224_v59  ;;  %v1061_v21 = vpop.permute.xlu0 %1060 }
 0x230   : > { %1128 = vst.msk [vmem:[#allocation3 + $0x1d0] sm:$0xff] %vm1098_vm5, %v1061_v21  ;;  %v1446_v37 = vpop.permute.xlu1 %1445 }
 0x231   : > { %1514 = vst.msk [vmem:[#allocation3 + $0x1c0] sm:$0xff] %vm1485_vm7, %v1446_v37 }
 0x233   : > { %v1254_v6 = vpop.permute.xlu0 %1253 }
 0x234   : > { %1321 = vst.msk [vmem:[#allocation3 + $0x1d0] sm:$0xff] %vm1291_vm6, %v1254_v6  ;;  %v1639_v39 = vpop.permute.xlu1 %1638 }
 0x235   : > { %1707 = vst.msk [vmem:[#allocation3 + $0x1c0] sm:$0xff] %vm1678_vm8, %v1639_v39 }
 0x237   : > { %v1448_v52 = vpop.permute.xlu0 %1447 }
 0x238   : > { %1515 = vst.msk [vmem:[#allocation3 + $0x1d0] sm:$0xff] %vm1485_vm7, %v1448_v52  ;;  %v484_v27 = vpop.permute.xlu1 %483 }
 0x239   : > { %550 = vst.msk [vmem:[#allocation3 + $0x1e0] sm:$0xff] %vm519_vm2, %v484_v27 }
 0x23b   : > { %v1641_v28 = vpop.permute.xlu0 %1640 }
 0x23c   : > { %1708 = vst.msk [vmem:[#allocation3 + $0x1d0] sm:$0xff] %vm1678_vm8, %v1641_v28  ;;  %v677_v15 = vpop.permute.xlu1 %676  ;;  %v1831_v56 = vld [vmem:[#allocation3 + $0x1c0] sm:$0xff] }
 0x23d   : > { %743 = vst.msk [vmem:[#allocation3 + $0x1e0] sm:$0xff] %vm712_vm3, %v677_v15  ;;  %2158 = vmatmul.mubr.f32.gmra.mrb[24].mxu1 %v1831_v56 }
 0x23e   : > { %2376 = vmatprep.mubr.msk.f32.mxu1 %vm142_vm0, %v1834_v36 }
 0x23f   : > { %v3627_v42 = vpop.f32.mrb[2].mxu1  ;;  %v486_v2 = vpop.permute.xlu0 %485 }
 0x240   : > { %v870_v16 = vpop.permute.xlu1 %869  ;;  %551 = vst.msk [vmem:[#allocation3 + $0x1f0] sm:$0xff] %vm519_vm2, %v486_v2  ;;  %v2106_v8 = vpop.f32.mrb[3].mxu1 }
 0x241   : > { %936 = vst.msk [vmem:[#allocation3 + $0x1e0] sm:$0xff] %vm905_vm4, %v870_v16  ;;  %v2232_v8 = vmul.f32 %v3611_v22, %v3611_v22 }
 0x243   : > { %v1833_v17 = vld [vmem:[#allocation3 + $0x1d0] sm:$0xff]  ;;  %v679_v19 = vpop.permute.xlu0 %678 }
 0x244   : > { %v2064_v3 = vpop.f32.mrb[18].mxu0  ;;  %v1063_v49 = vpop.permute.xlu1 %1062  ;;  %2163 = vmatmul.mubr.f32.gmra.mrb[26].mxu1 %v1833_v17  ;;  %744 = vst.msk [vmem:[#allocation3 + $0x1f0] sm:$0xff] %vm712_vm3, %v679_v19  ;;  %v2233_v17 = vmul.f32 %v3627_v42, %v3627_v42 }
 0x245   : > { %v2186_v29 = vadd.f32 %v2185_v24, %v2064_v3  ;;  %v2225_v50 = vmul.f32 %v2064_v3, %v2064_v3  ;;  %v2066_v54 = vpop.f32.mrb[19].mxu0  ;;  %1129 = vst.msk [vmem:[#allocation3 + $0x1e0] sm:$0xff] %vm1098_vm5, %v1063_v49  ;;  %2377 = vmatprep.mubr.msk.f32.mxu1 %vm142_vm0, %v1836_v32 }
 0x247   : > { %v2256_v11 = vadd.f32 %v2255_v14, %v2225_v50  ;;  %v872_v35 = vpop.permute.xlu0 %871 }
 0x248   : > { %v1256_v46 = vpop.permute.xlu1 %1255  ;;  %937 = vst.msk [vmem:[#allocation3 + $0x1f0] sm:$0xff] %vm905_vm4, %v872_v35 }
 0x249   : > { %1322 = vst.msk [vmem:[#allocation3 + $0x1e0] sm:$0xff] %vm1291_vm6, %v1256_v46 }
 0x24b   : > { %v1065_v31 = vpop.permute.xlu0 %1064 }
 0x24c   : > { %v1450_v60 = vpop.permute.xlu1 %1449  ;;  %1130 = vst.msk [vmem:[#allocation3 + $0x1f0] sm:$0xff] %vm1098_vm5, %v1065_v31 }
 0x24d   : > { %1516 = vst.msk [vmem:[#allocation3 + $0x1e0] sm:$0xff] %vm1485_vm7, %v1450_v60 }
 0x24f   : > { %v1452_v4 = vpop.permute.xlu0 %1451 }
 0x250   : > { %v1643_v0 = vpop.permute.xlu1 %1642 }
 0x251   : > { %1709 = vst.msk [vmem:[#allocation3 + $0x1e0] sm:$0xff] %vm1678_vm8, %v1643_v0 }
 0x254   : > { %v1258_v23 = vpop.permute.xlu1 %1257 }
 0x255   : > { %1323 = vst.msk [vmem:[#allocation3 + $0x1f0] sm:$0xff] %vm1291_vm6, %v1258_v23 }
 0x256   : > { %1517 = vst.msk [vmem:[#allocation3 + $0x1f0] sm:$0xff] %vm1485_vm7, %v1452_v4 }
 0x257   : > { %v2109_v20 = vpop.f32.mrb[4].mxu1 }
 0x258   : > { %v1645_v43 = vpop.permute.xlu1 %1644  ;;  %v1835_v7 = vld [vmem:[#allocation3 + $0x1e0] sm:$0xff]  ;;  %v2111_v1 = vpop.f32.mrb[5].mxu1  ;;  %v2234_v50 = vmul.f32 %v2109_v20, %v2109_v20 }
 0x259   : > { %1710 = vst.msk [vmem:[#allocation3 + $0x1f0] sm:$0xff] %vm1678_vm8, %v1645_v43  ;;  %2168 = vmatmul.mubr.f32.gmra.mrb[28].mxu1 %v1835_v7 }
 0x25a   : > { %2378 = vmatprep.mubr.msk.f32.mxu1 %vm142_vm0, %v1838_v44 }
 0x25c   : > { %v2069_v9 = vpop.f32.mrb[20].mxu0 }
 0x25d   : > { %v2187_v33 = vadd.f32 %v2186_v29, %v2069_v9  ;;  %v2226_v45 = vmul.f32 %v2069_v9, %v2069_v9  ;;  %v2071_v10 = vpop.f32.mrb[21].mxu0 }
 0x25f   : > { %v2257_v5 = vadd.f32 %v2256_v11, %v2226_v45 }
 0x260   : > { %v1837_v48 = vld [vmem:[#allocation3 + $0x1f0] sm:$0xff] }
 0x261   : > { %2173 = vmatmul.mubr.f32.gmra.mrb[30].mxu1 %v1837_v48 }
 0x26f   : > { %v2114_v62 = vpop.f32.mrb[6].mxu1 }
 0x270   : > { %v2116_v47 = vpop.f32.mrb[7].mxu1  ;;  %v2235_v35 = vmul.f32 %v2114_v62, %v2114_v62 }
 0x274   : > { %v2074_v55 = vpop.f32.mrb[22].mxu0 }
 0x275   : > { %v2188_v18 = vadd.f32 %v2187_v33, %v2074_v55  ;;  %v2227_v34 = vmul.f32 %v2074_v55, %v2074_v55  ;;  %v2076_v58 = vpop.f32.mrb[23].mxu0 }
 0x277   : > { %v2258_v57 = vadd.f32 %v2257_v5, %v2227_v34 }
 0x287   : > { %v2119_v12 = vpop.f32.mrb[8].mxu1 }
 0x288   : > { %v2121_v61 = vpop.f32.mrb[9].mxu1  ;;  %v2236_v0 = vmul.f32 %v2119_v12, %v2119_v12 }
 0x28c   : > { %v2079_v53 = vpop.f32.mrb[24].mxu0 }
 0x28d   : > { %v2189_v38 = vadd.f32 %v2188_v18, %v2079_v53  ;;  %v2228_v63 = vmul.f32 %v2079_v53, %v2079_v53  ;;  %v2081_v26 = vpop.f32.mrb[25].mxu0 }
 0x28f   : > { %v2259_v40 = vadd.f32 %v2258_v57, %v2228_v63 }
 0x29f   : > { %v2124_v30 = vpop.f32.mrb[10].mxu1 }
 0x2a0   : > { %v2126_v25 = vpop.f32.mrb[11].mxu1  ;;  %v2237_v44 = vmul.f32 %v2124_v30, %v2124_v30 }
 0x2a4   : > { %v2084_v41 = vpop.f32.mrb[26].mxu0 }
 0x2a5   : > { %v2190_v13 = vadd.f32 %v2189_v38, %v2084_v41  ;;  %v2229_v24 = vmul.f32 %v2084_v41, %v2084_v41  ;;  %v2086_v59 = vpop.f32.mrb[27].mxu0 }
 0x2a7   : > { %v2260_v51 = vadd.f32 %v2259_v40, %v2229_v24 }
 0x2b7   : > { %v2129_v14 = vpop.f32.mrb[12].mxu1 }
 0x2b8   : > { %v2131_v21 = vpop.f32.mrb[13].mxu1  ;;  %v2238_v7 = vmul.f32 %v2129_v14, %v2129_v14 }
 0x2bc   : > { %v2089_v37 = vpop.f32.mrb[28].mxu0 }
 0x2bd   : > { %v2191_v6 = vadd.f32 %v2190_v13, %v2089_v37  ;;  %v2230_v39 = vmul.f32 %v2089_v37, %v2089_v37  ;;  %v2091_v52 = vpop.f32.mrb[29].mxu0 }
 0x2bf   : > { %v2261_v27 = vadd.f32 %v2260_v51, %v2230_v39 }
 0x2cd   : > { %v2134_v28 = vpop.f32.mrb[14].mxu1 }
 0x2ce   : > { %v2136_v36 = vpop.f32.mrb[15].mxu1 }
 0x2d0   : > { %v2094_v15 = vpop.f32.mrb[30].mxu0 }
 0x2d1   : > { %v2192_v56 = vadd.f32 %v2191_v6, %v2094_v15  ;;  %v2231_v2 = vmul.f32 %v2094_v15, %v2094_v15  ;;  %v2096_v16 = vpop.f32.mrb[31].mxu0 }
 0x2d3   : > { %v2193_v32 = vadd.f32 %v2192_v56, %v3611_v22  ;;  %v2262_v3 = vadd.f32 %v2261_v27, %v2231_v2 }
 0x2d5   : > { %v2194_v49 = vadd.f32 %v2193_v32, %v3627_v42  ;;  %v2263_v29 = vadd.f32 %v2262_v3, %v2232_v8  ;;  %v2239_v42 = vmul.f32 %v2134_v28, %v2134_v28 }
 0x2d7   : > { %v2195_v54 = vadd.f32 %v2194_v49, %v2109_v20  ;;  %v2264_v19 = vadd.f32 %v2263_v29, %v2233_v17  ;;  %v2139_v11 = vpop.f32.mrb[16].mxu1 }
 0x2d8   : > { %v2141_v46 = vpop.f32.mrb[17].mxu1  ;;  %v2240_v5 = vmul.f32 %v2139_v11, %v2139_v11 }
 0x2d9   : > { %v2265_v60 = vadd.f32 %v2264_v19, %v2234_v50  ;;  %v2196_v31 = vadd.f32 %v2195_v54, %v2114_v62 }
 0x2db   : > { %v2197_v4 = vadd.f32 %v2196_v31, %v2119_v12  ;;  %v2266_v23 = vadd.f32 %v2265_v60, %v2235_v35 }
 0x2dd   : > { %v2198_v22 = vadd.f32 %v2197_v4, %v2124_v30  ;;  %v2267_v43 = vadd.f32 %v2266_v23, %v2236_v0 }
 0x2df   : > { %v2199_v1 = vadd.f32 %v2198_v22, %v2129_v14  ;;  %v2268_v9 = vadd.f32 %v2267_v43, %v2237_v44 }
 0x2e1   : > { %v2200_v33 = vadd.f32 %v2199_v1, %v2134_v28  ;;  %v2269_v45 = vadd.f32 %v2268_v9, %v2238_v7 }
 0x2e3   : > { %v2270_v10 = vadd.f32 %v2269_v45, %v2239_v42  ;;  %v2201_v20 = vadd.f32 %v2200_v33, %v2139_v11  ;;  %v2144_v48 = vpop.f32.mrb[18].mxu1 }
 0x2e4   : > { %v2241_v47 = vmul.f32 %v2144_v48, %v2144_v48  ;;  %v2146_v55 = vpop.f32.mrb[19].mxu1 }
 0x2e5   : > { %v2271_v18 = vadd.f32 %v2270_v10, %v2240_v5  ;;  %v2202_v62 = vadd.f32 %v2201_v20, %v2144_v48 }
 0x2e7   : > { %v2272_v34 = vadd.f32 %v2271_v18, %v2241_v47 }
 0x2ef   : > { %v2149_v58 = vpop.f32.mrb[20].mxu1 }
 0x2f0   : > { %v2203_v57 = vadd.f32 %v2202_v62, %v2149_v58  ;;  %v2242_v12 = vmul.f32 %v2149_v58, %v2149_v58  ;;  %v2151_v61 = vpop.f32.mrb[21].mxu1 }
 0x2f2   : > { %v2273_v53 = vadd.f32 %v2272_v34, %v2242_v12 }
 0x2fb   : > { %v2154_v38 = vpop.f32.mrb[22].mxu1 }
 0x2fc   : > { %v2204_v63 = vadd.f32 %v2203_v57, %v2154_v38  ;;  %v2243_v26 = vmul.f32 %v2154_v38, %v2154_v38  ;;  %v2156_v40 = vpop.f32.mrb[23].mxu1 }
 0x2fe   : > { %v2274_v30 = vadd.f32 %v2273_v53, %v2243_v26 }
 0x310   : > { %v2159_v25 = vpop.f32.mrb[24].mxu1 }
 0x311   : > { %v2205_v41 = vadd.f32 %v2204_v63, %v2159_v25  ;;  %v2244_v13 = vmul.f32 %v2159_v25, %v2159_v25  ;;  %v2161_v24 = vpop.f32.mrb[25].mxu1 }
 0x313   : > { %v2275_v59 = vadd.f32 %v2274_v30, %v2244_v13 }
 0x317   : > { %v2164_v51 = vpop.f32.mrb[26].mxu1 }
 0x318   : > { %v2206_v14 = vadd.f32 %v2205_v41, %v2164_v51  ;;  %v2245_v21 = vmul.f32 %v2164_v51, %v2164_v51  ;;  %v2166_v37 = vpop.f32.mrb[27].mxu1 }
 0x31a   : > { %v2276_v6 = vadd.f32 %v2275_v59, %v2245_v21 }
 0x32c   : > { %v2169_v39 = vpop.f32.mrb[28].mxu1 }
 0x32d   : > { %v2207_v52 = vadd.f32 %v2206_v14, %v2169_v39  ;;  %v2246_v27 = vmul.f32 %v2169_v39, %v2169_v39  ;;  %v2171_v28 = vpop.f32.mrb[29].mxu1 }
 0x32f   : > { %v2277_v36 = vadd.f32 %v2276_v6, %v2246_v27 }
 0x334   : > { %v2174_v15 = vpop.f32.mrb[30].mxu1 }
 0x335   : > { %v2208_v56 = vadd.f32 %v2207_v52, %v2174_v15  ;;  %v2247_v2 = vmul.f32 %v2174_v15, %v2174_v15  ;;  %v2176_v16 = vpop.f32.mrb[31].mxu1 }
 0x337   : > { %v2209_v8 = vrot.slane %v2208_v56, 4  ;;  %v2278_v32 = vadd.f32 %v2277_v36, %v2247_v2 }
 0x339   : > { %v2210_v3 = vadd.f32 %v2209_v8, %v2208_v56  ;;  %v2279_v17 = vrot.slane %v2278_v32, 4 }
 0x33b   : > { %v2211_v49 = vrot.slane %v2210_v3, 2  ;;  %v2280_v29 = vadd.f32 %v2279_v17, %v2278_v32 }
 0x33d   : > { %v2212_v50 = vadd.f32 %v2211_v49, %v2210_v3  ;;  %v2281_v54 = vrot.slane %v2280_v29, 2 }
 0x33f   : > { %v2213_v19 = vrot.slane %v2212_v50, 1  ;;  %v2282_v11 = vadd.f32 %v2281_v54, %v2280_v29 }
 0x341   : > { %v2214_v46 = vadd.f32 %v2213_v19, %v2212_v50  ;;  %v2283_v35 = vrot.slane %v2282_v11, 1 }
 0x343   : > { %2215 = vst [vmem:[%s141_s8] sm:$0x1] %v2214_v46  ;;  %v2284_v60 = vadd.f32 %v2283_v35, %v2282_v11 }
 0x345   : > { %2285 = vst [vmem:[%s141_s8 + $0x1] sm:$0x1] %v2284_v60 }
 0x346 PF: > { %s12_s9 = sadd.s32 1, %s2450_s9  }
 0x347   : > { %p9_p4 = scmp.ge.s32.totalorder %s12_s9, 4  }
 0x349   :  { %11 = sbr.rel (!%p9_p4) target bundleno = 1 (0x1), region = 60 }

// kernel: nas201_search_cell_forward.7
= control target key start
LH: loop header
LB: loop body
LE: loop exit
PB: predicated region body
PF: predicated region fallthrough
CT: control target
= control target key end

     0   :  { %s5164_s15 = smov 0   ;;  %s8198_s0 = inlined_call_operand.vmem [shape: f32[2,16,16,16], index: 0, kind: input, shape index: {}]   ;;  %s8199_s1 = inlined_call_operand.vmem [shape: f32[304,128], index: 1, kind: input, shape index: {}]   ;;  %s8200_s2 = inlined_call_operand.vmem [shape: f32[1,128], index: 2, kind: input, shape index: {}]   ;;  %s8201_s3 = inlined_call_operand.vmem [shape: f32[256,1], index: 3, kind: input, shape index: {}]   ;;  %s8202_s4 = inlined_call_operand.vmem [shape: f32[512,128], index: 4, kind: output, shape index: {}]  }
   0x1 LB: > { %s5170_s16 = sadd.s32 4294967295, %s5127_s15   ;;  %p4820_p0 = scmp.ge.s32.totalorder %s5127_s15, 1  ;;  %s5127_s15 = sphi %s5164_s15, %s14_s15  }
   0x2   : > { %p162_p1 = scmp.lt.s32.totalorder %s5127_s15, 3 }
   0x4   : > { %p163_p2 = pnand %p4820_p0, %p162_p1 }
   0x6   : > { %166 = sbr.rel (%p163_p2) target bundleno = 1500 (0x5dc), region = 36 }
   0xd   : > { %v322_v0 = vld [vmem:[%s8201_s3 + $0x10] sm:$0xff]  ;;  %v320_v1 = vld [vmem:[%s8201_s3] sm:$0xff]  ;;  %vm199_vm0 = vcmask 130048   ;;  %v5129_v2 = vmov 0   ;;  %v5130_v3 = vmov 0.0   ;;  %vm202_vm1 = vcmask 123904  }
   0xe   : > { %5070 = vset.pattern.permute.xlu1 %v5129_v2  ;;  %5069 = vset.pattern.permute.xlu0 %v5129_v2  ;;  %200 = vst.msk [vmem:[#allocation2] sm:$0xff] %vm199_vm0, %v5130_v3  ;;  %201 = vst.msk [vmem:[#allocation2 + $0x8] sm:$0xff] %vm199_vm0, %v5130_v3  ;;  %p188_p3 = scmp.lt.s32.totalorder %s5170_s16, 1  ;;  %v323_v4 = vld [vmem:[%s8201_s3 + $0x18] sm:$0xff]  ;;  %v321_v5 = vld [vmem:[%s8201_s3 + $0x8] sm:$0xff]  ;;  %s5131_s14 = smov 16  }
   0xf   : > { %204 = vst.msk [vmem:[#allocation2 + $0x18] sm:$0xff] %vm199_vm0, %v5130_v3  ;;  %205 = vst.msk [vmem:[#allocation2 + $0x20] sm:$0xff] %vm199_vm0, %v5130_v3  ;;  %460 = vperm.xlu1 %5070, %v322_v0   ;;  %450 = vperm.xlu0 %5069, %v320_v1   ;;  %v325_v6 = vld [vmem:[%s8201_s3 + $0x28] sm:$0xff]  ;;  %v324_v7 = vld [vmem:[%s8201_s3 + $0x20] sm:$0xff]  ;;  %vm993_vm2 = vcmask 261248   ;;  %vm768_vm3 = vcmask 392448  }
  0x10   : > { %207 = vst.msk [vmem:[#allocation2 + $0x30] sm:$0xff] %vm199_vm0, %v5130_v3  ;;  %208 = vst.msk [vmem:[#allocation2 + $0x38] sm:$0xff] %vm199_vm0, %v5130_v3  ;;  %s189_s25 = scalar_select %p188_p3, %s5170_s16, 1  ;;  %v327_v8 = vld [vmem:[%s8201_s3 + $0x38] sm:$0xff]  ;;  %v326_v9 = vld [vmem:[%s8201_s3 + $0x30] sm:$0xff]  ;;  %vm1186_vm4 = vcmask 523648  }
  0x11   : > { %210 = vst.msk [vmem:[#allocation2 + $0x48] sm:$0xff] %vm199_vm0, %v5130_v3  ;;  %211 = vst.msk [vmem:[#allocation2 + $0x50] sm:$0xff] %vm199_vm0, %v5130_v3  ;;  %v329_v13 = vld [vmem:[%s8201_s3 + $0x48] sm:$0xff]  ;;  %v328_v14 = vld [vmem:[%s8201_s3 + $0x40] sm:$0xff]  ;;  %s5133_s17 = smov 48   ;;  %s5134_s18 = smov 64  }
  0x12   : > { %213 = vst.msk [vmem:[#allocation2 + $0x60] sm:$0xff] %vm199_vm0, %v5130_v3  ;;  %214 = vst.msk [vmem:[#allocation2 + $0x68] sm:$0xff] %vm199_vm0, %v5130_v3  ;;  %s4860_s26 = sshll.u32 %s189_s25, 8  ;;  %v331_v28 = vld [vmem:[%s8201_s3 + $0x58] sm:$0xff]  ;;  %v330_v29 = vld [vmem:[%s8201_s3 + $0x50] sm:$0xff]  ;;  %vm1603_vm5 = vcmask 654848  }
  0x13   : > { %216 = vst.msk [vmem:[#allocation2 + $0x78] sm:$0xff] %vm199_vm0, %v5130_v3  ;;  %217 = vst.msk [vmem:[#allocation2 + $0x80] sm:$0xff] %vm199_vm0, %v5130_v3  ;;  %465 = vperm.xlu1 %5070, %v323_v4   ;;  %455 = vperm.xlu0 %5069, %v321_v5   ;;  %s5253_s7 = scalar_lea.vmem %s8198_s0, %s4860_s26  ;;  %v333_v30 = vld [vmem:[%s8201_s3 + $0x68] sm:$0xff]  ;;  %v332_v31 = vld [vmem:[%s8201_s3 + $0x60] sm:$0xff]  ;;  %s5135_s19 = smov 80   ;;  %vm2020_vm6 = vcmask 786048  }
  0x14   : > { %219 = vst.msk [vmem:[#allocation2 + $0x90] sm:$0xff] %vm199_vm0, %v5130_v3  ;;  %220 = vst.msk [vmem:[#allocation2 + $0x98] sm:$0xff] %vm199_vm0, %v5130_v3  ;;  %v255_v10 = vld [vmem:[%s5253_s7] sm:$0xff]  ;;  %v256_v11 = vld [vmem:[%s5253_s7 + $0x8] sm:$0xff]  ;;  %s5136_s20 = smov 96   ;;  %vm2437_vm7 = vcmask 917248  }
  0x15   : > { %222 = vst.msk [vmem:[#allocation2 + $0xa8] sm:$0xff] %vm199_vm0, %v5130_v3  ;;  %223 = vst.msk [vmem:[#allocation2 + $0xb0] sm:$0xff] %vm199_vm0, %v5130_v3  ;;  %v257_v12 = vld [vmem:[%s5253_s7 + $0x10] sm:$0xff]  ;;  %v258_v15 = vld [vmem:[%s5253_s7 + $0x18] sm:$0xff]  ;;  %s5138_s21 = smov 112   ;;  %vm3014_vm8 = vcmask 1048448  }
  0x16   : > { %225 = vst.msk [vmem:[#allocation2 + $0xc0] sm:$0xff] %vm199_vm0, %v5130_v3  ;;  %226 = vst.msk [vmem:[#allocation2 + $0xc8] sm:$0xff] %vm199_vm0, %v5130_v3  ;;  %v259_v16 = vld [vmem:[%s5253_s7 + $0x20] sm:$0xff]  ;;  %v260_v17 = vld [vmem:[%s5253_s7 + $0x28] sm:$0xff]  ;;  %vm4181_vm9 = vcmask 392192  }
  0x17   : > { %228 = vst.msk [vmem:[#allocation2 + $0xd8] sm:$0xff] %vm199_vm0, %v5130_v3  ;;  %229 = vst.msk [vmem:[#allocation2 + $0xe0] sm:$0xff] %vm199_vm0, %v5130_v3  ;;  %475 = vperm.xlu1 %5070, %v325_v6   ;;  %470 = vperm.xlu0 %5069, %v324_v7   ;;  %v261_v18 = vld [vmem:[%s5253_s7 + $0x30] sm:$0xff]  ;;  %v262_v19 = vld [vmem:[%s5253_s7 + $0x38] sm:$0xff] }
  0x18   : > { %231 = vst.msk [vmem:[#allocation2 + $0xf0] sm:$0xff] %vm199_vm0, %v5130_v3  ;;  %232 = vst.msk [vmem:[#allocation2 + $0xf8] sm:$0xff] %vm199_vm0, %v5130_v3  ;;  %v263_v20 = vld [vmem:[%s5253_s7 + $0x40] sm:$0xff]  ;;  %v264_v21 = vld [vmem:[%s5253_s7 + $0x48] sm:$0xff] }
  0x19   : > { %234 = vst.msk [vmem:[#allocation2 + $0x108] sm:$0xff] %vm199_vm0, %v5130_v3  ;;  %235 = vst.msk [vmem:[#allocation2 + $0x110] sm:$0xff] %vm199_vm0, %v5130_v3  ;;  %v265_v22 = vld [vmem:[%s5253_s7 + $0x50] sm:$0xff]  ;;  %v266_v23 = vld [vmem:[%s5253_s7 + $0x58] sm:$0xff] }
  0x1a   : > { %237 = vst.msk [vmem:[#allocation2 + $0x120] sm:$0xff] %vm199_vm0, %v5130_v3  ;;  %238 = vst.msk [vmem:[#allocation2 + $0x128] sm:$0xff] %vm199_vm0, %v5130_v3  ;;  %v267_v24 = vld [vmem:[%s5253_s7 + $0x60] sm:$0xff]  ;;  %v268_v25 = vld [vmem:[%s5253_s7 + $0x68] sm:$0xff] }
  0x1b   : > { %240 = vst.msk [vmem:[#allocation2 + $0x138] sm:$0xff] %vm199_vm0, %v5130_v3  ;;  %241 = vst.msk [vmem:[#allocation2 + $0x140] sm:$0xff] %vm199_vm0, %v5130_v3  ;;  %485 = vperm.xlu1 %5070, %v327_v8   ;;  %480 = vperm.xlu0 %5069, %v326_v9   ;;  %v269_v26 = vld [vmem:[%s5253_s7 + $0x70] sm:$0xff]  ;;  %v270_v27 = vld [vmem:[%s5253_s7 + $0x78] sm:$0xff] }
  0x1c   : > { %243 = vst.msk [vmem:[#allocation2 + $0x150] sm:$0xff] %vm199_vm0, %v5130_v3  ;;  %244 = vst.msk [vmem:[#allocation2 + $0x158] sm:$0xff] %vm199_vm0, %v5130_v3  ;;  %v271_v32 = vld [vmem:[%s5253_s7 + $0x80] sm:$0xff]  ;;  %v272_v33 = vld [vmem:[%s5253_s7 + $0x88] sm:$0xff] }
  0x1d   : > { %246 = vst.msk [vmem:[#allocation2 + $0x168] sm:$0xff] %vm199_vm0, %v5130_v3  ;;  %247 = vst.msk [vmem:[#allocation2 + $0x170] sm:$0xff] %vm199_vm0, %v5130_v3  ;;  %v273_v34 = vld [vmem:[%s5253_s7 + $0x90] sm:$0xff]  ;;  %v274_v35 = vld [vmem:[%s5253_s7 + $0x98] sm:$0xff] }
  0x1e   : > { %249 = vst.msk [vmem:[#allocation2 + $0x180] sm:$0xff] %vm199_vm0, %v5130_v3  ;;  %250 = vst.msk [vmem:[#allocation2 + $0x188] sm:$0xff] %vm199_vm0, %v5130_v3  ;;  %v335_v36 = vld [vmem:[%s8201_s3 + $0x78] sm:$0xff]  ;;  %v334_v37 = vld [vmem:[%s8201_s3 + $0x70] sm:$0xff] }
  0x1f   : > { %252 = vst.msk [vmem:[#allocation2 + $0x198] sm:$0xff] %vm199_vm0, %v5130_v3  ;;  %253 = vst.msk [vmem:[#allocation2 + $0x1a0] sm:$0xff] %vm199_vm0, %v5130_v3  ;;  %495 = vperm.xlu1 %5070, %v329_v13   ;;  %490 = vperm.xlu0 %5069, %v328_v14   ;;  %v275_v38 = vld [vmem:[%s5253_s7 + $0xa0] sm:$0xff]  ;;  %v276_v39 = vld [vmem:[%s5253_s7 + $0xa8] sm:$0xff] }
  0x20   : > { %203 = vst.msk [vmem:[#allocation2 + $0x10] sm:$0x3] %vm202_vm1, %v5130_v3  ;;  %206 = vst.msk [vmem:[#allocation2 + $0x28] sm:$0x3] %vm202_vm1, %v5130_v3  ;;  %v337_v40 = vld [vmem:[%s8201_s3 + $0x88] sm:$0xff]  ;;  %v336_v41 = vld [vmem:[%s8201_s3 + $0x80] sm:$0xff] }
  0x21   : > { %209 = vst.msk [vmem:[#allocation2 + $0x40] sm:$0x3] %vm202_vm1, %v5130_v3  ;;  %212 = vst.msk [vmem:[#allocation2 + $0x58] sm:$0x3] %vm202_vm1, %v5130_v3  ;;  %v277_v42 = vld [vmem:[%s5253_s7 + $0xb0] sm:$0xff]  ;;  %v278_v43 = vld [vmem:[%s5253_s7 + $0xb8] sm:$0xff] }
  0x22   : > { %215 = vst.msk [vmem:[#allocation2 + $0x70] sm:$0x3] %vm202_vm1, %v5130_v3  ;;  %218 = vst.msk [vmem:[#allocation2 + $0x88] sm:$0x3] %vm202_vm1, %v5130_v3  ;;  %v339_v44 = vld [vmem:[%s8201_s3 + $0x98] sm:$0xff]  ;;  %v338_v45 = vld [vmem:[%s8201_s3 + $0x90] sm:$0xff] }
  0x23   : > { %221 = vst.msk [vmem:[#allocation2 + $0xa0] sm:$0x3] %vm202_vm1, %v5130_v3  ;;  %224 = vst.msk [vmem:[#allocation2 + $0xb8] sm:$0x3] %vm202_vm1, %v5130_v3  ;;  %505 = vperm.xlu1 %5070, %v331_v28   ;;  %500 = vperm.xlu0 %5069, %v330_v29   ;;  %v279_v46 = vld [vmem:[%s5253_s7 + $0xc0] sm:$0xff]  ;;  %v280_v47 = vld [vmem:[%s5253_s7 + $0xc8] sm:$0xff] }
  0x24   : > { %227 = vst.msk [vmem:[#allocation2 + $0xd0] sm:$0x3] %vm202_vm1, %v5130_v3  ;;  %230 = vst.msk [vmem:[#allocation2 + $0xe8] sm:$0x3] %vm202_vm1, %v5130_v3  ;;  %v341_v48 = vld [vmem:[%s8201_s3 + $0xa8] sm:$0xff]  ;;  %v340_v49 = vld [vmem:[%s8201_s3 + $0xa0] sm:$0xff] }
  0x25   : > { %233 = vst.msk [vmem:[#allocation2 + $0x100] sm:$0x3] %vm202_vm1, %v5130_v3  ;;  %236 = vst.msk [vmem:[#allocation2 + $0x118] sm:$0x3] %vm202_vm1, %v5130_v3  ;;  %v281_v50 = vld [vmem:[%s5253_s7 + $0xd0] sm:$0xff]  ;;  %v282_v51 = vld [vmem:[%s5253_s7 + $0xd8] sm:$0xff] }
  0x26   : > { %239 = vst.msk [vmem:[#allocation2 + $0x130] sm:$0x3] %vm202_vm1, %v5130_v3  ;;  %242 = vst.msk [vmem:[#allocation2 + $0x148] sm:$0x3] %vm202_vm1, %v5130_v3  ;;  %v343_v52 = vld [vmem:[%s8201_s3 + $0xb8] sm:$0xff]  ;;  %v342_v53 = vld [vmem:[%s8201_s3 + $0xb0] sm:$0xff] }
  0x27   : > { %245 = vst.msk [vmem:[#allocation2 + $0x160] sm:$0x3] %vm202_vm1, %v5130_v3  ;;  %248 = vst.msk [vmem:[#allocation2 + $0x178] sm:$0x3] %vm202_vm1, %v5130_v3  ;;  %515 = vperm.xlu1 %5070, %v333_v30   ;;  %510 = vperm.xlu0 %5069, %v332_v31   ;;  %v283_v54 = vld [vmem:[%s5253_s7 + $0xe0] sm:$0xff]  ;;  %v284_v55 = vld [vmem:[%s5253_s7 + $0xe8] sm:$0xff] }
  0x28   : > { %251 = vst.msk [vmem:[#allocation2 + $0x190] sm:$0x3] %vm202_vm1, %v5130_v3  ;;  %254 = vst.msk [vmem:[#allocation2 + $0x1a8] sm:$0x3] %vm202_vm1, %v5130_v3  ;;  %v345_v56 = vld [vmem:[%s8201_s3 + $0xc8] sm:$0xff]  ;;  %v344_v57 = vld [vmem:[%s8201_s3 + $0xc0] sm:$0xff] }
  0x29   : > { %288 = vst.msk [vmem:[#allocation2 + $0x19] sm:$0xff] %vm199_vm0, %v255_v10  ;;  %289 = vst.msk [vmem:[#allocation2 + $0x21] sm:$0xff] %vm199_vm0, %v256_v11  ;;  %v347_v58 = vld [vmem:[%s8201_s3 + $0xd8] sm:$0xff]  ;;  %v346_v59 = vld [vmem:[%s8201_s3 + $0xd0] sm:$0xff] }
  0x2a   : > { %290 = vst.msk [vmem:[#allocation2 + $0x31] sm:$0xff] %vm199_vm0, %v257_v12  ;;  %291 = vst.msk [vmem:[#allocation2 + $0x39] sm:$0xff] %vm199_vm0, %v258_v15  ;;  %v349_v60 = vld [vmem:[%s8201_s3 + $0xe8] sm:$0xff]  ;;  %v348_v61 = vld [vmem:[%s8201_s3 + $0xe0] sm:$0xff] }
  0x2b   : > { %292 = vst.msk [vmem:[#allocation2 + $0x49] sm:$0xff] %vm199_vm0, %v259_v16  ;;  %293 = vst.msk [vmem:[#allocation2 + $0x51] sm:$0xff] %vm199_vm0, %v260_v17  ;;  %525 = vperm.xlu1 %5070, %v335_v36   ;;  %520 = vperm.xlu0 %5069, %v334_v37   ;;  %v351_v62 = vld [vmem:[%s8201_s3 + $0xf8] sm:$0xff]  ;;  %v350_v63 = vld [vmem:[%s8201_s3 + $0xf0] sm:$0xff] }
  0x2c   : > { %294 = vst.msk [vmem:[#allocation2 + $0x61] sm:$0xff] %vm199_vm0, %v261_v18  ;;  %295 = vst.msk [vmem:[#allocation2 + $0x69] sm:$0xff] %vm199_vm0, %v262_v19  ;;  %v5393_v0 = vld [vmem:[#allocation2 + $0x1] sm:$0xff]  ;;  %v5395_v1 = vld [vmem:[#allocation2 + $0x9] sm:$0xff] }
  0x2d   : > { %296 = vst.msk [vmem:[#allocation2 + $0x79] sm:$0xff] %vm199_vm0, %v263_v20  ;;  %297 = vst.msk [vmem:[#allocation2 + $0x81] sm:$0xff] %vm199_vm0, %v264_v21  ;;  %v833_v2 = vmax.f32 %v5393_v0, 0.0  ;;  %v834_v3 = vmax.f32 %v5395_v1, 0.0  ;;  %v285_v6 = vld [vmem:[%s5253_s7 + $0xf0] sm:$0xff]  ;;  %v286_v7 = vld [vmem:[%s5253_s7 + $0xf8] sm:$0xff] }
  0x2e   : > { %298 = vst.msk [vmem:[#allocation2 + $0x91] sm:$0xff] %vm199_vm0, %v265_v22  ;;  %299 = vst.msk [vmem:[#allocation2 + $0x99] sm:$0xff] %vm199_vm0, %v266_v23  ;;  %v352_v10 = vld [vmem:[#allocation2] sm:$0xff]  ;;  %v353_v12 = vld [vmem:[#allocation2 + $0x8] sm:$0xff]  ;;  %s5132_s7 = smov 32  }
  0x2f   : > { %300 = vst.msk [vmem:[#allocation2 + $0xa9] sm:$0xff] %vm199_vm0, %v267_v24  ;;  %301 = vst.msk [vmem:[#allocation2 + $0xb1] sm:$0xff] %vm199_vm0, %v268_v25  ;;  %535 = vperm.xlu1 %5070, %v337_v40   ;;  %530 = vperm.xlu0 %5069, %v336_v41   ;;  %v384_v11 = vmax.f32 %v352_v10, 0.0  ;;  %v385_v14 = vmax.f32 %v353_v12, 0.0 }
  0x30   : > { %302 = vst.msk [vmem:[#allocation2 + $0xc1] sm:$0xff] %vm199_vm0, %v269_v26  ;;  %303 = vst.msk [vmem:[#allocation2 + $0xc9] sm:$0xff] %vm199_vm0, %v270_v27  ;;  %v5399_v4 = vld [vmem:[#allocation2 + $0x19] sm:$0xff]  ;;  %v5401_v5 = vld [vmem:[#allocation2 + $0x21] sm:$0xff] }
  0x31   : > { %304 = vst.msk [vmem:[#allocation2 + $0xd9] sm:$0xff] %vm199_vm0, %v271_v32  ;;  %305 = vst.msk [vmem:[#allocation2 + $0xe1] sm:$0xff] %vm199_vm0, %v272_v33  ;;  %v835_v8 = vmax.f32 %v5399_v4, 0.0  ;;  %v836_v9 = vmax.f32 %v5401_v5, 0.0  ;;  %v354_v13 = vld [vmem:[#allocation2 + $0x18] sm:$0xff]  ;;  %v355_v16 = vld [vmem:[#allocation2 + $0x20] sm:$0xff] }
  0x32   : > { %306 = vst.msk [vmem:[#allocation2 + $0xf1] sm:$0xff] %vm199_vm0, %v273_v34  ;;  %307 = vst.msk [vmem:[#allocation2 + $0xf9] sm:$0xff] %vm199_vm0, %v274_v35  ;;  %v386_v15 = vmax.f32 %v354_v13, 0.0  ;;  %v387_v17 = vmax.f32 %v355_v16, 0.0  ;;  %v5429_v25 = vld [vmem:[#allocation2 + $0x30] sm:$0xff]  ;;  %v5440_v30 = vld [vmem:[#allocation2 + $0x38] sm:$0xff] }
  0x33   : > { %308 = vst.msk [vmem:[#allocation2 + $0x109] sm:$0xff] %vm199_vm0, %v275_v38  ;;  %309 = vst.msk [vmem:[#allocation2 + $0x111] sm:$0xff] %vm199_vm0, %v276_v39  ;;  %545 = vperm.xlu1 %5070, %v339_v44   ;;  %540 = vperm.xlu0 %5069, %v338_v45   ;;  %v5442_v31 = vld [vmem:[#allocation2 + $0x48] sm:$0xff]  ;;  %v5454_v36 = vld [vmem:[#allocation2 + $0x50] sm:$0xff] }
  0x34   : > { %310 = vst.msk [vmem:[#allocation2 + $0x121] sm:$0xff] %vm199_vm0, %v277_v42  ;;  %311 = vst.msk [vmem:[#allocation2 + $0x129] sm:$0xff] %vm199_vm0, %v278_v43  ;;  %v5456_v37 = vld [vmem:[#allocation2 + $0x60] sm:$0xff]  ;;  %v5468_v42 = vld [vmem:[#allocation2 + $0x68] sm:$0xff] }
  0x35   : > { %312 = vst.msk [vmem:[#allocation2 + $0x139] sm:$0xff] %vm199_vm0, %v279_v46  ;;  %313 = vst.msk [vmem:[#allocation2 + $0x141] sm:$0xff] %vm199_vm0, %v280_v47  ;;  %v5470_v43 = vld [vmem:[#allocation2 + $0x78] sm:$0xff] }
  0x36   : > { %314 = vst.msk [vmem:[#allocation2 + $0x151] sm:$0xff] %vm199_vm0, %v281_v50  ;;  %315 = vst.msk [vmem:[#allocation2 + $0x159] sm:$0xff] %vm199_vm0, %v282_v51 }
  0x37   : > { %555 = vperm.xlu1 %5070, %v341_v48   ;;  %550 = vperm.xlu0 %5069, %v340_v49   ;;  %316 = vst.msk [vmem:[#allocation2 + $0x169] sm:$0xff] %vm199_vm0, %v283_v54  ;;  %317 = vst.msk [vmem:[#allocation2 + $0x171] sm:$0xff] %vm199_vm0, %v284_v55  ;;  %v5482_v48 = vld [vmem:[#allocation2 + $0x80] sm:$0xff]  ;;  %v5484_v49 = vld [vmem:[#allocation2 + $0x90] sm:$0xff] }
  0x38   : > { %8286 = vst [vmem:[#allocation4_spill] sm:$0xff] %v5393_v0  ;;  %8287 = vst [vmem:[#allocation5_spill] sm:$0xff] %v5395_v1  ;;  %v5496_v54 = vld [vmem:[#allocation2 + $0x98] sm:$0xff]  ;;  %v5498_v55 = vld [vmem:[#allocation2 + $0xa8] sm:$0xff] }
  0x39   : > { %8288 = vst [vmem:[#allocation6_spill] sm:$0xff] %v5399_v4  ;;  %8289 = vst [vmem:[#allocation7_spill] sm:$0xff] %v5401_v5 }
  0x3a   : > { %318 = vst.msk [vmem:[#allocation2 + $0x181] sm:$0xff] %vm199_vm0, %v285_v6  ;;  %319 = vst.msk [vmem:[#allocation2 + $0x189] sm:$0xff] %vm199_vm0, %v286_v7  ;;  %v3048_v6 = vld [vmem:[#allocation2 + $0x30] sm:$0xff]  ;;  %v5524_v7 = vld [vmem:[#allocation2 + $0xc8] sm:$0xff] }
  0x3b   : > { %565 = vperm.xlu1 %5070, %v343_v52   ;;  %560 = vperm.xlu0 %5069, %v342_v53   ;;  %416 = vst.msk [vmem:[#allocation3] sm:$0xff] %vm199_vm0, %v384_v11  ;;  %417 = vst.msk [vmem:[#allocation3 + $0x18] sm:$0xff] %vm199_vm0, %v385_v14  ;;  %v3049_v14 = vld [vmem:[#allocation2 + $0x38] sm:$0xff] }
  0x3c   : > { %418 = vst.msk [vmem:[#allocation3 + $0x30] sm:$0xff] %vm199_vm0, %v386_v15  ;;  %419 = vst.msk [vmem:[#allocation3 + $0x48] sm:$0xff] %vm199_vm0, %v387_v17  ;;  %v5539_v15 = vld [vmem:[#allocation2 + $0xe0] sm:$0xff] }
  0x3f   : > { %575 = vperm.xlu1 %5070, %v345_v56   ;;  %570 = vperm.xlu0 %5069, %v344_v57  }
  0x43   : > { %585 = vperm.xlu1 %5070, %v347_v58   ;;  %580 = vperm.xlu0 %5069, %v346_v59  }
  0x47   : > { %595 = vperm.xlu1 %5070, %v349_v60   ;;  %590 = vperm.xlu0 %5069, %v348_v61   ;;  %v5510_v60 = vld [vmem:[#allocation2 + $0xb0] sm:$0xff]  ;;  %v5512_v61 = vld [vmem:[#allocation2 + $0xc0] sm:$0xff] }
  0x4b   : > { %605 = vperm.xlu1 %5070, %v351_v62   ;;  %600 = vperm.xlu0 %5069, %v350_v63  }
  0x4f   : > { %897 = vrot.lane.b32.xlu0 %v833_v2, %s5131_s14  ;;  %899 = vrot.lane.b32.xlu1 %v834_v3, %s5131_s14 }
  0x53   : > { %901 = vrot.lane.b32.xlu0 %v835_v8, %s5131_s14  ;;  %903 = vrot.lane.b32.xlu1 %v836_v9, %s5131_s14  ;;  %v5526_v8 = vld [vmem:[#allocation2 + $0xd8] sm:$0xff] }
  0x8e   : > { %v5417_v18 = vpop.permute.xlu1 %460  ;;  %v5419_v19 = vpop.permute.xlu0 %450 }
  0x8f   : > { %8290 = vst [vmem:[#allocation8_spill] sm:$0xff] %v5417_v18  ;;  %8291 = vst [vmem:[#allocation9_spill] sm:$0xff] %v5419_v19  ;;  %v608_v20 = vmul.f32 %v5419_v19, %v352_v10  ;;  %v610_v21 = vmul.f32 %v5417_v18, %v354_v13  ;;  %v3272_v11 = vmul.f32 %v3048_v6, %v5419_v19 }
  0x91   : > { %672 = vrot.lane.b32.xlu0 %v608_v20, %s5132_s7  ;;  %3304 = vst.msk [vmem:[#allocation3 + $0x10] sm:$0xff] %vm199_vm0, %v3272_v11 }
  0x92   : > { %v5424_v22 = vpop.permute.xlu1 %465  ;;  %v5426_v23 = vpop.permute.xlu0 %455 }
  0x93   : > { %8292 = vst [vmem:[#allocation10_spill] sm:$0xff] %v5424_v22  ;;  %8293 = vst [vmem:[#allocation11_spill] sm:$0xff] %v5426_v23  ;;  %v609_v24 = vmul.f32 %v5426_v23, %v353_v12  ;;  %v611_v28 = vmul.f32 %v5424_v22, %v355_v16  ;;  %v5541_v16 = vld [vmem:[#allocation2 + $0xf0] sm:$0xff] }
  0x95   : > { %674 = vrot.lane.b32.xlu1 %v609_v24, %s5132_s7  ;;  %676 = vrot.lane.b32.xlu0 %v610_v21, %s5132_s7  ;;  %v3273_v21 = vmul.f32 %v3049_v14, %v5426_v23 }
  0x96   : > { %v5433_v26 = vpop.permute.xlu1 %475  ;;  %v5435_v27 = vpop.permute.xlu0 %470 }
  0x97   : > { %8294 = vst [vmem:[#allocation12_spill] sm:$0xff] %v5433_v26  ;;  %8295 = vst [vmem:[#allocation13_spill] sm:$0xff] %v5435_v27  ;;  %v612_v29 = vmul.f32 %v5435_v27, %v5429_v25  ;;  %v613_v34 = vmul.f32 %v5433_v26, %v5440_v30 }
  0x98   : > { %3305 = vst.msk [vmem:[#allocation3 + $0x28] sm:$0xff] %vm199_vm0, %v3273_v21  ;;  %v3053_v21 = vld [vmem:[#allocation2 + $0x68] sm:$0xff] }
  0x99   : > { %678 = vrot.lane.b32.xlu1 %v611_v28, %s5132_s7  ;;  %680 = vrot.lane.b32.xlu0 %v612_v29, %s5132_s7  ;;  %v3050_v29 = vld [vmem:[#allocation2 + $0x48] sm:$0xff] }
  0x9a   : > { %v5446_v32 = vpop.permute.xlu1 %485  ;;  %v5448_v33 = vpop.permute.xlu0 %480 }
  0x9b   : > { %8296 = vst [vmem:[#allocation14_spill] sm:$0xff] %v5448_v33  ;;  %v614_v35 = vmul.f32 %v5448_v33, %v5442_v31  ;;  %v615_v40 = vmul.f32 %v5446_v32, %v5454_v36 }
  0x9d   : > { %682 = vrot.lane.b32.xlu1 %v613_v34, %s5132_s7  ;;  %684 = vrot.lane.b32.xlu0 %v614_v35, %s5132_s7  ;;  %v3051_v34 = vld [vmem:[#allocation2 + $0x50] sm:$0xff]  ;;  %v5555_v35 = vld [vmem:[#allocation2 + $0xf8] sm:$0xff] }
  0x9e   : > { %v5460_v38 = vpop.permute.xlu1 %495  ;;  %v5462_v39 = vpop.permute.xlu0 %490 }
  0x9f   : > { %v616_v41 = vmul.f32 %v5462_v39, %v5456_v37  ;;  %v617_v46 = vmul.f32 %v5460_v38, %v5468_v42 }
  0xa1   : > { %686 = vrot.lane.b32.xlu1 %v615_v40, %s5132_s7  ;;  %688 = vrot.lane.b32.xlu0 %v616_v41, %s5132_s7  ;;  %v5557_v40 = vld [vmem:[#allocation2 + $0x108] sm:$0xff] }
  0xa2   : > { %v5474_v44 = vpop.permute.xlu1 %505  ;;  %v5476_v45 = vpop.permute.xlu0 %500 }
  0xa3   : > { %8297 = vst [vmem:[#allocation15_spill] sm:$0xff] %v5474_v44  ;;  %8298 = vst [vmem:[#allocation16_spill] sm:$0xff] %v5476_v45  ;;  %v618_v47 = vmul.f32 %v5476_v45, %v5470_v43  ;;  %v619_v52 = vmul.f32 %v5474_v44, %v5482_v48 }
  0xa5   : > { %690 = vrot.lane.b32.xlu1 %v617_v46, %s5132_s7  ;;  %692 = vrot.lane.b32.xlu0 %v618_v47, %s5132_s7  ;;  %v3274_v47 = vmul.f32 %v3050_v29, %v5417_v18  ;;  %v3056_v18 = vld [vmem:[#allocation2 + $0x90] sm:$0xff] }
  0xa6   : > { %v5488_v50 = vpop.permute.xlu1 %515  ;;  %v5490_v51 = vpop.permute.xlu0 %510  ;;  %v3280_v23 = vmul.f32 %v3056_v18, %v5462_v39 }
  0xa7   : > { %8299 = vst [vmem:[#allocation17_spill] sm:$0xff] %v5488_v50  ;;  %8300 = vst [vmem:[#allocation18_spill] sm:$0xff] %v5490_v51  ;;  %v620_v53 = vmul.f32 %v5490_v51, %v5484_v49  ;;  %v621_v58 = vmul.f32 %v5488_v50, %v5496_v54 }
  0xa8   : > { %3306 = vst.msk [vmem:[#allocation3 + $0x40] sm:$0xff] %vm199_vm0, %v3274_v47  ;;  %v3277_v47 = vmul.f32 %v3053_v21, %v5433_v26  ;;  %3312 = vst.msk [vmem:[#allocation3 + $0xd0] sm:$0xff] %vm199_vm0, %v3280_v23 }
  0xa9   : > { %694 = vrot.lane.b32.xlu1 %v619_v52, %s5132_s7  ;;  %696 = vrot.lane.b32.xlu0 %v620_v53, %s5132_s7  ;;  %v3275_v52 = vmul.f32 %v3051_v34, %v5424_v22 }
  0xaa   : > { %v5502_v56 = vpop.permute.xlu1 %525  ;;  %v5504_v57 = vpop.permute.xlu0 %520  ;;  %3309 = vst.msk [vmem:[#allocation3 + $0x88] sm:$0xff] %vm199_vm0, %v3277_v47  ;;  %v3054_v47 = vld [vmem:[#allocation2 + $0x78] sm:$0xff] }
  0xab   : > { %8301 = vst [vmem:[#allocation19_spill] sm:$0xff] %v5502_v56  ;;  %8302 = vst [vmem:[#allocation20_spill] sm:$0xff] %v5504_v57  ;;  %v622_v59 = vmul.f32 %v5504_v57, %v5498_v55  ;;  %v623_v2 = vmul.f32 %v5502_v56, %v5510_v60 }
  0xac   : > { %3307 = vst.msk [vmem:[#allocation3 + $0x58] sm:$0xff] %vm199_vm0, %v3275_v52 }
  0xad   : > { %698 = vrot.lane.b32.xlu1 %v621_v58, %s5132_s7  ;;  %700 = vrot.lane.b32.xlu0 %v622_v59, %s5132_s7  ;;  %v3052_v59 = vld [vmem:[#allocation2 + $0x60] sm:$0xff] }
  0xae   : > { %v5516_v62 = vpop.permute.xlu1 %535  ;;  %v5518_v63 = vpop.permute.xlu0 %530 }
  0xaf   : > { %8303 = vst [vmem:[#allocation21_spill] sm:$0xff] %v5516_v62  ;;  %8304 = vst [vmem:[#allocation22_spill] sm:$0xff] %v5518_v63  ;;  %v624_v3 = vmul.f32 %v5518_v63, %v5512_v61  ;;  %v625_v12 = vmul.f32 %v5516_v62, %v5524_v7 }
  0xb1   : > { %702 = vrot.lane.b32.xlu1 %v623_v2, %s5132_s7  ;;  %704 = vrot.lane.b32.xlu0 %v624_v3, %s5132_s7  ;;  %v5572_v2 = vld [vmem:[#allocation2 + $0x110] sm:$0xff]  ;;  %v5574_v3 = vld [vmem:[#allocation2 + $0x120] sm:$0xff] }
  0xb2   : > { %v5530_v9 = vpop.permute.xlu1 %545  ;;  %v5532_v10 = vpop.permute.xlu0 %540 }
  0xb3   : > { %8305 = vst [vmem:[#allocation23_spill] sm:$0xff] %v5530_v9  ;;  %8306 = vst [vmem:[#allocation24_spill] sm:$0xff] %v5532_v10  ;;  %v626_v13 = vmul.f32 %v5532_v10, %v5526_v8  ;;  %v627_v24 = vmul.f32 %v5530_v9, %v5539_v15 }
  0xb5   : > { %706 = vrot.lane.b32.xlu1 %v625_v12, %s5132_s7  ;;  %708 = vrot.lane.b32.xlu0 %v626_v13, %s5132_s7  ;;  %v3276_v12 = vmul.f32 %v3052_v59, %v5435_v27  ;;  %v5607_v59 = vld [vmem:[#allocation2 + $0x150] sm:$0xff] }
  0xb6   : > { %v5546_v17 = vpop.permute.xlu1 %555  ;;  %v5548_v20 = vpop.permute.xlu0 %550 }
  0xb7   : > { %8307 = vst [vmem:[#allocation25_spill] sm:$0xff] %v5546_v17  ;;  %8308 = vst [vmem:[#allocation26_spill] sm:$0xff] %v5548_v20  ;;  %v628_v28 = vmul.f32 %v5548_v20, %v5541_v16  ;;  %v629_v53 = vmul.f32 %v5546_v17, %v5555_v35 }
  0xb8   : > { %3308 = vst.msk [vmem:[#allocation3 + $0x70] sm:$0xff] %vm199_vm0, %v3276_v12  ;;  %v388_v12 = vmax.f32 %v5429_v25, 0.0 }
  0xb9   : > { %710 = vrot.lane.b32.xlu1 %v627_v24, %s5132_s7  ;;  %712 = vrot.lane.b32.xlu0 %v628_v28, %s5132_s7  ;;  %v5589_v24 = vld [vmem:[#allocation2 + $0x128] sm:$0xff]  ;;  %v5591_v28 = vld [vmem:[#allocation2 + $0x138] sm:$0xff] }
  0xba   : > { %v5562_v41 = vpop.permute.xlu1 %565  ;;  %v5564_v46 = vpop.permute.xlu0 %560  ;;  %420 = vst.msk [vmem:[#allocation3 + $0x60] sm:$0xff] %vm199_vm0, %v388_v12  ;;  %v391_v12 = vmax.f32 %v5454_v36, 0.0  ;;  %v392_v36 = vmax.f32 %v5456_v37, 0.0  ;;  %v5659_v37 = vld [vmem:[#allocation2 + $0x39] sm:$0xff] }
  0xbb   : > { %8309 = vst [vmem:[#allocation27_spill] sm:$0xff] %v5562_v41  ;;  %8310 = vst [vmem:[#allocation28_spill] sm:$0xff] %v5564_v46  ;;  %v630_v58 = vmul.f32 %v5564_v46, %v5557_v40  ;;  %v631_v13 = vmul.f32 %v5562_v41, %v5572_v2 }
  0xbc   : > { %423 = vst.msk [vmem:[#allocation3 + $0xa8] sm:$0xff] %vm199_vm0, %v391_v12  ;;  %424 = vst.msk [vmem:[#allocation3 + $0xc0] sm:$0xff] %vm199_vm0, %v392_v36 }
  0xbd   : > { %714 = vrot.lane.b32.xlu1 %v629_v53, %s5132_s7  ;;  %716 = vrot.lane.b32.xlu0 %v630_v58, %s5132_s7  ;;  %v5605_v58 = vld [vmem:[#allocation2 + $0x140] sm:$0xff] }
  0xbe   : > { %v5580_v6 = vpop.permute.xlu1 %575  ;;  %v5582_v11 = vpop.permute.xlu0 %570 }
  0xbf   : > { %v632_v14 = vmul.f32 %v5582_v11, %v5574_v3  ;;  %v633_v52 = vmul.f32 %v5580_v6, %v5589_v24 }
  0xc1   : > { %718 = vrot.lane.b32.xlu1 %v631_v13, %s5132_s7  ;;  %720 = vrot.lane.b32.xlu0 %v632_v14, %s5132_s7  ;;  %v389_v13 = vmax.f32 %v5440_v30, 0.0  ;;  %v390_v30 = vmax.f32 %v5442_v31, 0.0 }
  0xc2   : > { %v5596_v29 = vpop.permute.xlu1 %585  ;;  %v5598_v34 = vpop.permute.xlu0 %580 }
  0xc3   : > { %8311 = vst [vmem:[#allocation29_spill] sm:$0xff] %v5596_v29  ;;  %v634_v53 = vmul.f32 %v5598_v34, %v5591_v28  ;;  %v635_v26 = vmul.f32 %v5596_v29, %v5605_v58  ;;  %421 = vst.msk [vmem:[#allocation3 + $0x78] sm:$0xff] %vm199_vm0, %v389_v13  ;;  %v3278_v13 = vmul.f32 %v3054_v47, %v5448_v33  ;;  %v3055_v33 = vld [vmem:[#allocation2 + $0x80] sm:$0xff] }
  0xc4   : > { %422 = vst.msk [vmem:[#allocation3 + $0x90] sm:$0xff] %vm199_vm0, %v390_v30  ;;  %v393_v30 = vmax.f32 %v5468_v42, 0.0  ;;  %v394_v42 = vmax.f32 %v5470_v43, 0.0  ;;  %v3279_v36 = vmul.f32 %v3055_v33, %v5446_v32  ;;  %v3061_v43 = vld [vmem:[#allocation2 + $0xc8] sm:$0xff] }
  0xc5   : > { %722 = vrot.lane.b32.xlu1 %v633_v52, %s5132_s7  ;;  %724 = vrot.lane.b32.xlu0 %v634_v53, %s5132_s7  ;;  %v5624_v52 = vld [vmem:[#allocation2 + $0x158] sm:$0xff]  ;;  %v5626_v53 = vld [vmem:[#allocation2 + $0x168] sm:$0xff]  ;;  %3310 = vst.msk [vmem:[#allocation3 + $0xa0] sm:$0xff] %vm199_vm0, %v3278_v13 }
  0xc6   : > { %v5614_v14 = vpop.permute.xlu1 %595  ;;  %v5616_v21 = vpop.permute.xlu0 %590  ;;  %425 = vst.msk [vmem:[#allocation3 + $0xd8] sm:$0xff] %vm199_vm0, %v393_v30  ;;  %v5661_v13 = vld [vmem:[#allocation2 + $0x49] sm:$0xff]  ;;  %v395_v30 = vmax.f32 %v5482_v48, 0.0  ;;  %426 = vst.msk [vmem:[#allocation3 + $0xf0] sm:$0xff] %vm199_vm0, %v394_v42  ;;  %v5679_v48 = vld [vmem:[#allocation2 + $0x51] sm:$0xff]  ;;  %v396_v42 = vmax.f32 %v5484_v49, 0.0 }
  0xc7   : > { %8312 = vst [vmem:[#allocation30_spill] sm:$0xff] %v5614_v14  ;;  %8313 = vst [vmem:[#allocation31_spill] sm:$0xff] %v5616_v21  ;;  %v636_v25 = vmul.f32 %v5616_v21, %v5607_v59  ;;  %v637_v27 = vmul.f32 %v5614_v14, %v5624_v52  ;;  %v3063_v49 = vld [vmem:[#allocation2 + $0xe0] sm:$0xff] }
  0xc8   : > { %3311 = vst.msk [vmem:[#allocation3 + $0xb8] sm:$0xff] %vm199_vm0, %v3279_v36  ;;  %427 = vst.msk [vmem:[#allocation3 + $0x108] sm:$0xff] %vm199_vm0, %v395_v30  ;;  %v3285_v36 = vmul.f32 %v3061_v43, %v5488_v50  ;;  %v5699_v30 = vld [vmem:[#allocation2 + $0x79] sm:$0xff]  ;;  %v3066_v50 = vld [vmem:[#allocation2 + $0x108] sm:$0xff] }
  0xc9   : > { %726 = vrot.lane.b32.xlu1 %v635_v26, %s5132_s7  ;;  %728 = vrot.lane.b32.xlu0 %v636_v25, %s5132_s7  ;;  %v5643_v26 = vld [vmem:[#allocation2 + $0x170] sm:$0xff]  ;;  %428 = vst.msk [vmem:[#allocation3 + $0x120] sm:$0xff] %vm199_vm0, %v396_v42  ;;  %8318 = vst [vmem:[#allocation36_spill] sm:$0xff] %v5699_v30  ;;  %v843_v42 = vmax.f32 %v5699_v30, 0.0  ;;  %v3071_v30 = vld [vmem:[#allocation2 + $0x140] sm:$0xff] }
  0xca   : > { %v5632_v5 = vpop.permute.xlu1 %605  ;;  %v5634_v22 = vpop.permute.xlu0 %600  ;;  %v5645_v25 = vld [vmem:[#allocation2 + $0x31] sm:$0xff]  ;;  %3317 = vst.msk [vmem:[#allocation3 + $0x148] sm:$0xff] %vm199_vm0, %v3285_v36  ;;  %v3069_v36 = vld [vmem:[#allocation2 + $0x128] sm:$0xff] }
  0xcb   : > { %8314 = vst [vmem:[#allocation32_spill] sm:$0xff] %v5632_v5  ;;  %8315 = vst [vmem:[#allocation33_spill] sm:$0xff] %v5634_v22  ;;  %v638_v31 = vmul.f32 %v5634_v22, %v5626_v53  ;;  %v837_v47 = vmax.f32 %v5645_v25, 0.0  ;;  %v639_v1 = vmul.f32 %v5632_v5, %v5643_v26 }
  0xcc   : > { %8316 = vst [vmem:[#allocation34_spill] sm:$0xff] %v5645_v25  ;;  %v3059_v25 = vld [vmem:[#allocation2 + $0xb0] sm:$0xff] }
  0xcd   : > { %730 = vrot.lane.b32.xlu1 %v637_v27, %s5132_s7  ;;  %732 = vrot.lane.b32.xlu0 %v638_v31, %s5132_s7  ;;  %v3057_v27 = vld [vmem:[#allocation2 + $0x98] sm:$0xff]  ;;  %v3058_v31 = vld [vmem:[#allocation2 + $0xa8] sm:$0xff] }
  0xce   : > { %v898_v4 = vpop.permute.xlu0 %897  ;;  %v900_v12 = vpop.permute.xlu1 %899  ;;  %v3281_v33 = vmul.f32 %v3057_v27, %v5460_v38  ;;  %v3282_v18 = vmul.f32 %v3058_v31, %v5476_v45  ;;  %v397_v27 = vmax.f32 %v5496_v54, 0.0  ;;  %v3062_v31 = vld [vmem:[#allocation2 + $0xd8] sm:$0xff]  ;;  %v5701_v54 = vld [vmem:[#allocation2 + $0x81] sm:$0xff]  ;;  %v3075_v45 = vld [vmem:[#allocation2 + $0x170] sm:$0xff] }
  0xcf   : > { %994 = vst.msk [vmem:[#allocation3] sm:$0xff] %vm993_vm2, %v898_v4  ;;  %995 = vst.msk [vmem:[#allocation3 + $0x18] sm:$0xff] %vm993_vm2, %v900_v12  ;;  %v838_v4 = vmax.f32 %v5659_v37, 0.0  ;;  %v839_v12 = vmax.f32 %v5661_v13, 0.0 }
  0xd0   : > { %3313 = vst.msk [vmem:[#allocation3 + $0xe8] sm:$0xff] %vm199_vm0, %v3281_v33  ;;  %3314 = vst.msk [vmem:[#allocation3 + $0x100] sm:$0xff] %vm199_vm0, %v3282_v18  ;;  %v398_v33 = vmax.f32 %v5498_v55, 0.0  ;;  %v3065_v18 = vld [vmem:[#allocation2 + $0xf8] sm:$0xff]  ;;  %v3072_v55 = vld [vmem:[#allocation2 + $0x150] sm:$0xff] }
  0xd1   : > { %734 = vrot.lane.b32.xlu1 %v639_v1, %s5132_s7  ;;  %905 = vrot.lane.b32.xlu0 %v837_v47, %s5131_s14  ;;  %v3060_v1 = vld [vmem:[#allocation2 + $0xc0] sm:$0xff]  ;;  %429 = vst.msk [vmem:[#allocation3 + $0x138] sm:$0xff] %vm199_vm0, %v397_v27  ;;  %v399_v27 = vmax.f32 %v5510_v60, 0.0  ;;  %v3074_v60 = vld [vmem:[#allocation2 + $0x168] sm:$0xff] }
  0xd2   : > { %v902_v0 = vpop.permute.xlu0 %901  ;;  %v904_v19 = vpop.permute.xlu1 %903  ;;  %v5681_v47 = vld [vmem:[#allocation2 + $0x61] sm:$0xff]  ;;  %430 = vst.msk [vmem:[#allocation3 + $0x150] sm:$0xff] %vm199_vm0, %v398_v33 }
  0xd3   : > { %996 = vst.msk [vmem:[#allocation3 + $0x30] sm:$0xff] %vm993_vm2, %v902_v0  ;;  %997 = vst.msk [vmem:[#allocation3 + $0x48] sm:$0xff] %vm993_vm2, %v904_v19  ;;  %v3283_v0 = vmul.f32 %v3059_v25, %v5474_v44  ;;  %v840_v19 = vmax.f32 %v5679_v48, 0.0  ;;  %v841_v23 = vmax.f32 %v5681_v47, 0.0  ;;  %v3284_v25 = vmul.f32 %v3060_v1, %v5490_v51  ;;  %v3067_v51 = vld [vmem:[#allocation2 + $0x110] sm:$0xff]  ;;  %v3073_v44 = vld [vmem:[#allocation2 + $0x158] sm:$0xff] }
  0xd4   : > { %v3286_v1 = vmul.f32 %v3062_v31, %v5504_v57  ;;  %v3068_v31 = vld [vmem:[#allocation2 + $0x120] sm:$0xff]  ;;  %v844_v57 = vmax.f32 %v5701_v54, 0.0  ;;  %431 = vst.msk [vmem:[#allocation3 + $0x168] sm:$0xff] %vm199_vm0, %v399_v27  ;;  %v401_v27 = vmax.f32 %v5524_v7, 0.0  ;;  %v3297_v7 = vmul.f32 %v3073_v44, %v5580_v6 }
  0xd5   : > { %907 = vrot.lane.b32.xlu1 %v838_v4, %s5131_s14  ;;  %909 = vrot.lane.b32.xlu0 %v839_v12, %s5131_s14  ;;  %3315 = vst.msk [vmem:[#allocation3 + $0x118] sm:$0xff] %vm199_vm0, %v3283_v0  ;;  %v5696_v4 = vld [vmem:[#allocation2 + $0x69] sm:$0xff]  ;;  %3316 = vst.msk [vmem:[#allocation3 + $0x130] sm:$0xff] %vm199_vm0, %v3284_v25  ;;  %v5711_v0 = vld [vmem:[#allocation2 + $0x91] sm:$0xff]  ;;  %v3287_v25 = vmul.f32 %v3063_v49, %v5502_v56  ;;  %v3289_v49 = vmul.f32 %v3065_v18, %v5516_v62  ;;  %v400_v56 = vmax.f32 %v5512_v61, 0.0 }
  0xd6   : > { %8317 = vst [vmem:[#allocation35_spill] sm:$0xff] %v5696_v4  ;;  %v3064_v12 = vld [vmem:[#allocation2 + $0xf0] sm:$0xff]  ;;  %v842_v43 = vmax.f32 %v5696_v4, 0.0  ;;  %3318 = vst.msk [vmem:[#allocation3 + $0x160] sm:$0xff] %vm199_vm0, %v3286_v1  ;;  %v845_v33 = vmax.f32 %v5711_v0, 0.0  ;;  %v3076_v4 = vld [vmem:[#allocation2 + $0x180] sm:$0xff]  ;;  %v3291_v1 = vmul.f32 %v3067_v51, %v5530_v9  ;;  %v3292_v61 = vmul.f32 %v3068_v31, %v5548_v20 }
  0xd7   : > { %3319 = vst.msk [vmem:[#allocation3 + $0x178] sm:$0xff] %vm199_vm0, %v3287_v25  ;;  %v3077_v25 = vld [vmem:[#allocation2 + $0x188] sm:$0xff]  ;;  %v3078_v18 = vld [vmem:[#allocation2 + $0x198] sm:$0xff]  ;;  %v3079_v62 = vld [vmem:[#allocation2 + $0x1a0] sm:$0xff]  ;;  %v3296_v51 = vmul.f32 %v3072_v55, %v5582_v11  ;;  %v402_v44 = vmax.f32 %v5526_v8, 0.0 }
  0xd8   : > { %3321 = vst.msk [vmem:[#allocation3 + $0x1a8] sm:$0xff] %vm199_vm0, %v3289_v49  ;;  %432 = vst.msk [vmem:[#allocation3 + $0x180] sm:$0xff] %vm199_vm0, %v400_v56  ;;  %v3299_v56 = vmul.f32 %v3075_v45, %v5596_v29  ;;  %v5747_v31 = vld [vmem:[#allocation2 + $0x99] sm:$0xff]  ;;  %v3302_v45 = vmul.f32 %v3078_v18, %v5634_v22  ;;  %v405_v49 = vmax.f32 %v5555_v35, 0.0  ;;  %v407_v35 = vmax.f32 %v5572_v2, 0.0  ;;  %v5797_v18 = vld [vmem:[#allocation2 + $0xf1] sm:$0xff] }
  0xd9   : > { %911 = vrot.lane.b32.xlu1 %v840_v19, %s5131_s14  ;;  %913 = vrot.lane.b32.xlu0 %v841_v23, %s5131_s14  ;;  %v3070_v19 = vld [vmem:[#allocation2 + $0x138] sm:$0xff]  ;;  %v3288_v23 = vmul.f32 %v3064_v12, %v5518_v63  ;;  %v3290_v12 = vmul.f32 %v3066_v50, %v5532_v10  ;;  %v3293_v63 = vmul.f32 %v3069_v36, %v5546_v17  ;;  %v846_v8 = vmax.f32 %v5747_v31, 0.0 }
  0xda   : > { %3323 = vst.msk [vmem:[#allocation3 + $0x1d8] sm:$0xff] %vm199_vm0, %v3291_v1  ;;  %v3295_v50 = vmul.f32 %v3071_v30, %v5562_v41  ;;  %433 = vst.msk [vmem:[#allocation3 + $0x198] sm:$0xff] %vm199_vm0, %v401_v27  ;;  %v5749_v30 = vld [vmem:[#allocation2 + $0xa9] sm:$0xff]  ;;  %v403_v36 = vmax.f32 %v5539_v15, 0.0  ;;  %v404_v15 = vmax.f32 %v5541_v16, 0.0  ;;  %v406_v16 = vmax.f32 %v5557_v40, 0.0 }
  0xdb   : > { %3320 = vst.msk [vmem:[#allocation3 + $0x190] sm:$0xff] %vm199_vm0, %v3288_v23  ;;  %v3294_v23 = vmul.f32 %v3070_v19, %v5564_v46  ;;  %3322 = vst.msk [vmem:[#allocation3 + $0x1c0] sm:$0xff] %vm199_vm0, %v3290_v12  ;;  %v847_v55 = vmax.f32 %v5749_v30, 0.0  ;;  %v5785_v12 = vld [vmem:[#allocation2 + $0xd9] sm:$0xff]  ;;  %v408_v40 = vmax.f32 %v5574_v3, 0.0  ;;  %v409_v2 = vmax.f32 %v5589_v24, 0.0 }
  0xdc   : > { %3324 = vst.msk [vmem:[#allocation3 + $0x1f0] sm:$0xff] %vm199_vm0, %v3292_v61  ;;  %3325 = vst.msk [vmem:[#allocation3 + $0x208] sm:$0xff] %vm199_vm0, %v3293_v63  ;;  %v3301_v63 = vmul.f32 %v3077_v25, %v5614_v14  ;;  %v851_v27 = vmax.f32 %v5785_v12, 0.0  ;;  %v5795_v25 = vld [vmem:[#allocation2 + $0xe1] sm:$0xff]  ;;  %v410_v3 = vmax.f32 %v5591_v28, 0.0  ;;  %v411_v24 = vmax.f32 %v5605_v58, 0.0 }
  0xdd   : > { %915 = vrot.lane.b32.xlu1 %v842_v43, %s5131_s14  ;;  %917 = vrot.lane.b32.xlu0 %v843_v42, %s5131_s14  ;;  %v3298_v43 = vmul.f32 %v3074_v60, %v5598_v34  ;;  %3326 = vst.msk [vmem:[#allocation3 + $0x220] sm:$0xff] %vm199_vm0, %v3294_v23  ;;  %v3300_v42 = vmul.f32 %v3076_v4, %v5616_v21  ;;  %3327 = vst.msk [vmem:[#allocation3 + $0x238] sm:$0xff] %vm199_vm0, %v3295_v50  ;;  %v852_v61 = vmax.f32 %v5795_v25, 0.0  ;;  %v5807_v50 = vld [vmem:[#allocation2 + $0xf9] sm:$0xff] }
  0xde   : > { %3328 = vst.msk [vmem:[#allocation3 + $0x250] sm:$0xff] %vm199_vm0, %v3296_v51  ;;  %3329 = vst.msk [vmem:[#allocation3 + $0x268] sm:$0xff] %vm199_vm0, %v3297_v7  ;;  %v3303_v4 = vmul.f32 %v3079_v62, %v5632_v5  ;;  %v5773_v62 = vld [vmem:[#allocation2 + $0xc1] sm:$0xff]  ;;  %v853_v23 = vmax.f32 %v5797_v18, 0.0  ;;  %v5809_v51 = vld [vmem:[#allocation2 + $0x109] sm:$0xff]  ;;  %v854_v7 = vmax.f32 %v5807_v50, 0.0 }
  0xdf   : > { %3330 = vst.msk [vmem:[#allocation3 + $0x280] sm:$0xff] %vm199_vm0, %v3298_v43  ;;  %3331 = vst.msk [vmem:[#allocation3 + $0x298] sm:$0xff] %vm199_vm0, %v3299_v56  ;;  %v849_v60 = vmax.f32 %v5773_v62, 0.0  ;;  %v855_v43 = vmax.f32 %v5809_v51, 0.0  ;;  %v5819_v56 = vld [vmem:[#allocation2 + $0x111] sm:$0xff]  ;;  %v412_v28 = vmax.f32 %v5607_v59, 0.0 }
  0xe0   : > { %3332 = vst.msk [vmem:[#allocation3 + $0x2b0] sm:$0xff] %vm199_vm0, %v3300_v42  ;;  %434 = vst.msk [vmem:[#allocation3 + $0x1b0] sm:$0xff] %vm199_vm0, %v402_v44  ;;  %v5821_v42 = vld [vmem:[#allocation2 + $0x121] sm:$0xff]  ;;  %v856_v44 = vmax.f32 %v5819_v56, 0.0  ;;  %v413_v58 = vmax.f32 %v5624_v52, 0.0  ;;  %v414_v59 = vmax.f32 %v5626_v53, 0.0 }
  0xe1   : > { %919 = vrot.lane.b32.xlu1 %v844_v57, %s5131_s14  ;;  %921 = vrot.lane.b32.xlu0 %v845_v33, %s5131_s14  ;;  %3333 = vst.msk [vmem:[#allocation3 + $0x2c8] sm:$0xff] %vm199_vm0, %v3301_v63  ;;  %3334 = vst.msk [vmem:[#allocation3 + $0x2e0] sm:$0xff] %vm199_vm0, %v3302_v45  ;;  %v5771_v57 = vld [vmem:[#allocation2 + $0xb1] sm:$0xff]  ;;  %v5783_v33 = vld [vmem:[#allocation2 + $0xc9] sm:$0xff]  ;;  %v857_v63 = vmax.f32 %v5821_v42, 0.0  ;;  %v415_v52 = vmax.f32 %v5643_v26, 0.0 }
  0xe2   : > { %3335 = vst.msk [vmem:[#allocation3 + $0x2f8] sm:$0xff] %vm199_vm0, %v3303_v4  ;;  %435 = vst.msk [vmem:[#allocation3 + $0x1c8] sm:$0xff] %vm199_vm0, %v403_v36  ;;  %v848_v19 = vmax.f32 %v5771_v57, 0.0  ;;  %v850_v1 = vmax.f32 %v5783_v33, 0.0  ;;  %v5831_v45 = vld [vmem:[#allocation2 + $0x129] sm:$0xff]  ;;  %v5833_v4 = vld [vmem:[#allocation2 + $0x139] sm:$0xff] }
  0xe3   : > { %436 = vst.msk [vmem:[#allocation3 + $0x1e0] sm:$0xff] %vm199_vm0, %v404_v15  ;;  %437 = vst.msk [vmem:[#allocation3 + $0x1f8] sm:$0xff] %vm199_vm0, %v405_v49  ;;  %v5843_v36 = vld [vmem:[#allocation2 + $0x141] sm:$0xff]  ;;  %v5845_v15 = vld [vmem:[#allocation2 + $0x151] sm:$0xff] }
  0xe4   : > { %438 = vst.msk [vmem:[#allocation3 + $0x210] sm:$0xff] %vm199_vm0, %v406_v16  ;;  %439 = vst.msk [vmem:[#allocation3 + $0x228] sm:$0xff] %vm199_vm0, %v407_v35  ;;  %v860_v53 = vmax.f32 %v5843_v36, 0.0  ;;  %v5853_v49 = vld [vmem:[#allocation2 + $0x169] sm:$0xff] }
  0xe5   : > { %923 = vrot.lane.b32.xlu1 %v846_v8, %s5131_s14  ;;  %925 = vrot.lane.b32.xlu0 %v847_v55, %s5131_s14  ;;  %440 = vst.msk [vmem:[#allocation3 + $0x240] sm:$0xff] %vm199_vm0, %v408_v40  ;;  %441 = vst.msk [vmem:[#allocation3 + $0x258] sm:$0xff] %vm199_vm0, %v409_v2  ;;  %v858_v8 = vmax.f32 %v5831_v45, 0.0  ;;  %v859_v55 = vmax.f32 %v5833_v4, 0.0  ;;  %v863_v16 = vmax.f32 %v5853_v49, 0.0  ;;  %v8320_v2 = vld [vmem:[#allocation4_spill] sm:$0xff] }
  0xe6   : > { %442 = vst.msk [vmem:[#allocation3 + $0x270] sm:$0xff] %vm199_vm0, %v410_v3  ;;  %443 = vst.msk [vmem:[#allocation3 + $0x288] sm:$0xff] %vm199_vm0, %v411_v24  ;;  %v8321_v24 = vld [vmem:[#allocation11_spill] sm:$0xff] }
  0xe7   : > { %444 = vst.msk [vmem:[#allocation3 + $0x2a0] sm:$0xff] %vm199_vm0, %v412_v28  ;;  %445 = vst.msk [vmem:[#allocation3 + $0x2b8] sm:$0xff] %vm199_vm0, %v413_v58  ;;  %v8322_v28 = vld [vmem:[#allocation5_spill] sm:$0xff]  ;;  %v8324_v58 = vld [vmem:[#allocation6_spill] sm:$0xff] }
  0xe8   : > { %446 = vst.msk [vmem:[#allocation3 + $0x2d0] sm:$0xff] %vm199_vm0, %v414_v59  ;;  %447 = vst.msk [vmem:[#allocation3 + $0x2e8] sm:$0xff] %vm199_vm0, %v415_v52 }
  0xe9   : > { %927 = vrot.lane.b32.xlu1 %v848_v19, %s5131_s14  ;;  %929 = vrot.lane.b32.xlu0 %v849_v60, %s5131_s14  ;;  %v861_v19 = vmax.f32 %v5845_v15, 0.0  ;;  %v5851_v60 = vld [vmem:[#allocation2 + $0x159] sm:$0xff] }
  0xea   : > { %v862_v26 = vmax.f32 %v5851_v60, 0.0 }
  0xed   : > { %931 = vrot.lane.b32.xlu1 %v850_v1, %s5131_s14  ;;  %933 = vrot.lane.b32.xlu0 %v851_v27, %s5131_s14  ;;  %v5860_v27 = vld [vmem:[#allocation2 + $0x171] sm:$0xff] }
  0xee   : > { %v864_v35 = vmax.f32 %v5860_v27, 0.0 }
  0xf1   : > { %935 = vrot.lane.b32.xlu1 %v852_v61, %s5131_s14  ;;  %937 = vrot.lane.b32.xlu0 %v853_v23, %s5131_s14  ;;  %v8319_v23 = vld [vmem:[#allocation9_spill] sm:$0xff] }
  0xf2   : > { %v1026_v3 = vmul.f32 %v8320_v2, %v8319_v23 }
  0xf5   : > { %939 = vrot.lane.b32.xlu1 %v854_v7, %s5131_s14  ;;  %941 = vrot.lane.b32.xlu0 %v855_v43, %s5131_s14 }
  0xf9   : > { %943 = vrot.lane.b32.xlu1 %v856_v44, %s5131_s14  ;;  %945 = vrot.lane.b32.xlu0 %v857_v63, %s5131_s14  ;;  %v1027_v44 = vmul.f32 %v8322_v28, %v8321_v24  ;;  %v8323_v63 = vld [vmem:[#allocation8_spill] sm:$0xff]  ;;  %v1034_v28 = vmul.f32 %v5681_v47, %v5462_v39  ;;  %v8334_v47 = vld [vmem:[#allocation15_spill] sm:$0xff] }
  0xfa   : > { %v1028_v59 = vmul.f32 %v8324_v58, %v8323_v63 }
  0xfd   : > { %947 = vrot.lane.b32.xlu1 %v858_v8, %s5131_s14  ;;  %949 = vrot.lane.b32.xlu0 %v859_v55, %s5131_s14  ;;  %v8325_v8 = vld [vmem:[#allocation13_spill] sm:$0xff]  ;;  %v8326_v55 = vld [vmem:[#allocation34_spill] sm:$0xff] }
  0xfe   : > { %v1030_v52 = vmul.f32 %v8326_v55, %v8325_v8  ;;  %v8333_v55 = vld [vmem:[#allocation36_spill] sm:$0xff] }
 0x101   : > { %951 = vrot.lane.b32.xlu1 %v860_v53, %s5131_s14  ;;  %953 = vrot.lane.b32.xlu0 %v861_v19, %s5131_s14 }
 0x103   : > { %v673_v1 = vpop.permute.xlu0 %672 }
 0x104   : > { %769 = vst.msk [vmem:[#allocation3 + $0x8] sm:$0xff] %vm768_vm3, %v673_v1 }
 0x105   : > { %955 = vrot.lane.b32.xlu1 %v862_v26, %s5131_s14  ;;  %957 = vrot.lane.b32.xlu0 %v863_v16, %s5131_s14  ;;  %v8327_v26 = vld [vmem:[#allocation10_spill] sm:$0xff]  ;;  %v8328_v16 = vld [vmem:[#allocation7_spill] sm:$0xff] }
 0x106   : > { %v1029_v1 = vmul.f32 %v8328_v16, %v8327_v26  ;;  %v8335_v16 = vld [vmem:[#allocation18_spill] sm:$0xff] }
 0x107   : > { %v675_v40 = vpop.permute.xlu1 %674  ;;  %v677_v61 = vpop.permute.xlu0 %676 }
 0x108   : > { %770 = vst.msk [vmem:[#allocation3 + $0x20] sm:$0xff] %vm768_vm3, %v675_v40  ;;  %771 = vst.msk [vmem:[#allocation3 + $0x38] sm:$0xff] %vm768_vm3, %v677_v61  ;;  %v8330_v61 = vld [vmem:[#allocation14_spill] sm:$0xff] }
 0x109   : > { %959 = vrot.lane.b32.xlu1 %v864_v35, %s5131_s14  ;;  %1090 = vrot.lane.b32.xlu0 %v1026_v3, %s5133_s17  ;;  %v8329_v35 = vld [vmem:[#allocation12_spill] sm:$0xff]  ;;  %v1032_v2 = vmul.f32 %v5661_v13, %v8330_v61  ;;  %v8331_v13 = vld [vmem:[#allocation35_spill] sm:$0xff] }
 0x10a   : > { %v1031_v40 = vmul.f32 %v5659_v37, %v8329_v35  ;;  %v1035_v58 = vmul.f32 %v8331_v13, %v5460_v38  ;;  %v8339_v13 = vld [vmem:[#allocation22_spill] sm:$0xff] }
 0x10b   : > { %v679_v7 = vpop.permute.xlu1 %678  ;;  %v681_v43 = vpop.permute.xlu0 %680 }
 0x10c   : > { %772 = vst.msk [vmem:[#allocation3 + $0x50] sm:$0xff] %vm768_vm3, %v679_v7  ;;  %773 = vst.msk [vmem:[#allocation3 + $0x68] sm:$0xff] %vm768_vm3, %v681_v43  ;;  %v1033_v43 = vmul.f32 %v5679_v48, %v5446_v32 }
 0x10d   : > { %1092 = vrot.lane.b32.xlu1 %v1027_v44, %s5133_s17  ;;  %1094 = vrot.lane.b32.xlu0 %v1028_v59, %s5133_s17  ;;  %v8332_v59 = vld [vmem:[#allocation16_spill] sm:$0xff] }
 0x10f   : > { %v683_v53 = vpop.permute.xlu1 %682  ;;  %v685_v19 = vpop.permute.xlu0 %684 }
 0x110   : > { %774 = vst.msk [vmem:[#allocation3 + $0x80] sm:$0xff] %vm768_vm3, %v683_v53  ;;  %775 = vst.msk [vmem:[#allocation3 + $0x98] sm:$0xff] %vm768_vm3, %v685_v19  ;;  %v1037_v19 = vmul.f32 %v5701_v54, %v8334_v47 }
 0x111   : > { %1096 = vrot.lane.b32.xlu1 %v1029_v1, %s5133_s17  ;;  %1098 = vrot.lane.b32.xlu0 %v1030_v52, %s5133_s17  ;;  %v1036_v52 = vmul.f32 %v8333_v55, %v8332_v59  ;;  %v1038_v1 = vmul.f32 %v5711_v0, %v8335_v16  ;;  %v8338_v0 = vld [vmem:[#allocation19_spill] sm:$0xff] }
 0x113   : > { %v687_v3 = vpop.permute.xlu1 %686  ;;  %v689_v7 = vpop.permute.xlu0 %688 }
 0x114   : > { %776 = vst.msk [vmem:[#allocation3 + $0xb0] sm:$0xff] %vm768_vm3, %v687_v3  ;;  %777 = vst.msk [vmem:[#allocation3 + $0xc8] sm:$0xff] %vm768_vm3, %v689_v7  ;;  %v8336_v3 = vld [vmem:[#allocation17_spill] sm:$0xff] }
 0x115   : > { %1100 = vrot.lane.b32.xlu1 %v1031_v40, %s5133_s17  ;;  %1102 = vrot.lane.b32.xlu0 %v1032_v2, %s5133_s17  ;;  %v1039_v7 = vmul.f32 %v5747_v31, %v8336_v3 }
 0x117   : > { %v691_v37 = vpop.permute.xlu1 %690  ;;  %v693_v44 = vpop.permute.xlu0 %692 }
 0x118   : > { %778 = vst.msk [vmem:[#allocation3 + $0xe0] sm:$0xff] %vm768_vm3, %v691_v37  ;;  %779 = vst.msk [vmem:[#allocation3 + $0xf8] sm:$0xff] %vm768_vm3, %v693_v44  ;;  %v1041_v44 = vmul.f32 %v5771_v57, %v8338_v0 }
 0x119   : > { %1104 = vrot.lane.b32.xlu1 %v1033_v43, %s5133_s17  ;;  %1106 = vrot.lane.b32.xlu0 %v1034_v28, %s5133_s17  ;;  %v8337_v43 = vld [vmem:[#allocation20_spill] sm:$0xff] }
 0x11a   : > { %v1040_v28 = vmul.f32 %v5749_v30, %v8337_v43  ;;  %v8340_v30 = vld [vmem:[#allocation21_spill] sm:$0xff] }
 0x11b   : > { %v695_v48 = vpop.permute.xlu1 %694  ;;  %v697_v53 = vpop.permute.xlu0 %696 }
 0x11c   : > { %780 = vst.msk [vmem:[#allocation3 + $0x110] sm:$0xff] %vm768_vm3, %v695_v48  ;;  %781 = vst.msk [vmem:[#allocation3 + $0x128] sm:$0xff] %vm768_vm3, %v697_v53  ;;  %v1044_v48 = vmul.f32 %v5785_v12, %v5532_v10  ;;  %v1047_v12 = vmul.f32 %v5807_v50, %v5546_v17 }
 0x11d   : > { %1108 = vrot.lane.b32.xlu1 %v1035_v58, %s5133_s17  ;;  %1110 = vrot.lane.b32.xlu0 %v1036_v52, %s5133_s17  ;;  %v1042_v58 = vmul.f32 %v5773_v62, %v8339_v13  ;;  %v1043_v52 = vmul.f32 %v5783_v33, %v8340_v30  ;;  %v1045_v62 = vmul.f32 %v5795_v25, %v5530_v9 }
 0x11f   : > { %v699_v40 = vpop.permute.xlu1 %698  ;;  %v701_v2 = vpop.permute.xlu0 %700 }
 0x120   : > { %782 = vst.msk [vmem:[#allocation3 + $0x140] sm:$0xff] %vm768_vm3, %v699_v40  ;;  %783 = vst.msk [vmem:[#allocation3 + $0x158] sm:$0xff] %vm768_vm3, %v701_v2  ;;  %v1048_v40 = vmul.f32 %v5809_v51, %v5564_v46  ;;  %v1051_v51 = vmul.f32 %v5831_v45, %v5580_v6 }
 0x121   : > { %1112 = vrot.lane.b32.xlu1 %v1037_v19, %s5133_s17  ;;  %1114 = vrot.lane.b32.xlu0 %v1038_v1, %s5133_s17  ;;  %v1046_v19 = vmul.f32 %v5797_v18, %v5548_v20  ;;  %v1049_v18 = vmul.f32 %v5819_v56, %v5562_v41 }
 0x123   : > { %v703_v54 = vpop.permute.xlu1 %702  ;;  %v705_v37 = vpop.permute.xlu0 %704 }
 0x124   : > { %784 = vst.msk [vmem:[#allocation3 + $0x170] sm:$0xff] %vm768_vm3, %v703_v54  ;;  %785 = vst.msk [vmem:[#allocation3 + $0x188] sm:$0xff] %vm768_vm3, %v705_v37  ;;  %v1052_v54 = vmul.f32 %v5833_v4, %v5598_v34  ;;  %v1055_v4 = vmul.f32 %v5851_v60, %v5614_v14  ;;  %v1057_v60 = vmul.f32 %v5860_v27, %v5632_v5 }
 0x125   : > { %1116 = vrot.lane.b32.xlu1 %v1039_v7, %s5133_s17  ;;  %1118 = vrot.lane.b32.xlu0 %v1040_v28, %s5133_s17  ;;  %v1050_v7 = vmul.f32 %v5821_v42, %v5582_v11  ;;  %v1053_v42 = vmul.f32 %v5843_v36, %v5596_v29 }
 0x127   : > { %v707_v31 = vpop.permute.xlu1 %706  ;;  %v709_v55 = vpop.permute.xlu0 %708 }
 0x128   : > { %786 = vst.msk [vmem:[#allocation3 + $0x1a0] sm:$0xff] %vm768_vm3, %v707_v31  ;;  %787 = vst.msk [vmem:[#allocation3 + $0x1b8] sm:$0xff] %vm768_vm3, %v709_v55  ;;  %v1056_v31 = vmul.f32 %v5853_v49, %v5634_v22  ;;  %v5998_v49 = vld [vmem:[#allocation2 + $0xa] sm:$0xff] }
 0x129   : > { %1120 = vrot.lane.b32.xlu1 %v1041_v44, %s5133_s17  ;;  %1122 = vrot.lane.b32.xlu0 %v1042_v58, %s5133_s17  ;;  %v1054_v44 = vmul.f32 %v5845_v15, %v5616_v21  ;;  %v5989_v15 = vld [vmem:[#allocation2 + $0x2] sm:$0xff] }
 0x12b   : > { %v711_v57 = vpop.permute.xlu1 %710  ;;  %v713_v53 = vpop.permute.xlu0 %712 }
 0x12c   : > { %788 = vst.msk [vmem:[#allocation3 + $0x1d0] sm:$0xff] %vm768_vm3, %v711_v57  ;;  %789 = vst.msk [vmem:[#allocation3 + $0x1e8] sm:$0xff] %vm768_vm3, %v713_v53  ;;  %v6000_v53 = vld [vmem:[#allocation2 + $0x1a] sm:$0xff] }
 0x12d   : > { %1124 = vrot.lane.b32.xlu1 %v1043_v52, %s5133_s17  ;;  %1126 = vrot.lane.b32.xlu0 %v1044_v48, %s5133_s17  ;;  %v1251_v52 = vmax.f32 %v5989_v15, 0.0 }
 0x12f   : > { %v715_v33 = vpop.permute.xlu1 %714  ;;  %v717_v1 = vpop.permute.xlu0 %716 }
 0x130   : > { %790 = vst.msk [vmem:[#allocation3 + $0x200] sm:$0xff] %vm768_vm3, %v715_v33  ;;  %791 = vst.msk [vmem:[#allocation3 + $0x218] sm:$0xff] %vm768_vm3, %v717_v1  ;;  %v6008_v1 = vld [vmem:[#allocation2 + $0x22] sm:$0xff] }
 0x131   : > { %1128 = vrot.lane.b32.xlu1 %v1045_v62, %s5133_s17  ;;  %1130 = vrot.lane.b32.xlu0 %v1046_v19, %s5133_s17  ;;  %v1252_v62 = vmax.f32 %v5998_v49, 0.0  ;;  %v1253_v19 = vmax.f32 %v6000_v53, 0.0 }
 0x133   : > { %v719_v25 = vpop.permute.xlu1 %718  ;;  %v721_v2 = vpop.permute.xlu0 %720 }
 0x134   : > { %792 = vst.msk [vmem:[#allocation3 + $0x230] sm:$0xff] %vm768_vm3, %v719_v25  ;;  %793 = vst.msk [vmem:[#allocation3 + $0x248] sm:$0xff] %vm768_vm3, %v721_v2 }
 0x135   : > { %1132 = vrot.lane.b32.xlu1 %v1047_v12, %s5133_s17  ;;  %1134 = vrot.lane.b32.xlu0 %v1048_v40, %s5133_s17  ;;  %v6010_v12 = vld [vmem:[#allocation2 + $0x32] sm:$0xff]  ;;  %v1254_v40 = vmax.f32 %v6008_v1, 0.0 }
 0x136   : > { %v1255_v25 = vmax.f32 %v6010_v12, 0.0 }
 0x137   : > { %v723_v50 = vpop.permute.xlu1 %722  ;;  %v725_v28 = vpop.permute.xlu0 %724 }
 0x138   : > { %794 = vst.msk [vmem:[#allocation3 + $0x260] sm:$0xff] %vm768_vm3, %v723_v50  ;;  %795 = vst.msk [vmem:[#allocation3 + $0x278] sm:$0xff] %vm768_vm3, %v725_v28  ;;  %v6020_v50 = vld [vmem:[#allocation2 + $0x4a] sm:$0xff] }
 0x139   : > { %1136 = vrot.lane.b32.xlu1 %v1049_v18, %s5133_s17  ;;  %1138 = vrot.lane.b32.xlu0 %v1050_v7, %s5133_s17  ;;  %v6018_v7 = vld [vmem:[#allocation2 + $0x3a] sm:$0xff] }
 0x13a   : > { %v1256_v28 = vmax.f32 %v6018_v7, 0.0 }
 0x13b   : > { %v727_v56 = vpop.permute.xlu1 %726  ;;  %v729_v37 = vpop.permute.xlu0 %728 }
 0x13c   : > { %796 = vst.msk [vmem:[#allocation3 + $0x290] sm:$0xff] %vm768_vm3, %v727_v56  ;;  %797 = vst.msk [vmem:[#allocation3 + $0x2a8] sm:$0xff] %vm768_vm3, %v729_v37  ;;  %v6028_v37 = vld [vmem:[#allocation2 + $0x52] sm:$0xff] }
 0x13d   : > { %1140 = vrot.lane.b32.xlu1 %v1051_v51, %s5133_s17  ;;  %1142 = vrot.lane.b32.xlu0 %v1052_v54, %s5133_s17  ;;  %v1257_v51 = vmax.f32 %v6020_v50, 0.0 }
 0x13f   : > { %v731_v45 = vpop.permute.xlu1 %730  ;;  %v733_v58 = vpop.permute.xlu0 %732 }
 0x140   : > { %798 = vst.msk [vmem:[#allocation3 + $0x2c0] sm:$0xff] %vm768_vm3, %v731_v45  ;;  %799 = vst.msk [vmem:[#allocation3 + $0x2d8] sm:$0xff] %vm768_vm3, %v733_v58 }
 0x141   : > { %1144 = vrot.lane.b32.xlu1 %v1053_v42, %s5133_s17  ;;  %1146 = vrot.lane.b32.xlu0 %v1054_v44, %s5133_s17  ;;  %v6030_v42 = vld [vmem:[#allocation2 + $0x62] sm:$0xff]  ;;  %v1258_v44 = vmax.f32 %v6028_v37, 0.0 }
 0x142   : > { %v1259_v45 = vmax.f32 %v6030_v42, 0.0 }
 0x143   : > { %v735_v36 = vpop.permute.xlu1 %734  ;;  %v906_v55 = vpop.permute.xlu0 %905 }
 0x144   : > { %800 = vst.msk [vmem:[#allocation3 + $0x2f0] sm:$0xff] %vm768_vm3, %v735_v36  ;;  %v6040_v36 = vld [vmem:[#allocation2 + $0x7a] sm:$0xff] }
 0x145   : > { %998 = vst.msk [vmem:[#allocation3 + $0x60] sm:$0xff] %vm993_vm2, %v906_v55  ;;  %1148 = vrot.lane.b32.xlu1 %v1055_v4, %s5133_s17  ;;  %1150 = vrot.lane.b32.xlu0 %v1056_v31, %s5133_s17  ;;  %v6038_v31 = vld [vmem:[#allocation2 + $0x6a] sm:$0xff] }
 0x146   : > { %v1260_v55 = vmax.f32 %v6038_v31, 0.0 }
 0x147   : > { %v908_v48 = vpop.permute.xlu1 %907  ;;  %v910_v57 = vpop.permute.xlu0 %909 }
 0x148   : > { %999 = vst.msk [vmem:[#allocation3 + $0x78] sm:$0xff] %vm993_vm2, %v908_v48  ;;  %1000 = vst.msk [vmem:[#allocation3 + $0x90] sm:$0xff] %vm993_vm2, %v910_v57  ;;  %v6048_v57 = vld [vmem:[#allocation2 + $0x82] sm:$0xff] }
 0x149   : > { %1152 = vrot.lane.b32.xlu1 %v1057_v60, %s5133_s17  ;;  %1315 = vrot.lane.b32.xlu0 %v1251_v52, %s5132_s7  ;;  %v1261_v52 = vmax.f32 %v6040_v36, 0.0 }
 0x14b   : > { %v912_v33 = vpop.permute.xlu1 %911  ;;  %v914_v27 = vpop.permute.xlu0 %913 }
 0x14c   : > { %1001 = vst.msk [vmem:[#allocation3 + $0xa8] sm:$0xff] %vm993_vm2, %v912_v33  ;;  %1002 = vst.msk [vmem:[#allocation3 + $0xc0] sm:$0xff] %vm993_vm2, %v914_v27 }
 0x14d   : > { %1317 = vrot.lane.b32.xlu1 %v1252_v62, %s5132_s7  ;;  %1319 = vrot.lane.b32.xlu0 %v1253_v19, %s5132_s7  ;;  %v6050_v62 = vld [vmem:[#allocation2 + $0x92] sm:$0xff]  ;;  %v1262_v19 = vmax.f32 %v6048_v57, 0.0 }
 0x14e   : > { %v1263_v33 = vmax.f32 %v6050_v62, 0.0 }
 0x14f   : > { %v916_v2 = vpop.permute.xlu1 %915  ;;  %v918_v18 = vpop.permute.xlu0 %917 }
 0x150   : > { %1003 = vst.msk [vmem:[#allocation3 + $0xd8] sm:$0xff] %vm993_vm2, %v916_v2  ;;  %1004 = vst.msk [vmem:[#allocation3 + $0xf0] sm:$0xff] %vm993_vm2, %v918_v18  ;;  %v6060_v2 = vld [vmem:[#allocation2 + $0xaa] sm:$0xff] }
 0x151   : > { %1321 = vrot.lane.b32.xlu1 %v1254_v40, %s5132_s7  ;;  %1323 = vrot.lane.b32.xlu0 %v1255_v25, %s5132_s7  ;;  %v6058_v25 = vld [vmem:[#allocation2 + $0x9a] sm:$0xff] }
 0x152   : > { %v1264_v18 = vmax.f32 %v6058_v25, 0.0 }
 0x153   : > { %v920_v54 = vpop.permute.xlu1 %919  ;;  %v922_v56 = vpop.permute.xlu0 %921 }
 0x154   : > { %1005 = vst.msk [vmem:[#allocation3 + $0x108] sm:$0xff] %vm993_vm2, %v920_v54  ;;  %1006 = vst.msk [vmem:[#allocation3 + $0x120] sm:$0xff] %vm993_vm2, %v922_v56  ;;  %v6068_v56 = vld [vmem:[#allocation2 + $0xb2] sm:$0xff] }
 0x155   : > { %1325 = vrot.lane.b32.xlu1 %v1256_v28, %s5132_s7  ;;  %1327 = vrot.lane.b32.xlu0 %v1257_v51, %s5132_s7  ;;  %v1265_v28 = vmax.f32 %v6060_v2, 0.0 }
 0x157   : > { %v924_v58 = vpop.permute.xlu1 %923  ;;  %v926_v4 = vpop.permute.xlu0 %925 }
 0x158   : > { %1007 = vst.msk [vmem:[#allocation3 + $0x138] sm:$0xff] %vm993_vm2, %v924_v58  ;;  %1008 = vst.msk [vmem:[#allocation3 + $0x150] sm:$0xff] %vm993_vm2, %v926_v4 }
 0x159   : > { %1329 = vrot.lane.b32.xlu1 %v1258_v44, %s5132_s7  ;;  %1331 = vrot.lane.b32.xlu0 %v1259_v45, %s5132_s7  ;;  %v6070_v44 = vld [vmem:[#allocation2 + $0xc2] sm:$0xff]  ;;  %v1266_v45 = vmax.f32 %v6068_v56, 0.0 }
 0x15a   : > { %v1267_v58 = vmax.f32 %v6070_v44, 0.0 }
 0x15b   : > { %v928_v60 = vpop.permute.xlu1 %927  ;;  %v930_v48 = vpop.permute.xlu0 %929 }
 0x15c   : > { %1009 = vst.msk [vmem:[#allocation3 + $0x168] sm:$0xff] %vm993_vm2, %v928_v60  ;;  %1010 = vst.msk [vmem:[#allocation3 + $0x180] sm:$0xff] %vm993_vm2, %v930_v48  ;;  %v6080_v60 = vld [vmem:[#allocation2 + $0xda] sm:$0xff] }
 0x15d   : > { %1333 = vrot.lane.b32.xlu1 %v1260_v55, %s5132_s7  ;;  %1335 = vrot.lane.b32.xlu0 %v1261_v52, %s5132_s7  ;;  %v6078_v52 = vld [vmem:[#allocation2 + $0xca] sm:$0xff] }
 0x15e   : > { %v1268_v48 = vmax.f32 %v6078_v52, 0.0 }
 0x15f   : > { %v932_v27 = vpop.permute.xlu1 %931  ;;  %v934_v40 = vpop.permute.xlu0 %933 }
 0x160   : > { %1011 = vst.msk [vmem:[#allocation3 + $0x198] sm:$0xff] %vm993_vm2, %v932_v27  ;;  %1012 = vst.msk [vmem:[#allocation3 + $0x1b0] sm:$0xff] %vm993_vm2, %v934_v40  ;;  %v6088_v40 = vld [vmem:[#allocation2 + $0xe2] sm:$0xff] }
 0x161   : > { %1337 = vrot.lane.b32.xlu1 %v1262_v19, %s5132_s7  ;;  %1339 = vrot.lane.b32.xlu0 %v1263_v33, %s5132_s7  ;;  %v1269_v19 = vmax.f32 %v6080_v60, 0.0 }
 0x163   : > { %v936_v51 = vpop.permute.xlu1 %935  ;;  %v938_v54 = vpop.permute.xlu0 %937 }
 0x164   : > { %1013 = vst.msk [vmem:[#allocation3 + $0x1c8] sm:$0xff] %vm993_vm2, %v936_v51  ;;  %1014 = vst.msk [vmem:[#allocation3 + $0x1e0] sm:$0xff] %vm993_vm2, %v938_v54 }
 0x165   : > { %1341 = vrot.lane.b32.xlu1 %v1264_v18, %s5132_s7  ;;  %1343 = vrot.lane.b32.xlu0 %v1265_v28, %s5132_s7  ;;  %v6090_v18 = vld [vmem:[#allocation2 + $0xf2] sm:$0xff]  ;;  %v1270_v28 = vmax.f32 %v6088_v40, 0.0 }
 0x166   : > { %v1271_v51 = vmax.f32 %v6090_v18, 0.0 }
 0x167   : > { %v940_v4 = vpop.permute.xlu1 %939  ;;  %v942_v55 = vpop.permute.xlu0 %941 }
 0x168   : > { %1015 = vst.msk [vmem:[#allocation3 + $0x1f8] sm:$0xff] %vm993_vm2, %v940_v4  ;;  %1016 = vst.msk [vmem:[#allocation3 + $0x210] sm:$0xff] %vm993_vm2, %v942_v55  ;;  %v6100_v4 = vld [vmem:[#allocation2 + $0x10a] sm:$0xff] }
 0x169   : > { %1345 = vrot.lane.b32.xlu1 %v1266_v45, %s5132_s7  ;;  %1347 = vrot.lane.b32.xlu0 %v1267_v58, %s5132_s7  ;;  %v6098_v58 = vld [vmem:[#allocation2 + $0xfa] sm:$0xff] }
 0x16a   : > { %v1272_v55 = vmax.f32 %v6098_v58, 0.0 }
 0x16b   : > { %v944_v33 = vpop.permute.xlu1 %943  ;;  %v946_v27 = vpop.permute.xlu0 %945 }
 0x16c   : > { %1017 = vst.msk [vmem:[#allocation3 + $0x228] sm:$0xff] %vm993_vm2, %v944_v33  ;;  %1018 = vst.msk [vmem:[#allocation3 + $0x240] sm:$0xff] %vm993_vm2, %v946_v27  ;;  %v6108_v27 = vld [vmem:[#allocation2 + $0x112] sm:$0xff] }
 0x16d   : > { %1349 = vrot.lane.b32.xlu1 %v1268_v48, %s5132_s7  ;;  %1351 = vrot.lane.b32.xlu0 %v1269_v19, %s5132_s7  ;;  %v1273_v48 = vmax.f32 %v6100_v4, 0.0 }
 0x16f   : > { %v948_v54 = vpop.permute.xlu1 %947  ;;  %v950_v45 = vpop.permute.xlu0 %949 }
 0x170   : > { %1019 = vst.msk [vmem:[#allocation3 + $0x258] sm:$0xff] %vm993_vm2, %v948_v54  ;;  %1020 = vst.msk [vmem:[#allocation3 + $0x270] sm:$0xff] %vm993_vm2, %v950_v45  ;;  %v6110_v54 = vld [vmem:[#allocation2 + $0x122] sm:$0xff] }
 0x171   : > { %1353 = vrot.lane.b32.xlu1 %v1270_v28, %s5132_s7  ;;  %1355 = vrot.lane.b32.xlu0 %v1271_v51, %s5132_s7  ;;  %v1274_v28 = vmax.f32 %v6108_v27, 0.0  ;;  %v1275_v51 = vmax.f32 %v6110_v54, 0.0 }
 0x173   : > { %v952_v19 = vpop.permute.xlu1 %951  ;;  %v954_v33 = vpop.permute.xlu0 %953 }
 0x174   : > { %1021 = vst.msk [vmem:[#allocation3 + $0x288] sm:$0xff] %vm993_vm2, %v952_v19  ;;  %1022 = vst.msk [vmem:[#allocation3 + $0x2a0] sm:$0xff] %vm993_vm2, %v954_v33  ;;  %v6118_v19 = vld [vmem:[#allocation2 + $0x12a] sm:$0xff]  ;;  %v6120_v33 = vld [vmem:[#allocation2 + $0x13a] sm:$0xff] }
 0x175   : > { %1357 = vrot.lane.b32.xlu1 %v1272_v55, %s5132_s7  ;;  %1359 = vrot.lane.b32.xlu0 %v1273_v48, %s5132_s7  ;;  %v1276_v55 = vmax.f32 %v6118_v19, 0.0  ;;  %v1277_v48 = vmax.f32 %v6120_v33, 0.0 }
 0x177   : > { %v956_v45 = vpop.permute.xlu1 %955  ;;  %v958_v5 = vpop.permute.xlu0 %957 }
 0x178   : > { %1023 = vst.msk [vmem:[#allocation3 + $0x2b8] sm:$0xff] %vm993_vm2, %v956_v45  ;;  %1024 = vst.msk [vmem:[#allocation3 + $0x2d0] sm:$0xff] %vm993_vm2, %v958_v5  ;;  %v6128_v5 = vld [vmem:[#allocation2 + $0x142] sm:$0xff]  ;;  %v6130_v45 = vld [vmem:[#allocation2 + $0x152] sm:$0xff] }
 0x179   : > { %1361 = vrot.lane.b32.xlu1 %v1274_v28, %s5132_s7  ;;  %1363 = vrot.lane.b32.xlu0 %v1275_v51, %s5132_s7  ;;  %8341 = vst [vmem:[#allocation9_spill] sm:$0xff] %v6128_v5  ;;  %8342 = vst [vmem:[#allocation4_spill] sm:$0xff] %v6130_v45  ;;  %v1278_v28 = vmax.f32 %v6128_v5, 0.0  ;;  %v1279_v51 = vmax.f32 %v6130_v45, 0.0 }
 0x17b   : > { %v960_v22 = vpop.permute.xlu1 %959  ;;  %v1091_v14 = vpop.permute.xlu0 %1090 }
 0x17c   : > { %1025 = vst.msk [vmem:[#allocation3 + $0x2e8] sm:$0xff] %vm993_vm2, %v960_v22  ;;  %v6138_v22 = vld [vmem:[#allocation2 + $0x15a] sm:$0xff] }
 0x17d   : > { %1187 = vst.msk [vmem:[#allocation3 + $0x8] sm:$0xff] %vm1186_vm4, %v1091_v14  ;;  %1365 = vrot.lane.b32.xlu1 %v1276_v55, %s5132_s7  ;;  %1367 = vrot.lane.b32.xlu0 %v1277_v48, %s5132_s7  ;;  %8343 = vst [vmem:[#allocation11_spill] sm:$0xff] %v6138_v22  ;;  %v6140_v14 = vld [vmem:[#allocation2 + $0x16a] sm:$0xff]  ;;  %v1280_v55 = vmax.f32 %v6138_v22, 0.0  ;;  %v1443_v22 = vmul.f32 %v5989_v15, %v8319_v23 }
 0x17e   : > { %v1281_v48 = vmax.f32 %v6140_v14, 0.0 }
 0x17f   : > { %v1093_v21 = vpop.permute.xlu1 %1092  ;;  %v1095_v29 = vpop.permute.xlu0 %1094 }
 0x180   : > { %1188 = vst.msk [vmem:[#allocation3 + $0x20] sm:$0xff] %vm1186_vm4, %v1093_v21  ;;  %1189 = vst.msk [vmem:[#allocation3 + $0x38] sm:$0xff] %vm1186_vm4, %v1095_v29  ;;  %v6148_v21 = vld [vmem:[#allocation2 + $0x172] sm:$0xff] }
 0x181   : > { %1369 = vrot.lane.b32.xlu1 %v1278_v28, %s5132_s7  ;;  %1371 = vrot.lane.b32.xlu0 %v1279_v51, %s5132_s7  ;;  %v1282_v29 = vmax.f32 %v6148_v21, 0.0 }
 0x183   : > { %v1097_v5 = vpop.permute.xlu1 %1096  ;;  %v1099_v45 = vpop.permute.xlu0 %1098 }
 0x184   : > { %1190 = vst.msk [vmem:[#allocation3 + $0x50] sm:$0xff] %vm1186_vm4, %v1097_v5  ;;  %1191 = vst.msk [vmem:[#allocation3 + $0x68] sm:$0xff] %vm1186_vm4, %v1099_v45 }
 0x185   : > { %1373 = vrot.lane.b32.xlu1 %v1280_v55, %s5132_s7  ;;  %1375 = vrot.lane.b32.xlu0 %v1281_v48, %s5132_s7  ;;  %v1444_v55 = vmul.f32 %v5998_v49, %v8321_v24  ;;  %v1445_v48 = vmul.f32 %v6000_v53, %v8323_v63 }
 0x187   : > { %v1101_v28 = vpop.permute.xlu1 %1100  ;;  %v1103_v51 = vpop.permute.xlu0 %1102 }
 0x188   : > { %1192 = vst.msk [vmem:[#allocation3 + $0x80] sm:$0xff] %vm1186_vm4, %v1101_v28  ;;  %1193 = vst.msk [vmem:[#allocation3 + $0x98] sm:$0xff] %vm1186_vm4, %v1103_v51  ;;  %v1447_v28 = vmul.f32 %v6010_v12, %v8325_v8  ;;  %v1448_v51 = vmul.f32 %v6018_v7, %v8329_v35 }
 0x189   : > { %1377 = vrot.lane.b32.xlu1 %v1282_v29, %s5132_s7  ;;  %1507 = vrot.lane.b32.xlu0 %v1443_v22, %s5134_s18  ;;  %v1446_v22 = vmul.f32 %v6008_v1, %v8327_v26 }
 0x18b   : > { %v1105_v5 = vpop.permute.xlu1 %1104  ;;  %v1107_v45 = vpop.permute.xlu0 %1106 }
 0x18c   : > { %1194 = vst.msk [vmem:[#allocation3 + $0xb0] sm:$0xff] %vm1186_vm4, %v1105_v5  ;;  %1195 = vst.msk [vmem:[#allocation3 + $0xc8] sm:$0xff] %vm1186_vm4, %v1107_v45  ;;  %v1449_v5 = vmul.f32 %v6020_v50, %v8330_v61  ;;  %v1450_v45 = vmul.f32 %v6028_v37, %v5446_v32 }
 0x18d   : > { %1509 = vrot.lane.b32.xlu1 %v1444_v55, %s5134_s18  ;;  %1511 = vrot.lane.b32.xlu0 %v1445_v48, %s5134_s18  ;;  %v1451_v55 = vmul.f32 %v6030_v42, %v5462_v39  ;;  %v1452_v48 = vmul.f32 %v6038_v31, %v5460_v38 }
 0x18f   : > { %v1109_v15 = vpop.permute.xlu1 %1108  ;;  %v1111_v29 = vpop.permute.xlu0 %1110 }
 0x190   : > { %1196 = vst.msk [vmem:[#allocation3 + $0xe0] sm:$0xff] %vm1186_vm4, %v1109_v15  ;;  %1197 = vst.msk [vmem:[#allocation3 + $0xf8] sm:$0xff] %vm1186_vm4, %v1111_v29  ;;  %v1453_v15 = vmul.f32 %v6040_v36, %v8332_v59  ;;  %v1454_v29 = vmul.f32 %v6048_v57, %v8334_v47 }
 0x191   : > { %1513 = vrot.lane.b32.xlu1 %v1446_v22, %s5134_s18  ;;  %1515 = vrot.lane.b32.xlu0 %v1447_v28, %s5134_s18  ;;  %v1455_v22 = vmul.f32 %v6050_v62, %v8335_v16  ;;  %v1456_v28 = vmul.f32 %v6058_v25, %v8336_v3 }
 0x193   : > { %v1113_v49 = vpop.permute.xlu1 %1112  ;;  %v1115_v53 = vpop.permute.xlu0 %1114 }
 0x194   : > { %1198 = vst.msk [vmem:[#allocation3 + $0x110] sm:$0xff] %vm1186_vm4, %v1113_v49  ;;  %1199 = vst.msk [vmem:[#allocation3 + $0x128] sm:$0xff] %vm1186_vm4, %v1115_v53  ;;  %v1457_v49 = vmul.f32 %v6060_v2, %v8337_v43  ;;  %v1458_v53 = vmul.f32 %v6068_v56, %v8338_v0 }
 0x195   : > { %1517 = vrot.lane.b32.xlu1 %v1448_v51, %s5134_s18  ;;  %1519 = vrot.lane.b32.xlu0 %v1449_v5, %s5134_s18  ;;  %v1459_v51 = vmul.f32 %v6070_v44, %v8339_v13  ;;  %v1460_v5 = vmul.f32 %v6078_v52, %v8340_v30 }
 0x197   : > { %v1117_v1 = vpop.permute.xlu1 %1116  ;;  %v1119_v12 = vpop.permute.xlu0 %1118 }
 0x198   : > { %1200 = vst.msk [vmem:[#allocation3 + $0x140] sm:$0xff] %vm1186_vm4, %v1117_v1  ;;  %1201 = vst.msk [vmem:[#allocation3 + $0x158] sm:$0xff] %vm1186_vm4, %v1119_v12  ;;  %v1461_v1 = vmul.f32 %v6080_v60, %v5532_v10  ;;  %v1462_v12 = vmul.f32 %v6088_v40, %v5530_v9 }
 0x199   : > { %1521 = vrot.lane.b32.xlu1 %v1450_v45, %s5134_s18  ;;  %1523 = vrot.lane.b32.xlu0 %v1451_v55, %s5134_s18  ;;  %v1463_v45 = vmul.f32 %v6090_v18, %v5548_v20  ;;  %v1464_v55 = vmul.f32 %v6098_v58, %v5546_v17 }
 0x19b   : > { %v1121_v7 = vpop.permute.xlu1 %1120  ;;  %v1123_v50 = vpop.permute.xlu0 %1122 }
 0x19c   : > { %1202 = vst.msk [vmem:[#allocation3 + $0x170] sm:$0xff] %vm1186_vm4, %v1121_v7  ;;  %1203 = vst.msk [vmem:[#allocation3 + $0x188] sm:$0xff] %vm1186_vm4, %v1123_v50  ;;  %v1465_v7 = vmul.f32 %v6100_v4, %v5564_v46  ;;  %v1466_v50 = vmul.f32 %v6108_v27, %v5562_v41 }
 0x19d   : > { %1525 = vrot.lane.b32.xlu1 %v1452_v48, %s5134_s18  ;;  %1527 = vrot.lane.b32.xlu0 %v1453_v15, %s5134_s18  ;;  %v1467_v48 = vmul.f32 %v6110_v54, %v5582_v11  ;;  %v1468_v15 = vmul.f32 %v6118_v19, %v5580_v6 }
 0x19f   : > { %v1125_v37 = vpop.permute.xlu1 %1124  ;;  %v1127_v42 = vpop.permute.xlu0 %1126 }
 0x1a0   : > { %1204 = vst.msk [vmem:[#allocation3 + $0x1a0] sm:$0xff] %vm1186_vm4, %v1125_v37  ;;  %1205 = vst.msk [vmem:[#allocation3 + $0x1b8] sm:$0xff] %vm1186_vm4, %v1127_v42  ;;  %v1469_v37 = vmul.f32 %v6120_v33, %v5598_v34  ;;  %v8344_v42 = vld [vmem:[#allocation29_spill] sm:$0xff] }
 0x1a1   : > { %1529 = vrot.lane.b32.xlu1 %v1454_v29, %s5134_s18  ;;  %1531 = vrot.lane.b32.xlu0 %v1455_v22, %s5134_s18  ;;  %v8345_v29 = vld [vmem:[#allocation9_spill] sm:$0xff] }
 0x1a2   : > { %v1470_v22 = vmul.f32 %v8345_v29, %v8344_v42  ;;  %v6316_v29 = vld [vmem:[#allocation2 + $0x68] sm:$0xff] }
 0x1a3   : > { %v1129_v31 = vpop.permute.xlu1 %1128  ;;  %v1131_v36 = vpop.permute.xlu0 %1130 }
 0x1a4   : > { %1206 = vst.msk [vmem:[#allocation3 + $0x1d0] sm:$0xff] %vm1186_vm4, %v1129_v31  ;;  %1207 = vst.msk [vmem:[#allocation3 + $0x1e8] sm:$0xff] %vm1186_vm4, %v1131_v36  ;;  %v8346_v31 = vld [vmem:[#allocation31_spill] sm:$0xff]  ;;  %v8347_v36 = vld [vmem:[#allocation4_spill] sm:$0xff] }
 0x1a5   : > { %1533 = vrot.lane.b32.xlu1 %v1456_v28, %s5134_s18  ;;  %1535 = vrot.lane.b32.xlu0 %v1457_v49, %s5134_s18  ;;  %v1471_v28 = vmul.f32 %v8347_v36, %v8346_v31  ;;  %v8348_v49 = vld [vmem:[#allocation30_spill] sm:$0xff]  ;;  %v1675_v36 = vmax.f32 %v6316_v29, 0.0 }
 0x1a7   : > { %v1133_v57 = vpop.permute.xlu1 %1132  ;;  %v1135_v62 = vpop.permute.xlu0 %1134 }
 0x1a8   : > { %1208 = vst.msk [vmem:[#allocation3 + $0x200] sm:$0xff] %vm1186_vm4, %v1133_v57  ;;  %1209 = vst.msk [vmem:[#allocation3 + $0x218] sm:$0xff] %vm1186_vm4, %v1135_v62  ;;  %v8349_v57 = vld [vmem:[#allocation11_spill] sm:$0xff] }
 0x1a9   : > { %1537 = vrot.lane.b32.xlu1 %v1458_v53, %s5134_s18  ;;  %1539 = vrot.lane.b32.xlu0 %v1459_v51, %s5134_s18  ;;  %v1472_v62 = vmul.f32 %v8349_v57, %v8348_v49  ;;  %v8350_v53 = vld [vmem:[#allocation33_spill] sm:$0xff]  ;;  %v6326_v57 = vld [vmem:[#allocation2 + $0x80] sm:$0xff] }
 0x1aa   : > { %v1473_v51 = vmul.f32 %v6140_v14, %v8350_v53  ;;  %v6286_v14 = vld [vmem:[#allocation2 + $0x20] sm:$0xff] }
 0x1ab   : > { %v1137_v25 = vpop.permute.xlu1 %1136  ;;  %v1139_v2 = vpop.permute.xlu0 %1138 }
 0x1ac   : > { %1210 = vst.msk [vmem:[#allocation3 + $0x230] sm:$0xff] %vm1186_vm4, %v1137_v25  ;;  %1211 = vst.msk [vmem:[#allocation3 + $0x248] sm:$0xff] %vm1186_vm4, %v1139_v2  ;;  %v6277_v25 = vld [vmem:[#allocation2 + $0x18] sm:$0xff] }
 0x1ad   : > { %1541 = vrot.lane.b32.xlu1 %v1460_v5, %s5134_s18  ;;  %1543 = vrot.lane.b32.xlu0 %v1461_v1, %s5134_s18  ;;  %v1668_v2 = vmax.f32 %v6277_v25, 0.0 }
 0x1af   : > { %v1141_v56 = vpop.permute.xlu1 %1140  ;;  %v1143_v44 = vpop.permute.xlu0 %1142 }
 0x1b0   : > { %1212 = vst.msk [vmem:[#allocation3 + $0x260] sm:$0xff] %vm1186_vm4, %v1141_v56  ;;  %1213 = vst.msk [vmem:[#allocation3 + $0x278] sm:$0xff] %vm1186_vm4, %v1143_v44  ;;  %v8351_v56 = vld [vmem:[#allocation32_spill] sm:$0xff] }
 0x1b1   : > { %1545 = vrot.lane.b32.xlu1 %v1462_v12, %s5134_s18  ;;  %1547 = vrot.lane.b32.xlu0 %v1463_v45, %s5134_s18  ;;  %v1474_v44 = vmul.f32 %v6148_v21, %v8351_v56  ;;  %v6288_v12 = vld [vmem:[#allocation2 + $0x30] sm:$0xff]  ;;  %v1669_v45 = vmax.f32 %v6286_v14, 0.0  ;;  %v6296_v21 = vld [vmem:[#allocation2 + $0x38] sm:$0xff] }
 0x1b3   : > { %v1145_v52 = vpop.permute.xlu1 %1144  ;;  %v1147_v60 = vpop.permute.xlu0 %1146 }
 0x1b4   : > { %1214 = vst.msk [vmem:[#allocation3 + $0x290] sm:$0xff] %vm1186_vm4, %v1145_v52  ;;  %1215 = vst.msk [vmem:[#allocation3 + $0x2a8] sm:$0xff] %vm1186_vm4, %v1147_v60  ;;  %v1670_v52 = vmax.f32 %v6288_v12, 0.0 }
 0x1b5   : > { %1549 = vrot.lane.b32.xlu1 %v1464_v55, %s5134_s18  ;;  %1551 = vrot.lane.b32.xlu0 %v1465_v7, %s5134_s18  ;;  %v6298_v7 = vld [vmem:[#allocation2 + $0x48] sm:$0xff] }
 0x1b7   : > { %v1149_v40 = vpop.permute.xlu1 %1148  ;;  %v1151_v18 = vpop.permute.xlu0 %1150 }
 0x1b8   : > { %1216 = vst.msk [vmem:[#allocation3 + $0x2c0] sm:$0xff] %vm1186_vm4, %v1149_v40  ;;  %1217 = vst.msk [vmem:[#allocation3 + $0x2d8] sm:$0xff] %vm1186_vm4, %v1151_v18  ;;  %v1671_v40 = vmax.f32 %v6296_v21, 0.0  ;;  %v1672_v18 = vmax.f32 %v6298_v7, 0.0 }
 0x1b9   : > { %1553 = vrot.lane.b32.xlu1 %v1466_v50, %s5134_s18  ;;  %1555 = vrot.lane.b32.xlu0 %v1467_v48, %s5134_s18 }
 0x1bb   : > { %v1153_v58 = vpop.permute.xlu1 %1152  ;;  %v1316_v4 = vpop.permute.xlu0 %1315 }
 0x1bc   : > { %1218 = vst.msk [vmem:[#allocation3 + $0x2f0] sm:$0xff] %vm1186_vm4, %v1153_v58  ;;  %v6306_v58 = vld [vmem:[#allocation2 + $0x50] sm:$0xff] }
 0x1bd   : > { %1411 = vst.msk [vmem:[#allocation3] sm:$0xff] %vm768_vm3, %v1316_v4  ;;  %1557 = vrot.lane.b32.xlu1 %v1468_v15, %s5134_s18  ;;  %1559 = vrot.lane.b32.xlu0 %v1469_v37, %s5134_s18  ;;  %v6308_v4 = vld [vmem:[#allocation2 + $0x60] sm:$0xff]  ;;  %v1673_v15 = vmax.f32 %v6306_v58, 0.0 }
 0x1be   : > { %v1674_v37 = vmax.f32 %v6308_v4, 0.0 }
 0x1bf   : > { %v1318_v27 = vpop.permute.xlu1 %1317  ;;  %v1320_v54 = vpop.permute.xlu0 %1319 }
 0x1c0   : > { %1412 = vst.msk [vmem:[#allocation3 + $0x18] sm:$0xff] %vm768_vm3, %v1318_v27  ;;  %1413 = vst.msk [vmem:[#allocation3 + $0x30] sm:$0xff] %vm768_vm3, %v1320_v54 }
 0x1c1   : > { %1561 = vrot.lane.b32.xlu1 %v1470_v22, %s5134_s18  ;;  %1563 = vrot.lane.b32.xlu0 %v1471_v28, %s5134_s18  ;;  %v6318_v22 = vld [vmem:[#allocation2 + $0x78] sm:$0xff] }
 0x1c2   : > { %v1676_v28 = vmax.f32 %v6318_v22, 0.0 }
 0x1c3   : > { %v1322_v19 = vpop.permute.xlu1 %1321  ;;  %v1324_v33 = vpop.permute.xlu0 %1323 }
 0x1c4   : > { %1414 = vst.msk [vmem:[#allocation3 + $0x48] sm:$0xff] %vm768_vm3, %v1322_v19  ;;  %1415 = vst.msk [vmem:[#allocation3 + $0x60] sm:$0xff] %vm768_vm3, %v1324_v33 }
 0x1c5   : > { %1565 = vrot.lane.b32.xlu1 %v1472_v62, %s5134_s18  ;;  %1567 = vrot.lane.b32.xlu0 %v1473_v51, %s5134_s18  ;;  %v6328_v62 = vld [vmem:[#allocation2 + $0x90] sm:$0xff]  ;;  %v1677_v51 = vmax.f32 %v6326_v57, 0.0 }
 0x1c7   : > { %v1326_v5 = vpop.permute.xlu1 %1325  ;;  %v1328_v1 = vpop.permute.xlu0 %1327 }
 0x1c8   : > { %1416 = vst.msk [vmem:[#allocation3 + $0x78] sm:$0xff] %vm768_vm3, %v1326_v5  ;;  %1417 = vst.msk [vmem:[#allocation3 + $0x90] sm:$0xff] %vm768_vm3, %v1328_v1 }
 0x1c9   : > { %1569 = vrot.lane.b32.xlu1 %v1474_v44, %s5134_s18  ;;  %1732 = vrot.lane.b32.xlu0 %v1668_v2, %s5133_s17  ;;  %v1678_v2 = vmax.f32 %v6328_v62, 0.0  ;;  %v6336_v44 = vld [vmem:[#allocation2 + $0x98] sm:$0xff] }
 0x1cb   : > { %v1330_v60 = vpop.permute.xlu1 %1329  ;;  %v1332_v55 = vpop.permute.xlu0 %1331 }
 0x1cc   : > { %1418 = vst.msk [vmem:[#allocation3 + $0xa8] sm:$0xff] %vm768_vm3, %v1330_v60  ;;  %1419 = vst.msk [vmem:[#allocation3 + $0xc0] sm:$0xff] %vm768_vm3, %v1332_v55 }
 0x1cd   : > { %1734 = vrot.lane.b32.xlu1 %v1669_v45, %s5133_s17  ;;  %1736 = vrot.lane.b32.xlu0 %v1670_v52, %s5133_s17  ;;  %v6338_v45 = vld [vmem:[#allocation2 + $0xa8] sm:$0xff]  ;;  %v1679_v52 = vmax.f32 %v6336_v44, 0.0 }
 0x1ce   : > { %v1680_v60 = vmax.f32 %v6338_v45, 0.0 }
 0x1cf   : > { %v1334_v50 = vpop.permute.xlu1 %1333  ;;  %v1336_v48 = vpop.permute.xlu0 %1335 }
 0x1d0   : > { %1420 = vst.msk [vmem:[#allocation3 + $0xd8] sm:$0xff] %vm768_vm3, %v1334_v50  ;;  %1421 = vst.msk [vmem:[#allocation3 + $0xf0] sm:$0xff] %vm768_vm3, %v1336_v48  ;;  %v6348_v50 = vld [vmem:[#allocation2 + $0xc0] sm:$0xff] }
 0x1d1   : > { %1738 = vrot.lane.b32.xlu1 %v1671_v40, %s5133_s17  ;;  %1740 = vrot.lane.b32.xlu0 %v1672_v18, %s5133_s17  ;;  %v6346_v18 = vld [vmem:[#allocation2 + $0xb0] sm:$0xff] }
 0x1d2   : > { %v1681_v48 = vmax.f32 %v6346_v18, 0.0 }
 0x1d3   : > { %v1338_v27 = vpop.permute.xlu1 %1337  ;;  %v1340_v54 = vpop.permute.xlu0 %1339 }
 0x1d4   : > { %1422 = vst.msk [vmem:[#allocation3 + $0x108] sm:$0xff] %vm768_vm3, %v1338_v27  ;;  %1423 = vst.msk [vmem:[#allocation3 + $0x120] sm:$0xff] %vm768_vm3, %v1340_v54  ;;  %v6356_v54 = vld [vmem:[#allocation2 + $0xc8] sm:$0xff] }
 0x1d5   : > { %1742 = vrot.lane.b32.xlu1 %v1673_v15, %s5133_s17  ;;  %1744 = vrot.lane.b32.xlu0 %v1674_v37, %s5133_s17  ;;  %v1682_v15 = vmax.f32 %v6348_v50, 0.0 }
 0x1d7   : > { %v1342_v19 = vpop.permute.xlu1 %1341  ;;  %v1344_v33 = vpop.permute.xlu0 %1343 }
 0x1d8   : > { %1424 = vst.msk [vmem:[#allocation3 + $0x138] sm:$0xff] %vm768_vm3, %v1342_v19  ;;  %1425 = vst.msk [vmem:[#allocation3 + $0x150] sm:$0xff] %vm768_vm3, %v1344_v33 }
 0x1d9   : > { %1746 = vrot.lane.b32.xlu1 %v1675_v36, %s5133_s17  ;;  %1748 = vrot.lane.b32.xlu0 %v1676_v28, %s5133_s17  ;;  %v6358_v36 = vld [vmem:[#allocation2 + $0xd8] sm:$0xff]  ;;  %v1683_v28 = vmax.f32 %v6356_v54, 0.0 }
 0x1da   : > { %v1684_v19 = vmax.f32 %v6358_v36, 0.0 }
 0x1db   : > { %v1346_v5 = vpop.permute.xlu1 %1345  ;;  %v1348_v1 = vpop.permute.xlu0 %1347 }
 0x1dc   : > { %1426 = vst.msk [vmem:[#allocation3 + $0x168] sm:$0xff] %vm768_vm3, %v1346_v5  ;;  %1427 = vst.msk [vmem:[#allocation3 + $0x180] sm:$0xff] %vm768_vm3, %v1348_v1  ;;  %v6368_v5 = vld [vmem:[#allocation2 + $0xf0] sm:$0xff] }
 0x1dd   : > { %1750 = vrot.lane.b32.xlu1 %v1677_v51, %s5133_s17  ;;  %1752 = vrot.lane.b32.xlu0 %v1678_v2, %s5133_s17  ;;  %v6366_v2 = vld [vmem:[#allocation2 + $0xe0] sm:$0xff] }
 0x1de   : > { %v1685_v1 = vmax.f32 %v6366_v2, 0.0 }
 0x1df   : > { %v1350_v55 = vpop.permute.xlu1 %1349  ;;  %v1352_v40 = vpop.permute.xlu0 %1351 }
 0x1e0   : > { %1428 = vst.msk [vmem:[#allocation3 + $0x198] sm:$0xff] %vm768_vm3, %v1350_v55  ;;  %1429 = vst.msk [vmem:[#allocation3 + $0x1b0] sm:$0xff] %vm768_vm3, %v1352_v40  ;;  %v6376_v40 = vld [vmem:[#allocation2 + $0xf8] sm:$0xff] }
 0x1e1   : > { %1754 = vrot.lane.b32.xlu1 %v1679_v52, %s5133_s17  ;;  %1756 = vrot.lane.b32.xlu0 %v1680_v60, %s5133_s17  ;;  %v1686_v52 = vmax.f32 %v6368_v5, 0.0 }
 0x1e3   : > { %v1354_v37 = vpop.permute.xlu1 %1353  ;;  %v1356_v27 = vpop.permute.xlu0 %1355 }
 0x1e4   : > { %1430 = vst.msk [vmem:[#allocation3 + $0x1c8] sm:$0xff] %vm768_vm3, %v1354_v37  ;;  %1431 = vst.msk [vmem:[#allocation3 + $0x1e0] sm:$0xff] %vm768_vm3, %v1356_v27 }
 0x1e5   : > { %1758 = vrot.lane.b32.xlu1 %v1681_v48, %s5133_s17  ;;  %1760 = vrot.lane.b32.xlu0 %v1682_v15, %s5133_s17  ;;  %v6378_v48 = vld [vmem:[#allocation2 + $0x108] sm:$0xff]  ;;  %v1687_v15 = vmax.f32 %v6376_v40, 0.0 }
 0x1e6   : > { %v1688_v37 = vmax.f32 %v6378_v48, 0.0 }
 0x1e7   : > { %v1358_v33 = vpop.permute.xlu1 %1357  ;;  %v1360_v51 = vpop.permute.xlu0 %1359 }
 0x1e8   : > { %1432 = vst.msk [vmem:[#allocation3 + $0x1f8] sm:$0xff] %vm768_vm3, %v1358_v33  ;;  %1433 = vst.msk [vmem:[#allocation3 + $0x210] sm:$0xff] %vm768_vm3, %v1360_v51  ;;  %v6388_v33 = vld [vmem:[#allocation2 + $0x120] sm:$0xff] }
 0x1e9   : > { %1762 = vrot.lane.b32.xlu1 %v1683_v28, %s5133_s17  ;;  %1764 = vrot.lane.b32.xlu0 %v1684_v19, %s5133_s17  ;;  %v6386_v19 = vld [vmem:[#allocation2 + $0x110] sm:$0xff] }
 0x1ea   : > { %v1689_v51 = vmax.f32 %v6386_v19, 0.0 }
 0x1eb   : > { %v1362_v60 = vpop.permute.xlu1 %1361  ;;  %v1364_v55 = vpop.permute.xlu0 %1363 }
 0x1ec   : > { %1434 = vst.msk [vmem:[#allocation3 + $0x228] sm:$0xff] %vm768_vm3, %v1362_v60  ;;  %1435 = vst.msk [vmem:[#allocation3 + $0x240] sm:$0xff] %vm768_vm3, %v1364_v55  ;;  %v6396_v55 = vld [vmem:[#allocation2 + $0x128] sm:$0xff] }
 0x1ed   : > { %1766 = vrot.lane.b32.xlu1 %v1685_v1, %s5133_s17  ;;  %1768 = vrot.lane.b32.xlu0 %v1686_v52, %s5133_s17  ;;  %v1690_v1 = vmax.f32 %v6388_v33, 0.0 }
 0x1ef   : > { %v1366_v27 = vpop.permute.xlu1 %1365  ;;  %v1368_v28 = vpop.permute.xlu0 %1367 }
 0x1f0   : > { %1436 = vst.msk [vmem:[#allocation3 + $0x258] sm:$0xff] %vm768_vm3, %v1366_v27  ;;  %1437 = vst.msk [vmem:[#allocation3 + $0x270] sm:$0xff] %vm768_vm3, %v1368_v28  ;;  %v6398_v27 = vld [vmem:[#allocation2 + $0x138] sm:$0xff] }
 0x1f1   : > { %1770 = vrot.lane.b32.xlu1 %v1687_v15, %s5133_s17  ;;  %1772 = vrot.lane.b32.xlu0 %v1688_v37, %s5133_s17  ;;  %v1691_v15 = vmax.f32 %v6396_v55, 0.0  ;;  %v1692_v37 = vmax.f32 %v6398_v27, 0.0 }
 0x1f3   : > { %v1370_v52 = vpop.permute.xlu1 %1369  ;;  %v1372_v60 = vpop.permute.xlu0 %1371 }
 0x1f4   : > { %1438 = vst.msk [vmem:[#allocation3 + $0x288] sm:$0xff] %vm768_vm3, %v1370_v52  ;;  %1439 = vst.msk [vmem:[#allocation3 + $0x2a0] sm:$0xff] %vm768_vm3, %v1372_v60  ;;  %v6406_v52 = vld [vmem:[#allocation2 + $0x140] sm:$0xff]  ;;  %v6408_v60 = vld [vmem:[#allocation2 + $0x150] sm:$0xff] }
 0x1f5   : > { %1774 = vrot.lane.b32.xlu1 %v1689_v51, %s5133_s17  ;;  %1776 = vrot.lane.b32.xlu0 %v1690_v1, %s5133_s17  ;;  %v1693_v51 = vmax.f32 %v6406_v52, 0.0  ;;  %v1694_v1 = vmax.f32 %v6408_v60, 0.0 }
 0x1f7   : > { %v1374_v28 = vpop.permute.xlu1 %1373  ;;  %v1376_v56 = vpop.permute.xlu0 %1375 }
 0x1f8   : > { %1440 = vst.msk [vmem:[#allocation3 + $0x2b8] sm:$0xff] %vm768_vm3, %v1374_v28  ;;  %1441 = vst.msk [vmem:[#allocation3 + $0x2d0] sm:$0xff] %vm768_vm3, %v1376_v56  ;;  %v6416_v56 = vld [vmem:[#allocation2 + $0x158] sm:$0xff]  ;;  %v6418_v28 = vld [vmem:[#allocation2 + $0x168] sm:$0xff] }
 0x1f9   : > { %1778 = vrot.lane.b32.xlu1 %v1691_v15, %s5133_s17  ;;  %1780 = vrot.lane.b32.xlu0 %v1692_v37, %s5133_s17  ;;  %8352 = vst [vmem:[#allocation5_spill] sm:$0xff] %v6416_v56  ;;  %8353 = vst [vmem:[#allocation8_spill] sm:$0xff] %v6418_v28  ;;  %v1695_v15 = vmax.f32 %v6416_v56, 0.0  ;;  %v1696_v37 = vmax.f32 %v6418_v28, 0.0 }
 0x1fb   : > { %v1378_v53 = vpop.permute.xlu1 %1377  ;;  %v1508_v49 = vpop.permute.xlu0 %1507 }
 0x1fc   : > { %1442 = vst.msk [vmem:[#allocation3 + $0x2e8] sm:$0xff] %vm768_vm3, %v1378_v53  ;;  %v6426_v53 = vld [vmem:[#allocation2 + $0x170] sm:$0xff] }
 0x1fd   : > { %1604 = vst.msk [vmem:[#allocation3 + $0x8] sm:$0xff] %vm1603_vm5, %v1508_v49  ;;  %1782 = vrot.lane.b32.xlu1 %v1693_v51, %s5133_s17  ;;  %1784 = vrot.lane.b32.xlu0 %v1694_v1, %s5133_s17  ;;  %8354 = vst [vmem:[#allocation6_spill] sm:$0xff] %v6426_v53  ;;  %v6428_v49 = vld [vmem:[#allocation2 + $0x180] sm:$0xff]  ;;  %v1697_v51 = vmax.f32 %v6426_v53, 0.0  ;;  %v1860_v53 = vmul.f32 %v6277_v25, %v8319_v23 }
 0x1fe   : > { %v1698_v1 = vmax.f32 %v6428_v49, 0.0 }
 0x1ff   : > { %v1510_v31 = vpop.permute.xlu1 %1509  ;;  %v1512_v42 = vpop.permute.xlu0 %1511 }
 0x200   : > { %1605 = vst.msk [vmem:[#allocation3 + $0x20] sm:$0xff] %vm1603_vm5, %v1510_v31  ;;  %1606 = vst.msk [vmem:[#allocation3 + $0x38] sm:$0xff] %vm1603_vm5, %v1512_v42  ;;  %v6436_v31 = vld [vmem:[#allocation2 + $0x188] sm:$0xff] }
 0x201   : > { %1786 = vrot.lane.b32.xlu1 %v1695_v15, %s5133_s17  ;;  %1788 = vrot.lane.b32.xlu0 %v1696_v37, %s5133_s17  ;;  %v1699_v42 = vmax.f32 %v6436_v31, 0.0 }
 0x203   : > { %v1514_v56 = vpop.permute.xlu1 %1513  ;;  %v1516_v28 = vpop.permute.xlu0 %1515 }
 0x204   : > { %1607 = vst.msk [vmem:[#allocation3 + $0x50] sm:$0xff] %vm1603_vm5, %v1514_v56  ;;  %1608 = vst.msk [vmem:[#allocation3 + $0x68] sm:$0xff] %vm1603_vm5, %v1516_v28 }
 0x205   : > { %1790 = vrot.lane.b32.xlu1 %v1697_v51, %s5133_s17  ;;  %1792 = vrot.lane.b32.xlu0 %v1698_v1, %s5133_s17  ;;  %v1861_v51 = vmul.f32 %v6286_v14, %v8321_v24  ;;  %v1862_v1 = vmul.f32 %v6288_v12, %v8323_v63 }
 0x207   : > { %v1518_v15 = vpop.permute.xlu1 %1517  ;;  %v1520_v37 = vpop.permute.xlu0 %1519 }
 0x208   : > { %1609 = vst.msk [vmem:[#allocation3 + $0x80] sm:$0xff] %vm1603_vm5, %v1518_v15  ;;  %1610 = vst.msk [vmem:[#allocation3 + $0x98] sm:$0xff] %vm1603_vm5, %v1520_v37  ;;  %v1864_v15 = vmul.f32 %v6298_v7, %v8325_v8  ;;  %v1865_v37 = vmul.f32 %v6306_v58, %v8329_v35 }
 0x209   : > { %1794 = vrot.lane.b32.xlu1 %v1699_v42, %s5133_s17  ;;  %1924 = vrot.lane.b32.xlu0 %v1860_v53, %s5135_s19  ;;  %v1863_v53 = vmul.f32 %v6296_v21, %v8327_v26 }
 0x20b   : > { %v1522_v56 = vpop.permute.xlu1 %1521  ;;  %v1524_v28 = vpop.permute.xlu0 %1523 }
 0x20c   : > { %1611 = vst.msk [vmem:[#allocation3 + $0xb0] sm:$0xff] %vm1603_vm5, %v1522_v56  ;;  %1612 = vst.msk [vmem:[#allocation3 + $0xc8] sm:$0xff] %vm1603_vm5, %v1524_v28  ;;  %v1866_v56 = vmul.f32 %v6308_v4, %v8330_v61  ;;  %v1867_v28 = vmul.f32 %v6316_v29, %v5446_v32 }
 0x20d   : > { %1926 = vrot.lane.b32.xlu1 %v1861_v51, %s5135_s19  ;;  %1928 = vrot.lane.b32.xlu0 %v1862_v1, %s5135_s19  ;;  %v1868_v51 = vmul.f32 %v6318_v22, %v5462_v39  ;;  %v1869_v1 = vmul.f32 %v6326_v57, %v5460_v38 }
 0x20f   : > { %v1526_v25 = vpop.permute.xlu1 %1525  ;;  %v1528_v42 = vpop.permute.xlu0 %1527 }
 0x210   : > { %1613 = vst.msk [vmem:[#allocation3 + $0xe0] sm:$0xff] %vm1603_vm5, %v1526_v25  ;;  %1614 = vst.msk [vmem:[#allocation3 + $0xf8] sm:$0xff] %vm1603_vm5, %v1528_v42  ;;  %v1870_v25 = vmul.f32 %v6328_v62, %v8332_v59  ;;  %v1871_v42 = vmul.f32 %v6336_v44, %v8334_v47 }
 0x211   : > { %1930 = vrot.lane.b32.xlu1 %v1863_v53, %s5135_s19  ;;  %1932 = vrot.lane.b32.xlu0 %v1864_v15, %s5135_s19  ;;  %v1872_v53 = vmul.f32 %v6338_v45, %v8335_v16  ;;  %v1873_v15 = vmul.f32 %v6346_v18, %v8336_v3 }
 0x213   : > { %v1530_v14 = vpop.permute.xlu1 %1529  ;;  %v1532_v12 = vpop.permute.xlu0 %1531 }
 0x214   : > { %1615 = vst.msk [vmem:[#allocation3 + $0x110] sm:$0xff] %vm1603_vm5, %v1530_v14  ;;  %1616 = vst.msk [vmem:[#allocation3 + $0x128] sm:$0xff] %vm1603_vm5, %v1532_v12  ;;  %v1874_v14 = vmul.f32 %v6348_v50, %v8337_v43  ;;  %v1875_v12 = vmul.f32 %v6356_v54, %v8338_v0 }
 0x215   : > { %1934 = vrot.lane.b32.xlu1 %v1865_v37, %s5135_s19  ;;  %1936 = vrot.lane.b32.xlu0 %v1866_v56, %s5135_s19  ;;  %v1876_v37 = vmul.f32 %v6358_v36, %v8339_v13  ;;  %v1877_v56 = vmul.f32 %v6366_v2, %v8340_v30 }
 0x217   : > { %v1534_v21 = vpop.permute.xlu1 %1533  ;;  %v1536_v7 = vpop.permute.xlu0 %1535 }
 0x218   : > { %1617 = vst.msk [vmem:[#allocation3 + $0x140] sm:$0xff] %vm1603_vm5, %v1534_v21  ;;  %1618 = vst.msk [vmem:[#allocation3 + $0x158] sm:$0xff] %vm1603_vm5, %v1536_v7  ;;  %v1878_v21 = vmul.f32 %v6368_v5, %v5532_v10  ;;  %v1879_v7 = vmul.f32 %v6376_v40, %v5530_v9 }
 0x219   : > { %1938 = vrot.lane.b32.xlu1 %v1867_v28, %s5135_s19  ;;  %1940 = vrot.lane.b32.xlu0 %v1868_v51, %s5135_s19  ;;  %v1880_v28 = vmul.f32 %v6378_v48, %v5548_v20  ;;  %v1881_v51 = vmul.f32 %v6386_v19, %v5546_v17 }
 0x21b   : > { %v1538_v58 = vpop.permute.xlu1 %1537  ;;  %v1540_v4 = vpop.permute.xlu0 %1539 }
 0x21c   : > { %1619 = vst.msk [vmem:[#allocation3 + $0x170] sm:$0xff] %vm1603_vm5, %v1538_v58  ;;  %1620 = vst.msk [vmem:[#allocation3 + $0x188] sm:$0xff] %vm1603_vm5, %v1540_v4  ;;  %v1882_v58 = vmul.f32 %v6388_v33, %v5564_v46  ;;  %v1883_v4 = vmul.f32 %v6396_v55, %v5562_v41 }
 0x21d   : > { %1942 = vrot.lane.b32.xlu1 %v1869_v1, %s5135_s19  ;;  %1944 = vrot.lane.b32.xlu0 %v1870_v25, %s5135_s19  ;;  %v1884_v1 = vmul.f32 %v6398_v27, %v5582_v11  ;;  %v1885_v25 = vmul.f32 %v6406_v52, %v5580_v6 }
 0x21f   : > { %v1542_v29 = vpop.permute.xlu1 %1541  ;;  %v1544_v22 = vpop.permute.xlu0 %1543 }
 0x220   : > { %1621 = vst.msk [vmem:[#allocation3 + $0x1a0] sm:$0xff] %vm1603_vm5, %v1542_v29  ;;  %1622 = vst.msk [vmem:[#allocation3 + $0x1b8] sm:$0xff] %vm1603_vm5, %v1544_v22  ;;  %v1886_v29 = vmul.f32 %v6408_v60, %v5598_v34  ;;  %v8355_v22 = vld [vmem:[#allocation29_spill] sm:$0xff] }
 0x221   : > { %1946 = vrot.lane.b32.xlu1 %v1871_v42, %s5135_s19  ;;  %1948 = vrot.lane.b32.xlu0 %v1872_v53, %s5135_s19  ;;  %v8356_v42 = vld [vmem:[#allocation5_spill] sm:$0xff] }
 0x222   : > { %v1887_v53 = vmul.f32 %v8356_v42, %v8355_v22  ;;  %v6610_v42 = vld [vmem:[#allocation2 + $0x69] sm:$0xff] }
 0x223   : > { %v1546_v57 = vpop.permute.xlu1 %1545  ;;  %v1548_v62 = vpop.permute.xlu0 %1547 }
 0x224   : > { %1623 = vst.msk [vmem:[#allocation3 + $0x1d0] sm:$0xff] %vm1603_vm5, %v1546_v57  ;;  %1624 = vst.msk [vmem:[#allocation3 + $0x1e8] sm:$0xff] %vm1603_vm5, %v1548_v62  ;;  %v8357_v57 = vld [vmem:[#allocation31_spill] sm:$0xff]  ;;  %v8358_v62 = vld [vmem:[#allocation8_spill] sm:$0xff] }
 0x225   : > { %1950 = vrot.lane.b32.xlu1 %v1873_v15, %s5135_s19  ;;  %1952 = vrot.lane.b32.xlu0 %v1874_v14, %s5135_s19  ;;  %v1888_v15 = vmul.f32 %v8358_v62, %v8357_v57  ;;  %v8359_v14 = vld [vmem:[#allocation30_spill] sm:$0xff]  ;;  %v2092_v62 = vmax.f32 %v6610_v42, 0.0 }
 0x227   : > { %v1550_v44 = vpop.permute.xlu1 %1549  ;;  %v1552_v45 = vpop.permute.xlu0 %1551 }
 0x228   : > { %1625 = vst.msk [vmem:[#allocation3 + $0x200] sm:$0xff] %vm1603_vm5, %v1550_v44  ;;  %1626 = vst.msk [vmem:[#allocation3 + $0x218] sm:$0xff] %vm1603_vm5, %v1552_v45  ;;  %v8360_v44 = vld [vmem:[#allocation6_spill] sm:$0xff] }
 0x229   : > { %1954 = vrot.lane.b32.xlu1 %v1875_v12, %s5135_s19  ;;  %1956 = vrot.lane.b32.xlu0 %v1876_v37, %s5135_s19  ;;  %v1889_v45 = vmul.f32 %v8360_v44, %v8359_v14  ;;  %v8361_v12 = vld [vmem:[#allocation33_spill] sm:$0xff]  ;;  %v6622_v44 = vld [vmem:[#allocation2 + $0x81] sm:$0xff] }
 0x22a   : > { %v1890_v37 = vmul.f32 %v6428_v49, %v8361_v12  ;;  %v6574_v49 = vld [vmem:[#allocation2 + $0x21] sm:$0xff] }
 0x22b   : > { %v1554_v18 = vpop.permute.xlu1 %1553  ;;  %v1556_v50 = vpop.permute.xlu0 %1555 }
 0x22c   : > { %1627 = vst.msk [vmem:[#allocation3 + $0x230] sm:$0xff] %vm1603_vm5, %v1554_v18  ;;  %1628 = vst.msk [vmem:[#allocation3 + $0x248] sm:$0xff] %vm1603_vm5, %v1556_v50  ;;  %v6565_v18 = vld [vmem:[#allocation2 + $0x19] sm:$0xff] }
 0x22d   : > { %1958 = vrot.lane.b32.xlu1 %v1877_v56, %s5135_s19  ;;  %1960 = vrot.lane.b32.xlu0 %v1878_v21, %s5135_s19  ;;  %v2085_v50 = vmax.f32 %v6565_v18, 0.0 }
 0x22f   : > { %v1558_v54 = vpop.permute.xlu1 %1557  ;;  %v1560_v36 = vpop.permute.xlu0 %1559 }
 0x230   : > { %1629 = vst.msk [vmem:[#allocation3 + $0x260] sm:$0xff] %vm1603_vm5, %v1558_v54  ;;  %1630 = vst.msk [vmem:[#allocation3 + $0x278] sm:$0xff] %vm1603_vm5, %v1560_v36  ;;  %v8362_v54 = vld [vmem:[#allocation32_spill] sm:$0xff] }
 0x231   : > { %1962 = vrot.lane.b32.xlu1 %v1879_v7, %s5135_s19  ;;  %1964 = vrot.lane.b32.xlu0 %v1880_v28, %s5135_s19  ;;  %v1891_v36 = vmul.f32 %v6436_v31, %v8362_v54  ;;  %v6576_v7 = vld [vmem:[#allocation2 + $0x31] sm:$0xff]  ;;  %v2086_v28 = vmax.f32 %v6574_v49, 0.0  ;;  %v6584_v31 = vld [vmem:[#allocation2 + $0x39] sm:$0xff] }
 0x233   : > { %v1562_v2 = vpop.permute.xlu1 %1561  ;;  %v1564_v5 = vpop.permute.xlu0 %1563 }
 0x234   : > { %1631 = vst.msk [vmem:[#allocation3 + $0x290] sm:$0xff] %vm1603_vm5, %v1562_v2  ;;  %1632 = vst.msk [vmem:[#allocation3 + $0x2a8] sm:$0xff] %vm1603_vm5, %v1564_v5  ;;  %v8259_v2 = vmax.f32 %v6576_v7, 0.0 }
 0x235   : > { %1966 = vrot.lane.b32.xlu1 %v1881_v51, %s5135_s19  ;;  %1968 = vrot.lane.b32.xlu0 %v1882_v58, %s5135_s19  ;;  %v6586_v58 = vld [vmem:[#allocation2 + $0x49] sm:$0xff] }
 0x237   : > { %v1566_v40 = vpop.permute.xlu1 %1565  ;;  %v1568_v48 = vpop.permute.xlu0 %1567 }
 0x238   : > { %1633 = vst.msk [vmem:[#allocation3 + $0x2c0] sm:$0xff] %vm1603_vm5, %v1566_v40  ;;  %1634 = vst.msk [vmem:[#allocation3 + $0x2d8] sm:$0xff] %vm1603_vm5, %v1568_v48  ;;  %v8258_v40 = vmax.f32 %v6584_v31, 0.0  ;;  %v8257_v48 = vmax.f32 %v6586_v58, 0.0 }
 0x239   : > { %1970 = vrot.lane.b32.xlu1 %v1883_v4, %s5135_s19  ;;  %1972 = vrot.lane.b32.xlu0 %v1884_v1, %s5135_s19 }
 0x23b   : > { %v1570_v19 = vpop.permute.xlu1 %1569  ;;  %v1733_v33 = vpop.permute.xlu0 %1732 }
 0x23c   : > { %1635 = vst.msk [vmem:[#allocation3 + $0x2f0] sm:$0xff] %vm1603_vm5, %v1570_v19  ;;  %v6596_v19 = vld [vmem:[#allocation2 + $0x51] sm:$0xff] }
 0x23d   : > { %1828 = vst.msk [vmem:[#allocation3] sm:$0xff] %vm1186_vm4, %v1733_v33  ;;  %1974 = vrot.lane.b32.xlu1 %v1885_v25, %s5135_s19  ;;  %1976 = vrot.lane.b32.xlu0 %v1886_v29, %s5135_s19  ;;  %v6598_v33 = vld [vmem:[#allocation2 + $0x61] sm:$0xff]  ;;  %v8256_v25 = vmax.f32 %v6596_v19, 0.0 }
 0x23e   : > { %v2091_v29 = vmax.f32 %v6598_v33, 0.0 }
 0x23f   : > { %v1735_v55 = vpop.permute.xlu1 %1734  ;;  %v1737_v27 = vpop.permute.xlu0 %1736 }
 0x240   : > { %1829 = vst.msk [vmem:[#allocation3 + $0x18] sm:$0xff] %vm1186_vm4, %v1735_v55  ;;  %1830 = vst.msk [vmem:[#allocation3 + $0x30] sm:$0xff] %vm1186_vm4, %v1737_v27 }
 0x241   : > { %1978 = vrot.lane.b32.xlu1 %v1887_v53, %s5135_s19  ;;  %1980 = vrot.lane.b32.xlu0 %v1888_v15, %s5135_s19  ;;  %v6612_v53 = vld [vmem:[#allocation2 + $0x79] sm:$0xff] }
 0x242   : > { %v2093_v15 = vmax.f32 %v6612_v53, 0.0 }
 0x243   : > { %v1739_v52 = vpop.permute.xlu1 %1738  ;;  %v1741_v60 = vpop.permute.xlu0 %1740 }
 0x244   : > { %1831 = vst.msk [vmem:[#allocation3 + $0x48] sm:$0xff] %vm1186_vm4, %v1739_v52  ;;  %1832 = vst.msk [vmem:[#allocation3 + $0x60] sm:$0xff] %vm1186_vm4, %v1741_v60 }
 0x245   : > { %1982 = vrot.lane.b32.xlu1 %v1889_v45, %s5135_s19  ;;  %1984 = vrot.lane.b32.xlu0 %v1890_v37, %s5135_s19  ;;  %v6624_v45 = vld [vmem:[#allocation2 + $0x91] sm:$0xff]  ;;  %v2094_v37 = vmax.f32 %v6622_v44, 0.0 }
 0x247   : > { %v1743_v56 = vpop.permute.xlu1 %1742  ;;  %v1745_v21 = vpop.permute.xlu0 %1744 }
 0x248   : > { %1833 = vst.msk [vmem:[#allocation3 + $0x78] sm:$0xff] %vm1186_vm4, %v1743_v56  ;;  %1834 = vst.msk [vmem:[#allocation3 + $0x90] sm:$0xff] %vm1186_vm4, %v1745_v21 }
 0x249   : > { %1986 = vrot.lane.b32.xlu1 %v1891_v36, %s5135_s19  ;;  %2149 = vrot.lane.b32.xlu0 %v2085_v50, %s5134_s18  ;;  %v2095_v50 = vmax.f32 %v6624_v45, 0.0  ;;  %v6632_v36 = vld [vmem:[#allocation2 + $0x99] sm:$0xff] }
 0x24b   : > { %v1747_v5 = vpop.permute.xlu1 %1746  ;;  %v1749_v51 = vpop.permute.xlu0 %1748 }
 0x24c   : > { %1835 = vst.msk [vmem:[#allocation3 + $0xa8] sm:$0xff] %vm1186_vm4, %v1747_v5  ;;  %1836 = vst.msk [vmem:[#allocation3 + $0xc0] sm:$0xff] %vm1186_vm4, %v1749_v51  ;;  %v2096_v5 = vmax.f32 %v6632_v36, 0.0 }
 0x24d   : > { %2151 = vrot.lane.b32.xlu1 %v2086_v28, %s5134_s18  ;;  %2153 = vrot.lane.b32.xlu0 %v8259_v2, %s5134_s18  ;;  %v6634_v28 = vld [vmem:[#allocation2 + $0xa9] sm:$0xff] }
 0x24e   : > { %v2097_v51 = vmax.f32 %v6634_v28, 0.0 }
 0x24f   : > { %v1751_v4 = vpop.permute.xlu1 %1750  ;;  %v1753_v1 = vpop.permute.xlu0 %1752 }
 0x250   : > { %1837 = vst.msk [vmem:[#allocation3 + $0xd8] sm:$0xff] %vm1186_vm4, %v1751_v4  ;;  %1838 = vst.msk [vmem:[#allocation3 + $0xf0] sm:$0xff] %vm1186_vm4, %v1753_v1 }
 0x251   : > { %2155 = vrot.lane.b32.xlu1 %v8258_v40, %s5134_s18  ;;  %2157 = vrot.lane.b32.xlu0 %v8257_v48, %s5134_s18 }
 0x253   : > { %v1755_v55 = vpop.permute.xlu1 %1754  ;;  %v1757_v27 = vpop.permute.xlu0 %1756 }
 0x254   : > { %1839 = vst.msk [vmem:[#allocation3 + $0x108] sm:$0xff] %vm1186_vm4, %v1755_v55  ;;  %1840 = vst.msk [vmem:[#allocation3 + $0x120] sm:$0xff] %vm1186_vm4, %v1757_v27  ;;  %v6644_v55 = vld [vmem:[#allocation2 + $0xc1] sm:$0xff] }
 0x255   : > { %2159 = vrot.lane.b32.xlu1 %v8256_v25, %s5134_s18  ;;  %2161 = vrot.lane.b32.xlu0 %v2091_v29, %s5134_s18  ;;  %v6642_v29 = vld [vmem:[#allocation2 + $0xb1] sm:$0xff] }
 0x256   : > { %v2098_v27 = vmax.f32 %v6642_v29, 0.0 }
 0x257   : > { %v1759_v52 = vpop.permute.xlu1 %1758  ;;  %v1761_v60 = vpop.permute.xlu0 %1760 }
 0x258   : > { %1841 = vst.msk [vmem:[#allocation3 + $0x138] sm:$0xff] %vm1186_vm4, %v1759_v52  ;;  %1842 = vst.msk [vmem:[#allocation3 + $0x150] sm:$0xff] %vm1186_vm4, %v1761_v60  ;;  %v6652_v60 = vld [vmem:[#allocation2 + $0xc9] sm:$0xff] }
 0x259   : > { %2163 = vrot.lane.b32.xlu1 %v2092_v62, %s5134_s18  ;;  %2165 = vrot.lane.b32.xlu0 %v2093_v15, %s5134_s18  ;;  %v2099_v62 = vmax.f32 %v6644_v55, 0.0 }
 0x25b   : > { %v1763_v56 = vpop.permute.xlu1 %1762  ;;  %v1765_v21 = vpop.permute.xlu0 %1764 }
 0x25c   : > { %1843 = vst.msk [vmem:[#allocation3 + $0x168] sm:$0xff] %vm1186_vm4, %v1763_v56  ;;  %1844 = vst.msk [vmem:[#allocation3 + $0x180] sm:$0xff] %vm1186_vm4, %v1765_v21 }
 0x25d   : > { %2167 = vrot.lane.b32.xlu1 %v2094_v37, %s5134_s18  ;;  %2169 = vrot.lane.b32.xlu0 %v2095_v50, %s5134_s18  ;;  %v6654_v37 = vld [vmem:[#allocation2 + $0xd9] sm:$0xff]  ;;  %v2100_v50 = vmax.f32 %v6652_v60, 0.0 }
 0x25e   : > { %v2101_v56 = vmax.f32 %v6654_v37, 0.0 }
 0x25f   : > { %v1767_v4 = vpop.permute.xlu1 %1766  ;;  %v1769_v1 = vpop.permute.xlu0 %1768 }
 0x260   : > { %1845 = vst.msk [vmem:[#allocation3 + $0x198] sm:$0xff] %vm1186_vm4, %v1767_v4  ;;  %1846 = vst.msk [vmem:[#allocation3 + $0x1b0] sm:$0xff] %vm1186_vm4, %v1769_v1  ;;  %v6664_v4 = vld [vmem:[#allocation2 + $0xf1] sm:$0xff] }
 0x261   : > { %2171 = vrot.lane.b32.xlu1 %v2096_v5, %s5134_s18  ;;  %2173 = vrot.lane.b32.xlu0 %v2097_v51, %s5134_s18  ;;  %v6662_v51 = vld [vmem:[#allocation2 + $0xe1] sm:$0xff] }
 0x262   : > { %v2102_v1 = vmax.f32 %v6662_v51, 0.0 }
 0x263   : > { %v1771_v15 = vpop.permute.xlu1 %1770  ;;  %v1773_v52 = vpop.permute.xlu0 %1772 }
 0x264   : > { %1847 = vst.msk [vmem:[#allocation3 + $0x1c8] sm:$0xff] %vm1186_vm4, %v1771_v15  ;;  %1848 = vst.msk [vmem:[#allocation3 + $0x1e0] sm:$0xff] %vm1186_vm4, %v1773_v52  ;;  %v6672_v52 = vld [vmem:[#allocation2 + $0xf9] sm:$0xff] }
 0x265   : > { %2175 = vrot.lane.b32.xlu1 %v2098_v27, %s5134_s18  ;;  %2177 = vrot.lane.b32.xlu0 %v2099_v62, %s5134_s18  ;;  %v2103_v27 = vmax.f32 %v6664_v4, 0.0 }
 0x267   : > { %v1775_v21 = vpop.permute.xlu1 %1774  ;;  %v1777_v5 = vpop.permute.xlu0 %1776 }
 0x268   : > { %1849 = vst.msk [vmem:[#allocation3 + $0x1f8] sm:$0xff] %vm1186_vm4, %v1775_v21  ;;  %1850 = vst.msk [vmem:[#allocation3 + $0x210] sm:$0xff] %vm1186_vm4, %v1777_v5  ;;  %v6674_v21 = vld [vmem:[#allocation2 + $0x109] sm:$0xff] }
 0x269   : > { %2179 = vrot.lane.b32.xlu1 %v2100_v50, %s5134_s18  ;;  %2181 = vrot.lane.b32.xlu0 %v2101_v56, %s5134_s18  ;;  %v2104_v50 = vmax.f32 %v6672_v52, 0.0  ;;  %v2105_v56 = vmax.f32 %v6674_v21, 0.0 }
 0x26b   : > { %v1779_v62 = vpop.permute.xlu1 %1778  ;;  %v1781_v15 = vpop.permute.xlu0 %1780 }
 0x26c   : > { %1851 = vst.msk [vmem:[#allocation3 + $0x228] sm:$0xff] %vm1186_vm4, %v1779_v62  ;;  %1852 = vst.msk [vmem:[#allocation3 + $0x240] sm:$0xff] %vm1186_vm4, %v1781_v15  ;;  %v6682_v62 = vld [vmem:[#allocation2 + $0x111] sm:$0xff]  ;;  %v6684_v15 = vld [vmem:[#allocation2 + $0x121] sm:$0xff] }
 0x26d   : > { %2183 = vrot.lane.b32.xlu1 %v2102_v1, %s5134_s18  ;;  %2185 = vrot.lane.b32.xlu0 %v2103_v27, %s5134_s18  ;;  %v2106_v1 = vmax.f32 %v6682_v62, 0.0  ;;  %v2107_v27 = vmax.f32 %v6684_v15, 0.0 }
 0x26f   : > { %v1783_v5 = vpop.permute.xlu1 %1782  ;;  %v1785_v25 = vpop.permute.xlu0 %1784 }
 0x270   : > { %1853 = vst.msk [vmem:[#allocation3 + $0x258] sm:$0xff] %vm1186_vm4, %v1783_v5  ;;  %1854 = vst.msk [vmem:[#allocation3 + $0x270] sm:$0xff] %vm1186_vm4, %v1785_v25  ;;  %v6692_v5 = vld [vmem:[#allocation2 + $0x129] sm:$0xff]  ;;  %v6694_v25 = vld [vmem:[#allocation2 + $0x139] sm:$0xff] }
 0x271   : > { %2187 = vrot.lane.b32.xlu1 %v2104_v50, %s5134_s18  ;;  %2189 = vrot.lane.b32.xlu0 %v2105_v56, %s5134_s18  ;;  %v2108_v50 = vmax.f32 %v6692_v5, 0.0  ;;  %v2109_v56 = vmax.f32 %v6694_v25, 0.0 }
 0x273   : > { %v1787_v48 = vpop.permute.xlu1 %1786  ;;  %v1789_v40 = vpop.permute.xlu0 %1788 }
 0x274   : > { %1855 = vst.msk [vmem:[#allocation3 + $0x288] sm:$0xff] %vm1186_vm4, %v1787_v48  ;;  %1856 = vst.msk [vmem:[#allocation3 + $0x2a0] sm:$0xff] %vm1186_vm4, %v1789_v40  ;;  %v6702_v48 = vld [vmem:[#allocation2 + $0x141] sm:$0xff]  ;;  %v6704_v40 = vld [vmem:[#allocation2 + $0x151] sm:$0xff] }
 0x275   : > { %2191 = vrot.lane.b32.xlu1 %v2106_v1, %s5134_s18  ;;  %2193 = vrot.lane.b32.xlu0 %v2107_v27, %s5134_s18  ;;  %8363 = vst [vmem:[#allocation13_spill] sm:$0xff] %v6704_v40  ;;  %v2110_v1 = vmax.f32 %v6702_v48, 0.0  ;;  %v8260_v27 = vmax.f32 %v6704_v40, 0.0 }
 0x277   : > { %v1791_v2 = vpop.permute.xlu1 %1790  ;;  %v1793_v54 = vpop.permute.xlu0 %1792 }
 0x278   : > { %1857 = vst.msk [vmem:[#allocation3 + $0x2b8] sm:$0xff] %vm1186_vm4, %v1791_v2  ;;  %1858 = vst.msk [vmem:[#allocation3 + $0x2d0] sm:$0xff] %vm1186_vm4, %v1793_v54  ;;  %v6712_v54 = vld [vmem:[#allocation2 + $0x159] sm:$0xff]  ;;  %v6714_v2 = vld [vmem:[#allocation2 + $0x169] sm:$0xff] }
 0x279   : > { %2195 = vrot.lane.b32.xlu1 %v2108_v50, %s5134_s18  ;;  %2197 = vrot.lane.b32.xlu0 %v2109_v56, %s5134_s18  ;;  %8364 = vst [vmem:[#allocation34_spill] sm:$0xff] %v6712_v54  ;;  %8365 = vst [vmem:[#allocation10_spill] sm:$0xff] %v6714_v2  ;;  %v8264_v50 = vmax.f32 %v6712_v54, 0.0  ;;  %v8263_v56 = vmax.f32 %v6714_v2, 0.0  ;;  %v2277_v54 = vmul.f32 %v6565_v18, %v8319_v23 }
 0x27b   : > { %v1795_v12 = vpop.permute.xlu1 %1794  ;;  %v1925_v14 = vpop.permute.xlu0 %1924 }
 0x27c   : > { %1859 = vst.msk [vmem:[#allocation3 + $0x2e8] sm:$0xff] %vm1186_vm4, %v1795_v12  ;;  %v6726_v12 = vld [vmem:[#allocation2 + $0x181] sm:$0xff] }
 0x27d   : > { %2021 = vst.msk [vmem:[#allocation3 + $0x8] sm:$0xff] %vm2020_vm6, %v1925_v14  ;;  %2199 = vrot.lane.b32.xlu1 %v2110_v1, %s5134_s18  ;;  %2201 = vrot.lane.b32.xlu0 %v8260_v27, %s5134_s18  ;;  %v6724_v14 = vld [vmem:[#allocation2 + $0x171] sm:$0xff]  ;;  %v8269_v27 = vmax.f32 %v6726_v12, 0.0 }
 0x27e   : > { %v8270_v1 = vmax.f32 %v6724_v14, 0.0 }
 0x27f   : > { %v1927_v57 = vpop.permute.xlu1 %1926  ;;  %v1929_v22 = vpop.permute.xlu0 %1928 }
 0x280   : > { %2022 = vst.msk [vmem:[#allocation3 + $0x20] sm:$0xff] %vm2020_vm6, %v1927_v57  ;;  %2023 = vst.msk [vmem:[#allocation3 + $0x38] sm:$0xff] %vm2020_vm6, %v1929_v22  ;;  %v6738_v22 = vld [vmem:[#allocation2 + $0x189] sm:$0xff] }
 0x281   : > { %2203 = vrot.lane.b32.xlu1 %v8264_v50, %s5134_s18  ;;  %2205 = vrot.lane.b32.xlu0 %v8263_v56, %s5134_s18  ;;  %v8271_v56 = vmax.f32 %v6738_v22, 0.0 }
 0x283   : > { %v1931_v40 = vpop.permute.xlu1 %1930  ;;  %v1933_v57 = vpop.permute.xlu0 %1932 }
 0x284   : > { %2024 = vst.msk [vmem:[#allocation3 + $0x50] sm:$0xff] %vm2020_vm6, %v1931_v40  ;;  %2025 = vst.msk [vmem:[#allocation3 + $0x68] sm:$0xff] %vm2020_vm6, %v1933_v57 }
 0x285   : > { %2207 = vrot.lane.b32.xlu1 %v8270_v1, %s5134_s18  ;;  %2209 = vrot.lane.b32.xlu0 %v8269_v27, %s5134_s18  ;;  %v2278_v27 = vmul.f32 %v6574_v49, %v8321_v24  ;;  %v2279_v1 = vmul.f32 %v6576_v7, %v8323_v63 }
 0x287   : > { %v1935_v50 = vpop.permute.xlu1 %1934  ;;  %v1937_v2 = vpop.permute.xlu0 %1936 }
 0x288   : > { %2026 = vst.msk [vmem:[#allocation3 + $0x80] sm:$0xff] %vm2020_vm6, %v1935_v50  ;;  %2027 = vst.msk [vmem:[#allocation3 + $0x98] sm:$0xff] %vm2020_vm6, %v1937_v2 }
 0x289   : > { %2211 = vrot.lane.b32.xlu1 %v8271_v56, %s5134_s18  ;;  %2341 = vrot.lane.b32.xlu0 %v2277_v54, %s5136_s20  ;;  %v2280_v54 = vmul.f32 %v6584_v31, %v8327_v26  ;;  %v2281_v56 = vmul.f32 %v6586_v58, %v8325_v8 }
 0x28b   : > { %v1939_v40 = vpop.permute.xlu1 %1938  ;;  %v1941_v57 = vpop.permute.xlu0 %1940 }
 0x28c   : > { %2028 = vst.msk [vmem:[#allocation3 + $0xb0] sm:$0xff] %vm2020_vm6, %v1939_v40  ;;  %2029 = vst.msk [vmem:[#allocation3 + $0xc8] sm:$0xff] %vm2020_vm6, %v1941_v57  ;;  %v2283_v57 = vmul.f32 %v6598_v33, %v8330_v61 }
 0x28d   : > { %2343 = vrot.lane.b32.xlu1 %v2278_v27, %s5136_s20  ;;  %2345 = vrot.lane.b32.xlu0 %v2279_v1, %s5136_s20  ;;  %v2282_v1 = vmul.f32 %v6596_v19, %v8329_v35 }
 0x28f   : > { %v1943_v2 = vpop.permute.xlu1 %1942  ;;  %v1945_v50 = vpop.permute.xlu0 %1944 }
 0x290   : > { %2030 = vst.msk [vmem:[#allocation3 + $0xe0] sm:$0xff] %vm2020_vm6, %v1943_v2  ;;  %2031 = vst.msk [vmem:[#allocation3 + $0xf8] sm:$0xff] %vm2020_vm6, %v1945_v50 }
 0x291   : > { %2347 = vrot.lane.b32.xlu1 %v2280_v54, %s5136_s20  ;;  %2349 = vrot.lane.b32.xlu0 %v2281_v56, %s5136_s20  ;;  %v2284_v56 = vmul.f32 %v6610_v42, %v5446_v32  ;;  %v2285_v54 = vmul.f32 %v6612_v53, %v5462_v39 }
 0x293   : > { %v1947_v40 = vpop.permute.xlu1 %1946  ;;  %v1949_v27 = vpop.permute.xlu0 %1948 }
 0x294   : > { %2032 = vst.msk [vmem:[#allocation3 + $0x110] sm:$0xff] %vm2020_vm6, %v1947_v40  ;;  %2033 = vst.msk [vmem:[#allocation3 + $0x128] sm:$0xff] %vm2020_vm6, %v1949_v27 }
 0x295   : > { %2351 = vrot.lane.b32.xlu1 %v2282_v1, %s5136_s20  ;;  %2353 = vrot.lane.b32.xlu0 %v2283_v57, %s5136_s20  ;;  %v2286_v1 = vmul.f32 %v6622_v44, %v5460_v38  ;;  %v2287_v57 = vmul.f32 %v6624_v45, %v8332_v59 }
 0x297   : > { %v1951_v2 = vpop.permute.xlu1 %1950  ;;  %v1953_v50 = vpop.permute.xlu0 %1952 }
 0x298   : > { %2034 = vst.msk [vmem:[#allocation3 + $0x140] sm:$0xff] %vm2020_vm6, %v1951_v2  ;;  %2035 = vst.msk [vmem:[#allocation3 + $0x158] sm:$0xff] %vm2020_vm6, %v1953_v50 }
 0x299   : > { %2355 = vrot.lane.b32.xlu1 %v2284_v56, %s5136_s20  ;;  %2357 = vrot.lane.b32.xlu0 %v2285_v54, %s5136_s20  ;;  %v2288_v56 = vmul.f32 %v6632_v36, %v8334_v47  ;;  %v2289_v54 = vmul.f32 %v6634_v28, %v8335_v16 }
 0x29b   : > { %v1955_v40 = vpop.permute.xlu1 %1954  ;;  %v1957_v27 = vpop.permute.xlu0 %1956 }
 0x29c   : > { %2036 = vst.msk [vmem:[#allocation3 + $0x170] sm:$0xff] %vm2020_vm6, %v1955_v40  ;;  %2037 = vst.msk [vmem:[#allocation3 + $0x188] sm:$0xff] %vm2020_vm6, %v1957_v27 }
 0x29d   : > { %2359 = vrot.lane.b32.xlu1 %v2286_v1, %s5136_s20  ;;  %2361 = vrot.lane.b32.xlu0 %v2287_v57, %s5136_s20  ;;  %v2290_v1 = vmul.f32 %v6642_v29, %v8336_v3  ;;  %v2291_v57 = vmul.f32 %v6644_v55, %v8337_v43 }
 0x29f   : > { %v1959_v2 = vpop.permute.xlu1 %1958  ;;  %v1961_v50 = vpop.permute.xlu0 %1960 }
 0x2a0   : > { %2038 = vst.msk [vmem:[#allocation3 + $0x1a0] sm:$0xff] %vm2020_vm6, %v1959_v2  ;;  %2039 = vst.msk [vmem:[#allocation3 + $0x1b8] sm:$0xff] %vm2020_vm6, %v1961_v50 }
 0x2a1   : > { %2363 = vrot.lane.b32.xlu1 %v2288_v56, %s5136_s20  ;;  %2365 = vrot.lane.b32.xlu0 %v2289_v54, %s5136_s20  ;;  %v2292_v56 = vmul.f32 %v6652_v60, %v8338_v0  ;;  %v2293_v54 = vmul.f32 %v6654_v37, %v8339_v13 }
 0x2a3   : > { %v1963_v40 = vpop.permute.xlu1 %1962  ;;  %v1965_v27 = vpop.permute.xlu0 %1964 }
 0x2a4   : > { %2040 = vst.msk [vmem:[#allocation3 + $0x1d0] sm:$0xff] %vm2020_vm6, %v1963_v40  ;;  %2041 = vst.msk [vmem:[#allocation3 + $0x1e8] sm:$0xff] %vm2020_vm6, %v1965_v27 }
 0x2a5   : > { %2367 = vrot.lane.b32.xlu1 %v2290_v1, %s5136_s20  ;;  %2369 = vrot.lane.b32.xlu0 %v2291_v57, %s5136_s20  ;;  %v2294_v1 = vmul.f32 %v6662_v51, %v8340_v30  ;;  %v2295_v57 = vmul.f32 %v6664_v4, %v5532_v10  ;;  %v8372_v10 = vld [vmem:[#allocation33_spill] sm:$0xff] }
 0x2a6   : > { %v2307_v30 = vmul.f32 %v6726_v12, %v8372_v10 }
 0x2a7   : > { %v1967_v2 = vpop.permute.xlu1 %1966  ;;  %v1969_v50 = vpop.permute.xlu0 %1968 }
 0x2a8   : > { %2042 = vst.msk [vmem:[#allocation3 + $0x200] sm:$0xff] %vm2020_vm6, %v1967_v2  ;;  %2043 = vst.msk [vmem:[#allocation3 + $0x218] sm:$0xff] %vm2020_vm6, %v1969_v50 }
 0x2a9   : > { %2371 = vrot.lane.b32.xlu1 %v2292_v56, %s5136_s20  ;;  %2373 = vrot.lane.b32.xlu0 %v2293_v54, %s5136_s20  ;;  %v2296_v56 = vmul.f32 %v6672_v52, %v5530_v9  ;;  %v2297_v54 = vmul.f32 %v6674_v21, %v5548_v20  ;;  %v8370_v20 = vld [vmem:[#allocation10_spill] sm:$0xff] }
 0x2ab   : > { %v1971_v40 = vpop.permute.xlu1 %1970  ;;  %v1973_v27 = vpop.permute.xlu0 %1972 }
 0x2ac   : > { %2044 = vst.msk [vmem:[#allocation3 + $0x230] sm:$0xff] %vm2020_vm6, %v1971_v40  ;;  %2045 = vst.msk [vmem:[#allocation3 + $0x248] sm:$0xff] %vm2020_vm6, %v1973_v27 }
 0x2ad   : > { %2375 = vrot.lane.b32.xlu1 %v2294_v1, %s5136_s20  ;;  %2377 = vrot.lane.b32.xlu0 %v2295_v57, %s5136_s20  ;;  %v2298_v1 = vmul.f32 %v6682_v62, %v5546_v17  ;;  %v2299_v57 = vmul.f32 %v6684_v15, %v5564_v46  ;;  %v8369_v17 = vld [vmem:[#allocation31_spill] sm:$0xff] }
 0x2ae   : > { %v2305_v9 = vmul.f32 %v8370_v20, %v8369_v17 }
 0x2af   : > { %v1975_v2 = vpop.permute.xlu1 %1974  ;;  %v1977_v50 = vpop.permute.xlu0 %1976 }
 0x2b0   : > { %2046 = vst.msk [vmem:[#allocation3 + $0x260] sm:$0xff] %vm2020_vm6, %v1975_v2  ;;  %2047 = vst.msk [vmem:[#allocation3 + $0x278] sm:$0xff] %vm2020_vm6, %v1977_v50 }
 0x2b1   : > { %2379 = vrot.lane.b32.xlu1 %v2296_v56, %s5136_s20  ;;  %2381 = vrot.lane.b32.xlu0 %v2297_v54, %s5136_s20  ;;  %v2300_v56 = vmul.f32 %v6692_v5, %v5562_v41  ;;  %v2301_v54 = vmul.f32 %v6694_v25, %v5582_v11 }
 0x2b3   : > { %v1979_v40 = vpop.permute.xlu1 %1978  ;;  %v1981_v27 = vpop.permute.xlu0 %1980 }
 0x2b4   : > { %2048 = vst.msk [vmem:[#allocation3 + $0x290] sm:$0xff] %vm2020_vm6, %v1979_v40  ;;  %2049 = vst.msk [vmem:[#allocation3 + $0x2a8] sm:$0xff] %vm2020_vm6, %v1981_v27 }
 0x2b5   : > { %2383 = vrot.lane.b32.xlu1 %v2298_v1, %s5136_s20  ;;  %2385 = vrot.lane.b32.xlu0 %v2299_v57, %s5136_s20  ;;  %v2302_v1 = vmul.f32 %v6702_v48, %v5580_v6  ;;  %v8366_v57 = vld [vmem:[#allocation13_spill] sm:$0xff] }
 0x2b6   : > { %v2303_v46 = vmul.f32 %v8366_v57, %v5598_v34 }
 0x2b7   : > { %v1983_v2 = vpop.permute.xlu1 %1982  ;;  %v1985_v50 = vpop.permute.xlu0 %1984 }
 0x2b8   : > { %2050 = vst.msk [vmem:[#allocation3 + $0x2c0] sm:$0xff] %vm2020_vm6, %v1983_v2  ;;  %2051 = vst.msk [vmem:[#allocation3 + $0x2d8] sm:$0xff] %vm2020_vm6, %v1985_v50 }
 0x2b9   : > { %2387 = vrot.lane.b32.xlu1 %v2300_v56, %s5136_s20  ;;  %2389 = vrot.lane.b32.xlu0 %v2301_v54, %s5136_s20  ;;  %v8367_v56 = vld [vmem:[#allocation29_spill] sm:$0xff]  ;;  %v8368_v54 = vld [vmem:[#allocation34_spill] sm:$0xff] }
 0x2ba   : > { %v2304_v41 = vmul.f32 %v8368_v54, %v8367_v56 }
 0x2bb   : > { %v1987_v40 = vpop.permute.xlu1 %1986  ;;  %v2150_v27 = vpop.permute.xlu0 %2149 }
 0x2bc   : > { %2052 = vst.msk [vmem:[#allocation3 + $0x2f0] sm:$0xff] %vm2020_vm6, %v1987_v40 }
 0x2bd   : > { %2245 = vst.msk [vmem:[#allocation3] sm:$0xff] %vm1603_vm5, %v2150_v27  ;;  %2391 = vrot.lane.b32.xlu1 %v2302_v1, %s5136_s20  ;;  %2393 = vrot.lane.b32.xlu0 %v2303_v46, %s5136_s20  ;;  %v8371_v1 = vld [vmem:[#allocation30_spill] sm:$0xff] }
 0x2be   : > { %v2306_v46 = vmul.f32 %v6724_v14, %v8371_v1 }
 0x2bf   : > { %v2152_v2 = vpop.permute.xlu1 %2151  ;;  %v2154_v50 = vpop.permute.xlu0 %2153 }
 0x2c0   : > { %2246 = vst.msk [vmem:[#allocation3 + $0x18] sm:$0xff] %vm1603_vm5, %v2152_v2  ;;  %2247 = vst.msk [vmem:[#allocation3 + $0x30] sm:$0xff] %vm1603_vm5, %v2154_v50  ;;  %v8373_v50 = vld [vmem:[#allocation32_spill] sm:$0xff] }
 0x2c1   : > { %2395 = vrot.lane.b32.xlu1 %v2304_v41, %s5136_s20  ;;  %2397 = vrot.lane.b32.xlu0 %v2305_v9, %s5136_s20  ;;  %v2308_v9 = vmul.f32 %v6738_v22, %v8373_v50 }
 0x2c3   : > { %v2156_v40 = vpop.permute.xlu1 %2155  ;;  %v2158_v27 = vpop.permute.xlu0 %2157 }
 0x2c4   : > { %2248 = vst.msk [vmem:[#allocation3 + $0x48] sm:$0xff] %vm1603_vm5, %v2156_v40  ;;  %2249 = vst.msk [vmem:[#allocation3 + $0x60] sm:$0xff] %vm1603_vm5, %v2158_v27 }
 0x2c5   : > { %2399 = vrot.lane.b32.xlu1 %v2306_v46, %s5136_s20  ;;  %2401 = vrot.lane.b32.xlu0 %v2307_v30, %s5136_s20 }
 0x2c7   : > { %v2160_v2 = vpop.permute.xlu1 %2159  ;;  %v2162_v41 = vpop.permute.xlu0 %2161 }
 0x2c8   : > { %2250 = vst.msk [vmem:[#allocation3 + $0x78] sm:$0xff] %vm1603_vm5, %v2160_v2  ;;  %2251 = vst.msk [vmem:[#allocation3 + $0x90] sm:$0xff] %vm1603_vm5, %v2162_v41 }
 0x2c9   : > { %2403 = vrot.lane.b32.xlu1 %v2308_v9, %s5136_s20  ;;  %2502 = vrot.lane.b32.xlu0 %v6565_v18, %s5131_s14  ;;  %v4136_v9 = vld [vmem:[%s8199_s1] sm:$0xff] }
 0x2cb   : > { %v2164_v40 = vpop.permute.xlu1 %2163  ;;  %v2166_v27 = vpop.permute.xlu0 %2165 }
 0x2cc   : > { %2252 = vst.msk [vmem:[#allocation3 + $0xa8] sm:$0xff] %vm1603_vm5, %v2164_v40  ;;  %2253 = vst.msk [vmem:[#allocation3 + $0xc0] sm:$0xff] %vm1603_vm5, %v2166_v27  ;;  %v4137_v40 = vld [vmem:[%s8199_s1 + $0x8] sm:$0xff]  ;;  %v5137_v27 = vmov 0.0|0.0  }
 0x2cd   : > { %2504 = vrot.lane.b32.xlu1 %v6574_v49, %s5131_s14  ;;  %2506 = vrot.lane.b32.xlu0 %v6576_v7, %s5131_s14 }
 0x2ce   : > { %4959 = vmatprep.subr.bf16.mxu0 %v5137_v27  ;;  %5019 = vmatprep.subr.bf16.mxu1 %v5137_v27 }
 0x2cf   : > { %v2168_v30 = vpop.permute.xlu1 %2167  ;;  %v2170_v46 = vpop.permute.xlu0 %2169 }
 0x2d0   : > { %2254 = vst.msk [vmem:[#allocation3 + $0xd8] sm:$0xff] %vm1603_vm5, %v2168_v30  ;;  %2255 = vst.msk [vmem:[#allocation3 + $0xf0] sm:$0xff] %vm1603_vm5, %v2170_v46 }
 0x2d1   : > { %2508 = vrot.lane.b32.xlu1 %v6584_v31, %s5131_s14  ;;  %2510 = vrot.lane.b32.xlu0 %v6586_v58, %s5131_s14 }
 0x2d3   : > { %v2172_v18 = vpop.permute.xlu1 %2171  ;;  %v2174_v2 = vpop.permute.xlu0 %2173 }
 0x2d4   : > { %2256 = vst.msk [vmem:[#allocation3 + $0x108] sm:$0xff] %vm1603_vm5, %v2172_v18  ;;  %2257 = vst.msk [vmem:[#allocation3 + $0x120] sm:$0xff] %vm1603_vm5, %v2174_v2 }
 0x2d5   : > { %2512 = vrot.lane.b32.xlu1 %v6596_v19, %s5131_s14  ;;  %2514 = vrot.lane.b32.xlu0 %v6598_v33, %s5131_s14  ;;  %v4960_v33 = vpack.c.bf16 %v4137_v40, %v4136_v9 }
 0x2d7   : > { %v2176_v49 = vpop.permute.xlu1 %2175  ;;  %v2178_v41 = vpop.permute.xlu0 %2177  ;;  %4961 = vmatpush1.bf16.msra.mxu0 %v4960_v33  ;;  %5035 = vmatpush1.bf16.msra.mxu1 %v4960_v33  ;;  %v4142_v33 = vld [vmem:[%s8199_s1 + $0x30] sm:$0xff] }
 0x2d8   : > { %2258 = vst.msk [vmem:[#allocation3 + $0x138] sm:$0xff] %vm1603_vm5, %v2176_v49  ;;  %2259 = vst.msk [vmem:[#allocation3 + $0x150] sm:$0xff] %vm1603_vm5, %v2178_v41  ;;  %4962 = vmatprep.subr.bf16.mxu0 %v5137_v27  ;;  %5020 = vmatprep.subr.bf16.mxu1 %v5137_v27  ;;  %v4140_v41 = vld [vmem:[%s8199_s1 + $0x20] sm:$0xff] }
 0x2d9   : > { %2516 = vrot.lane.b32.xlu1 %v6610_v42, %s5131_s14  ;;  %2518 = vrot.lane.b32.xlu0 %v6612_v53, %s5131_s14  ;;  %v4138_v42 = vld [vmem:[%s8199_s1 + $0x10] sm:$0xff]  ;;  %v4139_v53 = vld [vmem:[%s8199_s1 + $0x18] sm:$0xff] }
 0x2da   : > { %v4963_v18 = vpack.c.bf16 %v4139_v53, %v4138_v42  ;;  %v4144_v42 = vld [vmem:[%s8199_s1 + $0x40] sm:$0xff] }
 0x2db   : > { %v2180_v30 = vpop.permute.xlu1 %2179  ;;  %v2182_v46 = vpop.permute.xlu0 %2181 }
 0x2dc   : > { %2260 = vst.msk [vmem:[#allocation3 + $0x168] sm:$0xff] %vm1603_vm5, %v2180_v30  ;;  %2261 = vst.msk [vmem:[#allocation3 + $0x180] sm:$0xff] %vm1603_vm5, %v2182_v46  ;;  %4964 = vmatpush1.bf16.msra.mxu0 %v4963_v18  ;;  %5036 = vmatpush1.bf16.msra.mxu1 %v4963_v18 }
 0x2dd   : > { %2520 = vrot.lane.b32.xlu1 %v6622_v44, %s5131_s14  ;;  %2522 = vrot.lane.b32.xlu0 %v6624_v45, %s5131_s14  ;;  %v4141_v44 = vld [vmem:[%s8199_s1 + $0x28] sm:$0xff] }
 0x2de   : > { %4965 = vmatprep.subr.bf16.mxu0 %v5137_v27  ;;  %5021 = vmatprep.subr.bf16.mxu1 %v5137_v27  ;;  %v4966_v45 = vpack.c.bf16 %v4141_v44, %v4140_v41  ;;  %v4148_v44 = vld [vmem:[%s8199_s1 + $0x60] sm:$0xff] }
 0x2df   : > { %v2184_v2 = vpop.permute.xlu1 %2183  ;;  %v2186_v49 = vpop.permute.xlu0 %2185 }
 0x2e0   : > { %2262 = vst.msk [vmem:[#allocation3 + $0x198] sm:$0xff] %vm1603_vm5, %v2184_v2  ;;  %2263 = vst.msk [vmem:[#allocation3 + $0x1b0] sm:$0xff] %vm1603_vm5, %v2186_v49  ;;  %4967 = vmatpush1.bf16.msra.mxu0 %v4966_v45  ;;  %5037 = vmatpush1.bf16.msra.mxu1 %v4966_v45  ;;  %v4146_v2 = vld [vmem:[%s8199_s1 + $0x50] sm:$0xff] }
 0x2e1   : > { %2524 = vrot.lane.b32.xlu1 %v6632_v36, %s5131_s14  ;;  %2526 = vrot.lane.b32.xlu0 %v6634_v28, %s5131_s14  ;;  %v4143_v36 = vld [vmem:[%s8199_s1 + $0x38] sm:$0xff] }
 0x2e2   : > { %4968 = vmatprep.subr.bf16.mxu0 %v5137_v27  ;;  %5022 = vmatprep.subr.bf16.mxu1 %v5137_v27  ;;  %v4969_v28 = vpack.c.bf16 %v4143_v36, %v4142_v33 }
 0x2e3   : > { %v2188_v9 = vpop.permute.xlu1 %2187  ;;  %v2190_v40 = vpop.permute.xlu0 %2189 }
 0x2e4   : > { %2264 = vst.msk [vmem:[#allocation3 + $0x1c8] sm:$0xff] %vm1603_vm5, %v2188_v9  ;;  %2265 = vst.msk [vmem:[#allocation3 + $0x1e0] sm:$0xff] %vm1603_vm5, %v2190_v40  ;;  %4970 = vmatpush1.bf16.msra.mxu0 %v4969_v28  ;;  %5038 = vmatpush1.bf16.msra.mxu1 %v4969_v28  ;;  %v4150_v40 = vld [vmem:[%s8199_s1 + $0x70] sm:$0xff]  ;;  %v4152_v28 = vld [vmem:[%s8199_s1 + $0x80] sm:$0xff] }
 0x2e5   : > { %2528 = vrot.lane.b32.xlu1 %v6642_v29, %s5131_s14  ;;  %2530 = vrot.lane.b32.xlu0 %v6644_v55, %s5131_s14  ;;  %v4145_v29 = vld [vmem:[%s8199_s1 + $0x48] sm:$0xff] }
 0x2e6   : > { %4971 = vmatprep.subr.bf16.mxu0 %v5137_v27  ;;  %5023 = vmatprep.subr.bf16.mxu1 %v5137_v27  ;;  %v4972_v55 = vpack.c.bf16 %v4145_v29, %v4144_v42  ;;  %v4154_v42 = vld [vmem:[%s8199_s1 + $0x90] sm:$0xff] }
 0x2e7   : > { %v2192_v30 = vpop.permute.xlu1 %2191  ;;  %v2194_v46 = vpop.permute.xlu0 %2193 }
 0x2e8   : > { %2266 = vst.msk [vmem:[#allocation3 + $0x1f8] sm:$0xff] %vm1603_vm5, %v2192_v30  ;;  %2267 = vst.msk [vmem:[#allocation3 + $0x210] sm:$0xff] %vm1603_vm5, %v2194_v46  ;;  %4973 = vmatpush1.bf16.msra.mxu0 %v4972_v55  ;;  %5039 = vmatpush1.bf16.msra.mxu1 %v4972_v55 }
 0x2e9   : > { %2532 = vrot.lane.b32.xlu1 %v6652_v60, %s5131_s14  ;;  %2534 = vrot.lane.b32.xlu0 %v6654_v37, %s5131_s14  ;;  %v4147_v60 = vld [vmem:[%s8199_s1 + $0x58] sm:$0xff] }
 0x2ea   : > { %4974 = vmatprep.subr.bf16.mxu0 %v5137_v27  ;;  %5024 = vmatprep.subr.bf16.mxu1 %v5137_v27  ;;  %v4975_v37 = vpack.c.bf16 %v4147_v60, %v4146_v2 }
 0x2eb   : > { %v2196_v53 = vpop.permute.xlu1 %2195  ;;  %v2198_v18 = vpop.permute.xlu0 %2197 }
 0x2ec   : > { %2268 = vst.msk [vmem:[#allocation3 + $0x228] sm:$0xff] %vm1603_vm5, %v2196_v53  ;;  %2269 = vst.msk [vmem:[#allocation3 + $0x240] sm:$0xff] %vm1603_vm5, %v2198_v18  ;;  %4976 = vmatpush1.bf16.msra.mxu0 %v4975_v37  ;;  %5040 = vmatpush1.bf16.msra.mxu1 %v4975_v37  ;;  %v4156_v53 = vld [vmem:[%s8199_s1 + $0xa0] sm:$0xff] }
 0x2ed   : > { %2536 = vrot.lane.b32.xlu1 %v6662_v51, %s5131_s14  ;;  %2538 = vrot.lane.b32.xlu0 %v6664_v4, %s5131_s14  ;;  %v4149_v51 = vld [vmem:[%s8199_s1 + $0x68] sm:$0xff]  ;;  %v2630_v37 = vld [vmem:[#allocation2 + $0x1a] sm:$0xff] }
 0x2ee   : > { %4977 = vmatprep.subr.bf16.mxu0 %v5137_v27  ;;  %5025 = vmatprep.subr.bf16.mxu1 %v5137_v27  ;;  %v4978_v4 = vpack.c.bf16 %v4149_v51, %v4148_v44  ;;  %v4159_v44 = vld [vmem:[%s8199_s1 + $0xb8] sm:$0xff] }
 0x2ef   : > { %v2200_v49 = vpop.permute.xlu1 %2199  ;;  %v2202_v41 = vpop.permute.xlu0 %2201 }
 0x2f0   : > { %2270 = vst.msk [vmem:[#allocation3 + $0x258] sm:$0xff] %vm1603_vm5, %v2200_v49  ;;  %2271 = vst.msk [vmem:[#allocation3 + $0x270] sm:$0xff] %vm1603_vm5, %v2202_v41  ;;  %4979 = vmatpush1.bf16.msra.mxu0 %v4978_v4  ;;  %5041 = vmatpush1.bf16.msra.mxu1 %v4978_v4  ;;  %v2662_v49 = vmax.f32 %v2630_v37, 0.0  ;;  %v4158_v41 = vld [vmem:[%s8199_s1 + $0xb0] sm:$0xff] }
 0x2f1   : > { %2540 = vrot.lane.b32.xlu1 %v6672_v52, %s5131_s14  ;;  %2542 = vrot.lane.b32.xlu0 %v6674_v21, %s5131_s14  ;;  %v4151_v52 = vld [vmem:[%s8199_s1 + $0x78] sm:$0xff]  ;;  %v4993_v51 = vpack.c.bf16 %v4159_v44, %v4158_v41 }
 0x2f2   : > { %4980 = vmatprep.subr.bf16.mxu0 %v5137_v27  ;;  %5026 = vmatprep.subr.bf16.mxu1 %v5137_v27  ;;  %v4981_v21 = vpack.c.bf16 %v4151_v52, %v4150_v40  ;;  %v7072_v40 = vld [vmem:[#allocation2 + $0x32] sm:$0xff] }
 0x2f3   : > { %v2204_v45 = vpop.permute.xlu1 %2203  ;;  %v2206_v9 = vpop.permute.xlu0 %2205 }
 0x2f4   : > { %2272 = vst.msk [vmem:[#allocation3 + $0x288] sm:$0xff] %vm1603_vm5, %v2204_v45  ;;  %2273 = vst.msk [vmem:[#allocation3 + $0x2a0] sm:$0xff] %vm1603_vm5, %v2206_v9  ;;  %4982 = vmatpush1.bf16.msra.mxu0 %v4981_v21  ;;  %5042 = vmatpush1.bf16.msra.mxu1 %v4981_v21  ;;  %v7070_v9 = vld [vmem:[#allocation2 + $0x22] sm:$0xff]  ;;  %v2664_v21 = vmax.f32 %v7072_v40, 0.0 }
 0x2f5   : > { %2544 = vrot.lane.b32.xlu1 %v6682_v62, %s5131_s14  ;;  %2546 = vrot.lane.b32.xlu0 %v6684_v15, %s5131_s14  ;;  %v4153_v62 = vld [vmem:[%s8199_s1 + $0x88] sm:$0xff]  ;;  %v2663_v52 = vmax.f32 %v7070_v9, 0.0 }
 0x2f6   : > { %4983 = vmatprep.subr.bf16.mxu0 %v5137_v27  ;;  %5027 = vmatprep.subr.bf16.mxu1 %v5137_v27  ;;  %v4984_v15 = vpack.c.bf16 %v4153_v62, %v4152_v28 }
 0x2f7   : > { %v2208_v33 = vpop.permute.xlu1 %2207  ;;  %v2210_v36 = vpop.permute.xlu0 %2209 }
 0x2f8   : > { %2274 = vst.msk [vmem:[#allocation3 + $0x2b8] sm:$0xff] %vm1603_vm5, %v2208_v33  ;;  %2275 = vst.msk [vmem:[#allocation3 + $0x2d0] sm:$0xff] %vm1603_vm5, %v2210_v36  ;;  %4985 = vmatpush1.bf16.msra.mxu0 %v4984_v15  ;;  %5043 = vmatpush1.bf16.msra.mxu1 %v4984_v15  ;;  %v4160_v33 = vld [vmem:[%s8199_s1 + $0xc0] sm:$0xff]  ;;  %v4161_v36 = vld [vmem:[%s8199_s1 + $0xc8] sm:$0xff] }
 0x2f9   : > { %2548 = vrot.lane.b32.xlu1 %v6692_v5, %s5131_s14  ;;  %2550 = vrot.lane.b32.xlu0 %v6694_v25, %s5131_s14  ;;  %v4155_v5 = vld [vmem:[%s8199_s1 + $0x98] sm:$0xff]  ;;  %v4996_v28 = vpack.c.bf16 %v4161_v36, %v4160_v33  ;;  %v4166_v33 = vld [vmem:[%s8199_s1 + $0xf0] sm:$0xff] }
 0x2fa   : > { %4986 = vmatprep.subr.bf16.mxu0 %v5137_v27  ;;  %5028 = vmatprep.subr.bf16.mxu1 %v5137_v27  ;;  %v4987_v25 = vpack.c.bf16 %v4155_v5, %v4154_v42  ;;  %v4163_v42 = vld [vmem:[%s8199_s1 + $0xd8] sm:$0xff] }
 0x2fb   : > { %v2212_v30 = vpop.permute.xlu1 %2211  ;;  %v2342_v46 = vpop.permute.xlu0 %2341  ;;  %v4167_v36 = vld [vmem:[%s8199_s1 + $0xf8] sm:$0xff] }
 0x2fc   : > { %2276 = vst.msk [vmem:[#allocation3 + $0x2e8] sm:$0xff] %vm1603_vm5, %v2212_v30  ;;  %4988 = vmatpush1.bf16.msra.mxu0 %v4987_v25  ;;  %5044 = vmatpush1.bf16.msra.mxu1 %v4987_v25  ;;  %v7089_v30 = vld [vmem:[#allocation2 + $0x3a] sm:$0xff] }
 0x2fd   : > { %2438 = vst.msk [vmem:[#allocation3 + $0x8] sm:$0xff] %vm2437_vm7, %v2342_v46  ;;  %2552 = vrot.lane.b32.xlu1 %v6702_v48, %s5131_s14  ;;  %2554 = vrot.lane.b32.xlu0 %v8366_v57, %s5131_s14  ;;  %v4157_v48 = vld [vmem:[%s8199_s1 + $0xa8] sm:$0xff]  ;;  %v4162_v46 = vld [vmem:[%s8199_s1 + $0xd0] sm:$0xff]  ;;  %v2665_v5 = vmax.f32 %v7089_v30, 0.0 }
 0x2fe   : > { %4989 = vmatprep.subr.bf16.mxu0 %v5137_v27  ;;  %5029 = vmatprep.subr.bf16.mxu1 %v5137_v27  ;;  %v4990_v18 = vpack.c.bf16 %v4157_v48, %v4156_v53  ;;  %v4999_v25 = vpack.c.bf16 %v4163_v42, %v4162_v46  ;;  %v2854_v53 = vmul.f32 %v2630_v37, %v8319_v23  ;;  %v2654_v48 = vld [vmem:[#allocation2 + $0x13a] sm:$0xff] }
 0x2ff   : > { %v2344_v29 = vpop.permute.xlu1 %2343  ;;  %v2346_v55 = vpop.permute.xlu0 %2345  ;;  %v2878_v44 = vmul.f32 %v2654_v48, %v5582_v11 }
 0x300   : > { %2439 = vst.msk [vmem:[#allocation3 + $0x20] sm:$0xff] %vm2437_vm7, %v2344_v29  ;;  %2440 = vst.msk [vmem:[#allocation3 + $0x38] sm:$0xff] %vm2437_vm7, %v2346_v55  ;;  %4991 = vmatpush1.bf16.msra.mxu0 %v4990_v18  ;;  %5045 = vmatpush1.bf16.msra.mxu1 %v4990_v18  ;;  %v4164_v18 = vld [vmem:[%s8199_s1 + $0xe0] sm:$0xff] }
 0x301   : > { %2556 = vrot.lane.b32.xlu1 %v8368_v54, %s5131_s14  ;;  %2558 = vrot.lane.b32.xlu0 %v8370_v20, %s5131_s14 }
 0x302   : > { %4992 = vmatprep.subr.bf16.mxu0 %v5137_v27  ;;  %5030 = vmatprep.subr.bf16.mxu1 %v5137_v27 }
 0x303   : > { %v2348_v2 = vpop.permute.xlu1 %2347  ;;  %v2350_v60 = vpop.permute.xlu0 %2349 }
 0x304   : > { %2441 = vst.msk [vmem:[#allocation3 + $0x50] sm:$0xff] %vm2437_vm7, %v2348_v2  ;;  %2442 = vst.msk [vmem:[#allocation3 + $0x68] sm:$0xff] %vm2437_vm7, %v2350_v60  ;;  %4994 = vmatpush1.bf16.msra.mxu0 %v4993_v51  ;;  %5046 = vmatpush1.bf16.msra.mxu1 %v4993_v51  ;;  %v4165_v2 = vld [vmem:[%s8199_s1 + $0xe8] sm:$0xff]  ;;  %v2686_v60 = vmax.f32 %v2654_v48, 0.0  ;;  %v5071_v51 = vld [vmem:[#allocation2 + $0x30] sm:$0xff] }
 0x305   : > { %2560 = vrot.lane.b32.xlu1 %v6724_v14, %s5131_s14  ;;  %2562 = vrot.lane.b32.xlu0 %v6726_v12, %s5131_s14  ;;  %v5002_v37 = vpack.c.bf16 %v4165_v2, %v4164_v18  ;;  %v2855_v18 = vmul.f32 %v7070_v9, %v8321_v24  ;;  %v5074_v9 = vld [vmem:[#allocation2 + $0x158] sm:$0xff] }
 0x306   : > { %4995 = vmatprep.subr.bf16.mxu0 %v5137_v27  ;;  %5031 = vmatprep.subr.bf16.mxu1 %v5137_v27 }
 0x307   : > { %v2352_v4 = vpop.permute.xlu1 %2351  ;;  %v2354_v45 = vpop.permute.xlu0 %2353 }
 0x308   : > { %2443 = vst.msk [vmem:[#allocation3 + $0x80] sm:$0xff] %vm2437_vm7, %v2352_v4  ;;  %2444 = vst.msk [vmem:[#allocation3 + $0x98] sm:$0xff] %vm2437_vm7, %v2354_v45  ;;  %4997 = vmatpush1.bf16.msra.mxu0 %v4996_v28  ;;  %5047 = vmatpush1.bf16.msra.mxu1 %v4996_v28  ;;  %v3080_v4 = vmax.f32 %v5071_v51, 0.0  ;;  %v5072_v45 = vld [vmem:[#allocation2 + $0x150] sm:$0xff]  ;;  %v5005_v28 = vpack.c.bf16 %v4167_v36, %v4166_v33  ;;  %v8376_v51 = vmax.f32 %v6584_v31, 0.0  ;;  %v8377_v36 = vmax.f32 %v8368_v54, 0.0 }
 0x309   : > { %2564 = vrot.lane.b32.xlu1 %v6738_v22, %s5131_s14  ;;  %2726 = vrot.lane.b32.xlu0 %v2662_v49, %s5135_s19  ;;  %v7165_v33 = vld [vmem:[#allocation2 + $0x152] sm:$0xff]  ;;  %v5075_v54 = vld [vmem:[#allocation2 + $0x48] sm:$0xff] }
 0x30a   : > { %4998 = vmatprep.subr.bf16.mxu0 %v5137_v27  ;;  %5032 = vmatprep.subr.bf16.mxu1 %v5137_v27  ;;  %v2688_v31 = vmax.f32 %v7165_v33, 0.0 }
 0x30b   : > { %v2356_v62 = vpop.permute.xlu1 %2355  ;;  %v2358_v15 = vpop.permute.xlu0 %2357 }
 0x30c   : > { %2445 = vst.msk [vmem:[#allocation3 + $0xb0] sm:$0xff] %vm2437_vm7, %v2356_v62  ;;  %2446 = vst.msk [vmem:[#allocation3 + $0xc8] sm:$0xff] %vm2437_vm7, %v2358_v15  ;;  %5000 = vmatpush1.bf16.msra.mxu0 %v4999_v25  ;;  %5048 = vmatpush1.bf16.msra.mxu1 %v4999_v25  ;;  %v2655_v25 = vld [vmem:[#allocation2 + $0x142] sm:$0xff] }
 0x30d   : > { %2728 = vrot.lane.b32.xlu1 %v2663_v52, %s5135_s19  ;;  %2730 = vrot.lane.b32.xlu0 %v2664_v21, %s5135_s19  ;;  %v3104_v52 = vmax.f32 %v5072_v45, 0.0 }
 0x30e   : > { %5001 = vmatprep.subr.bf16.mxu0 %v5137_v27  ;;  %5033 = vmatprep.subr.bf16.mxu1 %v5137_v27 }
 0x30f   : > { %v2360_v29 = vpop.permute.xlu1 %2359  ;;  %v2362_v55 = vpop.permute.xlu0 %2361 }
 0x310   : > { %2447 = vst.msk [vmem:[#allocation3 + $0xe0] sm:$0xff] %vm2437_vm7, %v2360_v29  ;;  %2448 = vst.msk [vmem:[#allocation3 + $0xf8] sm:$0xff] %vm2437_vm7, %v2362_v55  ;;  %5003 = vmatpush1.bf16.msra.mxu0 %v5002_v37  ;;  %5049 = vmatpush1.bf16.msra.mxu1 %v5002_v37  ;;  %v8375_v29 = vmax.f32 %v8366_v57, 0.0  ;;  %v2687_v55 = vmax.f32 %v2655_v25, 0.0  ;;  %v2879_v57 = vmul.f32 %v2655_v25, %v5580_v6 }
 0x311   : > { %2732 = vrot.lane.b32.xlu1 %v2665_v5, %s5135_s19  ;;  %2918 = vrot.lane.b32.xlu0 %v2854_v53, %s5138_s21 }
 0x312   : > { %5004 = vmatprep.subr.bf16.mxu0 %v5137_v27  ;;  %5034 = vmatprep.subr.bf16.mxu1 %v5137_v27  ;;  %v8374_v27 = vmax.f32 %v6576_v7, 0.0  ;;  %v5073_v7 = vld [vmem:[#allocation2 + $0x38] sm:$0xff] }
 0x313   : > { %v2364_v49 = vpop.permute.xlu1 %2363  ;;  %v2366_v41 = vpop.permute.xlu0 %2365  ;;  %v3081_v2 = vmax.f32 %v5073_v7, 0.0  ;;  %v8379_v7 = vmax.f32 %v8370_v20, 0.0 }
 0x314   : > { %2449 = vst.msk [vmem:[#allocation3 + $0x110] sm:$0xff] %vm2437_vm7, %v2364_v49  ;;  %2450 = vst.msk [vmem:[#allocation3 + $0x128] sm:$0xff] %vm2437_vm7, %v2366_v41  ;;  %5006 = vmatpush1.bf16.msra.mxu0 %v5005_v28  ;;  %5050 = vmatpush1.bf16.msra.mxu1 %v5005_v28  ;;  %v3105_v49 = vmax.f32 %v5074_v9, 0.0 }
 0x315   : > { %2774 = vrot.lane.b32.xlu1 %v2686_v60, %s5135_s19  ;;  %2966 = vrot.lane.b32.xlu0 %v2878_v44, %s5138_s21 }
 0x317   : > { %v2368_v62 = vpop.permute.xlu1 %2367  ;;  %v2370_v15 = vpop.permute.xlu0 %2369 }
 0x318   : > { %2451 = vst.msk [vmem:[#allocation3 + $0x140] sm:$0xff] %vm2437_vm7, %v2368_v62  ;;  %2452 = vst.msk [vmem:[#allocation3 + $0x158] sm:$0xff] %vm2437_vm7, %v2370_v15  ;;  %v2880_v15 = vmul.f32 %v7165_v33, %v5598_v34  ;;  %v7378_v33 = vld [vmem:[#allocation2 + $0x91] sm:$0xff] }
 0x319   : > { %3144 = vrot.lane.b32.xlu1 %v3080_v4, %s5136_s20  ;;  %3192 = vrot.lane.b32.xlu0 %v3104_v52, %s5136_s20  ;;  %v2856_v52 = vmul.f32 %v7072_v40, %v8323_v63 }
 0x31b   : > { %v2372_v46 = vpop.permute.xlu1 %2371  ;;  %v2374_v42 = vpop.permute.xlu0 %2373 }
 0x31c   : > { %2453 = vst.msk [vmem:[#allocation3 + $0x170] sm:$0xff] %vm2437_vm7, %v2372_v46  ;;  %2454 = vst.msk [vmem:[#allocation3 + $0x188] sm:$0xff] %vm2437_vm7, %v2374_v42  ;;  %v3082_v46 = vmax.f32 %v5075_v54, 0.0  ;;  %v5076_v42 = vld [vmem:[#allocation2 + $0x168] sm:$0xff] }
 0x31d   : > { %3432 = vrot.lane.b32.xlu1 %v8374_v27, %s5138_s21  ;;  %3480 = vrot.lane.b32.xlu0 %v8375_v29, %s5138_s21  ;;  %v3106_v25 = vmax.f32 %v5076_v42, 0.0  ;;  %v7220_v54 = vld [vmem:[#allocation2 + $0x16a] sm:$0xff] }
 0x31f   : > { %v2376_v53 = vpop.permute.xlu1 %2375  ;;  %v2378_v48 = vpop.permute.xlu0 %2377 }
 0x320   : > { %2455 = vst.msk [vmem:[#allocation3 + $0x1a0] sm:$0xff] %vm2437_vm7, %v2376_v53  ;;  %2456 = vst.msk [vmem:[#allocation3 + $0x1b8] sm:$0xff] %vm2437_vm7, %v2378_v48  ;;  %v7186_v48 = vld [vmem:[#allocation2 + $0x15a] sm:$0xff] }
 0x321   : > { %2920 = vrot.lane.b32.xlu1 %v2855_v18, %s5138_s21  ;;  %2776 = vrot.lane.b32.xlu0 %v2687_v55, %s5135_s19  ;;  %v8378_v18 = vmax.f32 %v6586_v58, 0.0  ;;  %v5077_v58 = vld [vmem:[#allocation2 + $0x50] sm:$0xff] }
 0x322   : > { %v3083_v20 = vmax.f32 %v5077_v58, 0.0 }
 0x323   : > { %v2380_v60 = vpop.permute.xlu1 %2379  ;;  %v2382_v37 = vpop.permute.xlu0 %2381 }
 0x324   : > { %2457 = vst.msk [vmem:[#allocation3 + $0x1d0] sm:$0xff] %vm2437_vm7, %v2380_v60  ;;  %2458 = vst.msk [vmem:[#allocation3 + $0x1e8] sm:$0xff] %vm2437_vm7, %v2382_v37 }
 0x325   : > { %2968 = vrot.lane.b32.xlu1 %v2879_v57, %s5138_s21  ;;  %3146 = vrot.lane.b32.xlu0 %v3081_v2, %s5136_s20  ;;  %v2689_v2 = vmax.f32 %v7186_v48, 0.0  ;;  %v2857_v57 = vmul.f32 %v7089_v30, %v8327_v26 }
 0x327   : > { %v2384_v41 = vpop.permute.xlu1 %2383  ;;  %v2386_v44 = vpop.permute.xlu0 %2385 }
 0x328   : > { %2459 = vst.msk [vmem:[#allocation3 + $0x200] sm:$0xff] %vm2437_vm7, %v2384_v41  ;;  %2460 = vst.msk [vmem:[#allocation3 + $0x218] sm:$0xff] %vm2437_vm7, %v2386_v44  ;;  %v2881_v41 = vmul.f32 %v7186_v48, %v8367_v56  ;;  %v5078_v44 = vld [vmem:[#allocation2 + $0x170] sm:$0xff]  ;;  %v7428_v48 = vld [vmem:[#allocation2 + $0x99] sm:$0xff] }
 0x329   : > { %3194 = vrot.lane.b32.xlu1 %v3105_v49, %s5136_s20  ;;  %3434 = vrot.lane.b32.xlu0 %v8376_v51, %s5138_s21  ;;  %v3107_v51 = vmax.f32 %v5078_v44, 0.0 }
 0x32b   : > { %v2388_v4 = vpop.permute.xlu1 %2387  ;;  %v2390_v45 = vpop.permute.xlu0 %2389 }
 0x32c   : > { %2461 = vst.msk [vmem:[#allocation3 + $0x230] sm:$0xff] %vm2437_vm7, %v2388_v4  ;;  %2462 = vst.msk [vmem:[#allocation3 + $0x248] sm:$0xff] %vm2437_vm7, %v2390_v45 }
 0x32d   : > { %3482 = vrot.lane.b32.xlu1 %v8377_v36, %s5138_s21  ;;  %2922 = vrot.lane.b32.xlu0 %v2856_v52, %s5138_s21  ;;  %v7211_v52 = vld [vmem:[#allocation2 + $0x4a] sm:$0xff]  ;;  %v8380_v36 = vmax.f32 %v6596_v19, 0.0  ;;  %v2690_v19 = vmax.f32 %v7220_v54, 0.0 }
 0x32f   : > { %v2392_v28 = vpop.permute.xlu1 %2391  ;;  %v2394_v62 = vpop.permute.xlu0 %2393 }
 0x330   : > { %2463 = vst.msk [vmem:[#allocation3 + $0x260] sm:$0xff] %vm2437_vm7, %v2392_v28  ;;  %2464 = vst.msk [vmem:[#allocation3 + $0x278] sm:$0xff] %vm2437_vm7, %v2394_v62  ;;  %v2666_v28 = vmax.f32 %v7211_v52, 0.0 }
 0x331   : > { %2778 = vrot.lane.b32.xlu1 %v2688_v31, %s5135_s19  ;;  %2970 = vrot.lane.b32.xlu0 %v2880_v15, %s5138_s21 }
 0x333   : > { %v2396_v27 = vpop.permute.xlu1 %2395  ;;  %v2398_v29 = vpop.permute.xlu0 %2397 }
 0x334   : > { %2465 = vst.msk [vmem:[#allocation3 + $0x290] sm:$0xff] %vm2437_vm7, %v2396_v27  ;;  %2466 = vst.msk [vmem:[#allocation3 + $0x2a8] sm:$0xff] %vm2437_vm7, %v2398_v29  ;;  %v2858_v27 = vmul.f32 %v7211_v52, %v8325_v8 }
 0x335   : > { %3148 = vrot.lane.b32.xlu1 %v3082_v46, %s5136_s20  ;;  %3196 = vrot.lane.b32.xlu0 %v3106_v25, %s5136_s20  ;;  %v8381_v46 = vmax.f32 %v6724_v14, 0.0  ;;  %v5079_v14 = vld [vmem:[#allocation2 + $0x60] sm:$0xff] }
 0x336   : > { %v3084_v29 = vmax.f32 %v5079_v14, 0.0  ;;  %v7276_v14 = vld [vmem:[#allocation2 + $0x69] sm:$0xff] }
 0x337   : > { %v2400_v55 = vpop.permute.xlu1 %2399  ;;  %v2402_v53 = vpop.permute.xlu0 %2401 }
 0x338   : > { %2467 = vst.msk [vmem:[#allocation3 + $0x2c0] sm:$0xff] %vm2437_vm7, %v2400_v55  ;;  %2468 = vst.msk [vmem:[#allocation3 + $0x2d8] sm:$0xff] %vm2437_vm7, %v2402_v53 }
 0x339   : > { %3436 = vrot.lane.b32.xlu1 %v8378_v18, %s5138_s21  ;;  %3484 = vrot.lane.b32.xlu0 %v8379_v7, %s5138_s21  ;;  %v2882_v18 = vmul.f32 %v7220_v54, %v8369_v17  ;;  %v7241_v7 = vld [vmem:[#allocation2 + $0x61] sm:$0xff] }
 0x33b   : > { %v2404_v60 = vpop.permute.xlu1 %2403  ;;  %v2503_v37 = vpop.permute.xlu0 %2502 }
 0x33c   : > { %2469 = vst.msk [vmem:[#allocation3 + $0x2f0] sm:$0xff] %vm2437_vm7, %v2404_v60  ;;  %v5080_v60 = vld [vmem:[#allocation2 + $0x180] sm:$0xff] }
 0x33d   : > { %2598 = vst.msk [vmem:[#allocation3 + $0x8] sm:$0xff] %vm993_vm2, %v2503_v37  ;;  %2924 = vrot.lane.b32.xlu1 %v2857_v57, %s5138_s21  ;;  %2780 = vrot.lane.b32.xlu0 %v2689_v2, %s5135_s19  ;;  %v3108_v37 = vmax.f32 %v5080_v60, 0.0  ;;  %v3372_v57 = vmax.f32 %v7241_v7, 0.0 }
 0x33f   : > { %v2505_v9 = vpop.permute.xlu1 %2504  ;;  %v2507_v49 = vpop.permute.xlu0 %2506 }
 0x340   : > { %2599 = vst.msk [vmem:[#allocation3 + $0x20] sm:$0xff] %vm993_vm2, %v2505_v9  ;;  %2600 = vst.msk [vmem:[#allocation3 + $0x38] sm:$0xff] %vm993_vm2, %v2507_v49  ;;  %v7248_v9 = vld [vmem:[#allocation2 + $0x52] sm:$0xff] }
 0x341   : > { %2972 = vrot.lane.b32.xlu1 %v2881_v41, %s5138_s21  ;;  %3150 = vrot.lane.b32.xlu0 %v3083_v20, %s5136_s20  ;;  %v2667_v49 = vmax.f32 %v7248_v9, 0.0 }
 0x343   : > { %v2509_v4 = vpop.permute.xlu1 %2508  ;;  %v2511_v45 = vpop.permute.xlu0 %2510 }
 0x344   : > { %2601 = vst.msk [vmem:[#allocation3 + $0x50] sm:$0xff] %vm993_vm2, %v2509_v4  ;;  %2602 = vst.msk [vmem:[#allocation3 + $0x68] sm:$0xff] %vm993_vm2, %v2511_v45  ;;  %v8382_v4 = vmax.f32 %v6726_v12, 0.0  ;;  %v5081_v12 = vld [vmem:[#allocation2 + $0x68] sm:$0xff] }
 0x345   : > { %3198 = vrot.lane.b32.xlu1 %v3107_v51, %s5136_s20  ;;  %3438 = vrot.lane.b32.xlu0 %v8380_v36, %s5138_s21  ;;  %v7255_v51 = vld [vmem:[#allocation2 + $0x172] sm:$0xff] }
 0x346   : > { %v2691_v45 = vmax.f32 %v7255_v51, 0.0 }
 0x347   : > { %v2513_v62 = vpop.permute.xlu1 %2512  ;;  %v2515_v15 = vpop.permute.xlu0 %2514 }
 0x348   : > { %2603 = vst.msk [vmem:[#allocation3 + $0x80] sm:$0xff] %vm993_vm2, %v2513_v62  ;;  %2604 = vst.msk [vmem:[#allocation3 + $0x98] sm:$0xff] %vm993_vm2, %v2515_v15  ;;  %v2859_v15 = vmul.f32 %v7248_v9, %v8329_v35 }
 0x349   : > { %3486 = vrot.lane.b32.xlu1 %v8381_v46, %s5138_s21  ;;  %2734 = vrot.lane.b32.xlu0 %v2666_v28, %s5135_s19  ;;  %v3085_v46 = vmax.f32 %v5081_v12, 0.0 }
 0x34b   : > { %v2517_v42 = vpop.permute.xlu1 %2516  ;;  %v2519_v25 = vpop.permute.xlu0 %2518 }
 0x34c   : > { %2605 = vst.msk [vmem:[#allocation3 + $0xb0] sm:$0xff] %vm993_vm2, %v2517_v42  ;;  %2606 = vst.msk [vmem:[#allocation3 + $0xc8] sm:$0xff] %vm993_vm2, %v2519_v25 }
 0x34d   : > { %2926 = vrot.lane.b32.xlu1 %v2858_v27, %s5138_s21  ;;  %2782 = vrot.lane.b32.xlu0 %v2690_v19, %s5135_s19  ;;  %v2883_v27 = vmul.f32 %v7255_v51, %v8371_v1  ;;  %v5094_v51 = vld [vmem:[#allocation2 + $0xb0] sm:$0xff] }
 0x34f   : > { %v2521_v55 = vpop.permute.xlu1 %2520  ;;  %v2523_v53 = vpop.permute.xlu0 %2522 }
 0x350   : > { %2607 = vst.msk [vmem:[#allocation3 + $0xe0] sm:$0xff] %vm993_vm2, %v2521_v55  ;;  %2608 = vst.msk [vmem:[#allocation3 + $0xf8] sm:$0xff] %vm993_vm2, %v2523_v53  ;;  %v3373_v53 = vmax.f32 %v7276_v14, 0.0 }
 0x351   : > { %2974 = vrot.lane.b32.xlu1 %v2882_v18, %s5138_s21  ;;  %3152 = vrot.lane.b32.xlu0 %v3084_v29, %s5136_s20  ;;  %v5082_v29 = vld [vmem:[#allocation2 + $0x188] sm:$0xff] }
 0x352   : > { %v3109_v55 = vmax.f32 %v5082_v29, 0.0  ;;  %v5084_v29 = vld [vmem:[#allocation2 + $0x198] sm:$0xff] }
 0x353   : > { %v2525_v58 = vpop.permute.xlu1 %2524  ;;  %v2527_v20 = vpop.permute.xlu0 %2526 }
 0x354   : > { %2609 = vst.msk [vmem:[#allocation3 + $0x110] sm:$0xff] %vm993_vm2, %v2525_v58  ;;  %2610 = vst.msk [vmem:[#allocation3 + $0x128] sm:$0xff] %vm993_vm2, %v2527_v20 }
 0x355   : > { %3200 = vrot.lane.b32.xlu1 %v3108_v37, %s5136_s20  ;;  %3440 = vrot.lane.b32.xlu0 %v3372_v57, %s5138_s21  ;;  %v7283_v37 = vld [vmem:[#allocation2 + $0x62] sm:$0xff] }
 0x356   : > { %v2668_v57 = vmax.f32 %v7283_v37, 0.0 }
 0x357   : > { %v2529_v41 = vpop.permute.xlu1 %2528  ;;  %v2531_v44 = vpop.permute.xlu0 %2530 }
 0x358   : > { %2611 = vst.msk [vmem:[#allocation3 + $0x140] sm:$0xff] %vm993_vm2, %v2529_v41  ;;  %2612 = vst.msk [vmem:[#allocation3 + $0x158] sm:$0xff] %vm993_vm2, %v2531_v44  ;;  %v7290_v41 = vld [vmem:[#allocation2 + $0x182] sm:$0xff]  ;;  %v8383_v44 = vmax.f32 %v6738_v22, 0.0  ;;  %v5083_v22 = vld [vmem:[#allocation2 + $0x78] sm:$0xff] }
 0x359   : > { %3488 = vrot.lane.b32.xlu1 %v8382_v4, %s5138_s21  ;;  %2736 = vrot.lane.b32.xlu0 %v2667_v49, %s5135_s19  ;;  %v2692_v4 = vmax.f32 %v7290_v41, 0.0  ;;  %v3086_v12 = vmax.f32 %v5083_v22, 0.0  ;;  %v7325_v22 = vld [vmem:[#allocation2 + $0x18a] sm:$0xff] }
 0x35b   : > { %v2533_v36 = vpop.permute.xlu1 %2532  ;;  %v2535_v62 = vpop.permute.xlu0 %2534 }
 0x35c   : > { %2613 = vst.msk [vmem:[#allocation3 + $0x170] sm:$0xff] %vm993_vm2, %v2533_v36  ;;  %2614 = vst.msk [vmem:[#allocation3 + $0x188] sm:$0xff] %vm993_vm2, %v2535_v62 }
 0x35d   : > { %2928 = vrot.lane.b32.xlu1 %v2859_v15, %s5138_s21  ;;  %2784 = vrot.lane.b32.xlu0 %v2691_v45, %s5135_s19  ;;  %v2860_v15 = vmul.f32 %v7283_v37, %v8330_v61 }
 0x35f   : > { %v2537_v42 = vpop.permute.xlu1 %2536  ;;  %v2539_v25 = vpop.permute.xlu0 %2538 }
 0x360   : > { %2615 = vst.msk [vmem:[#allocation3 + $0x1a0] sm:$0xff] %vm993_vm2, %v2537_v42  ;;  %2616 = vst.msk [vmem:[#allocation3 + $0x1b8] sm:$0xff] %vm993_vm2, %v2539_v25  ;;  %v2884_v25 = vmul.f32 %v7290_v41, %v8372_v10  ;;  %v5095_v41 = vld [vmem:[#allocation2 + $0xc0] sm:$0xff] }
 0x361   : > { %2976 = vrot.lane.b32.xlu1 %v2883_v27, %s5138_s21  ;;  %3154 = vrot.lane.b32.xlu0 %v3085_v46, %s5136_s20  ;;  %v7311_v27 = vld [vmem:[#allocation2 + $0x79] sm:$0xff] }
 0x363   : > { %v2541_v18 = vpop.permute.xlu1 %2540  ;;  %v2543_v60 = vpop.permute.xlu0 %2542 }
 0x364   : > { %2617 = vst.msk [vmem:[#allocation3 + $0x1d0] sm:$0xff] %vm993_vm2, %v2541_v18  ;;  %2618 = vst.msk [vmem:[#allocation3 + $0x1e8] sm:$0xff] %vm993_vm2, %v2543_v60 }
 0x365   : > { %3202 = vrot.lane.b32.xlu1 %v3109_v55, %s5136_s20  ;;  %3442 = vrot.lane.b32.xlu0 %v3373_v53, %s5138_s21  ;;  %v3110_v55 = vmax.f32 %v5084_v29, 0.0  ;;  %v3374_v53 = vmax.f32 %v7311_v27, 0.0  ;;  %v5085_v29 = vld [vmem:[#allocation2 + $0x80] sm:$0xff] }
 0x367   : > { %v2545_v58 = vpop.permute.xlu1 %2544  ;;  %v2547_v20 = vpop.permute.xlu0 %2546 }
 0x368   : > { %2619 = vst.msk [vmem:[#allocation3 + $0x200] sm:$0xff] %vm993_vm2, %v2545_v58  ;;  %2620 = vst.msk [vmem:[#allocation3 + $0x218] sm:$0xff] %vm993_vm2, %v2547_v20  ;;  %v3366_v58 = vld [vmem:[#allocation2 + $0x199] sm:$0xff]  ;;  %v7318_v20 = vld [vmem:[#allocation2 + $0x6a] sm:$0xff] }
 0x369   : > { %3490 = vrot.lane.b32.xlu1 %v8383_v44, %s5138_s21  ;;  %2738 = vrot.lane.b32.xlu0 %v2668_v57, %s5135_s19  ;;  %v3398_v44 = vmax.f32 %v3366_v58, 0.0  ;;  %v7344_v58 = vld [vmem:[#allocation2 + $0x81] sm:$0xff] }
 0x36b   : > { %v2549_v36 = vpop.permute.xlu1 %2548  ;;  %v2551_v62 = vpop.permute.xlu0 %2550 }
 0x36c   : > { %2621 = vst.msk [vmem:[#allocation3 + $0x230] sm:$0xff] %vm993_vm2, %v2549_v36  ;;  %2622 = vst.msk [vmem:[#allocation3 + $0x248] sm:$0xff] %vm993_vm2, %v2551_v62  ;;  %v2669_v36 = vmax.f32 %v7318_v20, 0.0 }
 0x36d   : > { %2930 = vrot.lane.b32.xlu1 %v2860_v15, %s5138_s21  ;;  %2786 = vrot.lane.b32.xlu0 %v2692_v4, %s5135_s19 }
 0x36f   : > { %v2553_v46 = vpop.permute.xlu1 %2552  ;;  %v2555_v42 = vpop.permute.xlu0 %2554 }
 0x370   : > { %2623 = vst.msk [vmem:[#allocation3 + $0x260] sm:$0xff] %vm993_vm2, %v2553_v46  ;;  %2624 = vst.msk [vmem:[#allocation3 + $0x278] sm:$0xff] %vm993_vm2, %v2555_v42 }
 0x371   : > { %2978 = vrot.lane.b32.xlu1 %v2884_v25, %s5138_s21  ;;  %3156 = vrot.lane.b32.xlu0 %v3086_v12, %s5136_s20  ;;  %v2693_v12 = vmax.f32 %v7325_v22, 0.0  ;;  %v2861_v25 = vmul.f32 %v7318_v20, %v5446_v32 }
 0x373   : > { %v2557_v18 = vpop.permute.xlu1 %2556  ;;  %v2559_v60 = vpop.permute.xlu0 %2558 }
 0x374   : > { %2625 = vst.msk [vmem:[#allocation3 + $0x290] sm:$0xff] %vm993_vm2, %v2557_v18  ;;  %2626 = vst.msk [vmem:[#allocation3 + $0x2a8] sm:$0xff] %vm993_vm2, %v2559_v60  ;;  %v2885_v60 = vmul.f32 %v7325_v22, %v8373_v50  ;;  %v5096_v22 = vld [vmem:[#allocation2 + $0xc8] sm:$0xff] }
 0x375   : > { %3204 = vrot.lane.b32.xlu1 %v3110_v55, %s5136_s20  ;;  %3444 = vrot.lane.b32.xlu0 %v3374_v53, %s5138_s21  ;;  %v3087_v55 = vmax.f32 %v5085_v29, 0.0  ;;  %v7351_v29 = vld [vmem:[#allocation2 + $0x7a] sm:$0xff] }
 0x377   : > { %v2561_v62 = vpop.permute.xlu1 %2560  ;;  %v2563_v15 = vpop.permute.xlu0 %2562 }
 0x378   : > { %2627 = vst.msk [vmem:[#allocation3 + $0x2c0] sm:$0xff] %vm993_vm2, %v2561_v62  ;;  %2628 = vst.msk [vmem:[#allocation3 + $0x2d8] sm:$0xff] %vm993_vm2, %v2563_v15  ;;  %v3375_v15 = vmax.f32 %v7344_v58, 0.0 }
 0x379   : > { %3492 = vrot.lane.b32.xlu1 %v3398_v44, %s5138_s21  ;;  %2740 = vrot.lane.b32.xlu0 %v2669_v36, %s5135_s19  ;;  %v5086_v44 = vld [vmem:[#allocation2 + $0x1a0] sm:$0xff] }
 0x37a   : > { %v3111_v62 = vmax.f32 %v5086_v44, 0.0  ;;  %v4168_v44 = vld [vmem:[%s8199_s1 + $0x100] sm:$0xff] }
 0x37b   : > { %v2565_v46 = vpop.permute.xlu1 %2564  ;;  %v2727_v42 = vpop.permute.xlu0 %2726 }
 0x37c   : > { %2629 = vst.msk [vmem:[#allocation3 + $0x2f0] sm:$0xff] %vm993_vm2, %v2565_v46 }
 0x37d   : > { %2822 = vst.msk [vmem:[#allocation3] sm:$0xff] %vm2020_vm6, %v2727_v42  ;;  %2932 = vrot.lane.b32.xlu1 %v2861_v25, %s5138_s21  ;;  %2788 = vrot.lane.b32.xlu0 %v2693_v12, %s5135_s19  ;;  %v3367_v25 = vld [vmem:[#allocation2 + $0x1a1] sm:$0xff] }
 0x37f   : > { %v2729_v53 = vpop.permute.xlu1 %2728  ;;  %v2731_v18 = vpop.permute.xlu0 %2730 }
 0x380   : > { %2823 = vst.msk [vmem:[#allocation3 + $0x18] sm:$0xff] %vm2020_vm6, %v2729_v53  ;;  %2824 = vst.msk [vmem:[#allocation3 + $0x30] sm:$0xff] %vm2020_vm6, %v2731_v18  ;;  %v8285_v53 = vmax.f32 %v7351_v29, 0.0 }
 0x381   : > { %2980 = vrot.lane.b32.xlu1 %v2885_v60, %s5138_s21  ;;  %3158 = vrot.lane.b32.xlu0 %v3087_v55, %s5136_s20  ;;  %v3399_v55 = vmax.f32 %v3367_v25, 0.0 }
 0x383   : > { %v2733_v46 = vpop.permute.xlu1 %2732  ;;  %v2919_v42 = vpop.permute.xlu0 %2918 }
 0x384   : > { %2825 = vst.msk [vmem:[#allocation3 + $0x48] sm:$0xff] %vm2020_vm6, %v2733_v46 }
 0x385   : > { %3015 = vst.msk [vmem:[#allocation3 + $0x8] sm:$0xff] %vm3014_vm8, %v2919_v42  ;;  %3206 = vrot.lane.b32.xlu1 %v3111_v62, %s5136_s20  ;;  %3446 = vrot.lane.b32.xlu0 %v3375_v15, %s5138_s21  ;;  %v5087_v62 = vld [vmem:[#allocation2 + $0x90] sm:$0xff] }
 0x386   : > { %3816 = vst.msk [vmem:[#allocation3 + $0x8] sm:$0xff] %vm199_vm0, %v2664_v21  ;;  %v4169_v21 = vld [vmem:[%s8199_s1 + $0x108] sm:$0xff]  ;;  %v3088_v15 = vmax.f32 %v5087_v62, 0.0 }
 0x387   : > { %v2775_v18 = vpop.permute.xlu1 %2774  ;;  %v2967_v60 = vpop.permute.xlu0 %2966  ;;  %v5007_v46 = vpack.c.bf16 %v4169_v21, %v4168_v44  ;;  %v5088_v21 = vld [vmem:[#allocation2 + $0x31] sm:$0xff] }
 0x388   : > { %2846 = vst.msk [vmem:[#allocation3 + $0x240] sm:$0xff] %vm2020_vm6, %v2775_v18  ;;  %v2862_v18 = vmul.f32 %v7351_v29, %v5462_v39  ;;  %v3560_v62 = vmul.f32 %v5088_v21, %v8319_v23 }
 0x389   : > { %3039 = vst.msk [vmem:[#allocation3 + $0x248] sm:$0xff] %vm3014_vm8, %v2967_v60  ;;  %3494 = vrot.lane.b32.xlu1 %v3399_v55, %s5138_s21  ;;  %2742 = vrot.lane.b32.xlu0 %v8285_v53, %s5135_s19  ;;  %v3376_v55 = vmax.f32 %v7378_v33, 0.0  ;;  %v3848_v53 = vmul.f32 %v7072_v40, %v8319_v23 }
 0x38a   : > { %3840 = vst.msk [vmem:[#allocation3 + $0x248] sm:$0xff] %vm199_vm0, %v2688_v31  ;;  %5008 = vmatprep.subr.bf16.mxu1 %v5007_v46 }
 0x38b   : > { %v3145_v42 = vpop.permute.xlu1 %3144  ;;  %v3193_v25 = vpop.permute.xlu0 %3192 }
 0x38c   : > { %3240 = vst.msk [vmem:[#allocation3] sm:$0xff] %vm2437_vm7, %v3145_v42  ;;  %3264 = vst.msk [vmem:[#allocation3 + $0x240] sm:$0xff] %vm2437_vm7, %v3193_v25 }
 0x38d   : > { %v4041_v31 = vld [vmem:[#allocation3 + $0x8] sm:$0xff]  ;;  %2934 = vrot.lane.b32.xlu1 %v2862_v18, %s5138_s21  ;;  %3160 = vrot.lane.b32.xlu0 %v3088_v15, %s5136_s20 }
 0x38e   : > { %4342 = vmatprep.mubr.f32.mxu0 %v4041_v31  ;;  %v5089_v18 = vld [vmem:[#allocation2 + $0x39] sm:$0xff] }
 0x38f   : > { %v3433_v60 = vpop.permute.xlu1 %3432  ;;  %v3481_v44 = vpop.permute.xlu0 %3480  ;;  %v3561_v31 = vmul.f32 %v5089_v18, %v8321_v24 }
 0x390   : > { %3528 = vst.msk [vmem:[#allocation3] sm:$0xff] %vm3014_vm8, %v3433_v60  ;;  %3552 = vst.msk [vmem:[#allocation3 + $0x240] sm:$0xff] %vm3014_vm8, %v3481_v44  ;;  %v7393_v60 = vld [vmem:[#allocation2 + $0x82] sm:$0xff]  ;;  %v4170_v44 = vld [vmem:[%s8199_s1 + $0x110] sm:$0xff] }
 0x391   : > { %v4113_v42 = vld [vmem:[#allocation3 + $0x248] sm:$0xff]  ;;  %3624 = vrot.lane.b32.xlu1 %v3560_v62, %s5131_s14  ;;  %3448 = vrot.lane.b32.xlu0 %v3376_v55, %s5138_s21  ;;  %v2671_v23 = vmax.f32 %v7393_v60, 0.0 }
 0x392   : > { %4462 = vmatprep.mubr.f32.mxu1 %v4113_v42  ;;  %v4171_v55 = vld [vmem:[%s8199_s1 + $0x118] sm:$0xff]  ;;  %v3849_v42 = vmul.f32 %v7089_v30, %v8321_v24 }
 0x393   : > { %v2921_v25 = vpop.permute.xlu1 %2920  ;;  %v2777_v15 = vpop.permute.xlu0 %2776  ;;  %v5090_v24 = vld [vmem:[#allocation2 + $0x98] sm:$0xff] }
 0x394   : > { %3016 = vst.msk [vmem:[#allocation3 + $0x20] sm:$0xff] %vm3014_vm8, %v2921_v25  ;;  %v3089_v30 = vmax.f32 %v5090_v24, 0.0 }
 0x395   : > { %2847 = vst.msk [vmem:[#allocation3 + $0x258] sm:$0xff] %vm2020_vm6, %v2777_v15  ;;  %3626 = vrot.lane.b32.xlu1 %v3561_v31, %s5131_s14  ;;  %3912 = vrot.lane.b32.xlu0 %v3848_v53, %s5132_s7  ;;  %v5011_v15 = vpack.c.bf16 %v4171_v55, %v4170_v44  ;;  %v4173_v53 = vld [vmem:[%s8199_s1 + $0x128] sm:$0xff]  ;;  %v2863_v44 = vmul.f32 %v7393_v60, %v5460_v38 }
 0x396   : > { %3817 = vst.msk [vmem:[#allocation3 + $0x20] sm:$0xff] %vm199_vm0, %v2665_v5  ;;  %v4172_v5 = vld [vmem:[%s8199_s1 + $0x120] sm:$0xff] }
 0x397   : > { %v2969_v40 = vpop.permute.xlu1 %2968  ;;  %v3147_v21 = vpop.permute.xlu0 %3146  ;;  %v4040_v62 = vld [vmem:[#allocation3] sm:$0xff]  ;;  %v5015_v55 = vpack.c.bf16 %v4173_v53, %v4172_v5 }
 0x398   : > { %v4112_v25 = vld [vmem:[#allocation3 + $0x240] sm:$0xff]  ;;  %3040 = vst.msk [vmem:[#allocation3 + $0x260] sm:$0xff] %vm3014_vm8, %v2969_v40  ;;  %4343 = vmatmul.mubr.f32.vlgmr.msra.gmra.mrb[0].mxu0 %v4040_v62 }
 0x399   : > { %3241 = vst.msk [vmem:[#allocation3 + $0x18] sm:$0xff] %vm2437_vm7, %v3147_v21  ;;  %4463 = vmatmul.mubr.f32.vlgmr.msra.gmra.mrb[0].mxu1 %v4112_v25  ;;  %3914 = vrot.lane.b32.xlu1 %v3849_v42, %s5132_s7  ;;  %v5091_v62 = vld [vmem:[#allocation2 + $0x49] sm:$0xff]  ;;  %v5092_v53 = vld [vmem:[#allocation2 + $0x51] sm:$0xff] }
 0x39a   : > { %3841 = vst.msk [vmem:[#allocation3 + $0x260] sm:$0xff] %vm199_vm0, %v2689_v2  ;;  %2744 = vrot.lane.b32.xlu0 %v2671_v23, %s5135_s19  ;;  %5010 = vmatpush3.bf16.msra.mxu1 %v5007_v46  ;;  %v3377_v46 = vmax.f32 %v7428_v48, 0.0  ;;  %v3562_v42 = vmul.f32 %v5091_v62, %v8323_v63  ;;  %v3563_v24 = vmul.f32 %v5092_v53, %v8327_v26 }
 0x39b   : > { %v3195_v18 = vpop.permute.xlu1 %3194  ;;  %v3435_v31 = vpop.permute.xlu0 %3434  ;;  %5012 = vmatprep.subr.bf16.mxu1 %v5011_v15 }
 0x39c   : > { %3265 = vst.msk [vmem:[#allocation3 + $0x258] sm:$0xff] %vm2437_vm7, %v3195_v18 }
 0x39d   : > { %3529 = vst.msk [vmem:[#allocation3 + $0x18] sm:$0xff] %vm3014_vm8, %v3435_v31  ;;  %v4044_v2 = vld [vmem:[#allocation3 + $0x20] sm:$0xff]  ;;  %2936 = vrot.lane.b32.xlu1 %v2863_v44, %s5138_s21 }
 0x39e   : > { %3162 = vrot.lane.b32.xlu0 %v3089_v30, %s5136_s20  ;;  %4347 = vmatprep.mubr.f32.mxu0 %v4044_v2  ;;  %v3850_v30 = vmul.f32 %v7211_v52, %v8323_v63 }
 0x39f   : > { %5014 = vmatpush3.bf16.msra.mxu1 %v5011_v15  ;;  %v3483_v40 = vpop.permute.xlu1 %3482  ;;  %v2923_v21 = vpop.permute.xlu0 %2922 }
 0x3a0   : > { %5016 = vmatprep.subr.bf16.mxu1 %v5015_v55  ;;  %3553 = vst.msk [vmem:[#allocation3 + $0x258] sm:$0xff] %vm3014_vm8, %v3483_v40  ;;  %3017 = vst.msk [vmem:[#allocation3 + $0x38] sm:$0xff] %vm3014_vm8, %v2923_v21  ;;  %v7466_v21 = vld [vmem:[#allocation2 + $0xa9] sm:$0xff] }
 0x3a1   : > { %v4116_v25 = vld [vmem:[#allocation3 + $0x260] sm:$0xff]  ;;  %3818 = vst.msk [vmem:[#allocation3 + $0x38] sm:$0xff] %vm199_vm0, %v2666_v28  ;;  %3628 = vrot.lane.b32.xlu1 %v3562_v42, %s5131_s14  ;;  %v3378_v42 = vmax.f32 %v7466_v21, 0.0 }
 0x3a2   : > { %3450 = vrot.lane.b32.xlu0 %v3377_v46, %s5138_s21  ;;  %4467 = vmatprep.mubr.f32.mxu1 %v4116_v25  ;;  %v7446_v28 = vld [vmem:[#allocation2 + $0x92] sm:$0xff] }
 0x3a3   : > { %5018 = vmatpush3.bf16.msra.mxu1 %v5015_v55  ;;  %v2779_v15 = vpop.permute.xlu1 %2778  ;;  %v2971_v5 = vpop.permute.xlu0 %2970  ;;  %v2672_v31 = vmax.f32 %v7446_v28, 0.0  ;;  %v3851_v55 = vmul.f32 %v7248_v9, %v8327_v26  ;;  %v2864_v26 = vmul.f32 %v7446_v28, %v8332_v59  ;;  %v7486_v9 = vld [vmem:[#allocation2 + $0x9a] sm:$0xff] }
 0x3a4   : > { %v4043_v18 = vld [vmem:[#allocation3 + $0x18] sm:$0xff]  ;;  %2848 = vst.msk [vmem:[#allocation3 + $0x270] sm:$0xff] %vm2020_vm6, %v2779_v15 }
 0x3a5   : > { %3041 = vst.msk [vmem:[#allocation3 + $0x278] sm:$0xff] %vm3014_vm8, %v2971_v5  ;;  %4348 = vmatmul.mubr.f32.gmra.mrb[2].mxu0 %v4043_v18  ;;  %3630 = vrot.lane.b32.xlu1 %v3563_v24, %s5131_s14  ;;  %v3564_v5 = vmul.f32 %v7241_v7, %v8325_v8  ;;  %v3565_v18 = vmul.f32 %v7276_v14, %v8329_v35 }
 0x3a6   : > { %3842 = vst.msk [vmem:[#allocation3 + $0x278] sm:$0xff] %vm199_vm0, %v2690_v19  ;;  %3916 = vrot.lane.b32.xlu0 %v3850_v30, %s5132_s7  ;;  %v5093_v19 = vld [vmem:[#allocation2 + $0xa8] sm:$0xff]  ;;  %v3852_v7 = vmul.f32 %v7283_v37, %v8325_v8 }
 0x3a7   : > { %v3149_v44 = vpop.permute.xlu1 %3148  ;;  %v3197_v63 = vpop.permute.xlu0 %3196  ;;  %v4115_v52 = vld [vmem:[#allocation3 + $0x258] sm:$0xff]  ;;  %v3090_v2 = vmax.f32 %v5093_v19, 0.0  ;;  %v2865_v19 = vmul.f32 %v7486_v9, %v8334_v47 }
 0x3a8   : > { %3242 = vst.msk [vmem:[#allocation3 + $0x30] sm:$0xff] %vm2437_vm7, %v3149_v44  ;;  %3266 = vst.msk [vmem:[#allocation3 + $0x270] sm:$0xff] %vm2437_vm7, %v3197_v63  ;;  %4468 = vmatmul.mubr.f32.gmra.mrb[2].mxu1 %v4115_v52  ;;  %v4047_v54 = vld [vmem:[#allocation3 + $0x38] sm:$0xff]  ;;  %v3853_v63 = vmul.f32 %v7318_v20, %v8329_v35  ;;  %v7506_v35 = vld [vmem:[#allocation2 + $0xb1] sm:$0xff] }
 0x3a9   : > { %3918 = vrot.lane.b32.xlu1 %v3851_v55, %s5132_s7  ;;  %4352 = vmatprep.mubr.f32.mxu0 %v4047_v54  ;;  %v7526_v37 = vld [vmem:[#allocation2 + $0xaa] sm:$0xff]  ;;  %v7566_v20 = vld [vmem:[#allocation2 + $0xb2] sm:$0xff] }
 0x3aa   : > { %2746 = vrot.lane.b32.xlu0 %v2672_v31, %s5135_s19 }
 0x3ab   : > { %v3437_v46 = vpop.permute.xlu1 %3436  ;;  %v3485_v40 = vpop.permute.xlu0 %3484 }
 0x3ac   : > { %3530 = vst.msk [vmem:[#allocation3 + $0x30] sm:$0xff] %vm3014_vm8, %v3437_v46  ;;  %3554 = vst.msk [vmem:[#allocation3 + $0x270] sm:$0xff] %vm3014_vm8, %v3485_v40  ;;  %v3379_v46 = vmax.f32 %v7506_v35, 0.0 }
 0x3ad   : > { %v4119_v62 = vld [vmem:[#allocation3 + $0x278] sm:$0xff]  ;;  %2938 = vrot.lane.b32.xlu1 %v2864_v26, %s5138_s21 }
 0x3ae   : > { %3164 = vrot.lane.b32.xlu0 %v3090_v2, %s5136_s20  ;;  %4472 = vmatprep.mubr.f32.mxu1 %v4119_v62  ;;  %v3566_v62 = vmul.f32 %v7311_v27, %v8330_v61  ;;  %v3567_v27 = vmul.f32 %v7344_v58, %v5446_v32 }
 0x3af   : > { %v2925_v25 = vpop.permute.xlu1 %2924  ;;  %v2781_v15 = vpop.permute.xlu0 %2780 }
 0x3b0   : > { %3018 = vst.msk [vmem:[#allocation3 + $0x50] sm:$0xff] %vm3014_vm8, %v2925_v25 }
 0x3b1   : > { %2849 = vst.msk [vmem:[#allocation3 + $0x288] sm:$0xff] %vm2020_vm6, %v2781_v15  ;;  %3632 = vrot.lane.b32.xlu1 %v3564_v5, %s5131_s14 }
 0x3b2   : > { %3819 = vst.msk [vmem:[#allocation3 + $0x50] sm:$0xff] %vm199_vm0, %v2667_v49  ;;  %3452 = vrot.lane.b32.xlu0 %v3378_v42, %s5138_s21  ;;  %v2673_v49 = vmax.f32 %v7486_v9, 0.0 }
 0x3b3   : > { %v2973_v53 = vpop.permute.xlu1 %2972  ;;  %v3151_v24 = vpop.permute.xlu0 %3150  ;;  %v4046_v30 = vld [vmem:[#allocation3 + $0x30] sm:$0xff] }
 0x3b4   : > { %v4118_v44 = vld [vmem:[#allocation3 + $0x270] sm:$0xff]  ;;  %3042 = vst.msk [vmem:[#allocation3 + $0x290] sm:$0xff] %vm3014_vm8, %v2973_v53  ;;  %4353 = vmatmul.mubr.f32.gmra.mrb[4].mxu0 %v4046_v30  ;;  %v3854_v53 = vmul.f32 %v7351_v29, %v8330_v61  ;;  %v3855_v61 = vmul.f32 %v7393_v60, %v5446_v32  ;;  %v7647_v60 = vld [vmem:[#allocation2 + $0xca] sm:$0xff] }
 0x3b5   : > { %3243 = vst.msk [vmem:[#allocation3 + $0x48] sm:$0xff] %vm2437_vm7, %v3151_v24  ;;  %4473 = vmatmul.mubr.f32.gmra.mrb[4].mxu1 %v4118_v44  ;;  %3634 = vrot.lane.b32.xlu1 %v3565_v18, %s5131_s14  ;;  %v2866_v44 = vmul.f32 %v7526_v37, %v8335_v16  ;;  %v7546_v32 = vld [vmem:[#allocation2 + $0xc1] sm:$0xff] }
 0x3b6   : > { %3843 = vst.msk [vmem:[#allocation3 + $0x290] sm:$0xff] %vm199_vm0, %v2691_v45  ;;  %3920 = vrot.lane.b32.xlu0 %v3852_v7, %s5132_s7  ;;  %v3091_v45 = vmax.f32 %v5094_v51, 0.0  ;;  %v3568_v51 = vmul.f32 %v7378_v33, %v5462_v39  ;;  %v3569_v33 = vmul.f32 %v7428_v48, %v5460_v38 }
 0x3b7   : > { %v3199_v8 = vpop.permute.xlu1 %3198  ;;  %v3439_v14 = vpop.permute.xlu0 %3438 }
 0x3b8   : > { %3267 = vst.msk [vmem:[#allocation3 + $0x288] sm:$0xff] %vm2437_vm7, %v3199_v8 }
 0x3b9   : > { %3531 = vst.msk [vmem:[#allocation3 + $0x48] sm:$0xff] %vm3014_vm8, %v3439_v14  ;;  %v4050_v52 = vld [vmem:[#allocation3 + $0x50] sm:$0xff]  ;;  %3922 = vrot.lane.b32.xlu1 %v3853_v63, %s5132_s7  ;;  %v3380_v14 = vmax.f32 %v7546_v32, 0.0 }
 0x3ba   : > { %2748 = vrot.lane.b32.xlu0 %v2673_v49, %s5135_s19  ;;  %4357 = vmatprep.mubr.f32.mxu0 %v4050_v52 }
 0x3bb   : > { %v3487_v55 = vpop.permute.xlu1 %3486  ;;  %v2735_v54 = vpop.permute.xlu0 %2734 }
 0x3bc   : > { %3555 = vst.msk [vmem:[#allocation3 + $0x288] sm:$0xff] %vm3014_vm8, %v3487_v55 }
 0x3bd   : > { %2826 = vst.msk [vmem:[#allocation3 + $0x60] sm:$0xff] %vm2020_vm6, %v2735_v54  ;;  %v4122_v2 = vld [vmem:[#allocation3 + $0x290] sm:$0xff]  ;;  %2940 = vrot.lane.b32.xlu1 %v2865_v19, %s5138_s21 }
 0x3be   : > { %3166 = vrot.lane.b32.xlu0 %v3091_v45, %s5136_s20  ;;  %4477 = vmatprep.mubr.f32.mxu1 %v4122_v2  ;;  %v3856_v2 = vmul.f32 %v7446_v28, %v5462_v39  ;;  %v3857_v39 = vmul.f32 %v7486_v9, %v5460_v38  ;;  %v7586_v38 = vld [vmem:[#allocation2 + $0xc9] sm:$0xff]  ;;  %v7718_v9 = vld [vmem:[#allocation2 + $0xfa] sm:$0xff] }
 0x3bf   : > { %v2927_v40 = vpop.permute.xlu1 %2926  ;;  %v2783_v26 = vpop.permute.xlu0 %2782  ;;  %v7682_v28 = vld [vmem:[#allocation2 + $0xe2] sm:$0xff] }
 0x3c0   : > { %v4049_v42 = vld [vmem:[#allocation3 + $0x48] sm:$0xff]  ;;  %3019 = vst.msk [vmem:[#allocation3 + $0x68] sm:$0xff] %vm3014_vm8, %v2927_v40 }
 0x3c1   : > { %2850 = vst.msk [vmem:[#allocation3 + $0x2a0] sm:$0xff] %vm2020_vm6, %v2783_v26  ;;  %4358 = vmatmul.mubr.f32.gmra.mrb[6].mxu0 %v4049_v42  ;;  %3636 = vrot.lane.b32.xlu1 %v3566_v62, %s5131_s14  ;;  %v2867_v42 = vmul.f32 %v7566_v20, %v8336_v3 }
 0x3c2   : > { %3820 = vst.msk [vmem:[#allocation3 + $0x68] sm:$0xff] %vm199_vm0, %v2668_v57  ;;  %3454 = vrot.lane.b32.xlu0 %v3379_v46, %s5138_s21  ;;  %v2674_v57 = vmax.f32 %v7526_v37, 0.0 }
 0x3c3   : > { %v2975_v25 = vpop.permute.xlu1 %2974  ;;  %v3153_v15 = vpop.permute.xlu0 %3152  ;;  %v4121_v5 = vld [vmem:[#allocation3 + $0x288] sm:$0xff] }
 0x3c4   : > { %3043 = vst.msk [vmem:[#allocation3 + $0x2a8] sm:$0xff] %vm3014_vm8, %v2975_v25  ;;  %4478 = vmatmul.mubr.f32.gmra.mrb[6].mxu1 %v4121_v5 }
 0x3c5   : > { %3244 = vst.msk [vmem:[#allocation3 + $0x60] sm:$0xff] %vm2437_vm7, %v3153_v15  ;;  %3638 = vrot.lane.b32.xlu1 %v3567_v27, %s5131_s14  ;;  %v3381_v15 = vmax.f32 %v7586_v38, 0.0 }
 0x3c6   : > { %3844 = vst.msk [vmem:[#allocation3 + $0x2a8] sm:$0xff] %vm199_vm0, %v2692_v4  ;;  %3924 = vrot.lane.b32.xlu0 %v3854_v53, %s5132_s7  ;;  %v3092_v4 = vmax.f32 %v5095_v41, 0.0  ;;  %v3570_v53 = vmul.f32 %v7466_v21, %v8332_v59 }
 0x3c7   : > { %v3201_v58 = vpop.permute.xlu1 %3200  ;;  %v3441_v24 = vpop.permute.xlu0 %3440 }
 0x3c8   : > { %3268 = vst.msk [vmem:[#allocation3 + $0x2a0] sm:$0xff] %vm2437_vm7, %v3201_v58 }
 0x3c9   : > { %3532 = vst.msk [vmem:[#allocation3 + $0x60] sm:$0xff] %vm3014_vm8, %v3441_v24  ;;  %v4053_v30 = vld [vmem:[#allocation3 + $0x68] sm:$0xff]  ;;  %3926 = vrot.lane.b32.xlu1 %v3855_v61, %s5132_s7  ;;  %v8384_v61 = vmax.f32 %v7351_v29, 0.0  ;;  %v7609_v29 = vld [vmem:[#allocation2 + $0xc2] sm:$0xff] }
 0x3ca   : > { %2750 = vrot.lane.b32.xlu0 %v2674_v57, %s5135_s19  ;;  %4362 = vmatprep.mubr.f32.mxu0 %v4053_v30  ;;  %v7595_v24 = vld [vmem:[#allocation2 + $0x19a] sm:$0xff] }
 0x3cb   : > { %v3489_v18 = vpop.permute.xlu1 %3488  ;;  %v2737_v7 = vpop.permute.xlu0 %2736  ;;  %v3814_v30 = vmax.f32 %v7595_v24, 0.0 }
 0x3cc   : > { %3556 = vst.msk [vmem:[#allocation3 + $0x2a0] sm:$0xff] %vm3014_vm8, %v3489_v18  ;;  %v3571_v18 = vmul.f32 %v7506_v35, %v8334_v47 }
 0x3cd   : > { %2827 = vst.msk [vmem:[#allocation3 + $0x78] sm:$0xff] %vm2020_vm6, %v2737_v7  ;;  %v4125_v8 = vld [vmem:[#allocation3 + $0x2a8] sm:$0xff]  ;;  %2942 = vrot.lane.b32.xlu1 %v2866_v44, %s5138_s21  ;;  %v3858_v7 = vmul.f32 %v7526_v37, %v8332_v59  ;;  %v2676_v44 = vmax.f32 %v7609_v29, 0.0  ;;  %v3859_v59 = vmul.f32 %v7566_v20, %v8334_v47 }
 0x3ce   : > { %3168 = vrot.lane.b32.xlu0 %v3092_v4, %s5136_s20  ;;  %4482 = vmatprep.mubr.f32.mxu1 %v4125_v8  ;;  %v3350_v47 = vld [vmem:[#allocation2 + $0xd9] sm:$0xff] }
 0x3cf   : > { %v2929_v63 = vpop.permute.xlu1 %2928  ;;  %v2785_v52 = vpop.permute.xlu0 %2784  ;;  %v7757_v37 = vld [vmem:[#allocation2 + $0x112] sm:$0xff] }
 0x3d0   : > { %v4052_v45 = vld [vmem:[#allocation3 + $0x60] sm:$0xff]  ;;  %3020 = vst.msk [vmem:[#allocation3 + $0x80] sm:$0xff] %vm3014_vm8, %v2929_v63  ;;  %v5097_v63 = vld [vmem:[#allocation2 + $0xd8] sm:$0xff] }
 0x3d1   : > { %2851 = vst.msk [vmem:[#allocation3 + $0x2b8] sm:$0xff] %vm2020_vm6, %v2785_v52  ;;  %4363 = vmatmul.mubr.f32.gmra.mrb[8].mxu0 %v4052_v45  ;;  %3640 = vrot.lane.b32.xlu1 %v3568_v51, %s5131_s14  ;;  %v3094_v52 = vmax.f32 %v5097_v63, 0.0 }
 0x3d2   : > { %3821 = vst.msk [vmem:[#allocation3 + $0x80] sm:$0xff] %vm199_vm0, %v2669_v36  ;;  %3456 = vrot.lane.b32.xlu0 %v3380_v14, %s5138_s21  ;;  %v2675_v36 = vmax.f32 %v7566_v20, 0.0  ;;  %v7799_v20 = vld [vmem:[#allocation2 + $0x12a] sm:$0xff] }
 0x3d3   : > { %v2977_v55 = vpop.permute.xlu1 %2976  ;;  %v3155_v54 = vpop.permute.xlu0 %3154  ;;  %v4124_v19 = vld [vmem:[#allocation3 + $0x2a0] sm:$0xff] }
 0x3d4   : > { %3044 = vst.msk [vmem:[#allocation3 + $0x2c0] sm:$0xff] %vm3014_vm8, %v2977_v55  ;;  %4483 = vmatmul.mubr.f32.gmra.mrb[8].mxu1 %v4124_v19  ;;  %v2868_v55 = vmul.f32 %v7609_v29, %v8337_v43  ;;  %v3382_v19 = vmax.f32 %v3350_v47, 0.0 }
 0x3d5   : > { %3245 = vst.msk [vmem:[#allocation3 + $0x78] sm:$0xff] %vm2437_vm7, %v3155_v54  ;;  %3642 = vrot.lane.b32.xlu1 %v3569_v33, %s5131_s14 }
 0x3d6   : > { %3845 = vst.msk [vmem:[#allocation3 + $0x2c0] sm:$0xff] %vm199_vm0, %v2693_v12  ;;  %3928 = vrot.lane.b32.xlu0 %v3856_v2, %s5132_s7  ;;  %v3093_v12 = vmax.f32 %v5096_v22, 0.0 }
 0x3d7   : > { %v3203_v48 = vpop.permute.xlu1 %3202  ;;  %v3443_v46 = vpop.permute.xlu0 %3442 }
 0x3d8   : > { %3269 = vst.msk [vmem:[#allocation3 + $0x2b8] sm:$0xff] %vm2437_vm7, %v3203_v48  ;;  %v3572_v48 = vmul.f32 %v7546_v32, %v8335_v16 }
 0x3d9   : > { %3533 = vst.msk [vmem:[#allocation3 + $0x78] sm:$0xff] %vm3014_vm8, %v3443_v46  ;;  %v4056_v40 = vld [vmem:[#allocation3 + $0x80] sm:$0xff]  ;;  %3930 = vrot.lane.b32.xlu1 %v3857_v39, %s5132_s7  ;;  %v7633_v39 = vld [vmem:[#allocation2 + $0x1a2] sm:$0xff] }
 0x3da   : > { %2752 = vrot.lane.b32.xlu0 %v2675_v36, %s5135_s19  ;;  %4367 = vmatprep.mubr.f32.mxu0 %v4056_v40  ;;  %v3815_v40 = vmax.f32 %v7633_v39, 0.0 }
 0x3db   : > { %v3491_v26 = vpop.permute.xlu1 %3490  ;;  %v2739_v62 = vpop.permute.xlu0 %2738 }
 0x3dc   : > { %3557 = vst.msk [vmem:[#allocation3 + $0x2b8] sm:$0xff] %vm3014_vm8, %v3491_v26  ;;  %v3573_v26 = vmul.f32 %v7586_v38, %v8336_v3 }
 0x3dd   : > { %2828 = vst.msk [vmem:[#allocation3 + $0x90] sm:$0xff] %vm2020_vm6, %v2739_v62  ;;  %v4128_v25 = vld [vmem:[#allocation3 + $0x2c0] sm:$0xff]  ;;  %2944 = vrot.lane.b32.xlu1 %v2867_v42, %s5138_s21  ;;  %v3860_v62 = vmul.f32 %v7609_v29, %v8335_v16  ;;  %v3861_v16 = vmul.f32 %v7647_v60, %v8336_v3  ;;  %v3351_v3 = vld [vmem:[#allocation2 + $0xe1] sm:$0xff] }
 0x3de   : > { %3170 = vrot.lane.b32.xlu0 %v3093_v12, %s5136_s20  ;;  %4487 = vmatprep.mubr.f32.mxu1 %v4128_v25  ;;  %v7842_v29 = vld [vmem:[#allocation2 + $0x142] sm:$0xff] }
 0x3df   : > { %v2931_v5 = vpop.permute.xlu1 %2930  ;;  %v2787_v27 = vpop.permute.xlu0 %2786 }
 0x3e0   : > { %v4055_v58 = vld [vmem:[#allocation3 + $0x78] sm:$0xff]  ;;  %3021 = vst.msk [vmem:[#allocation3 + $0x98] sm:$0xff] %vm3014_vm8, %v2931_v5 }
 0x3e1   : > { %2852 = vst.msk [vmem:[#allocation3 + $0x2d0] sm:$0xff] %vm2020_vm6, %v2787_v27  ;;  %4368 = vmatmul.mubr.f32.gmra.mrb[10].mxu0 %v4055_v58  ;;  %3644 = vrot.lane.b32.xlu1 %v3570_v53, %s5131_s14  ;;  %v2869_v58 = vmul.f32 %v7647_v60, %v8338_v0 }
 0x3e2   : > { %3822 = vst.msk [vmem:[#allocation3 + $0x98] sm:$0xff] %vm199_vm0, %v8384_v61  ;;  %3458 = vrot.lane.b32.xlu0 %v3381_v15, %s5138_s21  ;;  %v5098_v15 = vld [vmem:[#allocation2 + $0xe0] sm:$0xff] }
 0x3e3   : > { %v2979_v41 = vpop.permute.xlu1 %2978  ;;  %v3157_v21 = vpop.permute.xlu0 %3156  ;;  %v4127_v4 = vld [vmem:[#allocation3 + $0x2b8] sm:$0xff]  ;;  %v3095_v5 = vmax.f32 %v5098_v15, 0.0 }
 0x3e4   : > { %3045 = vst.msk [vmem:[#allocation3 + $0x2d8] sm:$0xff] %vm3014_vm8, %v2979_v41  ;;  %4488 = vmatmul.mubr.f32.gmra.mrb[10].mxu1 %v4127_v4  ;;  %v3574_v4 = vmul.f32 %v3350_v47, %v8337_v43 }
 0x3e5   : > { %3246 = vst.msk [vmem:[#allocation3 + $0x90] sm:$0xff] %vm2437_vm7, %v3157_v21  ;;  %3646 = vrot.lane.b32.xlu1 %v3571_v18, %s5131_s14 }
 0x3e6   : > { %3846 = vst.msk [vmem:[#allocation3 + $0x2d8] sm:$0xff] %vm199_vm0, %v3814_v30  ;;  %3932 = vrot.lane.b32.xlu0 %v3858_v7, %s5132_s7  ;;  %v3383_v30 = vmax.f32 %v3351_v3, 0.0  ;;  %v7670_v7 = vld [vmem:[#allocation2 + $0xda] sm:$0xff] }
 0x3e7   : > { %v3205_v8 = vpop.permute.xlu1 %3204  ;;  %v3445_v35 = vpop.permute.xlu0 %3444  ;;  %v3862_v63 = vmul.f32 %v7670_v7, %v8337_v43 }
 0x3e8   : > { %3270 = vst.msk [vmem:[#allocation3 + $0x2d0] sm:$0xff] %vm2437_vm7, %v3205_v8 }
 0x3e9   : > { %3534 = vst.msk [vmem:[#allocation3 + $0x90] sm:$0xff] %vm3014_vm8, %v3445_v35  ;;  %v4059_v14 = vld [vmem:[#allocation3 + $0x98] sm:$0xff]  ;;  %3934 = vrot.lane.b32.xlu1 %v3859_v59, %s5132_s7 }
 0x3ea   : > { %2754 = vrot.lane.b32.xlu0 %v2676_v44, %s5135_s19  ;;  %4372 = vmatprep.mubr.f32.mxu0 %v4059_v14  ;;  %v3575_v14 = vmul.f32 %v3351_v3, %v8338_v0 }
 0x3eb   : > { %v3493_v51 = vpop.permute.xlu1 %3492  ;;  %v2741_v45 = vpop.permute.xlu0 %2740 }
 0x3ec   : > { %3558 = vst.msk [vmem:[#allocation3 + $0x2d0] sm:$0xff] %vm3014_vm8, %v3493_v51 }
 0x3ed   : > { %2829 = vst.msk [vmem:[#allocation3 + $0xa8] sm:$0xff] %vm2020_vm6, %v2741_v45  ;;  %v4131_v54 = vld [vmem:[#allocation3 + $0x2d8] sm:$0xff]  ;;  %2946 = vrot.lane.b32.xlu1 %v2868_v55, %s5138_s21  ;;  %v3863_v45 = vmul.f32 %v7682_v28, %v8338_v0  ;;  %v5099_v55 = vld [vmem:[#allocation2 + $0xf0] sm:$0xff] }
 0x3ee   : > { %3172 = vrot.lane.b32.xlu0 %v3094_v52, %s5136_s20  ;;  %4492 = vmatprep.mubr.f32.mxu1 %v4131_v54  ;;  %v3096_v47 = vmax.f32 %v5099_v55, 0.0 }
 0x3ef   : > { %v2933_v33 = vpop.permute.xlu1 %2932  ;;  %v2789_v2 = vpop.permute.xlu0 %2788 }
 0x3f0   : > { %v4058_v46 = vld [vmem:[#allocation3 + $0x90] sm:$0xff]  ;;  %3022 = vst.msk [vmem:[#allocation3 + $0xb0] sm:$0xff] %vm3014_vm8, %v2933_v33  ;;  %v2870_v33 = vmul.f32 %v7670_v7, %v8339_v13 }
 0x3f1   : > { %2853 = vst.msk [vmem:[#allocation3 + $0x2e8] sm:$0xff] %vm2020_vm6, %v2789_v2  ;;  %4373 = vmatmul.mubr.f32.gmra.mrb[12].mxu0 %v4058_v46  ;;  %3648 = vrot.lane.b32.xlu1 %v3572_v48, %s5131_s14  ;;  %v3352_v2 = vld [vmem:[#allocation2 + $0xf1] sm:$0xff] }
 0x3f2   : > { %3823 = vst.msk [vmem:[#allocation3 + $0xb0] sm:$0xff] %vm199_vm0, %v2671_v23  ;;  %3460 = vrot.lane.b32.xlu0 %v3382_v19, %s5138_s21  ;;  %v2677_v23 = vmax.f32 %v7647_v60, 0.0  ;;  %v3384_v48 = vmax.f32 %v3352_v2, 0.0  ;;  %v2683_v60 = vmax.f32 %v7757_v37, 0.0 }
 0x3f3   : > { %v2981_v22 = vpop.permute.xlu1 %2980  ;;  %v3159_v32 = vpop.permute.xlu0 %3158  ;;  %v4130_v12 = vld [vmem:[#allocation3 + $0x2d0] sm:$0xff] }
 0x3f4   : > { %3046 = vst.msk [vmem:[#allocation3 + $0x2f0] sm:$0xff] %vm3014_vm8, %v2981_v22  ;;  %4493 = vmatmul.mubr.f32.gmra.mrb[12].mxu1 %v4130_v12  ;;  %v3353_v12 = vld [vmem:[#allocation2 + $0xf9] sm:$0xff] }
 0x3f5   : > { %3247 = vst.msk [vmem:[#allocation3 + $0xa8] sm:$0xff] %vm2437_vm7, %v3159_v32  ;;  %3650 = vrot.lane.b32.xlu1 %v3573_v26, %s5131_s14  ;;  %v3576_v32 = vmul.f32 %v3352_v2, %v8339_v13  ;;  %v7705_v26 = vld [vmem:[#allocation2 + $0xf2] sm:$0xff] }
 0x3f6   : > { %3847 = vst.msk [vmem:[#allocation3 + $0x2f0] sm:$0xff] %vm199_vm0, %v3815_v40  ;;  %3936 = vrot.lane.b32.xlu0 %v3860_v62, %s5132_s7  ;;  %v3864_v15 = vmul.f32 %v7705_v26, %v8339_v13 }
 0x3f7   : > { %v3207_v42 = vpop.permute.xlu1 %3206  ;;  %v3447_v38 = vpop.permute.xlu0 %3446 }
 0x3f8   : > { %3271 = vst.msk [vmem:[#allocation3 + $0x2e8] sm:$0xff] %vm2437_vm7, %v3207_v42 }
 0x3f9   : > { %3535 = vst.msk [vmem:[#allocation3 + $0xa8] sm:$0xff] %vm3014_vm8, %v3447_v38  ;;  %v4062_v25 = vld [vmem:[#allocation3 + $0xb0] sm:$0xff]  ;;  %3938 = vrot.lane.b32.xlu1 %v3861_v16, %s5132_s7  ;;  %v8385_v16 = vld [vmem:[#allocation21_spill] sm:$0xff] }
 0x3fa   : > { %2756 = vrot.lane.b32.xlu0 %v2677_v23, %s5135_s19  ;;  %4377 = vmatprep.mubr.f32.mxu0 %v4062_v25  ;;  %v3577_v25 = vmul.f32 %v3353_v12, %v8385_v16 }
 0x3fb   : > { %v3495_v27 = vpop.permute.xlu1 %3494  ;;  %v2743_v53 = vpop.permute.xlu0 %2742 }
 0x3fc   : > { %3559 = vst.msk [vmem:[#allocation3 + $0x2e8] sm:$0xff] %vm3014_vm8, %v3495_v27 }
 0x3fd   : > { %2830 = vst.msk [vmem:[#allocation3 + $0xc0] sm:$0xff] %vm2020_vm6, %v2743_v53  ;;  %v4134_v61 = vld [vmem:[#allocation3 + $0x2f0] sm:$0xff]  ;;  %2948 = vrot.lane.b32.xlu1 %v2869_v58, %s5138_s21  ;;  %v3865_v53 = vmul.f32 %v7718_v9, %v8385_v16  ;;  %v5100_v58 = vld [vmem:[#allocation2 + $0xf8] sm:$0xff] }
 0x3fe   : > { %3174 = vrot.lane.b32.xlu0 %v3095_v5, %s5136_s20  ;;  %4497 = vmatprep.mubr.f32.mxu1 %v4134_v61  ;;  %v3097_v3 = vmax.f32 %v5100_v58, 0.0 }
 0x3ff   : > { %v2935_v41 = vpop.permute.xlu1 %2934  ;;  %v3161_v21 = vpop.permute.xlu0 %3160 }
 0x400   : > { %v4061_v18 = vld [vmem:[#allocation3 + $0xa8] sm:$0xff]  ;;  %3023 = vst.msk [vmem:[#allocation3 + $0xc8] sm:$0xff] %vm3014_vm8, %v2935_v41  ;;  %v2871_v41 = vmul.f32 %v7682_v28, %v8385_v16 }
 0x401   : > { %3248 = vst.msk [vmem:[#allocation3 + $0xc0] sm:$0xff] %vm2437_vm7, %v3161_v21  ;;  %4378 = vmatmul.mubr.f32.gmra.mrb[14].mxu0 %v4061_v18  ;;  %3652 = vrot.lane.b32.xlu1 %v3574_v4, %s5131_s14  ;;  %v3354_v4 = vld [vmem:[#allocation2 + $0x109] sm:$0xff]  ;;  %v3385_v18 = vmax.f32 %v3353_v12, 0.0 }
 0x402   : > { %3824 = vst.msk [vmem:[#allocation3 + $0xc8] sm:$0xff] %vm199_vm0, %v2672_v31  ;;  %3462 = vrot.lane.b32.xlu0 %v3383_v30, %s5138_s21  ;;  %v2678_v31 = vmax.f32 %v7670_v7, 0.0 }
 0x403   : > { %v3625_v8 = vpop.permute.xlu1 %3624  ;;  %v3449_v35 = vpop.permute.xlu0 %3448  ;;  %v4133_v59 = vld [vmem:[#allocation3 + $0x2e8] sm:$0xff] }
 0x404   : > { %3720 = vst.msk [vmem:[#allocation3 + $0x10] sm:$0xff] %vm993_vm2, %v3625_v8  ;;  %4498 = vmatmul.mubr.f32.gmra.mrb[14].mxu1 %v4133_v59 }
 0x405   : > { %3536 = vst.msk [vmem:[#allocation3 + $0xc0] sm:$0xff] %vm3014_vm8, %v3449_v35  ;;  %3654 = vrot.lane.b32.xlu1 %v3575_v14, %s5131_s14  ;;  %v8386_v14 = vld [vmem:[#allocation24_spill] sm:$0xff] }
 0x406   : > { %3940 = vrot.lane.b32.xlu0 %v3862_v63, %s5132_s7  ;;  %v3578_v63 = vmul.f32 %v3354_v4, %v8386_v14  ;;  %v2872_v12 = vmul.f32 %v7705_v26, %v8386_v14 }
 0x407   : > { %v3627_v52 = vpop.permute.xlu1 %3626  ;;  %v3913_v51 = vpop.permute.xlu0 %3912 }
 0x408   : > { %3721 = vst.msk [vmem:[#allocation3 + $0x28] sm:$0xff] %vm993_vm2, %v3627_v52  ;;  %v7741_v52 = vld [vmem:[#allocation2 + $0x111] sm:$0xff] }
 0x409   : > { %4008 = vst.msk [vmem:[#allocation3 + $0x10] sm:$0xff] %vm768_vm3, %v3913_v51  ;;  %v4065_v43 = vld [vmem:[#allocation3 + $0xc8] sm:$0xff]  ;;  %3942 = vrot.lane.b32.xlu1 %v3863_v45, %s5132_s7  ;;  %v7743_v51 = vld [vmem:[#allocation2 + $0x10a] sm:$0xff] }
 0x40a   : > { %2758 = vrot.lane.b32.xlu0 %v2678_v31, %s5135_s19  ;;  %4382 = vmatprep.mubr.f32.mxu0 %v4065_v43 }
 0x40b   : > { %v3915_v54 = vpop.permute.xlu1 %3914 }
 0x40c   : > { %v2745_v19 = vpop.permute.xlu0 %2744  ;;  %v4064_v0 = vld [vmem:[#allocation3 + $0xc0] sm:$0xff]  ;;  %4009 = vst.msk [vmem:[#allocation3 + $0x28] sm:$0xff] %vm768_vm3, %v3915_v54 }
 0x40d   : > { %2831 = vst.msk [vmem:[#allocation3 + $0xd8] sm:$0xff] %vm2020_vm6, %v2745_v19  ;;  %4383 = vmatmul.mubr.f32.gmra.mrb[16].mxu0 %v4064_v0  ;;  %2950 = vrot.lane.b32.xlu1 %v2870_v33, %s5138_s21  ;;  %v3866_v19 = vmul.f32 %v7743_v51, %v8386_v14 }
 0x40e   : > { %3176 = vrot.lane.b32.xlu0 %v3096_v47, %s5136_s20  ;;  %v8387_v47 = vld [vmem:[#allocation23_spill] sm:$0xff] }
 0x40f   : > { %v2937_v46 = vpop.permute.xlu1 %2936  ;;  %v3579_v54 = vmul.f32 %v7741_v52, %v8387_v47  ;;  %v3867_v2 = vmul.f32 %v7757_v37, %v8387_v47 }
 0x410   : > { %v3163_v40 = vpop.permute.xlu0 %3162  ;;  %v4042_v22 = vld [vmem:[#allocation3 + $0x10] sm:$0xff]  ;;  %3024 = vst.msk [vmem:[#allocation3 + $0xe0] sm:$0xff] %vm3014_vm8, %v2937_v46  ;;  %v5101_v46 = vld [vmem:[#allocation2 + $0x108] sm:$0xff] }
 0x411   : > { %3249 = vst.msk [vmem:[#allocation3 + $0xd8] sm:$0xff] %vm2437_vm7, %v3163_v40  ;;  %4911 = vmatprep.mubr.msk.f32.mxu1 %vm4181_vm9, %v4042_v22  ;;  %3656 = vrot.lane.b32.xlu1 %v3576_v32, %s5131_s14  ;;  %v3098_v40 = vmax.f32 %v5101_v46, 0.0  ;;  %v7826_v46 = vld [vmem:[#allocation2 + $0x141] sm:$0xff] }
 0x412   : > { %3825 = vst.msk [vmem:[#allocation3 + $0xe0] sm:$0xff] %vm199_vm0, %v2673_v49  ;;  %3464 = vrot.lane.b32.xlu0 %v3384_v48, %s5138_s21  ;;  %v2679_v49 = vmax.f32 %v7682_v28, 0.0  ;;  %v2685_v28 = vmax.f32 %v7799_v20, 0.0 }
 0x413   : > { %v3629_v62 = vpop.permute.xlu1 %3628  ;;  %v4045_v38 = vld [vmem:[#allocation3 + $0x28] sm:$0xff] }
 0x414   : > { %v3451_v42 = vpop.permute.xlu0 %3450  ;;  %3722 = vst.msk [vmem:[#allocation3 + $0x40] sm:$0xff] %vm993_vm2, %v3629_v62  ;;  %4912 = vmatmul.mubr.msk.f32.vlgmr.msra.gmra.mrb[16].mxu1 %vm4181_vm9, %v4045_v38  ;;  %v3386_v38 = vmax.f32 %v3354_v4, 0.0 }
 0x415   : > { %3537 = vst.msk [vmem:[#allocation3 + $0xd8] sm:$0xff] %vm3014_vm8, %v3451_v42  ;;  %3658 = vrot.lane.b32.xlu1 %v3577_v25, %s5131_s14  ;;  %v7774_v42 = vld [vmem:[#allocation2 + $0x121] sm:$0xff] }
 0x416   : > { %3944 = vrot.lane.b32.xlu0 %v3864_v15, %s5132_s7 }
 0x417   : > { %v3631_v5 = vpop.permute.xlu1 %3630 }
 0x418   : > { %v3917_v27 = vpop.permute.xlu0 %3916  ;;  %3723 = vst.msk [vmem:[#allocation3 + $0x58] sm:$0xff] %vm993_vm2, %v3631_v5  ;;  %v8388_v5 = vld [vmem:[#allocation26_spill] sm:$0xff] }
 0x419   : > { %4010 = vst.msk [vmem:[#allocation3 + $0x40] sm:$0xff] %vm768_vm3, %v3917_v27  ;;  %v4068_v13 = vld [vmem:[#allocation3 + $0xe0] sm:$0xff]  ;;  %3946 = vrot.lane.b32.xlu1 %v3865_v53, %s5132_s7  ;;  %v3580_v27 = vmul.f32 %v7774_v42, %v8388_v5 }
 0x41a   : > { %2760 = vrot.lane.b32.xlu0 %v2679_v49, %s5135_s19  ;;  %4387 = vmatprep.mubr.f32.mxu0 %v4068_v13  ;;  %v7783_v53 = vld [vmem:[#allocation2 + $0x129] sm:$0xff] }
 0x41b   : > { %v3919_v61 = vpop.permute.xlu1 %3918  ;;  %v7785_v13 = vld [vmem:[#allocation2 + $0x122] sm:$0xff] }
 0x41c   : > { %v2747_v30 = vpop.permute.xlu0 %2746  ;;  %v4067_v21 = vld [vmem:[#allocation3 + $0xd8] sm:$0xff]  ;;  %4011 = vst.msk [vmem:[#allocation3 + $0x58] sm:$0xff] %vm768_vm3, %v3919_v61  ;;  %v2684_v7 = vmax.f32 %v7785_v13, 0.0 }
 0x41d   : > { %2832 = vst.msk [vmem:[#allocation3 + $0xf0] sm:$0xff] %vm2020_vm6, %v2747_v30  ;;  %4388 = vmatmul.mubr.f32.gmra.mrb[18].mxu0 %v4067_v21  ;;  %2952 = vrot.lane.b32.xlu1 %v2871_v41, %s5138_s21  ;;  %v8389_v30 = vld [vmem:[#allocation25_spill] sm:$0xff]  ;;  %v3868_v21 = vmul.f32 %v7785_v13, %v8388_v5 }
 0x41e   : > { %3178 = vrot.lane.b32.xlu0 %v3097_v3, %s5136_s20  ;;  %v3581_v41 = vmul.f32 %v7783_v53, %v8389_v30 }
 0x41f   : > { %v2939_v8 = vpop.permute.xlu1 %2938 }
 0x420   : > { %v3165_v35 = vpop.permute.xlu0 %3164  ;;  %v4048_v59 = vld [vmem:[#allocation3 + $0x40] sm:$0xff]  ;;  %3025 = vst.msk [vmem:[#allocation3 + $0xf8] sm:$0xff] %vm3014_vm8, %v2939_v8  ;;  %v3869_v8 = vmul.f32 %v7799_v20, %v8389_v30 }
 0x421   : > { %3250 = vst.msk [vmem:[#allocation3 + $0xf0] sm:$0xff] %vm2437_vm7, %v3165_v35  ;;  %4914 = vmatprep.mubr.msk.f32.mxu1 %vm4181_vm9, %v4048_v59  ;;  %3660 = vrot.lane.b32.xlu1 %v3578_v63, %s5131_s14  ;;  %v5102_v59 = vld [vmem:[#allocation2 + $0x110] sm:$0xff] }
 0x422   : > { %3826 = vst.msk [vmem:[#allocation3 + $0xf8] sm:$0xff] %vm199_vm0, %v2674_v57  ;;  %3466 = vrot.lane.b32.xlu0 %v3385_v18, %s5138_s21  ;;  %v2680_v57 = vmax.f32 %v7705_v26, 0.0  ;;  %v3099_v14 = vmax.f32 %v5102_v59, 0.0  ;;  %v3878_v26 = vmul.f32 %v7595_v24, %v8372_v10 }
 0x423   : > { %v3633_v45 = vpop.permute.xlu1 %3632  ;;  %v4051_v55 = vld [vmem:[#allocation3 + $0x58] sm:$0xff] }
 0x424   : > { %v3453_v43 = vpop.permute.xlu0 %3452  ;;  %3724 = vst.msk [vmem:[#allocation3 + $0x70] sm:$0xff] %vm993_vm2, %v3633_v45  ;;  %4915 = vmatmul.mubr.msk.f32.gmra.mrb[18].mxu1 %vm4181_vm9, %v4051_v55 }
 0x425   : > { %3538 = vst.msk [vmem:[#allocation3 + $0xf0] sm:$0xff] %vm3014_vm8, %v3453_v43  ;;  %3662 = vrot.lane.b32.xlu1 %v3579_v54, %s5131_s14  ;;  %v2873_v43 = vmul.f32 %v7718_v9, %v8387_v47  ;;  %v7816_v54 = vld [vmem:[#allocation2 + $0x139] sm:$0xff] }
 0x426   : > { %3948 = vrot.lane.b32.xlu0 %v3866_v19, %s5132_s7  ;;  %v3387_v19 = vmax.f32 %v7741_v52, 0.0 }
 0x427   : > { %v3635_v33 = vpop.permute.xlu1 %3634 }
 0x428   : > { %v3921_v0 = vpop.permute.xlu0 %3920  ;;  %3725 = vst.msk [vmem:[#allocation3 + $0x88] sm:$0xff] %vm993_vm2, %v3635_v33 }
 0x429   : > { %4012 = vst.msk [vmem:[#allocation3 + $0x70] sm:$0xff] %vm768_vm3, %v3921_v0  ;;  %v4071_v48 = vld [vmem:[#allocation3 + $0xf8] sm:$0xff]  ;;  %3950 = vrot.lane.b32.xlu1 %v3867_v2, %s5132_s7 }
 0x42a   : > { %2762 = vrot.lane.b32.xlu0 %v2680_v57, %s5135_s19  ;;  %4392 = vmatprep.mubr.f32.mxu0 %v4071_v48  ;;  %v8390_v48 = vld [vmem:[#allocation28_spill] sm:$0xff] }
 0x42b   : > { %v3923_v22 = vpop.permute.xlu1 %3922  ;;  %v3582_v47 = vmul.f32 %v7816_v54, %v8390_v48 }
 0x42c   : > { %v2749_v32 = vpop.permute.xlu0 %2748  ;;  %v4070_v62 = vld [vmem:[#allocation3 + $0xf0] sm:$0xff]  ;;  %4013 = vst.msk [vmem:[#allocation3 + $0x88] sm:$0xff] %vm768_vm3, %v3923_v22 }
 0x42d   : > { %2833 = vst.msk [vmem:[#allocation3 + $0x108] sm:$0xff] %vm2020_vm6, %v2749_v32  ;;  %4393 = vmatmul.mubr.f32.gmra.mrb[20].mxu0 %v4070_v62  ;;  %2954 = vrot.lane.b32.xlu1 %v2872_v12, %s5138_s21  ;;  %v8391_v12 = vld [vmem:[#allocation27_spill] sm:$0xff] }
 0x42e   : > { %3180 = vrot.lane.b32.xlu0 %v3098_v40, %s5136_s20  ;;  %v7828_v40 = vld [vmem:[#allocation2 + $0x13a] sm:$0xff]  ;;  %v3583_v62 = vmul.f32 %v7826_v46, %v8391_v12 }
 0x42f   : > { %v2941_v16 = vpop.permute.xlu1 %2940 }
 0x430   : > { %v3167_v25 = vpop.permute.xlu0 %3166  ;;  %v4054_v15 = vld [vmem:[#allocation3 + $0x70] sm:$0xff]  ;;  %3026 = vst.msk [vmem:[#allocation3 + $0x110] sm:$0xff] %vm3014_vm8, %v2941_v16 }
 0x431   : > { %3251 = vst.msk [vmem:[#allocation3 + $0x108] sm:$0xff] %vm2437_vm7, %v3167_v25  ;;  %4917 = vmatprep.mubr.msk.f32.mxu1 %vm4181_vm9, %v4054_v15  ;;  %3664 = vrot.lane.b32.xlu1 %v3580_v27, %s5131_s14  ;;  %v3871_v15 = vmul.f32 %v7842_v29, %v8391_v12 }
 0x432   : > { %3827 = vst.msk [vmem:[#allocation3 + $0x110] sm:$0xff] %vm199_vm0, %v2675_v36  ;;  %3468 = vrot.lane.b32.xlu0 %v3386_v38, %s5138_s21  ;;  %v2681_v36 = vmax.f32 %v7718_v9, 0.0  ;;  %v3870_v38 = vmul.f32 %v7828_v40, %v8390_v48 }
 0x433   : > { %v3637_v58 = vpop.permute.xlu1 %3636  ;;  %v4057_v61 = vld [vmem:[#allocation3 + $0x88] sm:$0xff] }
 0x434   : > { %v3455_v3 = vpop.permute.xlu0 %3454  ;;  %3726 = vst.msk [vmem:[#allocation3 + $0xa0] sm:$0xff] %vm993_vm2, %v3637_v58  ;;  %4918 = vmatmul.mubr.msk.f32.gmra.mrb[20].mxu1 %vm4181_vm9, %v4057_v61  ;;  %v5103_v58 = vld [vmem:[#allocation2 + $0x120] sm:$0xff] }
 0x435   : > { %3539 = vst.msk [vmem:[#allocation3 + $0x108] sm:$0xff] %vm3014_vm8, %v3455_v3  ;;  %3666 = vrot.lane.b32.xlu1 %v3581_v41, %s5131_s14  ;;  %v3100_v3 = vmax.f32 %v5103_v58, 0.0  ;;  %v5109_v58 = vld [vmem:[#allocation2 + $0x169] sm:$0xff] }
 0x436   : > { %3952 = vrot.lane.b32.xlu0 %v3868_v21, %s5132_s7  ;;  %v2874_v21 = vmul.f32 %v7743_v51, %v8388_v5 }
 0x437   : > { %v3639_v4 = vpop.permute.xlu1 %3638 }
 0x438   : > { %v3925_v18 = vpop.permute.xlu0 %3924  ;;  %3727 = vst.msk [vmem:[#allocation3 + $0xb8] sm:$0xff] %vm993_vm2, %v3639_v4 }
 0x439   : > { %4014 = vst.msk [vmem:[#allocation3 + $0xa0] sm:$0xff] %vm768_vm3, %v3925_v18  ;;  %v4074_v35 = vld [vmem:[#allocation3 + $0x110] sm:$0xff]  ;;  %3954 = vrot.lane.b32.xlu1 %v3869_v8, %s5132_s7  ;;  %v3388_v18 = vmax.f32 %v7774_v42, 0.0 }
 0x43a   : > { %2764 = vrot.lane.b32.xlu0 %v2681_v36, %s5135_s19  ;;  %4397 = vmatprep.mubr.f32.mxu0 %v4074_v35 }
 0x43b   : > { %v3927_v63 = vpop.permute.xlu1 %3926 }
 0x43c   : > { %v2751_v45 = vpop.permute.xlu0 %2750  ;;  %v4073_v55 = vld [vmem:[#allocation3 + $0x108] sm:$0xff]  ;;  %4015 = vst.msk [vmem:[#allocation3 + $0xb8] sm:$0xff] %vm768_vm3, %v3927_v63 }
 0x43d   : > { %2834 = vst.msk [vmem:[#allocation3 + $0x120] sm:$0xff] %vm2020_vm6, %v2751_v45  ;;  %4398 = vmatmul.mubr.f32.gmra.mrb[22].mxu0 %v4073_v55  ;;  %2956 = vrot.lane.b32.xlu1 %v2873_v43, %s5138_s21  ;;  %v5105_v43 = vld [vmem:[#allocation2 + $0x159] sm:$0xff] }
 0x43e   : > { %3182 = vrot.lane.b32.xlu0 %v3099_v14, %s5136_s20  ;;  %v5104_v14 = vld [vmem:[#allocation2 + $0x151] sm:$0xff]  ;;  %v3585_v55 = vmul.f32 %v5105_v43, %v5580_v6 }
 0x43f   : > { %v2943_v33 = vpop.permute.xlu1 %2942  ;;  %v3584_v63 = vmul.f32 %v5104_v14, %v5582_v11  ;;  %v5113_v14 = vld [vmem:[#allocation2 + $0x138] sm:$0xff] }
 0x440   : > { %v3169_v0 = vpop.permute.xlu0 %3168  ;;  %v4060_v2 = vld [vmem:[#allocation3 + $0xa0] sm:$0xff]  ;;  %3027 = vst.msk [vmem:[#allocation3 + $0x128] sm:$0xff] %vm3014_vm8, %v2943_v33 }
 0x441   : > { %3252 = vst.msk [vmem:[#allocation3 + $0x120] sm:$0xff] %vm2437_vm7, %v3169_v0  ;;  %4920 = vmatprep.mubr.msk.f32.mxu1 %vm4181_vm9, %v4060_v2  ;;  %3668 = vrot.lane.b32.xlu1 %v3582_v47, %s5131_s14  ;;  %v5107_v2 = vld [vmem:[#allocation2 + $0x15a] sm:$0xff] }
 0x442   : > { %3828 = vst.msk [vmem:[#allocation3 + $0x128] sm:$0xff] %vm199_vm0, %v2676_v44  ;;  %3470 = vrot.lane.b32.xlu0 %v3387_v19, %s5138_s21  ;;  %v2682_v44 = vmax.f32 %v7743_v51, 0.0  ;;  %v5106_v19 = vld [vmem:[#allocation2 + $0x152] sm:$0xff]  ;;  %v3873_v47 = vmul.f32 %v5107_v2, %v5580_v6 }
 0x443   : > { %v3641_v52 = vpop.permute.xlu1 %3640  ;;  %v4063_v32 = vld [vmem:[#allocation3 + $0xb8] sm:$0xff]  ;;  %v3872_v33 = vmul.f32 %v5106_v19, %v5582_v11 }
 0x444   : > { %v3457_v22 = vpop.permute.xlu0 %3456  ;;  %3728 = vst.msk [vmem:[#allocation3 + $0xd0] sm:$0xff] %vm993_vm2, %v3641_v52  ;;  %4921 = vmatmul.mubr.msk.f32.gmra.mrb[22].mxu1 %vm4181_vm9, %v4063_v32  ;;  %v5108_v52 = vld [vmem:[#allocation2 + $0x128] sm:$0xff] }
 0x445   : > { %3540 = vst.msk [vmem:[#allocation3 + $0x120] sm:$0xff] %vm3014_vm8, %v3457_v22  ;;  %3670 = vrot.lane.b32.xlu1 %v3583_v62, %s5131_s14  ;;  %v3101_v22 = vmax.f32 %v5108_v52, 0.0 }
 0x446   : > { %3956 = vrot.lane.b32.xlu0 %v3870_v38, %s5132_s7  ;;  %v2875_v38 = vmul.f32 %v7757_v37, %v8389_v30 }
 0x447   : > { %v3643_v16 = vpop.permute.xlu1 %3642 }
 0x448   : > { %v3929_v25 = vpop.permute.xlu0 %3928  ;;  %3729 = vst.msk [vmem:[#allocation3 + $0xe8] sm:$0xff] %vm993_vm2, %v3643_v16  ;;  %v3389_v16 = vmax.f32 %v7783_v53, 0.0 }
 0x449   : > { %4016 = vst.msk [vmem:[#allocation3 + $0xd0] sm:$0xff] %vm768_vm3, %v3929_v25  ;;  %v4077_v27 = vld [vmem:[#allocation3 + $0x128] sm:$0xff]  ;;  %3958 = vrot.lane.b32.xlu1 %v3871_v15, %s5132_s7 }
 0x44a   : > { %2766 = vrot.lane.b32.xlu0 %v2682_v44, %s5135_s19  ;;  %4402 = vmatprep.mubr.f32.mxu0 %v4077_v27 }
 0x44b   : > { %v3931_v61 = vpop.permute.xlu1 %3930 }
 0x44c   : > { %v2753_v41 = vpop.permute.xlu0 %2752  ;;  %v4076_v4 = vld [vmem:[#allocation3 + $0x120] sm:$0xff]  ;;  %4017 = vst.msk [vmem:[#allocation3 + $0xe8] sm:$0xff] %vm768_vm3, %v3931_v61 }
 0x44d   : > { %2835 = vst.msk [vmem:[#allocation3 + $0x138] sm:$0xff] %vm2020_vm6, %v2753_v41  ;;  %4403 = vmatmul.mubr.f32.gmra.mrb[24].mxu0 %v4076_v4  ;;  %2958 = vrot.lane.b32.xlu1 %v2874_v21, %s5138_s21  ;;  %v5110_v41 = vld [vmem:[#allocation2 + $0x171] sm:$0xff] }
 0x44e   : > { %3184 = vrot.lane.b32.xlu0 %v3100_v3, %s5136_s20  ;;  %v3586_v3 = vmul.f32 %v5109_v58, %v5598_v34  ;;  %v3587_v21 = vmul.f32 %v5110_v41, %v8367_v56  ;;  %v5111_v4 = vld [vmem:[#allocation2 + $0x16a] sm:$0xff] }
 0x44f   : > { %v2945_v8 = vpop.permute.xlu1 %2944 }
 0x450   : > { %v3171_v35 = vpop.permute.xlu0 %3170  ;;  %v4066_v59 = vld [vmem:[#allocation3 + $0xd0] sm:$0xff]  ;;  %3028 = vst.msk [vmem:[#allocation3 + $0x140] sm:$0xff] %vm3014_vm8, %v2945_v8 }
 0x451   : > { %3253 = vst.msk [vmem:[#allocation3 + $0x138] sm:$0xff] %vm2437_vm7, %v3171_v35  ;;  %4923 = vmatprep.mubr.msk.f32.mxu1 %vm4181_vm9, %v4066_v59  ;;  %3672 = vrot.lane.b32.xlu1 %v3584_v63, %s5131_s14  ;;  %v5112_v35 = vld [vmem:[#allocation2 + $0x172] sm:$0xff]  ;;  %v3102_v63 = vmax.f32 %v5113_v14, 0.0  ;;  %v5120_v14 = vld [vmem:[#allocation2 + $0x1a1] sm:$0xff] }
 0x452   : > { %3829 = vst.msk [vmem:[#allocation3 + $0x140] sm:$0xff] %vm199_vm0, %v2677_v23  ;;  %3472 = vrot.lane.b32.xlu0 %v3388_v18, %s5138_s21  ;;  %v3874_v18 = vmul.f32 %v5111_v4, %v5598_v34  ;;  %v3875_v59 = vmul.f32 %v5112_v35, %v8367_v56  ;;  %v2876_v56 = vmul.f32 %v7785_v13, %v8390_v48  ;;  %v5114_v48 = vld [vmem:[#allocation2 + $0x181] sm:$0xff] }
 0x453   : > { %v3645_v42 = vpop.permute.xlu1 %3644  ;;  %v4069_v45 = vld [vmem:[#allocation3 + $0xe8] sm:$0xff] }
 0x454   : > { %v3459_v5 = vpop.permute.xlu0 %3458  ;;  %3730 = vst.msk [vmem:[#allocation3 + $0x100] sm:$0xff] %vm993_vm2, %v3645_v42  ;;  %4924 = vmatmul.mubr.msk.f32.gmra.mrb[24].mxu1 %vm4181_vm9, %v4069_v45 }
 0x455   : > { %3541 = vst.msk [vmem:[#allocation3 + $0x138] sm:$0xff] %vm3014_vm8, %v3459_v5  ;;  %3674 = vrot.lane.b32.xlu1 %v3585_v55, %s5131_s14 }
 0x456   : > { %3960 = vrot.lane.b32.xlu0 %v3872_v33, %s5132_s7  ;;  %v3390_v33 = vmax.f32 %v7816_v54, 0.0 }
 0x457   : > { %v3647_v23 = vpop.permute.xlu1 %3646 }
 0x458   : > { %v3933_v0 = vpop.permute.xlu0 %3932  ;;  %3731 = vst.msk [vmem:[#allocation3 + $0x118] sm:$0xff] %vm993_vm2, %v3647_v23 }
 0x459   : > { %4018 = vst.msk [vmem:[#allocation3 + $0x100] sm:$0xff] %vm768_vm3, %v3933_v0  ;;  %v4080_v11 = vld [vmem:[#allocation3 + $0x140] sm:$0xff]  ;;  %3962 = vrot.lane.b32.xlu1 %v3873_v47, %s5132_s7  ;;  %v3588_v47 = vmul.f32 %v5114_v48, %v8369_v17 }
 0x45a   : > { %2768 = vrot.lane.b32.xlu0 %v2683_v60, %s5135_s19  ;;  %4407 = vmatprep.mubr.f32.mxu0 %v4080_v11 }
 0x45b   : > { %v3935_v32 = vpop.permute.xlu1 %3934 }
 0x45c   : > { %v2755_v62 = vpop.permute.xlu0 %2754  ;;  %v4079_v6 = vld [vmem:[#allocation3 + $0x138] sm:$0xff]  ;;  %4019 = vst.msk [vmem:[#allocation3 + $0x118] sm:$0xff] %vm768_vm3, %v3935_v32 }
 0x45d   : > { %2836 = vst.msk [vmem:[#allocation3 + $0x150] sm:$0xff] %vm2020_vm6, %v2755_v62  ;;  %4408 = vmatmul.mubr.f32.gmra.mrb[26].mxu0 %v4079_v6  ;;  %2960 = vrot.lane.b32.xlu1 %v2875_v38, %s5138_s21  ;;  %v5116_v62 = vld [vmem:[#allocation2 + $0x182] sm:$0xff] }
 0x45e   : > { %3186 = vrot.lane.b32.xlu0 %v3101_v22, %s5136_s20  ;;  %v5115_v22 = vld [vmem:[#allocation2 + $0x189] sm:$0xff]  ;;  %v3876_v38 = vmul.f32 %v5116_v62, %v8369_v17 }
 0x45f   : > { %v2947_v25 = vpop.permute.xlu1 %2946  ;;  %v3589_v32 = vmul.f32 %v5115_v22, %v8371_v1 }
 0x460   : > { %v3173_v15 = vpop.permute.xlu0 %3172  ;;  %v4072_v27 = vld [vmem:[#allocation3 + $0x100] sm:$0xff]  ;;  %3029 = vst.msk [vmem:[#allocation3 + $0x158] sm:$0xff] %vm3014_vm8, %v2947_v25 }
 0x461   : > { %3254 = vst.msk [vmem:[#allocation3 + $0x150] sm:$0xff] %vm2437_vm7, %v3173_v15  ;;  %4926 = vmatprep.mubr.msk.f32.mxu1 %vm4181_vm9, %v4072_v27  ;;  %3676 = vrot.lane.b32.xlu1 %v3586_v3, %s5131_s14  ;;  %v5118_v3 = vld [vmem:[#allocation2 + $0x140] sm:$0xff] }
 0x462   : > { %3830 = vst.msk [vmem:[#allocation3 + $0x158] sm:$0xff] %vm199_vm0, %v2678_v31  ;;  %3474 = vrot.lane.b32.xlu0 %v3389_v16, %s5138_s21  ;;  %v5117_v16 = vld [vmem:[#allocation2 + $0x18a] sm:$0xff] }
 0x463   : > { %v3649_v53 = vpop.permute.xlu1 %3648  ;;  %v4075_v61 = vld [vmem:[#allocation3 + $0x118] sm:$0xff]  ;;  %v3877_v25 = vmul.f32 %v5117_v16, %v8371_v1 }
 0x464   : > { %v3461_v30 = vpop.permute.xlu0 %3460  ;;  %3732 = vst.msk [vmem:[#allocation3 + $0x130] sm:$0xff] %vm993_vm2, %v3649_v53  ;;  %4927 = vmatmul.mubr.msk.f32.gmra.mrb[26].mxu1 %vm4181_vm9, %v4075_v61  ;;  %v3103_v53 = vmax.f32 %v5118_v3, 0.0  ;;  %v2877_v61 = vmul.f32 %v7799_v20, %v8391_v12 }
 0x465   : > { %3542 = vst.msk [vmem:[#allocation3 + $0x150] sm:$0xff] %vm3014_vm8, %v3461_v30  ;;  %3678 = vrot.lane.b32.xlu1 %v3587_v21, %s5131_s14 }
 0x466   : > { %3964 = vrot.lane.b32.xlu0 %v3874_v18, %s5132_s7  ;;  %v3391_v18 = vmax.f32 %v7826_v46, 0.0 }
 0x467   : > { %v3651_v31 = vpop.permute.xlu1 %3650 }
 0x468   : > { %v3937_v8 = vpop.permute.xlu0 %3936  ;;  %3733 = vst.msk [vmem:[#allocation3 + $0x148] sm:$0xff] %vm993_vm2, %v3651_v31 }
 0x469   : > { %4020 = vst.msk [vmem:[#allocation3 + $0x130] sm:$0xff] %vm768_vm3, %v3937_v8  ;;  %v4083_v34 = vld [vmem:[#allocation3 + $0x158] sm:$0xff]  ;;  %3966 = vrot.lane.b32.xlu1 %v3875_v59, %s5132_s7  ;;  %v5119_v8 = vld [vmem:[#allocation2 + $0x199] sm:$0xff] }
 0x46a   : > { %2770 = vrot.lane.b32.xlu0 %v2684_v7, %s5135_s19  ;;  %4412 = vmatprep.mubr.f32.mxu0 %v4083_v34  ;;  %v3590_v35 = vmul.f32 %v5119_v8, %v8372_v10 }
 0x46b   : > { %v3939_v42 = vpop.permute.xlu1 %3938  ;;  %v7917_v5 = vpop.f32.mrb[0].mxu0 }
 0x46c   : > { %v4082_v45 = vld [vmem:[#allocation3 + $0x150] sm:$0xff]  ;;  %4021 = vst.msk [vmem:[#allocation3 + $0x148] sm:$0xff] %vm768_vm3, %v3939_v42  ;;  %v2757_v43 = vpop.permute.xlu0 %2756  ;;  %v4346_v55 = vpop.f32.mrb[1].mxu0 }
 0x46d   : > { %4413 = vmatmul.mubr.f32.gmra.mrb[28].mxu0 %v4082_v45  ;;  %2837 = vst.msk [vmem:[#allocation3 + $0x168] sm:$0xff] %vm2020_vm6, %v2757_v43  ;;  %2962 = vrot.lane.b32.xlu1 %v2876_v56, %s5138_s21  ;;  %v7924_v19 = vpop.f32.mrb[0].mxu1  ;;  %v3879_v45 = vmul.f32 %v7633_v39, %v8373_v50 }
 0x46e   : > { %3188 = vrot.lane.b32.xlu0 %v3102_v63, %s5136_s20  ;;  %v4466_v23 = vpop.f32.mrb[1].mxu1  ;;  %v3591_v63 = vmul.f32 %v5120_v14, %v8373_v50 }
 0x46f   : > { %v2949_v0 = vpop.permute.xlu1 %2948 }
 0x470   : > { %v4078_v2 = vld [vmem:[#allocation3 + $0x130] sm:$0xff]  ;;  %3030 = vst.msk [vmem:[#allocation3 + $0x170] sm:$0xff] %vm3014_vm8, %v2949_v0  ;;  %v3175_v11 = vpop.permute.xlu0 %3174 }
 0x471   : > { %4929 = vmatprep.mubr.msk.f32.mxu1 %vm4181_vm9, %v4078_v2  ;;  %3831 = vst.msk [vmem:[#allocation3 + $0x170] sm:$0xff] %vm199_vm0, %v2679_v49  ;;  %3680 = vrot.lane.b32.xlu1 %v3588_v47, %s5131_s14 }
 0x472   : > { %3255 = vst.msk [vmem:[#allocation3 + $0x168] sm:$0xff] %vm2437_vm7, %v3175_v11  ;;  %3476 = vrot.lane.b32.xlu0 %v3390_v33, %s5138_s21 }
 0x473   : > { %v3653_v54 = vpop.permute.xlu1 %3652  ;;  %v4081_v52 = vld [vmem:[#allocation3 + $0x148] sm:$0xff] }
 0x474   : > { %3734 = vst.msk [vmem:[#allocation3 + $0x160] sm:$0xff] %vm993_vm2, %v3653_v54  ;;  %v3463_v6 = vpop.permute.xlu0 %3462  ;;  %4930 = vmatmul.mubr.msk.f32.gmra.mrb[28].mxu1 %vm4181_vm9, %v4081_v52 }
 0x475   : > { %3543 = vst.msk [vmem:[#allocation3 + $0x168] sm:$0xff] %vm3014_vm8, %v3463_v6  ;;  %3682 = vrot.lane.b32.xlu1 %v3589_v32, %s5131_s14 }
 0x476   : > { %3968 = vrot.lane.b32.xlu0 %v3876_v38, %s5132_s7 }
 0x477   : > { %v3655_v49 = vpop.permute.xlu1 %3654 }
 0x478   : > { %v7946_v15 = vpop.f32.mrb[2].mxu0  ;;  %3735 = vst.msk [vmem:[#allocation3 + $0x178] sm:$0xff] %vm993_vm2, %v3655_v49  ;;  %v3941_v17 = vpop.permute.xlu0 %3940  ;;  %v4086_v58 = vld [vmem:[#allocation3 + $0x170] sm:$0xff] }
 0x479   : > { %v4351_v27 = vpop.f32.mrb[3].mxu0  ;;  %4022 = vst.msk [vmem:[#allocation3 + $0x160] sm:$0xff] %vm768_vm3, %v3941_v17  ;;  %3970 = vrot.lane.b32.xlu1 %v3877_v25, %s5132_s7  ;;  %4417 = vmatprep.mubr.f32.mxu0 %v4086_v58 }
 0x47a   : > { %2772 = vrot.lane.b32.xlu0 %v2685_v28, %s5135_s19 }
 0x47b   : > { %v3943_v30 = vpop.permute.xlu1 %3942  ;;  %v7954_v1 = vpop.f32.mrb[2].mxu1 }
 0x47c   : > { %4023 = vst.msk [vmem:[#allocation3 + $0x178] sm:$0xff] %vm768_vm3, %v3943_v30  ;;  %v2759_v41 = vpop.permute.xlu0 %2758  ;;  %v4471_v21 = vpop.f32.mrb[3].mxu1  ;;  %v4085_v4 = vld [vmem:[#allocation3 + $0x168] sm:$0xff] }
 0x47d   : > { %2838 = vst.msk [vmem:[#allocation3 + $0x180] sm:$0xff] %vm2020_vm6, %v2759_v41  ;;  %2964 = vrot.lane.b32.xlu1 %v2877_v61, %s5138_s21  ;;  %4418 = vmatmul.mubr.f32.gmra.mrb[30].mxu0 %v4085_v4 }
 0x47e   : > { %3190 = vrot.lane.b32.xlu0 %v3103_v53, %s5136_s20 }
 0x47f   : > { %v2951_v31 = vpop.permute.xlu1 %2950 }
 0x480   : > { %3031 = vst.msk [vmem:[#allocation3 + $0x188] sm:$0xff] %vm3014_vm8, %v2951_v31  ;;  %v3177_v12 = vpop.permute.xlu0 %3176  ;;  %v4084_v59 = vld [vmem:[#allocation3 + $0x160] sm:$0xff] }
 0x481   : > { %3832 = vst.msk [vmem:[#allocation3 + $0x188] sm:$0xff] %vm199_vm0, %v2680_v57  ;;  %4932 = vmatprep.mubr.msk.f32.mxu1 %vm4181_vm9, %v4084_v59  ;;  %3684 = vrot.lane.b32.xlu1 %v3590_v35, %s5131_s14 }
 0x482   : > { %3256 = vst.msk [vmem:[#allocation3 + $0x180] sm:$0xff] %vm2437_vm7, %v3177_v12  ;;  %3478 = vrot.lane.b32.xlu0 %v3391_v18, %s5138_s21 }
 0x483   : > { %v3657_v46 = vpop.permute.xlu1 %3656  ;;  %v4087_v34 = vld [vmem:[#allocation3 + $0x178] sm:$0xff] }
 0x484   : > { %3736 = vst.msk [vmem:[#allocation3 + $0x190] sm:$0xff] %vm993_vm2, %v3657_v46  ;;  %v3465_v42 = vpop.permute.xlu0 %3464  ;;  %4933 = vmatmul.mubr.msk.f32.gmra.mrb[30].mxu1 %vm4181_vm9, %v4087_v34 }
 0x485   : > { %3544 = vst.msk [vmem:[#allocation3 + $0x180] sm:$0xff] %vm3014_vm8, %v3465_v42  ;;  %3686 = vrot.lane.b32.xlu1 %v3591_v63, %s5131_s14  ;;  %s4823_s14 = sshll.u32 %s5170_s16, 5 }
 0x486   : > { %3972 = vrot.lane.b32.xlu0 %v3878_v26, %s5132_s7  ;;  %p194_p4 = scmp.lt.s32.totalorder %s4823_s14, 63 }
 0x487   : > { %v3659_v57 = vpop.permute.xlu1 %3658  ;;  %v7980_v56 = vpop.f32.mrb[4].mxu0 }
 0x488   : > { %3737 = vst.msk [vmem:[#allocation3 + $0x1a8] sm:$0xff] %vm993_vm2, %v3659_v57  ;;  %v3945_v43 = vpop.permute.xlu0 %3944  ;;  %v4356_v55 = vpop.f32.mrb[5].mxu0  ;;  %v4089_v33 = vld [vmem:[#allocation3 + $0x188] sm:$0xff]  ;;  %s8393_s14 = smov (!%p194_p4, %s4823_s14), 63 }
 0x489   : > { %4024 = vst.msk [vmem:[#allocation3 + $0x190] sm:$0xff] %vm768_vm3, %v3945_v43  ;;  %3974 = vrot.lane.b32.xlu1 %v3879_v45, %s5132_s7  ;;  %v7987_v10 = vpop.f32.mrb[4].mxu1  ;;  %4422 = vmatprep.mubr.f32.mxu0 %v4089_v33  ;;  %s4824_s19 = sshll.u32 %s8393_s14, 3 }
 0x48a   : > { %v4476_v24 = vpop.f32.mrb[5].mxu1  ;;  %s8099_s17 = scalar_lea.vmem %s8202_s4, %s4824_s19 }
 0x48b   : > { %v3947_v23 = vpop.permute.xlu1 %3946 }
 0x48c   : > { %4025 = vst.msk [vmem:[#allocation3 + $0x1a8] sm:$0xff] %vm768_vm3, %v3947_v23  ;;  %v2761_v0 = vpop.permute.xlu0 %2760  ;;  %v4088_v2 = vld [vmem:[#allocation3 + $0x180] sm:$0xff] }
 0x48d   : > { %2839 = vst.msk [vmem:[#allocation3 + $0x198] sm:$0xff] %vm2020_vm6, %v2761_v0  ;;  %4423 = vmatmul.mubr.f32.gmra.mrb[32].mxu0 %v4088_v2 }
 0x48f   : > { %v2953_v50 = vpop.permute.xlu1 %2952 }
 0x490   : > { %3032 = vst.msk [vmem:[#allocation3 + $0x1a0] sm:$0xff] %vm3014_vm8, %v2953_v50  ;;  %v3179_v39 = vpop.permute.xlu0 %3178  ;;  %v4090_v48 = vld [vmem:[#allocation3 + $0x190] sm:$0xff] }
 0x491   : > { %3833 = vst.msk [vmem:[#allocation3 + $0x1a0] sm:$0xff] %vm199_vm0, %v2681_v36  ;;  %4935 = vmatprep.mubr.msk.f32.mxu1 %vm4181_vm9, %v4090_v48 }
 0x492   : > { %3257 = vst.msk [vmem:[#allocation3 + $0x198] sm:$0xff] %vm2437_vm7, %v3179_v39 }
 0x493   : > { %v3661_v47 = vpop.permute.xlu1 %3660  ;;  %v4093_v11 = vld [vmem:[#allocation3 + $0x1a8] sm:$0xff] }
 0x494   : > { %v7997_v54 = vpop.f32.mrb[6].mxu0  ;;  %3738 = vst.msk [vmem:[#allocation3 + $0x1c0] sm:$0xff] %vm993_vm2, %v3661_v47  ;;  %v3467_v52 = vpop.permute.xlu0 %3466  ;;  %4936 = vmatmul.mubr.msk.f32.gmra.mrb[32].mxu1 %vm4181_vm9, %v4093_v11 }
 0x495   : > { %v4361_v22 = vpop.f32.mrb[7].mxu0  ;;  %3545 = vst.msk [vmem:[#allocation3 + $0x198] sm:$0xff] %vm3014_vm8, %v3467_v52 }
 0x497   : > { %v3663_v32 = vpop.permute.xlu1 %3662  ;;  %v8002_v9 = vpop.f32.mrb[6].mxu1 }
 0x498   : > { %3739 = vst.msk [vmem:[#allocation3 + $0x1d8] sm:$0xff] %vm993_vm2, %v3663_v32  ;;  %v3949_v36 = vpop.permute.xlu0 %3948  ;;  %v4481_v62 = vpop.f32.mrb[7].mxu1  ;;  %v4092_v38 = vld [vmem:[#allocation3 + $0x1a0] sm:$0xff] }
 0x499   : > { %4026 = vst.msk [vmem:[#allocation3 + $0x1c0] sm:$0xff] %vm768_vm3, %v3949_v36  ;;  %4427 = vmatprep.mubr.f32.mxu0 %v4092_v38 }
 0x49b   : > { %v3951_v6 = vpop.permute.xlu1 %3950 }
 0x49c   : > { %4027 = vst.msk [vmem:[#allocation3 + $0x1d8] sm:$0xff] %vm768_vm3, %v3951_v6  ;;  %v2763_v49 = vpop.permute.xlu0 %2762  ;;  %v4091_v16 = vld [vmem:[#allocation3 + $0x198] sm:$0xff] }
 0x49d   : > { %2840 = vst.msk [vmem:[#allocation3 + $0x1b0] sm:$0xff] %vm2020_vm6, %v2763_v49  ;;  %4428 = vmatmul.mubr.f32.gmra.mrb[34].mxu0 %v4091_v16 }
 0x49f   : > { %v2955_v25 = vpop.permute.xlu1 %2954 }
 0x4a0   : > { %3033 = vst.msk [vmem:[#allocation3 + $0x1b8] sm:$0xff] %vm3014_vm8, %v2955_v25  ;;  %v3181_v17 = vpop.permute.xlu0 %3180  ;;  %v4096_v27 = vld [vmem:[#allocation3 + $0x1c0] sm:$0xff] }
 0x4a1   : > { %3834 = vst.msk [vmem:[#allocation3 + $0x1b8] sm:$0xff] %vm199_vm0, %v2682_v44  ;;  %4938 = vmatprep.mubr.msk.f32.mxu1 %vm4181_vm9, %v4096_v27 }
 0x4a2   : > { %3258 = vst.msk [vmem:[#allocation3 + $0x1b0] sm:$0xff] %vm2437_vm7, %v3181_v17 }
 0x4a3   : > { %v3665_v58 = vpop.permute.xlu1 %3664  ;;  %v4099_v3 = vld [vmem:[#allocation3 + $0x1d8] sm:$0xff] }
 0x4a4   : > { %v8014_v53 = vpop.f32.mrb[8].mxu0  ;;  %3740 = vst.msk [vmem:[#allocation3 + $0x1f0] sm:$0xff] %vm993_vm2, %v3665_v58  ;;  %v3469_v30 = vpop.permute.xlu0 %3468  ;;  %4939 = vmatmul.mubr.msk.f32.gmra.mrb[34].mxu1 %vm4181_vm9, %v4099_v3 }
 0x4a5   : > { %v4366_v61 = vpop.f32.mrb[9].mxu0  ;;  %3546 = vst.msk [vmem:[#allocation3 + $0x1b0] sm:$0xff] %vm3014_vm8, %v3469_v30 }
 0x4a7   : > { %v3667_v41 = vpop.permute.xlu1 %3666  ;;  %v8019_v51 = vpop.f32.mrb[8].mxu1 }
 0x4a8   : > { %3741 = vst.msk [vmem:[#allocation3 + $0x208] sm:$0xff] %vm993_vm2, %v3667_v41  ;;  %v3953_v44 = vpop.permute.xlu0 %3952  ;;  %v4486_v21 = vpop.f32.mrb[9].mxu1  ;;  %v4095_v4 = vld [vmem:[#allocation3 + $0x1b8] sm:$0xff] }
 0x4a9   : > { %4028 = vst.msk [vmem:[#allocation3 + $0x1f0] sm:$0xff] %vm768_vm3, %v3953_v44  ;;  %4432 = vmatprep.mubr.f32.mxu0 %v4095_v4  ;;  %v3806_v4 = vmax.f32 %v7828_v40, 0.0  ;;  %v8087_v40 = vld [vmem:[%s8200_s2] ss:$0 sm:$0xff] }
 0x4ab   : > { %v3955_v18 = vpop.permute.xlu1 %3954 }
 0x4ac   : > { %4029 = vst.msk [vmem:[#allocation3 + $0x208] sm:$0xff] %vm768_vm3, %v3955_v18  ;;  %v2765_v31 = vpop.permute.xlu0 %2764  ;;  %v4094_v8 = vld [vmem:[#allocation3 + $0x1b0] sm:$0xff] }
 0x4ad   : > { %2841 = vst.msk [vmem:[#allocation3 + $0x1c8] sm:$0xff] %vm2020_vm6, %v2765_v31  ;;  %4433 = vmatmul.mubr.f32.gmra.mrb[36].mxu0 %v4094_v8 }
 0x4af   : > { %v2957_v35 = vpop.permute.xlu1 %2956 }
 0x4b0   : > { %3034 = vst.msk [vmem:[#allocation3 + $0x1d0] sm:$0xff] %vm3014_vm8, %v2957_v35  ;;  %v3183_v12 = vpop.permute.xlu0 %3182  ;;  %v4102_v59 = vld [vmem:[#allocation3 + $0x1f0] sm:$0xff] }
 0x4b1   : > { %3835 = vst.msk [vmem:[#allocation3 + $0x1d0] sm:$0xff] %vm199_vm0, %v2683_v60  ;;  %4941 = vmatprep.mubr.msk.f32.mxu1 %vm4181_vm9, %v4102_v59 }
 0x4b2   : > { %3259 = vst.msk [vmem:[#allocation3 + $0x1c8] sm:$0xff] %vm2437_vm7, %v3183_v12 }
 0x4b3   : > { %v3669_v46 = vpop.permute.xlu1 %3668  ;;  %v4105_v34 = vld [vmem:[#allocation3 + $0x208] sm:$0xff] }
 0x4b4   : > { %v8031_v14 = vpop.f32.mrb[10].mxu0  ;;  %3742 = vst.msk [vmem:[#allocation3 + $0x220] sm:$0xff] %vm993_vm2, %v3669_v46  ;;  %v3471_v63 = vpop.permute.xlu0 %3470  ;;  %4942 = vmatmul.mubr.msk.f32.gmra.mrb[36].mxu1 %vm4181_vm9, %v4105_v34 }
 0x4b5   : > { %v4371_v42 = vpop.f32.mrb[11].mxu0  ;;  %3547 = vst.msk [vmem:[#allocation3 + $0x1c8] sm:$0xff] %vm3014_vm8, %v3471_v63  ;;  %v4350_v63 = vadd.f32 %v8087_v40, %v7946_v15 }
 0x4b6   : > { %v4345_v42 = vadd.f32 %v8087_v40, %v7917_v5 }
 0x4b7   : > { %v3671_v26 = vpop.permute.xlu1 %3670  ;;  %v8036_v37 = vpop.f32.mrb[10].mxu1 }
 0x4b8   : > { %3743 = vst.msk [vmem:[#allocation3 + $0x238] sm:$0xff] %vm993_vm2, %v3671_v26  ;;  %v3957_v60 = vpop.permute.xlu0 %3956  ;;  %v4491_v57 = vpop.f32.mrb[11].mxu1  ;;  %v4098_v45 = vld [vmem:[#allocation3 + $0x1d0] sm:$0xff] }
 0x4b9   : > { %4030 = vst.msk [vmem:[#allocation3 + $0x220] sm:$0xff] %vm768_vm3, %v3957_v60  ;;  %4437 = vmatprep.mubr.f32.mxu0 %v4098_v45 }
 0x4bb   : > { %v3959_v43 = vpop.permute.xlu1 %3958 }
 0x4bc   : > { %4031 = vst.msk [vmem:[#allocation3 + $0x238] sm:$0xff] %vm768_vm3, %v3959_v43  ;;  %v2767_v55 = vpop.permute.xlu0 %2766  ;;  %v4097_v33 = vld [vmem:[#allocation3 + $0x1c8] sm:$0xff] }
 0x4bd   : > { %2842 = vst.msk [vmem:[#allocation3 + $0x1e0] sm:$0xff] %vm2020_vm6, %v2767_v55  ;;  %4438 = vmatmul.mubr.f32.gmra.mrb[38].mxu0 %v4097_v33 }
 0x4bf   : > { %v2959_v24 = vpop.permute.xlu1 %2958 }
 0x4c0   : > { %3035 = vst.msk [vmem:[#allocation3 + $0x1e8] sm:$0xff] %vm3014_vm8, %v2959_v24  ;;  %v3185_v23 = vpop.permute.xlu0 %3184  ;;  %v4108_v0 = vld [vmem:[#allocation3 + $0x220] sm:$0xff] }
 0x4c1   : > { %3836 = vst.msk [vmem:[#allocation3 + $0x1e8] sm:$0xff] %vm199_vm0, %v2684_v7  ;;  %4944 = vmatprep.mubr.msk.f32.mxu1 %vm4181_vm9, %v4108_v0 }
 0x4c2   : > { %3260 = vst.msk [vmem:[#allocation3 + $0x1e0] sm:$0xff] %vm2437_vm7, %v3185_v23  ;;  %v3807_v23 = vmax.f32 %v7842_v29, 0.0  ;;  %v4360_v29 = vadd.f32 %v8087_v40, %v7997_v54 }
 0x4c3   : > { %v3673_v2 = vpop.permute.xlu1 %3672  ;;  %v4111_v50 = vld [vmem:[#allocation3 + $0x238] sm:$0xff] }
 0x4c4   : > { %v8048_v39 = vpop.f32.mrb[12].mxu0  ;;  %3744 = vst.msk [vmem:[#allocation3 + $0x250] sm:$0xff] %vm993_vm2, %v3673_v2  ;;  %v3473_v48 = vpop.permute.xlu0 %3472  ;;  %4945 = vmatmul.mubr.msk.f32.gmra.mrb[38].mxu1 %vm4181_vm9, %v4111_v50 }
 0x4c5   : > { %v4376_v47 = vpop.f32.mrb[13].mxu0  ;;  %3548 = vst.msk [vmem:[#allocation3 + $0x1e0] sm:$0xff] %vm3014_vm8, %v3473_v48 }
 0x4c7   : > { %v3675_v11 = vpop.permute.xlu1 %3674  ;;  %v8053_v13 = vpop.f32.mrb[12].mxu1 }
 0x4c8   : > { %3745 = vst.msk [vmem:[#allocation3 + $0x268] sm:$0xff] %vm993_vm2, %v3675_v11  ;;  %v3961_v7 = vpop.permute.xlu0 %3960  ;;  %v4496_v52 = vpop.f32.mrb[13].mxu1  ;;  %v4101_v22 = vld [vmem:[#allocation3 + $0x1e8] sm:$0xff] }
 0x4c9   : > { %4032 = vst.msk [vmem:[#allocation3 + $0x250] sm:$0xff] %vm768_vm3, %v3961_v7  ;;  %4442 = vmatprep.mubr.f32.mxu0 %v4101_v22  ;;  %v4355_v22 = vadd.f32 %v8087_v40, %v7980_v56 }
 0x4cb   : > { %v3963_v32 = vpop.permute.xlu1 %3962 }
 0x4cc   : > { %4033 = vst.msk [vmem:[#allocation3 + $0x268] sm:$0xff] %vm768_vm3, %v3963_v32  ;;  %v2769_v36 = vpop.permute.xlu0 %2768  ;;  %v4100_v62 = vld [vmem:[#allocation3 + $0x1e0] sm:$0xff] }
 0x4cd   : > { %2843 = vst.msk [vmem:[#allocation3 + $0x1f8] sm:$0xff] %vm2020_vm6, %v2769_v36  ;;  %4443 = vmatmul.mubr.f32.gmra.mrb[40].mxu0 %v4100_v62 }
 0x4cf   : > { %v2961_v38 = vpop.permute.xlu1 %2960 }
 0x4d0   : > { %3036 = vst.msk [vmem:[#allocation3 + $0x200] sm:$0xff] %vm3014_vm8, %v2961_v38  ;;  %v3187_v6 = vpop.permute.xlu0 %3186  ;;  %v4114_v49 = vld [vmem:[#allocation3 + $0x250] sm:$0xff] }
 0x4d1   : > { %3837 = vst.msk [vmem:[#allocation3 + $0x200] sm:$0xff] %vm199_vm0, %v2685_v28  ;;  %4947 = vmatprep.mubr.msk.f32.mxu1 %vm4181_vm9, %v4114_v49 }
 0x4d2   : > { %3261 = vst.msk [vmem:[#allocation3 + $0x1f8] sm:$0xff] %vm2437_vm7, %v3187_v6 }
 0x4d3   : > { %v3677_v16 = vpop.permute.xlu1 %3676  ;;  %v4117_v25 = vld [vmem:[#allocation3 + $0x268] sm:$0xff] }
 0x4d4   : > { %v8065_v17 = vpop.f32.mrb[14].mxu0  ;;  %3746 = vst.msk [vmem:[#allocation3 + $0x280] sm:$0xff] %vm993_vm2, %v3677_v16  ;;  %v3475_v27 = vpop.permute.xlu0 %3474  ;;  %4948 = vmatmul.mubr.msk.f32.gmra.mrb[40].mxu1 %vm4181_vm9, %v4117_v25 }
 0x4d5   : > { %v4381_v58 = vpop.f32.mrb[15].mxu0  ;;  %3549 = vst.msk [vmem:[#allocation3 + $0x1f8] sm:$0xff] %vm3014_vm8, %v3475_v27 }
 0x4d7   : > { %v3679_v20 = vpop.permute.xlu1 %3678  ;;  %v8070_v3 = vpop.f32.mrb[14].mxu1 }
 0x4d8   : > { %3747 = vst.msk [vmem:[#allocation3 + $0x298] sm:$0xff] %vm993_vm2, %v3679_v20  ;;  %v3965_v28 = vpop.permute.xlu0 %3964  ;;  %v4501_v30 = vpop.f32.mrb[15].mxu1  ;;  %v4104_v61 = vld [vmem:[#allocation3 + $0x200] sm:$0xff] }
 0x4d9   : > { %4034 = vst.msk [vmem:[#allocation3 + $0x280] sm:$0xff] %vm768_vm3, %v3965_v28  ;;  %4447 = vmatprep.mubr.f32.mxu0 %v4104_v61  ;;  %v4370_v28 = vadd.f32 %v8087_v40, %v8031_v14  ;;  %v4365_v30 = vadd.f32 %v8087_v40, %v8014_v53  ;;  %v4375_v14 = vadd.f32 %v8087_v40, %v8048_v39 }
 0x4db   : > { %v3967_v41 = vpop.permute.xlu1 %3966 }
 0x4dc   : > { %4035 = vst.msk [vmem:[#allocation3 + $0x298] sm:$0xff] %vm768_vm3, %v3967_v41  ;;  %v2771_v44 = vpop.permute.xlu0 %2770  ;;  %v4103_v21 = vld [vmem:[#allocation3 + $0x1f8] sm:$0xff] }
 0x4dd   : > { %2844 = vst.msk [vmem:[#allocation3 + $0x210] sm:$0xff] %vm2020_vm6, %v2771_v44  ;;  %4448 = vmatmul.mubr.f32.gmra.mrb[42].mxu0 %v4103_v21 }
 0x4df   : > { %v2963_v18 = vpop.permute.xlu1 %2962 }
 0x4e0   : > { %v8078_v31 = vpop.f32.mrb[16].mxu0  ;;  %3037 = vst.msk [vmem:[#allocation3 + $0x218] sm:$0xff] %vm3014_vm8, %v2963_v18  ;;  %v3189_v8 = vpop.permute.xlu0 %3188  ;;  %v4120_v35 = vld [vmem:[#allocation3 + $0x280] sm:$0xff] }
 0x4e1   : > { %v4386_v12 = vpop.f32.mrb[17].mxu0  ;;  %3838 = vst.msk [vmem:[#allocation3 + $0x218] sm:$0xff] %vm199_vm0, %v3806_v4  ;;  %4950 = vmatprep.mubr.msk.f32.mxu1 %vm4181_vm9, %v4120_v35 }
 0x4e2   : > { %3262 = vst.msk [vmem:[#allocation3 + $0x210] sm:$0xff] %vm2437_vm7, %v3189_v8  ;;  %v4380_v8 = vadd.f32 %v8087_v40, %v8065_v17 }
 0x4e3   : > { %v3681_v59 = vpop.permute.xlu1 %3680  ;;  %v4123_v46 = vld [vmem:[#allocation3 + $0x298] sm:$0xff] }
 0x4e4   : > { %3748 = vst.msk [vmem:[#allocation3 + $0x2b0] sm:$0xff] %vm993_vm2, %v3681_v59  ;;  %v3477_v34 = vpop.permute.xlu0 %3476  ;;  %4951 = vmatmul.mubr.msk.f32.gmra.mrb[42].mxu1 %vm4181_vm9, %v4123_v46 }
 0x4e5   : > { %3550 = vst.msk [vmem:[#allocation3 + $0x210] sm:$0xff] %vm3014_vm8, %v3477_v34 }
 0x4e7   : > { %v3683_v26 = vpop.permute.xlu1 %3682  ;;  %v4913_v60 = vpop.f32.mrb[16].mxu1 }
 0x4e8   : > { %3749 = vst.msk [vmem:[#allocation3 + $0x2c8] sm:$0xff] %vm993_vm2, %v3683_v26  ;;  %v4575_v57 = vadd.f32 %v4913_v60, %v4350_v63  ;;  %v3969_v45 = vpop.permute.xlu0 %3968  ;;  %v4569_v43 = vpop.f32.mrb[17].mxu1  ;;  %v4107_v55 = vld [vmem:[#allocation3 + $0x218] sm:$0xff] }
 0x4e9   : > { %4036 = vst.msk [vmem:[#allocation3 + $0x2b0] sm:$0xff] %vm768_vm3, %v3969_v45  ;;  %v4570_v15 = vadd.f32 %v4569_v43, %v4345_v42  ;;  %4452 = vmatprep.mubr.f32.mxu0 %v4107_v55  ;;  %v4385_v42 = vadd.f32 %v8087_v40, %v8078_v31 }
 0x4ea   : > { %4729 = vst [vmem:[%s8099_s17 + $0x8] sm:$0xff] %v4575_v57 }
 0x4eb   : > { %4728 = vst [vmem:[%s8099_s17] sm:$0xff] %v4570_v15  ;;  %v3971_v5 = vpop.permute.xlu1 %3970 }
 0x4ec   : > { %4037 = vst.msk [vmem:[#allocation3 + $0x2c8] sm:$0xff] %vm768_vm3, %v3971_v5  ;;  %v2773_v33 = vpop.permute.xlu0 %2772  ;;  %v4106_v24 = vld [vmem:[#allocation3 + $0x210] sm:$0xff] }
 0x4ed   : > { %2845 = vst.msk [vmem:[#allocation3 + $0x228] sm:$0xff] %vm2020_vm6, %v2773_v33  ;;  %4453 = vmatmul.mubr.f32.gmra.mrb[44].mxu0 %v4106_v24 }
 0x4ef   : > { %v2965_v0 = vpop.permute.xlu1 %2964 }
 0x4f0   : > { %v4389_v2 = vpop.f32.mrb[18].mxu0  ;;  %3038 = vst.msk [vmem:[#allocation3 + $0x230] sm:$0xff] %vm3014_vm8, %v2965_v0  ;;  %v3191_v50 = vpop.permute.xlu0 %3190  ;;  %v4126_v48 = vld [vmem:[#allocation3 + $0x2b0] sm:$0xff] }
 0x4f1   : > { %v4391_v47 = vpop.f32.mrb[19].mxu0  ;;  %3839 = vst.msk [vmem:[#allocation3 + $0x230] sm:$0xff] %vm199_vm0, %v3807_v23  ;;  %4953 = vmatprep.mubr.msk.f32.mxu1 %vm4181_vm9, %v4126_v48  ;;  %v4390_v63 = vadd.f32 %v8087_v40, %v4389_v2 }
 0x4f2   : > { %3263 = vst.msk [vmem:[#allocation3 + $0x228] sm:$0xff] %vm2437_vm7, %v3191_v50 }
 0x4f3   : > { %v3685_v11 = vpop.permute.xlu1 %3684  ;;  %v4129_v7 = vld [vmem:[#allocation3 + $0x2c8] sm:$0xff] }
 0x4f4   : > { %3750 = vst.msk [vmem:[#allocation3 + $0x2e0] sm:$0xff] %vm993_vm2, %v3685_v11  ;;  %v3479_v52 = vpop.permute.xlu0 %3478  ;;  %4954 = vmatmul.mubr.msk.f32.gmra.mrb[44].mxu1 %vm4181_vm9, %v4129_v7 }
 0x4f5   : > { %3551 = vst.msk [vmem:[#allocation3 + $0x228] sm:$0xff] %vm3014_vm8, %v3479_v52 }
 0x4f7   : > { %v3687_v32 = vpop.permute.xlu1 %3686  ;;  %v4916_v36 = vpop.f32.mrb[18].mxu1 }
 0x4f8   : > { %3751 = vst.msk [vmem:[#allocation3 + $0x2f8] sm:$0xff] %vm993_vm2, %v3687_v32  ;;  %v4585_v62 = vadd.f32 %v4916_v36, %v4360_v29  ;;  %v3973_v38 = vpop.permute.xlu0 %3972  ;;  %v4579_v6 = vpop.f32.mrb[19].mxu1  ;;  %v4110_v49 = vld [vmem:[#allocation3 + $0x230] sm:$0xff] }
 0x4f9   : > { %4038 = vst.msk [vmem:[#allocation3 + $0x2e0] sm:$0xff] %vm768_vm3, %v3973_v38  ;;  %v4580_v16 = vadd.f32 %v4579_v6, %v4355_v22  ;;  %4457 = vmatprep.mubr.f32.mxu0 %v4110_v49 }
 0x4fa   : > { %4731 = vst [vmem:[%s8099_s17 + $0x18] sm:$0xff] %v4585_v62 }
 0x4fb   : > { %4730 = vst [vmem:[%s8099_s17 + $0x10] sm:$0xff] %v4580_v16  ;;  %v3975_v25 = vpop.permute.xlu1 %3974 }
 0x4fc   : > { %4039 = vst.msk [vmem:[#allocation3 + $0x2f8] sm:$0xff] %vm768_vm3, %v3975_v25  ;;  %v4109_v56 = vld [vmem:[#allocation3 + $0x228] sm:$0xff] }
 0x4fd   : > { %4458 = vmatmul.mubr.f32.gmra.mrb[46].mxu0 %v4109_v56 }
 0x500   : > { %v4394_v54 = vpop.f32.mrb[20].mxu0  ;;  %v4132_v27 = vld [vmem:[#allocation3 + $0x2e0] sm:$0xff] }
 0x501   : > { %v4396_v58 = vpop.f32.mrb[21].mxu0  ;;  %4956 = vmatprep.mubr.msk.f32.mxu1 %vm4181_vm9, %v4132_v27  ;;  %v4395_v55 = vadd.f32 %v8087_v40, %v4394_v54 }
 0x503   : > { %v4135_v20 = vld [vmem:[#allocation3 + $0x2f8] sm:$0xff] }
 0x504   : > { %4957 = vmatmul.mubr.msk.f32.gmra.mrb[46].mxu1 %vm4181_vm9, %v4135_v20 }
 0x507   : > { %v4919_v61 = vpop.f32.mrb[20].mxu1 }
 0x508   : > { %v4595_v41 = vadd.f32 %v4919_v61, %v4370_v28  ;;  %v4589_v44 = vpop.f32.mrb[21].mxu1 }
 0x509   : > { %v4590_v21 = vadd.f32 %v4589_v44, %v4365_v30 }
 0x50a   : > { %4733 = vst [vmem:[%s8099_s17 + $0x28] sm:$0xff] %v4595_v41 }
 0x50b   : > { %4732 = vst [vmem:[%s8099_s17 + $0x20] sm:$0xff] %v4590_v21 }
 0x510   : > { %v4399_v4 = vpop.f32.mrb[22].mxu0 }
 0x511   : > { %v4401_v18 = vpop.f32.mrb[23].mxu0  ;;  %v4400_v43 = vadd.f32 %v8087_v40, %v4399_v4 }
 0x517   : > { %v4922_v35 = vpop.f32.mrb[22].mxu1 }
 0x518   : > { %v4605_v12 = vadd.f32 %v4922_v35, %v4380_v8  ;;  %v4599_v53 = vpop.f32.mrb[23].mxu1 }
 0x519   : > { %v4600_v59 = vadd.f32 %v4599_v53, %v4375_v14 }
 0x51a   : > { %4735 = vst [vmem:[%s8099_s17 + $0x38] sm:$0xff] %v4605_v12 }
 0x51b   : > { %4734 = vst [vmem:[%s8099_s17 + $0x30] sm:$0xff] %v4600_v59 }
 0x520   : > { %v4404_v46 = vpop.f32.mrb[24].mxu0 }
 0x521   : > { %v4406_v34 = vpop.f32.mrb[25].mxu0  ;;  %v4405_v2 = vadd.f32 %v8087_v40, %v4404_v46 }
 0x527   : > { %v4925_v17 = vpop.f32.mrb[24].mxu1 }
 0x528   : > { %v4615_v26 = vadd.f32 %v4925_v17, %v4390_v63  ;;  %v4609_v60 = vpop.f32.mrb[25].mxu1 }
 0x529   : > { %v4610_v39 = vadd.f32 %v4609_v60, %v4385_v42  ;;  %v4465_v60 = vadd.f32 %v8087_v40, %v7924_v19  ;;  %v4475_v19 = vadd.f32 %v8087_v40, %v7987_v10  ;;  %v4485_v10 = vadd.f32 %v8087_v40, %v8019_v51 }
 0x52a   : > { %4737 = vst [vmem:[%s8099_s17 + $0x48] sm:$0xff] %v4615_v26  ;;  %v4470_v26 = vadd.f32 %v8087_v40, %v7954_v1  ;;  %v4480_v1 = vadd.f32 %v8087_v40, %v8002_v9  ;;  %v4490_v9 = vadd.f32 %v8087_v40, %v8036_v37  ;;  %v4500_v37 = vadd.f32 %v8087_v40, %v8070_v3 }
 0x52b   : > { %4736 = vst [vmem:[%s8099_s17 + $0x40] sm:$0xff] %v4610_v39  ;;  %v4495_v51 = vadd.f32 %v8087_v40, %v8053_v13 }
 0x530   : > { %v4409_v57 = vpop.f32.mrb[26].mxu0 }
 0x531   : > { %v4411_v45 = vpop.f32.mrb[27].mxu0  ;;  %v4410_v0 = vadd.f32 %v8087_v40, %v4409_v57 }
 0x537   : > { %v4928_v15 = vpop.f32.mrb[26].mxu1 }
 0x538   : > { %v4625_v5 = vadd.f32 %v4928_v15, %v4400_v43  ;;  %v4619_v33 = vpop.f32.mrb[27].mxu1 }
 0x539   : > { %v4620_v24 = vadd.f32 %v4619_v33, %v4395_v55 }
 0x53a   : > { %4739 = vst [vmem:[%s8099_s17 + $0x58] sm:$0xff] %v4625_v5 }
 0x53b   : > { %4738 = vst [vmem:[%s8099_s17 + $0x50] sm:$0xff] %v4620_v24 }
 0x540   : > { %v4414_v31 = vpop.f32.mrb[28].mxu0 }
 0x541   : > { %v4416_v23 = vpop.f32.mrb[29].mxu0  ;;  %v4415_v22 = vadd.f32 %v8087_v40, %v4414_v31 }
 0x547   : > { %v4931_v50 = vpop.f32.mrb[28].mxu1 }
 0x548   : > { %v4635_v48 = vadd.f32 %v4931_v50, %v4410_v0  ;;  %v4629_v47 = vpop.f32.mrb[29].mxu1 }
 0x549   : > { %v4630_v11 = vadd.f32 %v4629_v47, %v4405_v2 }
 0x54a   : > { %4741 = vst [vmem:[%s8099_s17 + $0x68] sm:$0xff] %v4635_v48 }
 0x54b   : > { %4740 = vst [vmem:[%s8099_s17 + $0x60] sm:$0xff] %v4630_v11 }
 0x550   : > { %v4419_v7 = vpop.f32.mrb[30].mxu0 }
 0x551   : > { %v4421_v52 = vpop.f32.mrb[31].mxu0  ;;  %v4420_v29 = vadd.f32 %v8087_v40, %v4419_v7 }
 0x557   : > { %v4934_v32 = vpop.f32.mrb[30].mxu1 }
 0x558   : > { %v4645_v36 = vadd.f32 %v4934_v32, %v4420_v29  ;;  %v4639_v62 = vpop.f32.mrb[31].mxu1 }
 0x559   : > { %v4640_v38 = vadd.f32 %v4639_v62, %v4415_v22 }
 0x55a   : > { %4743 = vst [vmem:[%s8099_s17 + $0x78] sm:$0xff] %v4645_v36 }
 0x55b   : > { %4742 = vst [vmem:[%s8099_s17 + $0x70] sm:$0xff] %v4640_v38 }
 0x560   : > { %v4424_v6 = vpop.f32.mrb[32].mxu0 }
 0x561   : > { %v4426_v49 = vpop.f32.mrb[33].mxu0  ;;  %v4425_v16 = vadd.f32 %v8087_v40, %v4424_v6 }
 0x567   : > { %v4937_v25 = vpop.f32.mrb[32].mxu1 }
 0x568   : > { %v4649_v56 = vpop.f32.mrb[33].mxu1 }
 0x569   : > { %v4650_v54 = vadd.f32 %v4649_v56, %v4425_v16 }
 0x56b   : > { %4744 = vst [vmem:[%s8099_s17 + $0x80] sm:$0xff] %v4650_v54 }
 0x570   : > { %v4429_v27 = vpop.f32.mrb[34].mxu0 }
 0x571   : > { %v4430_v58 = vadd.f32 %v8087_v40, %v4429_v27  ;;  %v4431_v20 = vpop.f32.mrb[35].mxu0 }
 0x573   : > { %v4655_v28 = vadd.f32 %v4937_v25, %v4430_v58 }
 0x575   : > { %4745 = vst [vmem:[%s8099_s17 + $0x88] sm:$0xff] %v4655_v28 }
 0x577   : > { %v4940_v30 = vpop.f32.mrb[34].mxu1 }
 0x578   : > { %v4659_v61 = vpop.f32.mrb[35].mxu1 }
 0x580   : > { %v4434_v41 = vpop.f32.mrb[36].mxu0 }
 0x581   : > { %v4435_v44 = vadd.f32 %v8087_v40, %v4434_v41  ;;  %v4436_v21 = vpop.f32.mrb[37].mxu0 }
 0x583   : > { %v4660_v4 = vadd.f32 %v4659_v61, %v4435_v44 }
 0x585   : > { %4746 = vst [vmem:[%s8099_s17 + $0x90] sm:$0xff] %v4660_v4 }
 0x587   : > { %v4943_v18 = vpop.f32.mrb[36].mxu1 }
 0x588   : > { %v4669_v8 = vpop.f32.mrb[37].mxu1 }
 0x590   : > { %v4439_v14 = vpop.f32.mrb[38].mxu0 }
 0x591   : > { %v4440_v35 = vadd.f32 %v8087_v40, %v4439_v14  ;;  %v4441_v12 = vpop.f32.mrb[39].mxu0 }
 0x593   : > { %v4665_v53 = vadd.f32 %v4940_v30, %v4440_v35 }
 0x595   : > { %4747 = vst [vmem:[%s8099_s17 + $0x98] sm:$0xff] %v4665_v53 }
 0x597   : > { %v4946_v59 = vpop.f32.mrb[38].mxu1 }
 0x598   : > { %v4679_v46 = vpop.f32.mrb[39].mxu1 }
 0x5a0   : > { %v4444_v34 = vpop.f32.mrb[40].mxu0 }
 0x5a1   : > { %v4445_v63 = vadd.f32 %v8087_v40, %v4444_v34  ;;  %v4446_v42 = vpop.f32.mrb[41].mxu0 }
 0x5a3   : > { %v4670_v17 = vadd.f32 %v4669_v8, %v4445_v63 }
 0x5a5   : > { %4748 = vst [vmem:[%s8099_s17 + $0xa0] sm:$0xff] %v4670_v17 }
 0x5a7   : > { %v4949_v39 = vpop.f32.mrb[40].mxu1 }
 0x5a8   : > { %v4695_v57 = vadd.f32 %v4949_v39, %v4470_v26  ;;  %v4689_v45 = vpop.f32.mrb[41].mxu1 }
 0x5a9   : > { %v4690_v43 = vadd.f32 %v4689_v45, %v4465_v60 }
 0x5aa   : > { %4753 = vst [vmem:[%s8099_s17 + $0xc8] sm:$0xff] %v4695_v57 }
 0x5ab   : > { %4752 = vst [vmem:[%s8099_s17 + $0xc0] sm:$0xff] %v4690_v43 }
 0x5b0   : > { %v4449_v55 = vpop.f32.mrb[42].mxu0 }
 0x5b1   : > { %v4450_v15 = vadd.f32 %v8087_v40, %v4449_v55  ;;  %v4451_v5 = vpop.f32.mrb[43].mxu0 }
 0x5b3   : > { %v4675_v33 = vadd.f32 %v4943_v18, %v4450_v15 }
 0x5b5   : > { %4749 = vst [vmem:[%s8099_s17 + $0xa8] sm:$0xff] %v4675_v33 }
 0x5b7   : > { %v4952_v24 = vpop.f32.mrb[42].mxu1 }
 0x5b8   : > { %v4705_v31 = vadd.f32 %v4952_v24, %v4480_v1  ;;  %v4699_v23 = vpop.f32.mrb[43].mxu1 }
 0x5b9   : > { %v4700_v0 = vadd.f32 %v4699_v23, %v4475_v19 }
 0x5ba   : > { %4755 = vst [vmem:[%s8099_s17 + $0xd8] sm:$0xff] %v4705_v31 }
 0x5bb   : > { %4754 = vst [vmem:[%s8099_s17 + $0xd0] sm:$0xff] %v4700_v0 }
 0x5c0   : > { %v4454_v2 = vpop.f32.mrb[44].mxu0 }
 0x5c1   : > { %v4455_v50 = vadd.f32 %v8087_v40, %v4454_v2  ;;  %v4456_v48 = vpop.f32.mrb[45].mxu0 }
 0x5c3   : > { %v4680_v47 = vadd.f32 %v4679_v46, %v4455_v50 }
 0x5c5   : > { %4750 = vst [vmem:[%s8099_s17 + $0xb0] sm:$0xff] %v4680_v47 }
 0x5c7   : > { %v4955_v11 = vpop.f32.mrb[44].mxu1 }
 0x5c8   : > { %v4715_v7 = vadd.f32 %v4955_v11, %v4490_v9  ;;  %v4709_v52 = vpop.f32.mrb[45].mxu1 }
 0x5c9   : > { %v4710_v29 = vadd.f32 %v4709_v52, %v4485_v10 }
 0x5ca   : > { %4757 = vst [vmem:[%s8099_s17 + $0xe8] sm:$0xff] %v4715_v7 }
 0x5cb   : > { %4756 = vst [vmem:[%s8099_s17 + $0xe0] sm:$0xff] %v4710_v29 }
 0x5d0   : > { %v4459_v22 = vpop.f32.mrb[46].mxu0 }
 0x5d1   : > { %v4460_v32 = vadd.f32 %v8087_v40, %v4459_v22  ;;  %v4461_v36 = vpop.f32.mrb[47].mxu0 }
 0x5d3   : > { %v4685_v62 = vadd.f32 %v4946_v59, %v4460_v32 }
 0x5d5   : > { %4751 = vst [vmem:[%s8099_s17 + $0xb8] sm:$0xff] %v4685_v62 }
 0x5d7   : > { %v4958_v38 = vpop.f32.mrb[46].mxu1 }
 0x5d8   : > { %v4725_v6 = vadd.f32 %v4958_v38, %v4500_v37  ;;  %v4719_v49 = vpop.f32.mrb[47].mxu1 }
 0x5d9   : > { %v4720_v16 = vadd.f32 %v4719_v49, %v4495_v51 }
 0x5da   : > { %4759 = vst [vmem:[%s8099_s17 + $0xf8] sm:$0xff] %v4725_v6 }
 0x5db   : > { %4758 = vst [vmem:[%s8099_s17 + $0xf0] sm:$0xff] %v4720_v16 }
 0x5dc PF: > { %s14_s15 = sadd.s32 1, %s5127_s15  }
 0x5dd   : > { %p11_p5 = scmp.ge.s32.totalorder %s14_s15, 4  }
 0x5df   :  { %13 = sbr.rel (!%p11_p5) target bundleno = 1 (0x1), region = 68 }

</bundles_post_ra>
